<compile_context>
chip_gen: v6e
topology: v6e:2x2x1
jax: 0.10.0
libtpu: 0.0.40
codegen_flags: <defaults>
</compile_context>

<pallas_src>
import functools

import jax
import jax.numpy as jnp
from jax.experimental import pallas as pl
from jax.experimental.pallas import tpu as pltpu


def _tpu_generation():
    """Best-effort TPU generation (7, 6, 5, 4); 0 if unknown."""
    try:
        kind = jax.devices()[0].device_kind.lower()
    except Exception:
        return 0
    if "v7" in kind or "7x" in kind:
        return 7
    if "v6" in kind:
        return 6
    if "v5" in kind:
        return 5
    if "v4" in kind:
        return 4
    return 0


def _gelu(x):
    # tanh-approx GELU (|err| vs exact erf GELU < ~1e-3); tanh runs on the EUP
    # slot, keeping the VPU free. Math stays in x.dtype (bf16 on v6e/v7x halves
    # the VALU work; f32 elsewhere).
    # NOTE: the cheaper sigmoid-GELU (x*sigmoid(1.702x)) deviates ~1-2e-2 from
    # erf GELU and would eat the whole error budget, so the tanh form is kept.
    c = 0.7978845608028654  # sqrt(2/pi)
    return 0.5 * x * (1.0 + jnp.tanh(c * (x + 0.044715 * (x * x * x))))


def _extensive_branch_kernel(x_ref,
                             w1, b1, w2, b2, w3, b3,
                             w4l, w4f, b4, w5, b5, w6, b6,
                             out_ref, low_acc, glob_acc,
                             *, bb, tn, act_dtype, two_pass):
    bf16 = jnp.bfloat16

    def first_conv(x):
        # 3 -> 64 via three VPU broadcast-FMAs (a K=3 matmul is ~98% MXU padding).
        w1v = w1[...]
        pre = (x[:, 0:1] * w1v[0:1, :] + x[:, 1:2] * w1v[1:2, :]
               + x[:, 2:3] * w1v[2:3, :] + b1[...])
        h = _gelu(pre.astype(act_dtype))
        # 64 -> 128; GELU output in act_dtype feeds the next matmul directly
        # (the astype(bf16) is a no-op when act_dtype == bf16).
        h = _gelu((jnp.dot(h.astype(bf16), w2[...],
                           preferred_element_type=jnp.float32)
                   + b2[...]).astype(act_dtype))
        # 128 -> 256: kept f32 -- feeds the `low` max that lands in the output.
        return _gelu(jnp.dot(h.astype(bf16), w3[...],
                             preferred_element_type=jnp.float32) + b3[...])

    def second_conv(f1, low):
        # second_conv layer 1 on cat([low_expand, feature], C):
        #   cat(...) @ W4 == low @ W4[:256] + feature @ W4[256:]
        # (torch cat order is [low_feature_global.expand, feature]).
        low_term = jnp.dot(low.astype(bf16), w4l[...],
                           preferred_element_type=jnp.float32) + b4[...]   # (bb, 512)
        pre4 = jnp.dot(f1.astype(bf16), w4f[...],
                       preferred_element_type=jnp.float32)                 # (bb*tn, 512)
        c4 = pre4.shape[-1]
        # Per-sample broadcast-add via a layout-free reshape; no materialized
        # broadcast_to / concatenate temporaries.
        h = _gelu((pre4.reshape(bb, tn, c4) + low_term[:, None, :])
                  .reshape(bb * tn, c4).astype(act_dtype))
        h = _gelu((jnp.dot(h.astype(bf16), w5[...],
                           preferred_element_type=jnp.float32)
                   + b5[...]).astype(act_dtype))
        # 1024 -> latent_dim: kept f32 -- feeds the `glob` max in the output.
        return _gelu(jnp.dot(h.astype(bf16), w6[...],
                             preferred_element_type=jnp.float32) + b6[...])

    x = x_ref[...].reshape(bb * tn, 3)        # layout-free merge of (bb, tn)

    if not two_pass:
        # N fits one tile: fused single pass, no recompute.
        f1 = first_conv(x)
        low = jnp.max(f1.reshape(bb, tn, -1), axis=1)            # (bb, 256)
        f2 = second_conv(f1, low)
        glob = jnp.max(f2.reshape(bb, tn, -1), axis=1)           # (bb, L)
        out_ref[...] = jnp.concatenate([low, glob], axis=1)[:, None, :]
    else:
        # Two passes over N tiles (second_conv needs the completed `low` max);
        # first_conv (~4% of the FLOPs) is recomputed in pass 1 instead of
        # staging f1 in HBM.
        p = pl.program_id(1)
        t = pl.program_id(2)
        nt = pl.num_programs(2)

        @pl.when(jnp.logical_and(p == 0, t == 0))
        def _init():
            low_acc[...] = jnp.full(low_acc.shape, -jnp.inf, low_acc.dtype)
            glob_acc[...] = jnp.full(glob_acc.shape, -jnp.inf, glob_acc.dtype)

        f1 = first_conv(x)

        @pl.when(p == 0)
        def _accumulate_low():
            low_acc[...] = jnp.maximum(
                low_acc[...], jnp.max(f1.reshape(bb, tn, -1), axis=1))

        @pl.when(p == 1)
        def _accumulate_glob():
            f2 = second_conv(f1, low_acc[...])
            glob_acc[...] = jnp.maximum(
                glob_acc[...], jnp.max(f2.reshape(bb, tn, -1), axis=1))

        @pl.when(jnp.logical_and(p == 1, t == nt - 1))
        def _finalize():
            out_ref[...] = jnp.concatenate(
                [low_acc[...], glob_acc[...]], axis=1)[:, None, :]


def fold_bn(w, b, gamma, beta, mean, var, eps=1e-5):
    """Fold inference-mode BatchNorm1d into a 1x1 Conv1d. Returns (Cin,Cout) W, (1,Cout) b."""
    s = gamma / jnp.sqrt(var + eps)
    w_eff = (w * s[:, None]).T                   # (Cin, Cout)
    b_eff = ((b - mean) * s + beta)[None, :]     # (1, Cout)
    return w_eff, b_eff


def _pick_tile_n(n, cap):
    if n <= cap:
        return n
    for t in range(cap - cap % 8, 7, -8):        # multiples of 8, descending
        if n % t == 0:
            return t
    # TODO(synk): pad N to a multiple of 8 for pathological point counts.
    return n


def extensive_branch_forward(xyz, params, latent_dim, *, tile_n=None):
    B, N, _ = xyz.shape
    folded = [fold_bn(*p) for p in params]
    (w1, b1), (w2, b2), (w3, b3), (w4, b4), (w5, b5), (w6, b6) = folded
    w4l, w4f = w4[:256], w4[256:]                # cat([low_expand, feature]) split boundary

    # bf16 weights for the MXU; w1 (VPU FMA layer) and all biases stay f32.
    bf16 = jnp.bfloat16
    w2, w3, w4l, w4f, w5, w6 = (w.astype(bf16) for w in (w2, w3, w4l, w4f, w5, w6))

    gen = _tpu_generation()
    # bf16 activation/GELU math only where the VPU/EUP handle bf16 natively.
    act_dtype = jnp.bfloat16 if gen >= 6 else jnp.float32
    conservative_vmem = (gen >= 7) or (gen == 0)          # v7x: 64 MiB physical VMEM

    # Two samples per step fill the 256-row MXU on v6e/v7x, but never collapse
    # the parallel batch axis below 2 steps (v7x: 2 TCs) and never on v5e.
    BB = 2 if (gen >= 6 and B % 2 == 0 and B >= 4) else 1

    cap = 512 if conservative_vmem else 1024
    TN = tile_n if tile_n is not None else _pick_tile_n(N, cap)
    assert N % TN == 0, (N, TN)
    NT = N // TN
    two_pass = NT > 1

    D_out = 256 + latent_dim

    def const(shape):                            # grid-invariant weights / biases
        zeros = (0,) * len(shape)
        return pl.BlockSpec(shape, lambda i, p, t: zeros)

    in_specs = [
        pl.BlockSpec((BB, TN, 3), lambda i, p, t: (i, t, 0)),
        const(w1.shape), const(b1.shape),
        const(w2.shape), const(b2.shape),
        const(w3.shape), const(b3.shape),
        const(w4l.shape), const(w4f.shape), const(b4.shape),
        const(w5.shape), const(b5.shape),
        const(w6.shape), const(b6.shape),
    ]
    out_specs = pl.BlockSpec((BB, 1, D_out), lambda i, p, t: (i, 0, 0))
    out_shape = jax.ShapeDtypeStruct((B, 1, D_out), jnp.float32)

    kernel = functools.partial(_extensive_branch_kernel, bb=BB, tn=TN,
                               act_dtype=act_dtype, two_pass=two_pass)
    out = pl.pallas_call(
        kernel,
        out_shape=out_shape,
        grid_spec=pltpu.PrefetchScalarGridSpec(
            num_scalar_prefetch=0,
            grid=(B // BB, 2 if two_pass else 1, NT),
            in_specs=in_specs,
            out_specs=out_specs,
            scratch_shapes=[pltpu.VMEM((BB, 256), jnp.float32),        # low running max
                            pltpu.VMEM((BB, latent_dim), jnp.float32)],  # glob running max
        ),
        compiler_params=pltpu.CompilerParams(
            dimension_semantics=("parallel", "arbitrary", "arbitrary"),
            vmem_limit_bytes=(48 if conservative_vmem else 96) * 1024 * 1024,
        ),
    )(xyz, w1, b1, w2, b2, w3, b3, w4l, w4f, b4, w5, b5, w6, b6)

    # torch.cat([squeeze(low_feature_global), feature_global], dim=1)
    return out[:, 0, :]


def reference_forward(xyz, params, latent_dim):
    """Plain-JAX f32 reference (exact erf GELU) of the folded-BN inference forward."""
    folded = [fold_bn(*p) for p in params]
    h = xyz
    for i in range(3):
        w, b = folded[i]
        h = jax.nn.gelu(h @ w + b, approximate=False)
    low = jnp.max(h, axis=1, keepdims=True)                                 # (B, 1, 256)
    g = jnp.concatenate([jnp.broadcast_to(low, h.shape), h], axis=-1)       # (B, N, 512)
    for i in range(3, 6):
        w, b = folded[i]
        g = jax.nn.gelu(g @ w + b, approximate=False)
    glob = jnp.max(g, axis=1)                                               # (B, L)
    return jnp.concatenate([low[:, 0, :], glob], axis=1)


def make_params(key, latent_dim):
    """Deterministic synthetic Conv1d + BatchNorm1d parameters."""
    dims = [(3, 64), (64, 128), (128, 256), (512, 512), (512, 1024), (1024, latent_dim)]
    params = []
    for cin, cout in dims:
        key, kw, kb, kg, kbeta, km, kv = jax.random.split(key, 7)
        bound = 1.0 / float(cin) ** 0.5
        w = jax.random.uniform(kw, (cout, cin), jnp.float32, -bound, bound)      # Conv1d weight
        b = jax.random.uniform(kb, (cout,), jnp.float32, -bound, bound)          # Conv1d bias
        gamma = 1.0 + 0.1 * jax.random.normal(kg, (cout,), jnp.float32)          # BN weight
        beta = 0.1 * jax.random.normal(kbeta, (cout,), jnp.float32)              # BN bias
        mean = 0.1 * jax.random.normal(km, (cout,), jnp.float32)                 # BN running_mean
        var = 1.0 + 0.1 * jax.random.uniform(kv, (cout,), jnp.float32)           # BN running_var
        params.append((w, b, gamma, beta, mean, var))
    return params


if __name__ == "__main__":
    B, N, latent_dim = 2, 128, 256                 # small shapes: (B, N, 3) point cloud
    key = jax.random.PRNGKey(0)
    key, kx = jax.random.split(key)
    xyz = jax.random.normal(kx, (B, N, 3), jnp.float32)
    params = make_params(key, latent_dim)

    ref = reference_forward(xyz, params, latent_dim)

    # 1) fused single-tile path (N fits one tile).
    out = jax.block_until_ready(extensive_branch_forward(xyz, params, latent_dim))
    assert out.shape == (B, 256 + latent_dim), out.shape
    max_err = float(jnp.max(jnp.abs(out - ref)))
    # bf16 MXU matmuls / bf16 GELU + tanh GELU vs an f32 exact-erf reference.
    assert jnp.allclose(out, ref, rtol=2e-2, atol=2e-2), max_err

    # 2) two-pass N-tiled path (forced small tile) -- exercises the running-max
    #    accumulators used for large point clouds on v7x.
    out2 = jax.block_until_ready(
        extensive_branch_forward(xyz, params, latent_dim, tile_n=64))
    max_err2 = float(jnp.max(jnp.abs(out2 - ref)))
    assert jnp.allclose(out2, ref, rtol=2e-2, atol=2e-2), max_err2

    print("KERNEL_OK")
</pallas_src>

<mosaic_0001>
module attributes {stable_mosaic.version = 11 : i64} {
  func.func @_extensive_branch_kernel(%arg0: i32, %arg1: i32, %arg2: i32, %arg3: memref<1x128x3xf32, #tpu.memory_space<vmem>>, %arg4: memref<3x64xf32, #tpu.memory_space<vmem>>, %arg5: memref<1x64xf32, #tpu.memory_space<vmem>>, %arg6: memref<64x128xbf16, #tpu.memory_space<vmem>>, %arg7: memref<1x128xf32, #tpu.memory_space<vmem>>, %arg8: memref<128x256xbf16, #tpu.memory_space<vmem>>, %arg9: memref<1x256xf32, #tpu.memory_space<vmem>>, %arg10: memref<256x512xbf16, #tpu.memory_space<vmem>>, %arg11: memref<256x512xbf16, #tpu.memory_space<vmem>>, %arg12: memref<1x512xf32, #tpu.memory_space<vmem>>, %arg13: memref<512x1024xbf16, #tpu.memory_space<vmem>>, %arg14: memref<1x1024xf32, #tpu.memory_space<vmem>>, %arg15: memref<1024x256xbf16, #tpu.memory_space<vmem>>, %arg16: memref<1x256xf32, #tpu.memory_space<vmem>>, %arg17: memref<1x1x512xf32, #tpu.memory_space<vmem>>, %arg18: memref<1x256xf32, #tpu.memory_space<vmem>>, %arg19: memref<1x256xf32, #tpu.memory_space<vmem>>) attributes {dimension_semantics = [#tpu.dimension_semantics<parallel>, #tpu.dimension_semantics<arbitrary>, #tpu.dimension_semantics<arbitrary>], iteration_bounds = array<i64: 2, 1, 1>, scalar_prefetch = 0 : i64, scratch_operands = 2 : i64, tpu.core_type = #tpu.core_type<tc>, window_params = [{transform_indices = @transform_0, window_bounds = array<i64: 1, 128, 3>}, {pipeline_mode = #tpu.pipeline_mode<synchronous>, transform_indices = @transform_1, window_bounds = array<i64: 3, 64>}, {pipeline_mode = #tpu.pipeline_mode<synchronous>, transform_indices = @transform_2, window_bounds = array<i64: 1, 64>}, {pipeline_mode = #tpu.pipeline_mode<synchronous>, transform_indices = @transform_3, window_bounds = array<i64: 64, 128>}, {pipeline_mode = #tpu.pipeline_mode<synchronous>, transform_indices = @transform_4, window_bounds = array<i64: 1, 128>}, {pipeline_mode = #tpu.pipeline_mode<synchronous>, transform_indices = @transform_5, window_bounds = array<i64: 128, 256>}, {pipeline_mode = #tpu.pipeline_mode<synchronous>, transform_indices = @transform_6, window_bounds = array<i64: 1, 256>}, {pipeline_mode = #tpu.pipeline_mode<synchronous>, transform_indices = @transform_7, window_bounds = array<i64: 256, 512>}, {pipeline_mode = #tpu.pipeline_mode<synchronous>, transform_indices = @transform_8, window_bounds = array<i64: 256, 512>}, {pipeline_mode = #tpu.pipeline_mode<synchronous>, transform_indices = @transform_9, window_bounds = array<i64: 1, 512>}, {pipeline_mode = #tpu.pipeline_mode<synchronous>, transform_indices = @transform_10, window_bounds = array<i64: 512, 1024>}, {pipeline_mode = #tpu.pipeline_mode<synchronous>, transform_indices = @transform_11, window_bounds = array<i64: 1, 1024>}, {pipeline_mode = #tpu.pipeline_mode<synchronous>, transform_indices = @transform_12, window_bounds = array<i64: 1024, 256>}, {pipeline_mode = #tpu.pipeline_mode<synchronous>, transform_indices = @transform_13, window_bounds = array<i64: 1, 256>}, {transform_indices = @transform_14, window_bounds = array<i64: 1, 1, 512>}]} {
    %c0 = arith.constant 0 : index
    %c0_0 = arith.constant 0 : index
    %c0_1 = arith.constant 0 : index
    %0 = vector.load %arg3[%c0, %c0_0, %c0_1] : memref<1x128x3xf32, #tpu.memory_space<vmem>>, vector<1x128x3xf32>
    %1 = vector.shape_cast %0 : vector<1x128x3xf32> to vector<128x3xf32>
    %c0_2 = arith.constant 0 : index
    %c0_3 = arith.constant 0 : index
    %2 = vector.load %arg4[%c0_2, %c0_3] : memref<3x64xf32, #tpu.memory_space<vmem>>, vector<3x64xf32>
    %3 = vector.extract_strided_slice %1 {offsets = [0, 0], sizes = [128, 1], strides = [1, 1]} : vector<128x3xf32> to vector<128x1xf32>
    %4 = vector.extract_strided_slice %2 {offsets = [0, 0], sizes = [1, 64], strides = [1, 1]} : vector<3x64xf32> to vector<1x64xf32>
    %5 = vector.broadcast %3 : vector<128x1xf32> to vector<128x64xf32>
    %6 = vector.broadcast %4 : vector<1x64xf32> to vector<128x64xf32>
    %7 = arith.mulf %5, %6 : vector<128x64xf32>
    %8 = vector.extract_strided_slice %1 {offsets = [0, 1], sizes = [128, 1], strides = [1, 1]} : vector<128x3xf32> to vector<128x1xf32>
    %9 = vector.extract_strided_slice %2 {offsets = [1, 0], sizes = [1, 64], strides = [1, 1]} : vector<3x64xf32> to vector<1x64xf32>
    %10 = vector.broadcast %8 : vector<128x1xf32> to vector<128x64xf32>
    %11 = vector.broadcast %9 : vector<1x64xf32> to vector<128x64xf32>
    %12 = arith.mulf %10, %11 : vector<128x64xf32>
    %13 = arith.addf %7, %12 : vector<128x64xf32>
    %14 = vector.extract_strided_slice %1 {offsets = [0, 2], sizes = [128, 1], strides = [1, 1]} : vector<128x3xf32> to vector<128x1xf32>
    %15 = vector.extract_strided_slice %2 {offsets = [2, 0], sizes = [1, 64], strides = [1, 1]} : vector<3x64xf32> to vector<1x64xf32>
    %16 = vector.broadcast %14 : vector<128x1xf32> to vector<128x64xf32>
    %17 = vector.broadcast %15 : vector<1x64xf32> to vector<128x64xf32>
    %18 = arith.mulf %16, %17 : vector<128x64xf32>
    %19 = arith.addf %13, %18 : vector<128x64xf32>
    %c0_4 = arith.constant 0 : index
    %c0_5 = arith.constant 0 : index
    %20 = vector.load %arg5[%c0_4, %c0_5] : memref<1x64xf32, #tpu.memory_space<vmem>>, vector<1x64xf32>
    %21 = vector.broadcast %20 : vector<1x64xf32> to vector<128x64xf32>
    %22 = arith.addf %19, %21 : vector<128x64xf32>
    %cst = arith.constant 5.000000e-01 : f32
    %23 = vector.broadcast %cst : f32 to vector<128x64xf32>
    %24 = arith.mulf %23, %22 : vector<128x64xf32>
    %25 = arith.mulf %22, %22 : vector<128x64xf32>
    %26 = arith.mulf %25, %22 : vector<128x64xf32>
    %cst_6 = arith.constant 4.471500e-02 : f32
    %27 = vector.broadcast %cst_6 : f32 to vector<128x64xf32>
    %28 = arith.mulf %27, %26 : vector<128x64xf32>
    %29 = arith.addf %22, %28 : vector<128x64xf32>
    %cst_7 = arith.constant 0.797884583 : f32
    %30 = vector.broadcast %cst_7 : f32 to vector<128x64xf32>
    %31 = arith.mulf %30, %29 : vector<128x64xf32>
    %32 = math.tanh %31 : vector<128x64xf32>
    %cst_8 = arith.constant 1.000000e+00 : f32
    %33 = vector.broadcast %cst_8 : f32 to vector<128x64xf32>
    %34 = arith.addf %33, %32 : vector<128x64xf32>
    %35 = arith.mulf %24, %34 : vector<128x64xf32>
    %36 = arith.truncf %35 : vector<128x64xf32> to vector<128x64xbf16>
    %c0_9 = arith.constant 0 : index
    %c0_10 = arith.constant 0 : index
    %37 = vector.load %arg6[%c0_9, %c0_10] : memref<64x128xbf16, #tpu.memory_space<vmem>>, vector<64x128xbf16>
    %cst_11 = arith.constant dense<0.000000e+00> : vector<128x128xf32>
    %38 = tpu.matmul %36, %37, %cst_11 {dimension_numbers = #tpu.dot_dimension_numbers<[1], [0], [0], [1], [0, 0, 1, 1], [], []>} : vector<128x64xbf16>, vector<64x128xbf16>, vector<128x128xf32> -> vector<128x128xf32>
    %c0_12 = arith.constant 0 : index
    %c0_13 = arith.constant 0 : index
    %39 = vector.load %arg7[%c0_12, %c0_13] : memref<1x128xf32, #tpu.memory_space<vmem>>, vector<1x128xf32>
    %40 = vector.broadcast %39 : vector<1x128xf32> to vector<128x128xf32>
    %41 = arith.addf %38, %40 : vector<128x128xf32>
    %cst_14 = arith.constant 5.000000e-01 : f32
    %42 = vector.broadcast %cst_14 : f32 to vector<128x128xf32>
    %43 = arith.mulf %42, %41 : vector<128x128xf32>
    %44 = arith.mulf %41, %41 : vector<128x128xf32>
    %45 = arith.mulf %44, %41 : vector<128x128xf32>
    %cst_15 = arith.constant 4.471500e-02 : f32
    %46 = vector.broadcast %cst_15 : f32 to vector<128x128xf32>
    %47 = arith.mulf %46, %45 : vector<128x128xf32>
    %48 = arith.addf %41, %47 : vector<128x128xf32>
    %cst_16 = arith.constant 0.797884583 : f32
    %49 = vector.broadcast %cst_16 : f32 to vector<128x128xf32>
    %50 = arith.mulf %49, %48 : vector<128x128xf32>
    %51 = math.tanh %50 : vector<128x128xf32>
    %cst_17 = arith.constant 1.000000e+00 : f32
    %52 = vector.broadcast %cst_17 : f32 to vector<128x128xf32>
    %53 = arith.addf %52, %51 : vector<128x128xf32>
    %54 = arith.mulf %43, %53 : vector<128x128xf32>
    %55 = arith.truncf %54 : vector<128x128xf32> to vector<128x128xbf16>
    %c0_18 = arith.constant 0 : index
    %c0_19 = arith.constant 0 : index
    %56 = vector.load %arg8[%c0_18, %c0_19] : memref<128x256xbf16, #tpu.memory_space<vmem>>, vector<128x256xbf16>
    %cst_20 = arith.constant dense<0.000000e+00> : vector<128x256xf32>
    %57 = tpu.matmul %55, %56, %cst_20 {dimension_numbers = #tpu.dot_dimension_numbers<[1], [0], [0], [1], [0, 0, 1, 1], [], []>} : vector<128x128xbf16>, vector<128x256xbf16>, vector<128x256xf32> -> vector<128x256xf32>
    %c0_21 = arith.constant 0 : index
    %c0_22 = arith.constant 0 : index
    %58 = vector.load %arg9[%c0_21, %c0_22] : memref<1x256xf32, #tpu.memory_space<vmem>>, vector<1x256xf32>
    %59 = vector.broadcast %58 : vector<1x256xf32> to vector<128x256xf32>
    %60 = arith.addf %57, %59 : vector<128x256xf32>
    %cst_23 = arith.constant 5.000000e-01 : f32
    %61 = vector.broadcast %cst_23 : f32 to vector<128x256xf32>
    %62 = arith.mulf %61, %60 : vector<128x256xf32>
    %63 = arith.mulf %60, %60 : vector<128x256xf32>
    %64 = arith.mulf %63, %60 : vector<128x256xf32>
    %cst_24 = arith.constant 4.471500e-02 : f32
    %65 = vector.broadcast %cst_24 : f32 to vector<128x256xf32>
    %66 = arith.mulf %65, %64 : vector<128x256xf32>
    %67 = arith.addf %60, %66 : vector<128x256xf32>
    %cst_25 = arith.constant 0.797884583 : f32
    %68 = vector.broadcast %cst_25 : f32 to vector<128x256xf32>
    %69 = arith.mulf %68, %67 : vector<128x256xf32>
    %70 = math.tanh %69 : vector<128x256xf32>
    %cst_26 = arith.constant 1.000000e+00 : f32
    %71 = vector.broadcast %cst_26 : f32 to vector<128x256xf32>
    %72 = arith.addf %71, %70 : vector<128x256xf32>
    %73 = arith.mulf %62, %72 : vector<128x256xf32>
    %74 = vector.shape_cast %73 : vector<128x256xf32> to vector<1x128x256xf32>
    %cst_27 = arith.constant dense<0xFF800000> : vector<1x256xf32>
    %75 = vector.multi_reduction <maximumf>, %74, %cst_27 [1] : vector<1x128x256xf32> to vector<1x256xf32>
    %76 = arith.truncf %75 : vector<1x256xf32> to vector<1x256xbf16>
    %c0_28 = arith.constant 0 : index
    %c0_29 = arith.constant 0 : index
    %77 = vector.load %arg10[%c0_28, %c0_29] : memref<256x512xbf16, #tpu.memory_space<vmem>>, vector<256x512xbf16>
    %cst_30 = arith.constant dense<0.000000e+00> : vector<1x512xf32>
    %78 = tpu.matmul %76, %77, %cst_30 {dimension_numbers = #tpu.dot_dimension_numbers<[1], [0], [0], [1], [0, 0, 1, 1], [], []>} : vector<1x256xbf16>, vector<256x512xbf16>, vector<1x512xf32> -> vector<1x512xf32>
    %c0_31 = arith.constant 0 : index
    %c0_32 = arith.constant 0 : index
    %79 = vector.load %arg12[%c0_31, %c0_32] : memref<1x512xf32, #tpu.memory_space<vmem>>, vector<1x512xf32>
    %80 = arith.addf %78, %79 : vector<1x512xf32>
    %81 = arith.truncf %73 : vector<128x256xf32> to vector<128x256xbf16>
    %c0_33 = arith.constant 0 : index
    %c0_34 = arith.constant 0 : index
    %82 = vector.load %arg11[%c0_33, %c0_34] : memref<256x512xbf16, #tpu.memory_space<vmem>>, vector<256x512xbf16>
    %cst_35 = arith.constant dense<0.000000e+00> : vector<128x512xf32>
    %83 = tpu.matmul %81, %82, %cst_35 {dimension_numbers = #tpu.dot_dimension_numbers<[1], [0], [0], [1], [0, 0, 1, 1], [], []>} : vector<128x256xbf16>, vector<256x512xbf16>, vector<128x512xf32> -> vector<128x512xf32>
    %84 = vector.shape_cast %83 : vector<128x512xf32> to vector<1x128x512xf32>
    %85 = vector.shape_cast %80 : vector<1x512xf32> to vector<1x1x512xf32>
    %86 = vector.broadcast %85 : vector<1x1x512xf32> to vector<1x128x512xf32>
    %87 = arith.addf %84, %86 : vector<1x128x512xf32>
    %88 = vector.shape_cast %87 : vector<1x128x512xf32> to vector<128x512xf32>
    %cst_36 = arith.constant 5.000000e-01 : f32
    %89 = vector.broadcast %cst_36 : f32 to vector<128x512xf32>
    %90 = arith.mulf %89, %88 : vector<128x512xf32>
    %91 = arith.mulf %88, %88 : vector<128x512xf32>
    %92 = arith.mulf %91, %88 : vector<128x512xf32>
    %cst_37 = arith.constant 4.471500e-02 : f32
    %93 = vector.broadcast %cst_37 : f32 to vector<128x512xf32>
    %94 = arith.mulf %93, %92 : vector<128x512xf32>
    %95 = arith.addf %88, %94 : vector<128x512xf32>
    %cst_38 = arith.constant 0.797884583 : f32
    %96 = vector.broadcast %cst_38 : f32 to vector<128x512xf32>
    %97 = arith.mulf %96, %95 : vector<128x512xf32>
    %98 = math.tanh %97 : vector<128x512xf32>
    %cst_39 = arith.constant 1.000000e+00 : f32
    %99 = vector.broadcast %cst_39 : f32 to vector<128x512xf32>
    %100 = arith.addf %99, %98 : vector<128x512xf32>
    %101 = arith.mulf %90, %100 : vector<128x512xf32>
    %102 = arith.truncf %101 : vector<128x512xf32> to vector<128x512xbf16>
    %c0_40 = arith.constant 0 : index
    %c0_41 = arith.constant 0 : index
    %103 = vector.load %arg13[%c0_40, %c0_41] : memref<512x1024xbf16, #tpu.memory_space<vmem>>, vector<512x1024xbf16>
    %cst_42 = arith.constant dense<0.000000e+00> : vector<128x1024xf32>
    %104 = tpu.matmul %102, %103, %cst_42 {dimension_numbers = #tpu.dot_dimension_numbers<[1], [0], [0], [1], [0, 0, 1, 1], [], []>} : vector<128x512xbf16>, vector<512x1024xbf16>, vector<128x1024xf32> -> vector<128x1024xf32>
    %c0_43 = arith.constant 0 : index
    %c0_44 = arith.constant 0 : index
    %105 = vector.load %arg14[%c0_43, %c0_44] : memref<1x1024xf32, #tpu.memory_space<vmem>>, vector<1x1024xf32>
    %106 = vector.broadcast %105 : vector<1x1024xf32> to vector<128x1024xf32>
    %107 = arith.addf %104, %106 : vector<128x1024xf32>
    %cst_45 = arith.constant 5.000000e-01 : f32
    %108 = vector.broadcast %cst_45 : f32 to vector<128x1024xf32>
    %109 = arith.mulf %108, %107 : vector<128x1024xf32>
    %110 = arith.mulf %107, %107 : vector<128x1024xf32>
    %111 = arith.mulf %110, %107 : vector<128x1024xf32>
    %cst_46 = arith.constant 4.471500e-02 : f32
    %112 = vector.broadcast %cst_46 : f32 to vector<128x1024xf32>
    %113 = arith.mulf %112, %111 : vector<128x1024xf32>
    %114 = arith.addf %107, %113 : vector<128x1024xf32>
    %cst_47 = arith.constant 0.797884583 : f32
    %115 = vector.broadcast %cst_47 : f32 to vector<128x1024xf32>
    %116 = arith.mulf %115, %114 : vector<128x1024xf32>
    %117 = math.tanh %116 : vector<128x1024xf32>
    %cst_48 = arith.constant 1.000000e+00 : f32
    %118 = vector.broadcast %cst_48 : f32 to vector<128x1024xf32>
    %119 = arith.addf %118, %117 : vector<128x1024xf32>
    %120 = arith.mulf %109, %119 : vector<128x1024xf32>
    %121 = arith.truncf %120 : vector<128x1024xf32> to vector<128x1024xbf16>
    %c0_49 = arith.constant 0 : index
    %c0_50 = arith.constant 0 : index
    %122 = vector.load %arg15[%c0_49, %c0_50] : memref<1024x256xbf16, #tpu.memory_space<vmem>>, vector<1024x256xbf16>
    %cst_51 = arith.constant dense<0.000000e+00> : vector<128x256xf32>
    %123 = tpu.matmul %121, %122, %cst_51 {dimension_numbers = #tpu.dot_dimension_numbers<[1], [0], [0], [1], [0, 0, 1, 1], [], []>} : vector<128x1024xbf16>, vector<1024x256xbf16>, vector<128x256xf32> -> vector<128x256xf32>
    %c0_52 = arith.constant 0 : index
    %c0_53 = arith.constant 0 : index
    %124 = vector.load %arg16[%c0_52, %c0_53] : memref<1x256xf32, #tpu.memory_space<vmem>>, vector<1x256xf32>
    %125 = vector.broadcast %124 : vector<1x256xf32> to vector<128x256xf32>
    %126 = arith.addf %123, %125 : vector<128x256xf32>
    %cst_54 = arith.constant 5.000000e-01 : f32
    %127 = vector.broadcast %cst_54 : f32 to vector<128x256xf32>
    %128 = arith.mulf %127, %126 : vector<128x256xf32>
    %129 = arith.mulf %126, %126 : vector<128x256xf32>
    %130 = arith.mulf %129, %126 : vector<128x256xf32>
    %cst_55 = arith.constant 4.471500e-02 : f32
    %131 = vector.broadcast %cst_55 : f32 to vector<128x256xf32>
    %132 = arith.mulf %131, %130 : vector<128x256xf32>
    %133 = arith.addf %126, %132 : vector<128x256xf32>
    %cst_56 = arith.constant 0.797884583 : f32
    %134 = vector.broadcast %cst_56 : f32 to vector<128x256xf32>
    %135 = arith.mulf %134, %133 : vector<128x256xf32>
    %136 = math.tanh %135 : vector<128x256xf32>
    %cst_57 = arith.constant 1.000000e+00 : f32
    %137 = vector.broadcast %cst_57 : f32 to vector<128x256xf32>
    %138 = arith.addf %137, %136 : vector<128x256xf32>
    %139 = arith.mulf %128, %138 : vector<128x256xf32>
    %140 = vector.shape_cast %139 : vector<128x256xf32> to vector<1x128x256xf32>
    %cst_58 = arith.constant dense<0xFF800000> : vector<1x256xf32>
    %141 = vector.multi_reduction <maximumf>, %140, %cst_58 [1] : vector<1x128x256xf32> to vector<1x256xf32>
    %142 = tpu.concatenate %75, %141 in 1 : vector<1x256xf32>, vector<1x256xf32> -> vector<1x512xf32>
    %143 = vector.shape_cast %142 : vector<1x512xf32> to vector<1x1x512xf32>
    %c0_59 = arith.constant 0 : index
    %c0_60 = arith.constant 0 : index
    %c0_61 = arith.constant 0 : index
    %144 = vector.load %arg17[%c0_59, %c0_60, %c0_61] : memref<1x1x512xf32, #tpu.memory_space<vmem>>, vector<1x1x512xf32>
    tpu.vector_store %arg17[%c0_59, %c0_60, %c0_61], %143 {strides = array<i32>} : memref<1x1x512xf32, #tpu.memory_space<vmem>>, vector<1x1x512xf32>,
    return
  }
  func.func @transform_0(%arg0: i32, %arg1: i32, %arg2: i32) -> (i32, i32, i32) {
    %c0_i32 = arith.constant 0 : i32
    %c0_i32_0 = arith.constant 0 : i32
    return %arg0, %arg2, %c0_i32 : i32, i32, i32
  }
  func.func @transform_1(%arg0: i32, %arg1: i32, %arg2: i32) -> (i32, i32) {
    %c0_i32 = arith.constant 0 : i32
    %c0_i32_0 = arith.constant 0 : i32
    %c0_i32_1 = arith.constant 0 : i32
    return %c0_i32, %c0_i32_0 : i32, i32
  }
  func.func @transform_2(%arg0: i32, %arg1: i32, %arg2: i32) -> (i32, i32) {
    %c0_i32 = arith.constant 0 : i32
    %c0_i32_0 = arith.constant 0 : i32
    %c0_i32_1 = arith.constant 0 : i32
    return %c0_i32, %c0_i32_0 : i32, i32
  }
  func.func @transform_3(%arg0: i32, %arg1: i32, %arg2: i32) -> (i32, i32) {
    %c0_i32 = arith.constant 0 : i32
    %c0_i32_0 = arith.constant 0 : i32
    %c0_i32_1 = arith.constant 0 : i32
    return %c0_i32, %c0_i32_0 : i32, i32
  }
  func.func @transform_4(%arg0: i32, %arg1: i32, %arg2: i32) -> (i32, i32) {
    %c0_i32 = arith.constant 0 : i32
    %c0_i32_0 = arith.constant 0 : i32
    %c0_i32_1 = arith.constant 0 : i32
    return %c0_i32, %c0_i32_0 : i32, i32
  }
  func.func @transform_5(%arg0: i32, %arg1: i32, %arg2: i32) -> (i32, i32) {
    %c0_i32 = arith.constant 0 : i32
    %c0_i32_0 = arith.constant 0 : i32
    %c0_i32_1 = arith.constant 0 : i32
    return %c0_i32, %c0_i32_0 : i32, i32
  }
  func.func @transform_6(%arg0: i32, %arg1: i32, %arg2: i32) -> (i32, i32) {
    %c0_i32 = arith.constant 0 : i32
    %c0_i32_0 = arith.constant 0 : i32
    %c0_i32_1 = arith.constant 0 : i32
    return %c0_i32, %c0_i32_0 : i32, i32
  }
  func.func @transform_7(%arg0: i32, %arg1: i32, %arg2: i32) -> (i32, i32) {
    %c0_i32 = arith.constant 0 : i32
    %c0_i32_0 = arith.constant 0 : i32
    %c0_i32_1 = arith.constant 0 : i32
    return %c0_i32, %c0_i32_0 : i32, i32
  }
  func.func @transform_8(%arg0: i32, %arg1: i32, %arg2: i32) -> (i32, i32) {
    %c0_i32 = arith.constant 0 : i32
    %c0_i32_0 = arith.constant 0 : i32
    %c0_i32_1 = arith.constant 0 : i32
    return %c0_i32, %c0_i32_0 : i32, i32
  }
  func.func @transform_9(%arg0: i32, %arg1: i32, %arg2: i32) -> (i32, i32) {
    %c0_i32 = arith.constant 0 : i32
    %c0_i32_0 = arith.constant 0 : i32
    %c0_i32_1 = arith.constant 0 : i32
    return %c0_i32, %c0_i32_0 : i32, i32
  }
  func.func @transform_10(%arg0: i32, %arg1: i32, %arg2: i32) -> (i32, i32) {
    %c0_i32 = arith.constant 0 : i32
    %c0_i32_0 = arith.constant 0 : i32
    %c0_i32_1 = arith.constant 0 : i32
    return %c0_i32, %c0_i32_0 : i32, i32
  }
  func.func @transform_11(%arg0: i32, %arg1: i32, %arg2: i32) -> (i32, i32) {
    %c0_i32 = arith.constant 0 : i32
    %c0_i32_0 = arith.constant 0 : i32
    %c0_i32_1 = arith.constant 0 : i32
    return %c0_i32, %c0_i32_0 : i32, i32
  }
  func.func @transform_12(%arg0: i32, %arg1: i32, %arg2: i32) -> (i32, i32) {
    %c0_i32 = arith.constant 0 : i32
    %c0_i32_0 = arith.constant 0 : i32
    %c0_i32_1 = arith.constant 0 : i32
    return %c0_i32, %c0_i32_0 : i32, i32
  }
  func.func @transform_13(%arg0: i32, %arg1: i32, %arg2: i32) -> (i32, i32) {
    %c0_i32 = arith.constant 0 : i32
    %c0_i32_0 = arith.constant 0 : i32
    %c0_i32_1 = arith.constant 0 : i32
    return %c0_i32, %c0_i32_0 : i32, i32
  }
  func.func @transform_14(%arg0: i32, %arg1: i32, %arg2: i32) -> (i32, i32, i32) {
    %c0_i32 = arith.constant 0 : i32
    %c0_i32_0 = arith.constant 0 : i32
    %c0_i32_1 = arith.constant 0 : i32
    return %arg0, %c0_i32, %c0_i32_0 : i32, i32, i32
  }
}

</mosaic_0001>

<bundles_post_ra>
// kernel: tpu_custom_call.1
= control target key start
LH: loop header
LB: loop body
LE: loop exit
PB: predicated region body
PF: predicated region fallthrough
CT: control target
= control target key end

     0   :  { %s15760_s0 = inlined_call_operand.vmem [shape: f32[2,128,3], index: 0, kind: input, shape index: {}]   ;;  %s15761_s1 = inlined_call_operand.vmem [shape: f32[3,64], index: 1, kind: input, shape index: {}]   ;;  %s15762_s2 = inlined_call_operand.vmem [shape: f32[1,64], index: 2, kind: input, shape index: {}]   ;;  %s15763_s3 = inlined_call_operand.vmem [shape: bf16[64,128], index: 3, kind: input, shape index: {}]   ;;  %s15764_s4 = inlined_call_operand.vmem [shape: f32[1,128], index: 4, kind: input, shape index: {}]   ;;  %s15765_s5 = inlined_call_operand.vmem [shape: bf16[128,256], index: 5, kind: input, shape index: {}]   ;;  %s15766_s6 = inlined_call_operand.vmem [shape: f32[1,256], index: 6, kind: input, shape index: {}]   ;;  %s15767_s7 = inlined_call_operand.hbm [shape: bf16[256,512], index: 7, kind: input, shape index: {}]   ;;  %s15768_s8 = inlined_call_operand.hbm [shape: bf16[256,512], index: 8, kind: input, shape index: {}]   ;;  %s15769_s9 = inlined_call_operand.vmem [shape: f32[1,512], index: 9, kind: input, shape index: {}]   ;;  %s15770_s10 = inlined_call_operand.hbm [shape: bf16[512,1024], index: 10, kind: input, shape index: {}]   ;;  %s15771_s11 = inlined_call_operand.vmem [shape: f32[1,1024], index: 11, kind: input, shape index: {}]   ;;  %s15772_s12 = inlined_call_operand.hbm [shape: bf16[1024,256], index: 12, kind: input, shape index: {}]   ;;  %s15773_s13 = inlined_call_operand.vmem [shape: f32[1,256], index: 13, kind: input, shape index: {}]   ;;  %s15774_s14 = inlined_call_operand.hbm [shape: f32[2,1,512], index: 14, kind: output, shape index: {}]  }
   0x1   :  { %15864 = sst [smem:[#allocation80_spill]] %s15767_s7 }
   0x2   :  { %19 = vsyncpa [#allocation5], 0 }
   0x3   :  { %20 = vsyncpa [#allocation8], 0 }
   0x4   :  { %21 = vsyncpa [#allocation11], 0 }
   0x5   :  { %22 = vsyncpa [#allocation6], 0 }
   0x6   :  { %24 = vsyncpa [#allocation6 + $0x1], 0  ;;  %s11200_s29 = smov 0   ;;  %s11202_s30 = smov 0  }
   0x7   :  { %s11204_s15 = smov 0   ;;  %s11206_s16 = smov 0  }
   0x8   :  { %s11208_s17 = smov 0   ;;  %s11210_s18 = smov 0  }
   0x9 LB: > { %15865 = sst [smem:[#allocation17_spill]] %s11088_s29  ;;  %s9144_s19 = sadd.s32 4294967295, %s11108_s18   ;;  %s11108_s18 = sphi %s11210_s18, %s30_s18   ;;  %s11104_s17 = sphi %s11208_s17, %s16404_s17   ;;  %s11100_s16 = sphi %s11206_s16, %s16403_s16   ;;  %s11096_s15 = sphi %s11204_s15, %s16407_s15   ;;  %s11092_s30 = sphi %s11202_s30, %s16406_s30   ;;  %s11088_s29 = sphi %s11200_s29, %s16405_s29  }
   0xa   : > { %15866 = sst [smem:[#allocation18_spill]] %s11096_s15  ;;  %s9145_s20 = sadd.s32 4294967294, %s11108_s18  }
   0xb   : > { %15867 = sst [smem:[#allocation19_spill]] %s11104_s17  ;;  %s49_s21 = sadd.s32 1, %s11104_s17 }
   0xc   : > { %s357_s22 = sadd.s32 1, %s11096_s15  ;;  %p51_p0 = scmp.ge.s32.totalorder %s49_s21, 2 }
   0xd   : > { %p367_p1 = scmp.ne.s32.totalorder %s11096_s15, %s11092_s30  ;;  %p368_p2 = scmp.eq.s32.totalorder %s9144_s19, 1 }
   0xe   : > { %p373_p3 = scmp.ne.s32.totalorder %s11092_s30, %s11088_s29  ;;  %s16409_s21 = smov (%p51_p0, %s49_s21), 0 }
   0xf   : > { %15868 = sst [smem:[#allocation20_spill]] %s16409_s21  ;;  %p11240_p4 = por %p368_p2, %p367_p1 }
  0x10   : > { %p374_p5 = scmp.eq.s32.totalorder %s9145_s20, 1  ;;  %s354_s24 = ssub.s32 %s11104_s17, %s16409_s21 }
  0x11   : > { %p9146_p6 = scmp.ge.s32.totalorder %s11108_s18, 1  ;;  %p355_p7 = scmp.eq.s32.totalorder %s354_s24, 0 }
  0x12   : > { %p11247_p8 = por %p374_p5, %p373_p3  ;;  %p381_p9 = scmp.lt.s32.totalorder %s11108_s18, 3 }
  0x13   : > { %s11253_s26 = scalar_select %p355_p7, %s11096_s15, %s357_s22  }
  0x14   : > { %s15870_s25 = scalar_select %p11247_p8, 1, 0 }
  0x15   : > { %15872 = sst [smem:[#allocation22_spill]] %s11253_s26  ;;  %p11255_p10 = pnand %p9146_p6, %p381_p9 }
  0x16   : > { %15871 = sst [smem:[#allocation21_spill]] %s15870_s25  ;;  %p11259_p11 = scmp.eq.s32.totalorder %s9144_s19, 0 }
  0x17   : > { %p9795_p12 = pneg %p11255_p10  ;;  %s11110_s20 = smov [#allocation7]  }
  0x18   : > { %s424_s24 = sshll.u32 %s11110_s20, 4  ;;  %s11111_s22 = smov [#allocation4]   ;;  %s425_s24 = int_to_ptr.vmem [resolvable:$true] %s424_s24 }
  0x19   : > { %p11267_p13 = pnand %p11259_p11, %p9795_p12  ;;  %s411_s17 = sshll.u32 %s11111_s22, 4  ;;  %s412_s17 = int_to_ptr.vmem [resolvable:$true] %s411_s17 }
  0x1a   : > { %s10927_s19 = scalar_lea.vmem %s425_s24, 8192  ;;  %p10935_p5 = scmp.lt.s32.totalorder %s425_s24, %s425_s24 }
  0x1b   : > { %p10918_p0 = pneg %p11267_p13  ;;  %p10928_p1 = scmp.ne.s32.totalorder %s425_s24, %s10927_s19 }
  0x1c   : > { %p10936_p6 = scmp.lt.s32.totalorder %s10927_s19, %s10927_s19 }
  0x1d   : > { %p10930_p2 = pnand %p10928_p1, %p10918_p0 }
  0x1e   : > { %p10937_p7 = por %p10936_p6, %p10935_p5 }
  0x1f   : > { %p10931_p3 = pneg %p10930_p2 }
  0x21   : > { %p10938_p9 = pnand %p10937_p7, %p10931_p3 }
  0x23   : > { %10941 = shalt.err (!%p10938_p9)
}
  0x24   : > { %s11112_s20 = smov 256   ;;  %s11113_s26 = smov 16  }
  0x25   : > { %9801 = dma.hbm_to_vmem [thread:$0]  (!%p11267_p13), %s15768_s8, 8192, %s425_s24, [#allocation8], %s11112_s20, %s11112_s20, %s11113_s26  }
  0x26   : > { %s10953_s25 = scalar_lea.vmem %s412_s17, 8192  ;;  %p10961_p8 = scmp.lt.s32.totalorder %s412_s17, %s412_s17 }
  0x27   : > { %p10954_p12 = scmp.ne.s32.totalorder %s412_s17, %s10953_s25  ;;  %p10962_p5 = scmp.lt.s32.totalorder %s10953_s25, %s10953_s25 }
  0x29   : > { %p10956_p1 = pnand %p10954_p12, %p10918_p0  ;;  %p10963_p3 = por %p10962_p5, %p10961_p8 }
  0x2b   : > { %p10957_p2 = pneg %p10956_p1 }
  0x2d   : > { %p10964_p6 = pnand %p10963_p3, %p10957_p2 }
  0x2f   : > { %10967 = shalt.err (!%p10964_p6)
}
  0x30   : > { %s15876_s7 = sld [smem:[#allocation80_spill]]  ;;  %s11114_s15 = smov [#allocation9]  }
  0x31   : > { %s440_s24 = sshll.u32 %s11114_s15, 4  ;;  %s441_s24 = int_to_ptr.vmem [resolvable:$true] %s440_s24 }
  0x32   : > { %s10979_s22 = scalar_lea.vmem %s441_s24, 32768  ;;  %p10987_p1 = scmp.lt.s32.totalorder %s441_s24, %s441_s24 }
  0x33   : > { %p10980_p7 = scmp.ne.s32.totalorder %s441_s24, %s10979_s22  ;;  %p10988_p8 = scmp.lt.s32.totalorder %s10979_s22, %s10979_s22 }
  0x35   : > { %p10982_p9 = pnand %p10980_p7, %p10918_p0  ;;  %p10989_p2 = por %p10988_p8, %p10987_p1 }
  0x36   : > { %9798 = dma.hbm_to_vmem [thread:$0]  (!%p11267_p13), %s15876_s7, 8192, %s412_s17, [#allocation5], %s11112_s20, %s11112_s20, %s11113_s26  }
  0x37   : > { %p10983_p12 = pneg %p10982_p9 }
  0x39   : > { %p10990_p5 = pnand %p10989_p2, %p10983_p12 }
  0x3b   : > { %10993 = shalt.err (!%p10990_p5)
}
  0x3c   : > { %s11115_s25 = smov 512   ;;  %s11116_s29 = smov 32  }
  0x3d   : > { %9804 = dma.hbm_to_vmem [thread:$0]  (!%p11267_p13), %s15770_s10, 32768, %s441_s24, [#allocation8], %s11115_s25, %s11115_s25, %s11116_s29  }
  0x3e   : > { %s11117_s20 = smov [#allocation10]  }
  0x3f   : > { %s456_s19 = sshll.u32 %s11117_s20, 4  ;;  %s457_s19 = int_to_ptr.vmem [resolvable:$true] %s456_s19 }
  0x40   : > { %s11005_s15 = scalar_lea.vmem %s457_s19, 16384  ;;  %p11013_p9 = scmp.lt.s32.totalorder %s457_s19, %s457_s19 }
  0x41   : > { %p11006_p3 = scmp.ne.s32.totalorder %s457_s19, %s11005_s15  ;;  %p11014_p12 = scmp.lt.s32.totalorder %s11005_s15, %s11005_s15 }
  0x43   : > { %p11008_p6 = pnand %p11006_p3, %p10918_p0  ;;  %p11015_p1 = por %p11014_p12, %p11013_p9 }
  0x45   : > { %p11009_p7 = pneg %p11008_p6 }
  0x47   : > { %p11016_p8 = pnand %p11015_p1, %p11009_p7 }
  0x49   : > { %11019 = shalt.err (!%p11016_p8)
}
  0x4a   : > { %s11118_s22 = smov 128   ;;  %s11119_s7 = smov 8  }
  0x4b   : > { %9807 = dma.hbm_to_vmem [thread:$0]  (!%p11267_p13), %s15772_s12, 16384, %s457_s19, [#allocation11], %s11118_s22, %s11118_s22, %s11119_s7  }
  0x4c   : > { %488 = sbr.rel (%p11255_p10) target bundleno = 2126 (0x84e), region = 76 }
  0x51   : > { %11071 = dma.done.wait (%p11259_p11), [#allocation5], 8192  }
  0x52   : > { %11073 = vsyncadd (%p11259_p11), [#allocation5], 4294959104 }
  0x53   : > { %11075 = dma.done.wait (%p11259_p11), [#allocation8], 40960  }
  0x54   : > { %11077 = vsyncadd (%p11259_p11), [#allocation8], 4294926336 }
  0x55   : > { %11079 = dma.done.wait (%p11259_p11), [#allocation11], 16384  }
  0x56   : > { %11081 = vsyncadd (%p11259_p11), [#allocation11], 4294950912  ;;  %p551_p10 = scmp.lt.s32.totalorder %s11100_s16, 1  ;;  %v11120_v0 = vmov 1   ;;  %v11121_v1 = vmov 0   ;;  %v11122_v8 = vmov 2   ;;  %v15780_v23 = vlaneseq }
  0x57   : > { %9884 = vset.pattern.permute.xlu1 %v11120_v0  ;;  %9883 = vset.pattern.permute.xlu0 %v11121_v1  ;;  %v9908_v12 = vld [vmem:[%s15763_s3 + $0x18] sm:$0xff]   ;;  %v9909_v13 = vld [vmem:[%s15763_s3 + $0x10] sm:$0xff]   ;;  %v9910_v15 = vld [vmem:[%s15763_s3 + $0x8] sm:$0xff]   ;;  %vm1092_vm0 = vcmask 523264   ;;  %s547_s17 = sand.u32 1, %s11092_s30   ;;  %s11124_s19 = smov [#allocation12]  }
  0x58   : > { %s552_s7 = scalar_select %p551_p10, %s11100_s16, 1  ;;  %1506 = vmatprep.mubr.bf16.mxu1 %v11121_v1  ;;  %9721 = vmatprep.subr.bf16.mxu0 %v9908_v12  ;;  %v9911_v17 = vld [vmem:[%s15763_s3] sm:$0xff]   ;;  %v11381_v26 = vshrl.u32 %v15780_v23, 7 }
  0x59   : > { %9722 = vmatpush3.bf16.msra.mxu0 %v9908_v12  ;;  %v577_v32 = vld [vmem:[%s15761_s1] sm:$0x7]  ;;  %s9157_s24 = sshll.u32 %s547_s17, 2  ;;  %s9016_s26 = scalar_lea.sflag [#allocation6], %s547_s17 }
  0x5a   : > { %s9707_s21 = sshll.u32 %s552_s7, 7  ;;  %9723 = vmatprep.subr.bf16.mxu0 %v9909_v13  ;;  %15877 = vst [vmem:[#allocation23_spill] sm:$0xff] %v11381_v26  ;;  %v11384_v29 = vsub.s32 1, %v11381_v26  ;;  %v11387_v30 = vsub.s32 0, %v11381_v26  ;;  %v11399_v36 = vsub.s32 2, %v11381_v26  ;;  %s9708_s7 = sshll.u32 %s11100_s16, 6 }
  0x5b   : > { %s11327_s29 = scalar_lea.vmem %s15760_s0, %s9707_s21  ;;  %v11414_v48 = vld [vmem:[%s15762_s2] ss:$0 sm:$0xff]  ;;  %s549_s21 = scalar_lea.vmem [#allocation12], %s9157_s24 }
  0x5c   : > { %v561_v2 = vld [vmem:[%s11327_s29] sm:$0xff]  ;;  %v562_v3 = vld [vmem:[%s11327_s29 + $0x8] sm:$0xff]  ;;  %v563_v4 = vld [vmem:[%s11327_s29 + $0x10] sm:$0xff]  ;;  %15878 = vst [vmem:[#allocation24_spill] sm:$0xff] %v11384_v29  ;;  %v11393_v34 = vrot.slane %v577_v32, %v11384_v29  ;;  %v11396_v35 = vrot.slane %v577_v32, %v11387_v30  ;;  %v11404_v41 = vrot.slane %v577_v32, %v11399_v36  ;;  %s9030_s27 = sshll.u32 %s549_s21, 4  ;;  %s9028_s28 = scalar_lea.hbm %s15774_s14, %s9708_s7  ;;  %s9031_s27 = int_to_ptr.vmem [resolvable:$true] %s9030_s27 }
  0x5d   : > { %679 = vperm.xlu1 %9884, %v561_v2   ;;  %580 = vperm.xlu0 %9883, %v561_v2   ;;  %v564_v5 = vld [vmem:[%s11327_s29 + $0x18] sm:$0xff]  ;;  %v566_v6 = vld [vmem:[%s11327_s29 + $0x28] sm:$0xff]  ;;  %v567_v7 = vld [vmem:[%s11327_s29 + $0x30] sm:$0xff]  ;;  %15879 = vst [vmem:[#allocation25_spill] sm:$0xff] %v11387_v30  ;;  %s11020_s20 = scalar_lea.vmem %s9031_s27, 64  ;;  %s11024_s16 = sshll.u32 %s11124_s19, 4  ;;  %s11025_s16 = int_to_ptr.vmem [resolvable:$false] %s11024_s16 }
  0x5e   : > { %v565_v9 = vld [vmem:[%s11327_s29 + $0x20] sm:$0xff]  ;;  %v568_v10 = vld [vmem:[%s11327_s29 + $0x38] sm:$0xff]  ;;  %v570_v11 = vld [vmem:[%s11327_s29 + $0x48] sm:$0xff]  ;;  %9724 = vmatpush3.bf16.msra.mxu0 %v9909_v13  ;;  %15880 = vst [vmem:[#allocation26_spill] sm:$0xff] %v11399_v36  ;;  %p11021_p11 = scmp.ne.s32.totalorder %s9031_s27, %s11020_s20  ;;  %s11026_s15 = scalar_lea.vmem %s11025_s16, 128 }
  0x5f   : > { %v571_v14 = vld [vmem:[%s11327_s29 + $0x50] sm:$0xff]  ;;  %v573_v16 = vld [vmem:[%s11327_s29 + $0x60] sm:$0xff]  ;;  %9725 = vmatprep.subr.bf16.mxu0 %v9910_v15  ;;  %v574_v18 = vld [vmem:[%s11327_s29 + $0x68] sm:$0xff]  ;;  %p11027_p2 = scmp.lt.s32.totalorder %s9031_s27, %s11025_s16  ;;  %p11028_p5 = scmp.lt.s32.totalorder %s11026_s15, %s11020_s20 }
  0x60   : > { %v569_v19 = vld [vmem:[%s11327_s29 + $0x40] sm:$0xff]  ;;  %v575_v20 = vld [vmem:[%s11327_s29 + $0x70] sm:$0xff]  ;;  %v572_v21 = vld [vmem:[%s11327_s29 + $0x58] sm:$0xff]  ;;  %p11022_p13 = pnand %p11021_p11, %p11240_p4 }
  0x61   : > { %683 = vperm.xlu1 %9884, %v562_v3   ;;  %585 = vperm.xlu0 %9883, %v562_v3   ;;  %v576_v22 = vld [vmem:[%s11327_s29 + $0x78] sm:$0xff]  ;;  %p11029_p3 = por %p11028_p5, %p11027_p2 }
  0x62   : > { %9726 = vmatpush3.bf16.msra.mxu0 %v9910_v15  ;;  %p11023_p0 = pneg %p11022_p13 }
  0x63   : > { %9727 = vmatprep.subr.bf16.mxu0 %v9911_v17 }
  0x64   : > { %p11030_p6 = pnand %p11029_p3, %p11023_p0 }
  0x65   : > { %9885 = vset.pattern.permute.xlu1 %v11121_v1  ;;  %590 = vperm.xlu0 %9883, %v563_v4  }
  0x66   : > { %595 = vperm.xlu1 %9885, %v564_v5   ;;  %9728 = vmatpush3.bf16.msra.mxu0 %v9911_v17 }
  0x69   : > { %9886 = vset.pattern.permute.xlu0 %v11120_v0 }
  0x6a   : > { %9887 = vset.pattern.permute.xlu1 %v11120_v0  ;;  %687 = vperm.xlu0 %9886, %v563_v4  }
  0x6b   : > { %691 = vperm.xlu1 %9887, %v564_v5  }
  0x6e   : > { %699 = vperm.xlu0 %9886, %v566_v6  }
  0x6f   : > { %9888 = vset.pattern.permute.xlu1 %v11122_v8 }
  0x70   : > { %779 = vperm.xlu1 %9888, %v561_v2  }
  0x72   : > { %703 = vperm.xlu0 %9886, %v567_v7  }
  0x74   : > { %787 = vperm.xlu1 %9888, %v563_v4  }
  0x76   : > { %9892 = vset.pattern.permute.xlu0 %v11122_v8 }
  0x77   : > { %783 = vperm.xlu0 %9892, %v562_v3  }
  0x78   : > { %791 = vperm.xlu1 %9888, %v564_v5  }
  0x7b   : > { %795 = vperm.xlu0 %9892, %v565_v9  }
  0x7c   : > { %9889 = vset.pattern.permute.xlu1 %v11121_v1 }
  0x7d   : > { %605 = vperm.xlu1 %9889, %v566_v6  }
  0x7f   : > { %807 = vperm.xlu0 %9892, %v568_v10  }
  0x81   : > { %9890 = vset.pattern.permute.xlu1 %v11120_v0 }
  0x82   : > { %695 = vperm.xlu1 %9890, %v565_v9  }
  0x83   : > { %815 = vperm.xlu0 %9892, %v570_v11  }
  0x86   : > { %9891 = vset.pattern.permute.xlu1 %v11121_v1 }
  0x87   : > { %610 = vperm.xlu1 %9891, %v567_v7   ;;  %9900 = vset.pattern.permute.xlu0 %v11121_v1 }
  0x88   : > { %600 = vperm.xlu0 %9900, %v565_v9  }
  0x8b   : > { %615 = vperm.xlu1 %9891, %v568_v10  }
  0x8c   : > { %625 = vperm.xlu0 %9900, %v570_v11  }
  0x8f   : > { %9893 = vset.pattern.permute.xlu1 %v11120_v0 }
  0x90   : > { %707 = vperm.xlu1 %9893, %v568_v10   ;;  %630 = vperm.xlu0 %9900, %v571_v14  }
  0x94   : > { %9894 = vset.pattern.permute.xlu1 %v11122_v8  ;;  %640 = vperm.xlu0 %9900, %v573_v16  }
  0x95   : > { %799 = vperm.xlu1 %9894, %v566_v6  }
  0x98   : > { %9901 = vset.pattern.permute.xlu0 %v11120_v0 }
  0x99   : > { %803 = vperm.xlu1 %9894, %v567_v7   ;;  %719 = vperm.xlu0 %9901, %v571_v14  }
  0x9d   : > { %9895 = vset.pattern.permute.xlu1 %v11121_v1  ;;  %731 = vperm.xlu0 %9901, %v574_v18  }
  0x9e   : > { %620 = vperm.xlu1 %9895, %v569_v19  }
  0xa1   : > { %735 = vperm.xlu0 %9901, %v575_v20  }
  0xa2   : > { %9896 = vset.pattern.permute.xlu1 %v11120_v0 }
  0xa3   : > { %711 = vperm.xlu1 %9896, %v569_v19  }
  0xa5   : > { %9906 = vset.pattern.permute.xlu0 %v11122_v8 }
  0xa6   : > { %827 = vperm.xlu0 %9906, %v573_v16  }
  0xa7   : > { %715 = vperm.xlu1 %9896, %v570_v11  }
  0xaa   : > { %839 = vperm.xlu0 %9906, %v576_v22  }
  0xab   : > { %9897 = vset.pattern.permute.xlu1 %v11121_v1 }
  0xac   : > { %635 = vperm.xlu1 %9897, %v572_v21  }
  0xb0   : > { %9898 = vset.pattern.permute.xlu1 %v11120_v0 }
  0xb1   : > { %723 = vperm.xlu1 %9898, %v572_v21  }
  0xb5   : > { %9899 = vset.pattern.permute.xlu1 %v11122_v8 }
  0xb6   : > { %811 = vperm.xlu1 %9899, %v569_v19  }
  0xba   : > { %819 = vperm.xlu1 %9899, %v571_v14  }
  0xbe   : > { %823 = vperm.xlu1 %9899, %v572_v21  }
  0xc2   : > { %9902 = vset.pattern.permute.xlu1 %v11121_v1 }
  0xc3   : > { %645 = vperm.xlu1 %9902, %v574_v18  }
  0xc7   : > { %9903 = vset.pattern.permute.xlu1 %v11120_v0 }
  0xc8   : > { %727 = vperm.xlu1 %9903, %v573_v16  }
  0xcc   : > { %9904 = vset.pattern.permute.xlu1 %v11121_v1 }
  0xcd   : > { %650 = vperm.xlu1 %9904, %v575_v20  }
  0xd1   : > { %655 = vperm.xlu1 %9904, %v576_v22  }
  0xd5   : > { %9905 = vset.pattern.permute.xlu1 %v11120_v0 }
  0xd6   : > { %739 = vperm.xlu1 %9905, %v576_v22  }
  0xd8   : > { %v680_v24 = vpop.permute.xlu1 %679  ;;  %v581_v25 = vpop.permute.xlu0 %580 }
  0xd9   : > { %v746_v39 = vmul.f32 %v11393_v34, %v680_v24  ;;  %v662_v40 = vmul.f32 %v11396_v35, %v581_v25 }
  0xda   : > { %9907 = vset.pattern.permute.xlu1 %v11122_v8 }
  0xdb   : > { %831 = vperm.xlu1 %9907, %v574_v18   ;;  %v762_v46 = vadd.f32 %v746_v39, %v662_v40 }
  0xdc   : > { %v684_v27 = vpop.permute.xlu1 %683  ;;  %v586_v28 = vpop.permute.xlu0 %585 }
  0xdd   : > { %v747_v52 = vmul.f32 %v11393_v34, %v684_v27  ;;  %v663_v53 = vmul.f32 %v11396_v35, %v586_v28 }
  0xdf   : > { %835 = vperm.xlu1 %9907, %v575_v20   ;;  %v763_v62 = vadd.f32 %v747_v52, %v663_v53 }
  0xe0   : > { %v591_v31 = vpop.permute.xlu0 %590 }
  0xe1   : > { %v596_v33 = vpop.permute.xlu1 %595  ;;  %v664_v43 = vmul.f32 %v11396_v35, %v591_v31 }
  0xe2   : > { %v665_v58 = vmul.f32 %v11396_v35, %v596_v33 }
  0xe5   : > { %v688_v37 = vpop.permute.xlu0 %687 }
  0xe6   : > { %v692_v38 = vpop.permute.xlu1 %691  ;;  %v748_v44 = vmul.f32 %v11393_v34, %v688_v37 }
  0xe7   : > { %v749_v55 = vmul.f32 %v11393_v34, %v692_v38 }
  0xe8   : > { %v764_v50 = vadd.f32 %v748_v44, %v664_v43 }
  0xe9   : > { %v11406_v42 = vpop.permute.xlu0 %699  ;;  %v765_v2 = vadd.f32 %v749_v55, %v665_v58 }
  0xeb   : > { %v780_v45 = vpop.permute.xlu1 %779 }
  0xec   : > { %v846_v47 = vmul.f32 %v11404_v41, %v780_v45 }
  0xed   : > { %v11416_v49 = vpop.permute.xlu0 %703 }
  0xee   : > { %v862_v51 = vadd.f32 %v846_v47, %v762_v46 }
  0xef   : > { %v788_v54 = vpop.permute.xlu1 %787 }
  0xf0   : > { %v11422_v56 = vadd.f32 %v11414_v48, %v862_v51  ;;  %v848_v57 = vmul.f32 %v11404_v41, %v788_v54 }
  0xf2   : > { %v917_v59 = vmul.f32 %v11422_v56, %v11422_v56  ;;  %v864_v60 = vadd.f32 %v848_v57, %v764_v50  ;;  %v784_v61 = vpop.permute.xlu0 %783 }
  0xf3   : > { %v847_v63 = vmul.f32 %v11404_v41, %v784_v61  ;;  %v792_v0 = vpop.permute.xlu1 %791  ;;  %v751_v61 = vmul.f32 %v11393_v34, %v11406_v42 }
  0xf4   : > { %v11430_v3 = vadd.f32 %v11414_v48, %v864_v60  ;;  %v849_v4 = vmul.f32 %v11404_v41, %v792_v0  ;;  %v933_v5 = vmul.f32 %v917_v59, %v11422_v56 }
  0xf5   : > { %v863_v6 = vadd.f32 %v847_v63, %v763_v62 }
  0xf6   : > { %v919_v7 = vmul.f32 %v11430_v3, %v11430_v3  ;;  %v865_v8 = vadd.f32 %v849_v4, %v765_v2  ;;  %v796_v9 = vpop.permute.xlu0 %795  ;;  %v949_v10 = vmul.f32 0.044715, %v933_v5  ;;  %v752_v2 = vmul.f32 %v11393_v34, %v11416_v49 }
  0xf7   : > { %v886_v11 = vadd.f32 %v11414_v48, %v863_v6  ;;  %v850_v44 = vmul.f32 %v11404_v41, %v796_v9  ;;  %v901_v4 = vmul.f32 0.5, %v11422_v56  ;;  %v903_v49 = vmul.f32 0.5, %v11430_v3 }
  0xf8   : > { %v935_v12 = vmul.f32 %v919_v7, %v11430_v3  ;;  %v888_v13 = vadd.f32 %v11414_v48, %v865_v8  ;;  %v606_v14 = vpop.permute.xlu1 %605  ;;  %v965_v15 = vadd.f32 %v949_v10, %v11422_v56 }
  0xf9   : > { %v918_v16 = vmul.f32 %v886_v11, %v886_v11  ;;  %v667_v62 = vmul.f32 %v11396_v35, %v606_v14  ;;  %v902_v10 = vmul.f32 0.5, %v886_v11 }
  0xfa   : > { %v951_v17 = vmul.f32 0.044715, %v935_v12  ;;  %v920_v18 = vmul.f32 %v888_v13, %v888_v13  ;;  %v808_v19 = vpop.permute.xlu0 %807  ;;  %v981_v21 = vmul.f32 0.7978846, %v965_v15  ;;  %v904_v56 = vmul.f32 0.5, %v888_v13 }
  0xfb   : > { %v934_v20 = vmul.f32 %v918_v16, %v886_v11  ;;  %v853_v55 = vmul.f32 %v11404_v41, %v808_v19  ;;  %v767_v42 = vadd.f32 %v751_v61, %v667_v62 }
  0xfc   : > { %v967_v22 = vadd.f32 %v951_v17, %v11430_v3  ;;  %v936_v24 = vmul.f32 %v920_v18, %v888_v13  ;;  %10320 = vtanh.f32 %v981_v21 }
  0xfd   : > { %v696_v25 = vpop.permute.xlu1 %695  ;;  %v950_v27 = vmul.f32 0.044715, %v934_v20 }
  0xfe   : > { %v983_v28 = vmul.f32 0.7978846, %v967_v22  ;;  %v952_v31 = vmul.f32 0.044715, %v936_v24  ;;  %v11441_v32 = vpop.permute.xlu0 %815  ;;  %v750_v45 = vmul.f32 %v11393_v34, %v696_v25 }
  0xff   : > { %v966_v33 = vadd.f32 %v950_v27, %v886_v11 }
 0x100   : > { %10322 = vtanh.f32 %v983_v28  ;;  %v968_v37 = vadd.f32 %v952_v31, %v888_v13 }
 0x101   : > { %v982_v38 = vmul.f32 0.7978846, %v966_v33 }
 0x102   : > { %v984_v39 = vmul.f32 0.7978846, %v968_v37  ;;  %v611_v40 = vpop.permute.xlu1 %610 }
 0x103   : > { %v601_v43 = vpop.permute.xlu0 %600  ;;  %10324 = vtanh.f32 %v982_v38  ;;  %v668_v7 = vmul.f32 %v11396_v35, %v611_v40 }
 0x104   : > { %10326 = vtanh.f32 %v984_v39  ;;  %v666_v46 = vmul.f32 %v11396_v35, %v601_v43 }
 0x105   : > { %v768_v24 = vadd.f32 %v752_v2, %v668_v7 }
 0x106   : > { %v766_v47 = vadd.f32 %v750_v45, %v666_v46  ;;  %v616_v50 = vpop.permute.xlu1 %615 }
 0x107   : > { %v669_v58 = vmul.f32 %v11396_v35, %v616_v50 }
 0x108   : > { %v866_v51 = vadd.f32 %v850_v44, %v766_v47 }
 0x109   : > { %v10321_v54 = vpop.eup %10320 }
 0x10a   : > { %v11447_v52 = vadd.f32 %v11414_v48, %v866_v51  ;;  %v1013_v5 = vadd.f32 1.0, %v10321_v54 }
 0x10b   : > { %v708_v53 = vpop.permute.xlu1 %707 }
 0x10c   : > { %v921_v57 = vmul.f32 %v11447_v52, %v11447_v52  ;;  %v753_v59 = vmul.f32 %v11393_v34, %v708_v53  ;;  %v1029_v21 = vmul.f32 %v1013_v5, %v901_v4  ;;  %v855_v4 = vmul.f32 %v11404_v41, %v11441_v32 }
 0x10d   : > { %v10323_v60 = vpop.eup %10322 }
 0x10e   : > { %v937_v63 = vmul.f32 %v921_v57, %v11447_v52  ;;  %v769_v0 = vadd.f32 %v753_v59, %v669_v58  ;;  %v1015_v12 = vadd.f32 1.0, %v10323_v60  ;;  %v626_v58 = vpop.permute.xlu0 %625 }
 0x110   : > { %v10325_v6 = vpop.eup %10324  ;;  %v869_v8 = vadd.f32 %v853_v55, %v769_v0  ;;  %v800_v9 = vpop.permute.xlu1 %799  ;;  %v953_v16 = vmul.f32 0.044715, %v937_v63  ;;  %v1031_v27 = vmul.f32 %v1015_v12, %v903_v49  ;;  %v671_v63 = vmul.f32 %v11396_v35, %v626_v58 }
 0x111   : > { %v10327_v15 = vpop.eup %10326  ;;  %v851_v14 = vmul.f32 %v11404_v41, %v800_v9  ;;  %v1014_v17 = vadd.f32 1.0, %v10325_v6 }
 0x112   : > { %v11464_v18 = vadd.f32 %v11414_v48, %v869_v8  ;;  %v1016_v19 = vadd.f32 1.0, %v10327_v15  ;;  %v969_v31 = vadd.f32 %v953_v16, %v11447_v52  ;;  %v631_v0 = vpop.permute.xlu0 %630 }
 0x113   : > { %v867_v20 = vadd.f32 %v851_v14, %v767_v42  ;;  %v1030_v22 = vmul.f32 %v1014_v17, %v902_v10 }
 0x114   : > { %v924_v11 = vmul.f32 %v11464_v18, %v11464_v18  ;;  %v804_v25 = vpop.permute.xlu1 %803  ;;  %v1032_v28 = vmul.f32 %v1016_v19, %v904_v56  ;;  %v985_v44 = vmul.f32 0.7978846, %v969_v31 }
 0x115   : > { %v890_v33 = vadd.f32 %v11414_v48, %v867_v20  ;;  %v852_v37 = vmul.f32 %v11404_v41, %v804_v25  ;;  %v1045_v3 = vpack.c.bf16 %v1030_v22, %v1029_v21  ;;  %v905_v20 = vmul.f32 0.5, %v11447_v52 }
 0x116   : > { %v940_v13 = vmul.f32 %v924_v11, %v11464_v18  ;;  %v1046_v38 = vpack.c.bf16 %v1032_v28, %v1031_v27  ;;  %10328 = vtanh.f32 %v985_v44  ;;  %v11481_v10 = vpop.permute.xlu0 %640  ;;  %v672_v11 = vmul.f32 %v11396_v35, %v631_v0 }
 0x117   : > { %v922_v39 = vmul.f32 %v890_v33, %v890_v33  ;;  %v868_v40 = vadd.f32 %v852_v37, %v768_v24  ;;  %9729 = vmatprep.mubr.msk.bf16.mxu0 %vm1092_vm0, %v1045_v3  ;;  %v906_v21 = vmul.f32 0.5, %v890_v33  ;;  %v908_v52 = vmul.f32 0.5, %v11464_v18 }
 0x118   : > { %v956_v43 = vmul.f32 0.044715, %v940_v13  ;;  %9730 = vmatmul.mubr.msk.bf16.vlgmr.msra.gmra.mxu0 %vm1092_vm0, %v1046_v38 }
 0x119   : > { %v938_v45 = vmul.f32 %v922_v39, %v890_v33  ;;  %v891_v46 = vadd.f32 %v11414_v48, %v868_v40  ;;  %v621_v47 = vpop.permute.xlu1 %620 }
 0x11a   : > { %v972_v50 = vadd.f32 %v956_v43, %v11464_v18  ;;  %v720_v17 = vpop.permute.xlu0 %719  ;;  %v670_v24 = vmul.f32 %v11396_v35, %v621_v47 }
 0x11b   : > { %v954_v51 = vmul.f32 0.044715, %v938_v45  ;;  %v923_v53 = vmul.f32 %v891_v46, %v891_v46  ;;  %v756_v25 = vmul.f32 %v11393_v34, %v720_v17  ;;  %v907_v43 = vmul.f32 0.5, %v891_v46 }
 0x11c   : > { %v988_v54 = vmul.f32 0.7978846, %v972_v50 }
 0x11d   : > { %v970_v55 = vadd.f32 %v954_v51, %v890_v33  ;;  %v939_v57 = vmul.f32 %v923_v53, %v891_v46  ;;  %v772_v45 = vadd.f32 %v756_v25, %v672_v11 }
 0x11e   : > { %v712_v59 = vpop.permute.xlu1 %711  ;;  %10330 = vtanh.f32 %v988_v54  ;;  %v732_v54 = vpop.permute.xlu0 %731 }
 0x11f   : > { %v986_v60 = vmul.f32 0.7978846, %v970_v55  ;;  %v955_v61 = vmul.f32 0.044715, %v939_v57  ;;  %v754_v56 = vmul.f32 %v11393_v34, %v712_v59 }
 0x121   : > { %10332 = vtanh.f32 %v986_v60  ;;  %v971_v62 = vadd.f32 %v955_v61, %v891_v46  ;;  %v770_v13 = vadd.f32 %v754_v56, %v670_v24 }
 0x122   : > { %v716_v2 = vpop.permute.xlu1 %715 }
 0x123   : > { %v987_v5 = vmul.f32 0.7978846, %v971_v62  ;;  %v755_v6 = vmul.f32 %v11393_v34, %v716_v2  ;;  %v10329_v15 = vpop.eup %10328 }
 0x124   : > { %v1017_v32 = vadd.f32 1.0, %v10329_v15 }
 0x125   : > { %10334 = vtanh.f32 %v987_v5  ;;  %v771_v7 = vadd.f32 %v755_v6, %v671_v63  ;;  %v736_v5 = vpop.permute.xlu0 %735 }
 0x126   : > { %v1033_v28 = vmul.f32 %v1017_v32, %v905_v20  ;;  %v674_v20 = vmul.f32 %v11396_v35, %v11481_v10 }
 0x127   : > { %v871_v8 = vadd.f32 %v855_v4, %v771_v7  ;;  %v636_v9 = vpop.permute.xlu1 %635 }
 0x128   : > { %v673_v46 = vmul.f32 %v11396_v35, %v636_v9 }
 0x129   : > { %v11484_v12 = vadd.f32 %v11414_v48, %v871_v8 }
 0x12b   : > { %v926_v42 = vmul.f32 %v11484_v12, %v11484_v12  ;;  %v10331_v14 = vpop.eup %10330 }
 0x12c   : > { %v724_v16 = vpop.permute.xlu1 %723  ;;  %v1020_v37 = vadd.f32 1.0, %v10331_v14 }
 0x12d   : > { %v942_v19 = vmul.f32 %v926_v42, %v11484_v12  ;;  %v757_v47 = vmul.f32 %v11393_v34, %v724_v16 }
 0x12e   : > { %v10333_v49 = vpop.eup %10332  ;;  %v1036_v53 = vmul.f32 %v1020_v37, %v908_v52 }
 0x12f   : > { %v1018_v22 = vadd.f32 1.0, %v10333_v49  ;;  %v958_v38 = vmul.f32 0.044715, %v942_v19  ;;  %v773_v61 = vadd.f32 %v757_v47, %v673_v46  ;;  %v828_v49 = vpop.permute.xlu0 %827 }
 0x130   : > { %v858_v25 = vmul.f32 %v11404_v41, %v828_v49 }
 0x131   : > { %v812_v27 = vpop.permute.xlu1 %811  ;;  %v1034_v31 = vmul.f32 %v1018_v22, %v906_v21  ;;  %v974_v55 = vadd.f32 %v958_v38, %v11484_v12 }
 0x132   : > { %v10335_v3 = vpop.eup %10334  ;;  %v854_v39 = vmul.f32 %v11404_v41, %v812_v27 }
 0x133   : > { %v1047_v40 = vpack.c.bf16 %v1034_v31, %v1033_v28  ;;  %v1019_v33 = vadd.f32 1.0, %v10335_v3  ;;  %v990_v63 = vmul.f32 0.7978846, %v974_v55  ;;  %v840_v10 = vpop.permute.xlu0 %839 }
 0x134   : > { %v870_v44 = vadd.f32 %v854_v39, %v770_v13 }
 0x135   : > { %v820_v50 = vpop.permute.xlu1 %819  ;;  %9733 = vmatprep.mubr.msk.bf16.mxu0 %vm1092_vm0, %v1047_v40  ;;  %v1035_v51 = vmul.f32 %v1019_v33, %v907_v43  ;;  %10336 = vtanh.f32 %v990_v63 }
 0x136   : > { %v893_v57 = vadd.f32 %v11414_v48, %v870_v44  ;;  %v856_v58 = vmul.f32 %v11404_v41, %v820_v50  ;;  %v910_v44 = vmul.f32 0.5, %v11484_v12  ;;  %v861_v50 = vmul.f32 %v11404_v41, %v840_v10 }
 0x137   : > { %v1048_v18 = vpack.c.bf16 %v1036_v53, %v1035_v51  ;;  %v760_v12 = vmul.f32 %v11393_v34, %v736_v5 }
 0x138   : > { %v925_v59 = vmul.f32 %v893_v57, %v893_v57  ;;  %v872_v60 = vadd.f32 %v856_v58, %v772_v45  ;;  %v909_v33 = vmul.f32 0.5, %v893_v57 }
 0x139   : > { %v824_v62 = vpop.permute.xlu1 %823  ;;  %9734 = vmatmul.mubr.msk.bf16.gmra.mxu0 %vm1092_vm0, %v1048_v18  ;;  %v759_v18 = vmul.f32 %v11393_v34, %v732_v54 }
 0x13a   : > { %v941_v0 = vmul.f32 %v925_v59, %v893_v57  ;;  %v11504_v2 = vadd.f32 %v11414_v48, %v872_v60  ;;  %v857_v4 = vmul.f32 %v11404_v41, %v824_v62 }
 0x13c   : > { %v957_v6 = vmul.f32 0.044715, %v941_v0  ;;  %v927_v7 = vmul.f32 %v11504_v2, %v11504_v2  ;;  %v873_v8 = vadd.f32 %v857_v4, %v773_v61 }
 0x13e   : > { %v973_v9 = vadd.f32 %v957_v6, %v893_v57  ;;  %v943_v15 = vmul.f32 %v927_v7, %v11504_v2  ;;  %v896_v42 = vadd.f32 %v11414_v48, %v873_v8  ;;  %v646_v16 = vpop.permute.xlu1 %645 }
 0x13f   : > { %v675_v59 = vmul.f32 %v11396_v35, %v646_v16 }
 0x140   : > { %v989_v14 = vmul.f32 0.7978846, %v973_v9  ;;  %v959_v17 = vmul.f32 0.044715, %v943_v15  ;;  %v928_v32 = vmul.f32 %v896_v42, %v896_v42  ;;  %v911_v15 = vmul.f32 0.5, %v11504_v2 }
 0x141   : > { %v775_v6 = vadd.f32 %v759_v18, %v675_v59  ;;  %v912_v16 = vmul.f32 0.5, %v896_v42  ;;  %v9929_v18 = vld [vmem:[%s15765_s5 + $0x20] ss:$8 sps:$4 sm:$0xff]   ;;  %v9930_v59 = vld [vmem:[%s15765_s5 + $0x14] ss:$8 sps:$4 sm:$0xff]  }
 0x142   : > { %10338 = vtanh.f32 %v989_v14  ;;  %v975_v56 = vadd.f32 %v959_v17, %v11504_v2  ;;  %v944_v19 = vmul.f32 %v928_v32, %v896_v42  ;;  %v10337_v13 = vpop.eup %10336 }
 0x143   : > { %v728_v21 = vpop.permute.xlu1 %727  ;;  %v1022_v40 = vadd.f32 1.0, %v10337_v13 }
 0x144   : > { %v991_v22 = vmul.f32 0.7978846, %v975_v56  ;;  %v960_v24 = vmul.f32 0.044715, %v944_v19  ;;  %v758_v11 = vmul.f32 %v11393_v34, %v728_v21 }
 0x145   : > { %v1038_v58 = vmul.f32 %v1022_v40, %v910_v44 }
 0x146   : > { %10340 = vtanh.f32 %v991_v22  ;;  %v976_v27 = vadd.f32 %v960_v24, %v896_v42  ;;  %v774_v28 = vadd.f32 %v758_v11, %v674_v20  ;;  %v9912_v11 = vld [vmem:[%s15765_s5 + $0x74] ss:$8 sps:$4 sm:$0xff]  }
 0x147   : > { %1474 = vmatprep.subr.bf16.mxu1 %v9912_v11 }
 0x148   : > { %v992_v31 = vmul.f32 0.7978846, %v976_v27  ;;  %v874_v37 = vadd.f32 %v858_v25, %v774_v28  ;;  %v651_v3 = vpop.permute.xlu1 %650 }
 0x149   : > { %v676_v8 = vmul.f32 %v11396_v35, %v651_v3 }
 0x14a   : > { %10342 = vtanh.f32 %v992_v31  ;;  %v11517_v38 = vadd.f32 %v11414_v48, %v874_v37 }
 0x14b   : > { %v776_v19 = vadd.f32 %v760_v12, %v676_v8 }
 0x14c   : > { %v656_v39 = vpop.permute.xlu1 %655  ;;  %v929_v52 = vmul.f32 %v11517_v38, %v11517_v38  ;;  %v913_v12 = vmul.f32 0.5, %v11517_v38 }
 0x14d   : > { %v677_v51 = vmul.f32 %v11396_v35, %v656_v39  ;;  %v9915_v39 = vld [vmem:[%s15765_s5 + $0x64] ss:$8 sps:$4 sm:$0xff]  }
 0x14e   : > { %v945_v60 = vmul.f32 %v929_v52, %v11517_v38 }
 0x14f   : > { %v10339_v43 = vpop.eup %10338 }
 0x150   : > { %v1021_v45 = vadd.f32 1.0, %v10339_v43  ;;  %v961_v7 = vmul.f32 0.044715, %v945_v60 }
 0x151   : > { %v740_v47 = vpop.permute.xlu1 %739 }
 0x152   : > { %v761_v53 = vmul.f32 %v11393_v34, %v740_v47  ;;  %v1037_v55 = vmul.f32 %v1021_v45, %v909_v33  ;;  %v977_v56 = vadd.f32 %v961_v7, %v11517_v38  ;;  %v9918_v33 = vld [vmem:[%s15765_s5 + $0x54] ss:$8 sps:$4 sm:$0xff]   ;;  %v9920_v45 = vld [vmem:[%s15765_s5 + $0x50] ss:$8 sps:$4 sm:$0xff]   ;;  %v9933_v38 = vld [vmem:[%s15765_s5 + $0x4] ss:$8 sps:$4 sm:$0xff]  }
 0x153   : > { %v10341_v46 = vpop.eup %10340 }
 0x154   : > { %v777_v57 = vadd.f32 %v761_v53, %v677_v51  ;;  %v1049_v61 = vpack.c.bf16 %v1038_v58, %v1037_v55  ;;  %v1023_v0 = vadd.f32 1.0, %v10341_v46  ;;  %v993_v25 = vmul.f32 0.7978846, %v977_v56  ;;  %v9923_v51 = vld [vmem:[%s15765_s5 + $0x40] ss:$8 sps:$4 sm:$0xff]  }
 0x155   : > { %v9924_v53 = vld [vmem:[%s15765_s5 + $0x34] ss:$8 sps:$4 sm:$0xff]   ;;  %v9926_v55 = vld [vmem:[%s15765_s5 + $0x30] ss:$8 sps:$4 sm:$0xff]   ;;  %v9927_v58 = vld [vmem:[%s15765_s5 + $0x24] ss:$8 sps:$4 sm:$0xff]  }
 0x156   : > { %v877_v62 = vadd.f32 %v861_v50, %v777_v57  ;;  %v832_v63 = vpop.permute.xlu1 %831  ;;  %9737 = vmatprep.mubr.msk.bf16.mxu0 %vm1092_vm0, %v1049_v61  ;;  %v1039_v32 = vmul.f32 %v1023_v0, %v911_v15  ;;  %10344 = vtanh.f32 %v993_v25  ;;  %v9921_v50 = vld [vmem:[%s15765_s5 + $0x44] ss:$8 sps:$4 sm:$0xff]   ;;  %v9932_v0 = vld [vmem:[%s15765_s5 + $0x10] ss:$8 sps:$4 sm:$0xff]  }
 0x157   : > { %v10343_v4 = vpop.eup %10342  ;;  %v859_v54 = vmul.f32 %v11404_v41, %v832_v63 }
 0x158   : > { %v11533_v9 = vadd.f32 %v11414_v48, %v877_v62  ;;  %v1024_v14 = vadd.f32 1.0, %v10343_v4 }
 0x159   : > { %v875_v34 = vadd.f32 %v859_v54, %v775_v6 }
 0x15a   : > { %v932_v5 = vmul.f32 %v11533_v9, %v11533_v9  ;;  %v836_v17 = vpop.permute.xlu1 %835  ;;  %v1040_v49 = vmul.f32 %v1024_v14, %v912_v16  ;;  %v916_v16 = vmul.f32 0.5, %v11533_v9 }
 0x15b   : > { %v898_v35 = vadd.f32 %v11414_v48, %v875_v34  ;;  %v860_v20 = vmul.f32 %v11404_v41, %v836_v17  ;;  %v9914_v41 = vld [vmem:[%s15765_s5 + $0x70] ss:$8 sps:$4 sm:$0xff]   ;;  %v9935_v17 = vld [vmem:[%s15765_s5] ss:$8 sps:$4 sm:$0xff]  }
 0x15c   : > { %v948_v21 = vmul.f32 %v932_v5, %v11533_v9  ;;  %v1050_v22 = vpack.c.bf16 %v1040_v49, %v1039_v32  ;;  %1475 = vmatpush1.bf16.msra.mxu1 %v9914_v41 }
 0x15d   : > { %v930_v2 = vmul.f32 %v898_v35, %v898_v35  ;;  %v876_v42 = vadd.f32 %v860_v20, %v776_v19  ;;  %1476 = vmatprep.subr.bf16.mxu1 %v9915_v39  ;;  %v914_v62 = vmul.f32 0.5, %v898_v35 }
 0x15e   : > { %v964_v24 = vmul.f32 0.044715, %v948_v21  ;;  %9738 = vmatmul.mubr.msk.bf16.gmra.mxu0 %vm1092_vm0, %v1050_v22 }
 0x15f   : > { %v946_v27 = vmul.f32 %v930_v2, %v898_v35  ;;  %v899_v28 = vadd.f32 %v11414_v48, %v876_v42  ;;  %v9917_v48 = vld [vmem:[%s15765_s5 + $0x60] ss:$8 sps:$4 sm:$0xff]  }
 0x160   : > { %v980_v31 = vadd.f32 %v964_v24, %v11533_v9  ;;  %1477 = vmatpush1.bf16.msra.mxu1 %v9917_v48  ;;  %v11600_v9 = vld [vmem:[%s15764_s4] ss:$0 sm:$0xff] }
 0x161   : > { %v962_v37 = vmul.f32 0.044715, %v946_v27  ;;  %v931_v3 = vmul.f32 %v899_v28, %v899_v28  ;;  %1478 = vmatprep.subr.bf16.mxu1 %v9918_v33  ;;  %v915_v15 = vmul.f32 0.5, %v899_v28 }
 0x162   : > { %v996_v13 = vmul.f32 0.7978846, %v980_v31 }
 0x163   : > { %v978_v10 = vadd.f32 %v962_v37, %v898_v35  ;;  %v947_v40 = vmul.f32 %v931_v3, %v899_v28  ;;  %v10345_v46 = vpop.eup %10344 }
 0x164   : > { %10346 = vtanh.f32 %v996_v13  ;;  %1479 = vmatpush1.bf16.msra.mxu1 %v9920_v45  ;;  %v1025_v57 = vadd.f32 1.0, %v10345_v46 }
 0x165   : > { %v994_v43 = vmul.f32 0.7978846, %v978_v10  ;;  %v963_v52 = vmul.f32 0.044715, %v947_v40  ;;  %1480 = vmatprep.subr.bf16.mxu1 %v9921_v50 }
 0x166   : > { %v1041_v4 = vmul.f32 %v1025_v57, %v913_v12 }
 0x167   : > { %10348 = vtanh.f32 %v994_v43  ;;  %v979_v44 = vadd.f32 %v963_v52, %v899_v28 }
 0x168   : > { %1481 = vmatpush1.bf16.msra.mxu1 %v9923_v51 }
 0x169   : > { %v995_v47 = vmul.f32 0.7978846, %v979_v44  ;;  %1482 = vmatprep.subr.bf16.mxu1 %v9924_v53 }
 0x16b   : > { %10350 = vtanh.f32 %v995_v47 }
 0x16c   : > { %1483 = vmatpush1.bf16.msra.mxu1 %v9926_v55 }
 0x16d   : > { %1484 = vmatprep.subr.bf16.mxu1 %v9927_v58 }
 0x170   : > { %1485 = vmatpush1.bf16.msra.mxu1 %v9929_v18 }
 0x171   : > { %v10347_v60 = vpop.eup %10346  ;;  %1486 = vmatprep.subr.bf16.mxu1 %v9930_v59 }
 0x172   : > { %v1028_v7 = vadd.f32 1.0, %v10347_v60 }
 0x174   : > { %v10349_v61 = vpop.eup %10348  ;;  %1487 = vmatpush1.bf16.msra.mxu1 %v9932_v0  ;;  %v1044_v5 = vmul.f32 %v1028_v7, %v916_v16 }
 0x175   : > { %v1026_v63 = vadd.f32 1.0, %v10349_v61  ;;  %1488 = vmatprep.subr.bf16.mxu1 %v9933_v38 }
 0x177   : > { %v1042_v6 = vmul.f32 %v1026_v63, %v914_v62 }
 0x178   : > { %v10351_v8 = vpop.eup %10350  ;;  %1489 = vmatpush1.bf16.msra.mxu1 %v9935_v17 }
 0x179   : > { %v1051_v54 = vpack.c.bf16 %v1042_v6, %v1041_v4  ;;  %v1027_v14 = vadd.f32 1.0, %v10351_v8 }
 0x17b   : > { %9741 = vmatprep.mubr.msk.bf16.mxu0 %vm1092_vm0, %v1051_v54  ;;  %v1043_v34 = vmul.f32 %v1027_v14, %v915_v15 }
 0x17d   : > { %v1052_v32 = vpack.c.bf16 %v1044_v5, %v1043_v34 }
 0x17f   : > { %9742 = vmatmul.mubr.msk.bf16.gmra.mxu0 %vm1092_vm0, %v1052_v32 }
 0x1d8   : > { %v9731_v49 = vpop.f32.mrf.mxu0 }
 0x1d9   : > { %v1160_v56 = vadd.f32 %v9731_v49, %v11600_v9 }
 0x1da   : > { %v1151_v19 = vpop.f32.mrf.mxu0 }
 0x1db   : > { %v1232_v35 = vmul.f32 %v1160_v56, %v1160_v56  ;;  %v1152_v20 = vadd.f32 %v11600_v9, %v1151_v19  ;;  %v1216_v17 = vmul.f32 0.5, %v1160_v56 }
 0x1dc   : > { %v9732_v21 = vpop.f32.mrf.mxu0 }
 0x1dd   : > { %v1230_v22 = vmul.f32 %v1152_v20, %v1152_v20  ;;  %v1163_v2 = vadd.f32 %v9732_v21, %v11600_v9  ;;  %v1248_v24 = vmul.f32 %v1232_v35, %v1160_v56  ;;  %v1214_v55 = vmul.f32 0.5, %v1152_v20 }
 0x1de   : > { %v1154_v42 = vpop.f32.mrf.mxu0 }
 0x1df   : > { %v1246_v11 = vmul.f32 %v1230_v22, %v1152_v20  ;;  %v1233_v25 = vmul.f32 %v1163_v2, %v1163_v2  ;;  %v1155_v27 = vadd.f32 %v11600_v9, %v1154_v42  ;;  %v1264_v37 = vmul.f32 0.044715, %v1248_v24 }
 0x1e0   : > { %v1217_v15 = vmul.f32 0.5, %v1163_v2 }
 0x1e1   : > { %v1262_v28 = vmul.f32 0.044715, %v1246_v11  ;;  %v1249_v41 = vmul.f32 %v1233_v25, %v1163_v2  ;;  %v1231_v31 = vmul.f32 %v1155_v27, %v1155_v27  ;;  %v1280_v43 = vadd.f32 %v1264_v37, %v1160_v56 }
 0x1e2   : > { %v1215_v58 = vmul.f32 0.5, %v1155_v27 }
 0x1e3   : > { %v1278_v3 = vadd.f32 %v1262_v28, %v1152_v20  ;;  %v1265_v13 = vmul.f32 0.044715, %v1249_v41  ;;  %v1247_v39 = vmul.f32 %v1231_v31, %v1155_v27  ;;  %v1296_v45 = vmul.f32 0.7978846, %v1280_v43 }
 0x1e5   : > { %v1294_v10 = vmul.f32 0.7978846, %v1278_v3  ;;  %v1281_v40 = vadd.f32 %v1265_v13, %v1163_v2  ;;  %v1263_v48 = vmul.f32 0.044715, %v1247_v39 }
 0x1e7   : > { %10352 = vtanh.f32 %v1294_v10  ;;  %v1279_v52 = vadd.f32 %v1263_v48, %v1155_v27  ;;  %v1297_v33 = vmul.f32 0.7978846, %v1281_v40 }
 0x1e9   : > { %v1295_v44 = vmul.f32 0.7978846, %v1279_v52 }
 0x1eb   : > { %10354 = vtanh.f32 %v1295_v44 }
 0x1ec   : > { %10356 = vtanh.f32 %v1297_v33 }
 0x1ed   : > { %10358 = vtanh.f32 %v1296_v45 }
 0x1f4   : > { %v10353_v47 = vpop.eup %10352 }
 0x1f5   : > { %v1326_v50 = vadd.f32 1.0, %v10353_v47 }
 0x1f7   : > { %v1342_v57 = vmul.f32 %v1326_v50, %v1214_v55 }
 0x1f8   : > { %v10355_v51 = vpop.eup %10354 }
 0x1f9   : > { %v9735_v53 = vpop.f32.mrf.mxu0  ;;  %v1327_v46 = vadd.f32 1.0, %v10355_v51  ;;  %v10357_v18 = vpop.eup %10356 }
 0x1fa   : > { %v11607_v59 = vadd.f32 %v9735_v53, %v11600_v9  ;;  %v10359_v12 = vpop.eup %10358  ;;  %v1329_v6 = vadd.f32 1.0, %v10357_v18 }
 0x1fb   : > { %v1167_v60 = vpop.f32.mrf.mxu0  ;;  %v1343_v61 = vmul.f32 %v1327_v46, %v1215_v58  ;;  %v1328_v16 = vadd.f32 1.0, %v10359_v12 }
 0x1fc   : > { %v1236_v62 = vmul.f32 %v11607_v59, %v11607_v59  ;;  %v1168_v63 = vadd.f32 %v11600_v9, %v1167_v60  ;;  %v1345_v32 = vmul.f32 %v1329_v6, %v1217_v15 }
 0x1fd   : > { %v9736_v0 = vpop.f32.mrf.mxu0  ;;  %v1358_v4 = vpack.c.bf16 %v1343_v61, %v1342_v57  ;;  %v1344_v20 = vmul.f32 %v1328_v16, %v1216_v17  ;;  %v1220_v57 = vmul.f32 0.5, %v11607_v59 }
 0x1fe   : > { %v1234_v7 = vmul.f32 %v1168_v63, %v1168_v63  ;;  %v1179_v8 = vadd.f32 %v9736_v0, %v11600_v9  ;;  %v1252_v14 = vmul.f32 %v1236_v62, %v11607_v59  ;;  %v1218_v10 = vmul.f32 0.5, %v1168_v63 }
 0x1ff   : > { %v1170_v54 = vpop.f32.mrf.mxu0  ;;  %1507 = vmatmul.mubr.bf16.vlgmr.msra.gmra.mxu1 %v1358_v4  ;;  %v1359_v2 = vpack.c.bf16 %v1345_v32, %v1344_v20 }
 0x200   : > { %v1250_v38 = vmul.f32 %v1234_v7, %v1168_v63  ;;  %v1237_v34 = vmul.f32 %v1179_v8, %v1179_v8  ;;  %v1171_v5 = vadd.f32 %v11600_v9, %v1170_v54  ;;  %1516 = vmatprep.mubr.bf16.mxu1 %v11121_v1  ;;  %v1268_v21 = vmul.f32 0.044715, %v1252_v14 }
 0x201   : > { %v1221_v55 = vmul.f32 0.5, %v1179_v8 }
 0x202   : > { %v1266_v49 = vmul.f32 0.044715, %v1250_v38  ;;  %v1253_v19 = vmul.f32 %v1237_v34, %v1179_v8  ;;  %v1235_v35 = vmul.f32 %v1171_v5, %v1171_v5  ;;  %v1284_v28 = vadd.f32 %v1268_v21, %v11607_v59 }
 0x203   : > { %v1219_v40 = vmul.f32 0.5, %v1171_v5 }
 0x204   : > { %v1282_v22 = vadd.f32 %v1266_v49, %v1168_v63  ;;  %v1269_v42 = vmul.f32 0.044715, %v1253_v19  ;;  %v1251_v24 = vmul.f32 %v1235_v35, %v1171_v5  ;;  %v1300_v37 = vmul.f32 0.7978846, %v1284_v28 }
 0x206   : > { %v1298_v11 = vmul.f32 0.7978846, %v1282_v22  ;;  %v1285_v25 = vadd.f32 %v1269_v42, %v1179_v8  ;;  %v1267_v27 = vmul.f32 0.044715, %v1251_v24 }
 0x207   : > { %1517 = vmatmul.mubr.bf16.gmra.mxu1 %v1359_v2 }
 0x208   : > { %10360 = vtanh.f32 %v1298_v11  ;;  %v1283_v41 = vadd.f32 %v1267_v27, %v1171_v5  ;;  %1526 = vmatprep.mubr.bf16.mxu1 %v11121_v1  ;;  %v1301_v56 = vmul.f32 0.7978846, %v1285_v25 }
 0x20a   : > { %v1299_v31 = vmul.f32 0.7978846, %v1283_v41 }
 0x20c   : > { %10362 = vtanh.f32 %v1299_v31 }
 0x20d   : > { %10364 = vtanh.f32 %v1301_v56 }
 0x20e   : > { %10366 = vtanh.f32 %v1300_v37 }
 0x215   : > { %v10361_v3 = vpop.eup %10360 }
 0x216   : > { %v1330_v13 = vadd.f32 1.0, %v10361_v3 }
 0x218   : > { %v1346_v52 = vmul.f32 %v1330_v13, %v1218_v10 }
 0x219   : > { %v10363_v39 = vpop.eup %10362 }
 0x21a   : > { %v1331_v48 = vadd.f32 1.0, %v10363_v39  ;;  %v10365_v43 = vpop.eup %10364 }
 0x21b   : > { %v10367_v44 = vpop.eup %10366  ;;  %v1333_v50 = vadd.f32 1.0, %v10365_v43 }
 0x21c   : > { %v1347_v33 = vmul.f32 %v1331_v48, %v1219_v40  ;;  %v1332_v58 = vadd.f32 1.0, %v10367_v44 }
 0x21d   : > { %v1349_v61 = vmul.f32 %v1333_v50, %v1221_v55 }
 0x21e   : > { %v9739_v45 = vpop.f32.mrf.mxu0  ;;  %v1360_v47 = vpack.c.bf16 %v1347_v33, %v1346_v52  ;;  %v1348_v0 = vmul.f32 %v1332_v58, %v1220_v57 }
 0x21f   : > { %v11619_v51 = vadd.f32 %v9739_v45, %v11600_v9 }
 0x220   : > { %v1183_v53 = vpop.f32.mrf.mxu0  ;;  %1527 = vmatmul.mubr.bf16.gmra.mxu1 %v1360_v47  ;;  %v1361_v54 = vpack.c.bf16 %v1349_v61, %v1348_v0 }
 0x221   : > { %v1240_v46 = vmul.f32 %v11619_v51, %v11619_v51  ;;  %v1184_v18 = vadd.f32 %v11600_v9, %v1183_v53  ;;  %1536 = vmatprep.mubr.bf16.mxu1 %v11121_v1 }
 0x222   : > { %v9740_v60 = vpop.f32.mrf.mxu0 }
 0x223   : > { %v1238_v12 = vmul.f32 %v1184_v18, %v1184_v18  ;;  %v1195_v62 = vadd.f32 %v9740_v60, %v11600_v9  ;;  %v1256_v4 = vmul.f32 %v1240_v46, %v11619_v51  ;;  %v1222_v25 = vmul.f32 0.5, %v1184_v18 }
 0x224   : > { %v1186_v63 = vpop.f32.mrf.mxu0  ;;  %v1224_v46 = vmul.f32 0.5, %v11619_v51 }
 0x225   : > { %v1254_v6 = vmul.f32 %v1238_v12, %v1184_v18  ;;  %v1241_v7 = vmul.f32 %v1195_v62, %v1195_v62  ;;  %v1187_v8 = vadd.f32 %v11600_v9, %v1186_v63  ;;  %v1272_v38 = vmul.f32 0.044715, %v1256_v4 }
 0x226   : > { %v1225_v45 = vmul.f32 0.5, %v1195_v62 }
 0x227   : > { %v1270_v15 = vmul.f32 0.044715, %v1254_v6  ;;  %v1257_v16 = vmul.f32 %v1241_v7, %v1195_v62  ;;  %v1239_v14 = vmul.f32 %v1187_v8, %v1187_v8  ;;  %v1288_v19 = vadd.f32 %v1272_v38, %v11619_v51 }
 0x228   : > { %1537 = vmatmul.mubr.bf16.gmra.mxu1 %v1361_v54  ;;  %v1223_v27 = vmul.f32 0.5, %v1187_v8 }
 0x229   : > { %v1286_v34 = vadd.f32 %v1270_v15, %v1184_v18  ;;  %v1273_v59 = vmul.f32 0.044715, %v1257_v16  ;;  %v1255_v5 = vmul.f32 %v1239_v14, %v1187_v8  ;;  %1546 = vmatprep.mubr.bf16.mxu1 %v11121_v1  ;;  %v1304_v22 = vmul.f32 0.7978846, %v1288_v19 }
 0x22b   : > { %v1302_v17 = vmul.f32 0.7978846, %v1286_v34  ;;  %v1289_v32 = vadd.f32 %v1273_v59, %v1195_v62  ;;  %v1271_v49 = vmul.f32 0.044715, %v1255_v5 }
 0x22d   : > { %10368 = vtanh.f32 %v1302_v17  ;;  %v1287_v35 = vadd.f32 %v1271_v49, %v1187_v8  ;;  %v1305_v20 = vmul.f32 0.7978846, %v1289_v32 }
 0x22f   : > { %v1303_v21 = vmul.f32 0.7978846, %v1287_v35 }
 0x231   : > { %10370 = vtanh.f32 %v1303_v21 }
 0x232   : > { %10372 = vtanh.f32 %v1305_v20 }
 0x233   : > { %10374 = vtanh.f32 %v1304_v22 }
 0x23a   : > { %v10369_v42 = vpop.eup %10368 }
 0x23b   : > { %v1334_v24 = vadd.f32 1.0, %v10369_v42 }
 0x23d   : > { %v1350_v37 = vmul.f32 %v1334_v24, %v1222_v25 }
 0x23e   : > { %v10371_v2 = vpop.eup %10370 }
 0x23f   : > { %v9743_v11 = vpop.f32.mrf.mxu0  ;;  %v1335_v28 = vadd.f32 1.0, %v10371_v2  ;;  %v10373_v41 = vpop.eup %10372 }
 0x240   : > { %v1208_v56 = vadd.f32 %v9743_v11, %v11600_v9  ;;  %v10375_v13 = vpop.eup %10374  ;;  %v1337_v43 = vadd.f32 1.0, %v10373_v41  ;;  %v9941_v41 = vld [vmem:[#allocation4 + $0xec] ss:$16 sps:$4 sm:$0xff]  }
 0x241   : > { %v1199_v31 = vpop.f32.mrf.mxu0  ;;  %v1351_v3 = vmul.f32 %v1335_v28, %v1223_v27  ;;  %v1336_v47 = vadd.f32 1.0, %v10375_v13  ;;  %v9938_v28 = vld [vmem:[#allocation4 + $0xe4] ss:$16 sps:$4 sm:$0xff]   ;;  %2366 = vmatprep.subr.bf16.mxu1 %v9941_v41  ;;  %v9947_v13 = vld [vmem:[#allocation4 + $0xcc] ss:$16 sps:$4 sm:$0xff]  }
 0x242   : > { %v1244_v39 = vmul.f32 %v1208_v56, %v1208_v56  ;;  %v1200_v10 = vadd.f32 %v11600_v9, %v1199_v31  ;;  %v1353_v18 = vmul.f32 %v1337_v43, %v1225_v45  ;;  %v1228_v2 = vmul.f32 0.5, %v1208_v56  ;;  %v9936_v31 = vld [vmem:[#allocation4 + $0xe0] ss:$16 sps:$4 sm:$0xff]   ;;  %2325 = vmatprep.subr.bf16.mxu0 %v9938_v28  ;;  %v9956_v43 = vld [vmem:[#allocation4 + $0x84] ss:$16 sps:$4 sm:$0xff]  }
 0x243   : > { %v9744_v40 = vpop.f32.mrf.mxu0  ;;  %v1362_v48 = vpack.c.bf16 %v1351_v3, %v1350_v37  ;;  %v1352_v12 = vmul.f32 %v1336_v47, %v1224_v46  ;;  %v9939_v37 = vld [vmem:[#allocation4 + $0xe8] ss:$16 sps:$4 sm:$0xff]   ;;  %2326 = vmatpush1.bf16.msra.mxu0 %v9936_v31  ;;  %v9944_v3 = vld [vmem:[#allocation4 + $0xc4] ss:$16 sps:$4 sm:$0xff]   ;;  %v9965_v47 = vld [vmem:[#allocation4 + $0x6c] ss:$16 sps:$4 sm:$0xff]  }
 0x244   : > { %v1242_v52 = vmul.f32 %v1200_v10, %v1200_v10  ;;  %v1211_v33 = vadd.f32 %v9744_v40, %v11600_v9  ;;  %v1260_v50 = vmul.f32 %v1244_v39, %v1208_v56  ;;  %v1226_v5 = vmul.f32 0.5, %v1200_v10  ;;  %2367 = vmatpush1.bf16.msra.mxu1 %v9939_v37  ;;  %v9942_v39 = vld [vmem:[#allocation4 + $0xc0] ss:$16 sps:$4 sm:$0xff]   ;;  %2327 = vmatprep.subr.bf16.mxu0 %v9944_v3  ;;  %v9962_v45 = vld [vmem:[#allocation4 + $0x64] ss:$16 sps:$4 sm:$0xff]  }
 0x245   : > { %v1202_v44 = vpop.f32.mrf.mxu0  ;;  %1547 = vmatmul.mubr.bf16.gmra.mxu1 %v1362_v48  ;;  %v1363_v62 = vpack.c.bf16 %v1353_v18, %v1352_v12  ;;  %2368 = vmatprep.subr.bf16.mxu1 %v9947_v13  ;;  %v9948_v40 = vld [vmem:[#allocation4 + $0xa0] ss:$16 sps:$4 sm:$0xff]   ;;  %v9951_v48 = vld [vmem:[#allocation4 + $0xa8] ss:$16 sps:$4 sm:$0xff]   ;;  %v9971_v46 = vld [vmem:[#allocation4 + $0x4c] ss:$16 sps:$4 sm:$0xff]  }
 0x246   : > { %v1258_v53 = vmul.f32 %v1242_v52, %v1200_v10  ;;  %v1245_v55 = vmul.f32 %v1211_v33, %v1211_v33  ;;  %v1203_v58 = vadd.f32 %v11600_v9, %v1202_v44  ;;  %1556 = vmatprep.mubr.bf16.mxu1 %v11121_v1  ;;  %v1276_v63 = vmul.f32 0.044715, %v1260_v50  ;;  %v9959_v52 = vld [vmem:[#allocation4 + $0x8c] ss:$16 sps:$4 sm:$0xff]   ;;  %v9957_v44 = vld [vmem:[#allocation4 + $0x88] ss:$16 sps:$4 sm:$0xff]  }
 0x247   : > { %v1229_v42 = vmul.f32 0.5, %v1211_v33  ;;  %2328 = vmatpush1.bf16.msra.mxu0 %v9942_v39  ;;  %v9960_v50 = vld [vmem:[#allocation4 + $0x60] ss:$16 sps:$4 sm:$0xff]   ;;  %v9977_v12 = vld [vmem:[#allocation4 + $0x2c] ss:$16 sps:$4 sm:$0xff]  }
 0x248   : > { %v1274_v60 = vmul.f32 0.044715, %v1258_v53  ;;  %v1261_v57 = vmul.f32 %v1245_v55, %v1211_v33  ;;  %v1243_v61 = vmul.f32 %v1203_v58, %v1203_v58  ;;  %v1292_v15 = vadd.f32 %v1276_v63, %v1208_v56  ;;  %v9953_v56 = vld [vmem:[#allocation4 + $0xac] ss:$16 sps:$4 sm:$0xff]   ;;  %v9963_v53 = vld [vmem:[#allocation4 + $0x68] ss:$16 sps:$4 sm:$0xff]  }
 0x249   : > { %v1227_v17 = vmul.f32 0.5, %v1203_v58  ;;  %v1382_v55 = vld [vmem:[%s15766_s6] sm:$0x3]  ;;  %v9993_v37 = vld [vmem:[#allocation4 + $0x1c8] ss:$16 sps:$4 sm:$0xff]  }
 0x24a   : > { %v1290_v0 = vadd.f32 %v1274_v60, %v1200_v10  ;;  %v1277_v4 = vmul.f32 0.044715, %v1261_v57  ;;  %v1259_v6 = vmul.f32 %v1243_v61, %v1203_v58  ;;  %v1308_v14 = vmul.f32 0.7978846, %v1292_v15  ;;  %v9945_v10 = vld [vmem:[#allocation4 + $0xc8] ss:$16 sps:$4 sm:$0xff]  }
 0x24b   : > { %2369 = vmatpush1.bf16.msra.mxu1 %v9945_v10  ;;  %v9966_v18 = vld [vmem:[#allocation4 + $0x40] ss:$16 sps:$4 sm:$0xff]   ;;  %v9969_v60 = vld [vmem:[#allocation4 + $0x48] ss:$16 sps:$4 sm:$0xff]   ;;  %v11643_v57 = vrot.slane %v1382_v55, %v11387_v30  ;;  %v9974_v61 = vld [vmem:[#allocation4 + $0x24] ss:$16 sps:$4 sm:$0xff]  }
 0x24c   : > { %v1306_v7 = vmul.f32 0.7978846, %v1290_v0  ;;  %v1293_v8 = vadd.f32 %v1277_v4, %v1211_v33  ;;  %v1275_v54 = vmul.f32 0.044715, %v1259_v6  ;;  %2370 = vmatprep.subr.bf16.mxu1 %v9953_v56  ;;  %v9954_v33 = vld [vmem:[#allocation4 + $0x80] ss:$16 sps:$4 sm:$0xff]  }
 0x24d   : > { %1557 = vmatmul.mubr.bf16.gmra.mxu1 %v1363_v62  ;;  %v9972_v63 = vld [vmem:[#allocation4 + $0x20] ss:$16 sps:$4 sm:$0xff]   ;;  %v9975_v0 = vld [vmem:[#allocation4 + $0x28] ss:$16 sps:$4 sm:$0xff]   ;;  %v9998_v56 = vld [vmem:[#allocation4 + $0x1a4] ss:$16 sps:$4 sm:$0xff]  }
 0x24e   : > { %10376 = vtanh.f32 %v1306_v7  ;;  %v1291_v9 = vadd.f32 %v1275_v54, %v1203_v58  ;;  %1566 = vmatprep.mubr.bf16.mxu1 %v11121_v1  ;;  %v1309_v51 = vmul.f32 0.7978846, %v1293_v8  ;;  %v9968_v58 = vld [vmem:[#allocation4 + $0x44] ss:$16 sps:$4 sm:$0xff]   ;;  %v9983_v8 = vld [vmem:[#allocation4 + $0xc] ss:$16 sps:$4 sm:$0xff]  }
 0x24f   : > { %2371 = vmatpush1.bf16.msra.mxu1 %v9951_v48  ;;  %v9980_v7 = vld [vmem:[#allocation4 + $0x4] ss:$16 sps:$4 sm:$0xff]   ;;  %v9978_v15 = vld [vmem:[#allocation4] ss:$16 sps:$4 sm:$0xff]  }
 0x250   : > { %v1307_v16 = vmul.f32 0.7978846, %v1291_v9  ;;  %2372 = vmatprep.subr.bf16.mxu1 %v9959_v52  ;;  %v9981_v9 = vld [vmem:[#allocation4 + $0x8] ss:$16 sps:$4 sm:$0xff]   ;;  %v9990_v31 = vld [vmem:[#allocation4 + $0x1c0] ss:$16 sps:$4 sm:$0xff]  }
 0x252   : > { %10378 = vtanh.f32 %v1307_v16 }
 0x253   : > { %10380 = vtanh.f32 %v1309_v51  ;;  %2373 = vmatpush1.bf16.msra.mxu1 %v9957_v44 }
 0x254   : > { %10382 = vtanh.f32 %v1308_v14  ;;  %2374 = vmatprep.subr.bf16.mxu1 %v9965_v47  ;;  %v10001_v47 = vld [vmem:[#allocation4 + $0x1ac] ss:$16 sps:$4 sm:$0xff]  }
 0x257   : > { %2375 = vmatpush1.bf16.msra.mxu1 %v9963_v53 }
 0x258   : > { %2376 = vmatprep.subr.bf16.mxu1 %v9971_v46 }
 0x25b   : > { %v10377_v38 = vpop.eup %10376  ;;  %2377 = vmatpush1.bf16.msra.mxu1 %v9969_v60  ;;  %v10004_v60 = vld [vmem:[#allocation4 + $0x184] ss:$16 sps:$4 sm:$0xff]  }
 0x25c   : > { %v1338_v34 = vadd.f32 1.0, %v10377_v38  ;;  %2378 = vmatprep.subr.bf16.mxu1 %v9977_v12  ;;  %v10005_v12 = vld [vmem:[#allocation4 + $0x188] ss:$16 sps:$4 sm:$0xff]  }
 0x25e   : > { %v1354_v19 = vmul.f32 %v1338_v34, %v1226_v5  ;;  %v9986_v34 = vld [vmem:[#allocation4 + $0x1e4] ss:$16 sps:$4 sm:$0xff]  }
 0x25f   : > { %v10379_v59 = vpop.eup %10378  ;;  %2379 = vmatpush1.bf16.msra.mxu1 %v9975_v0 }
 0x260   : > { %v1339_v32 = vadd.f32 1.0, %v10379_v59  ;;  %v10381_v49 = vpop.eup %10380  ;;  %2380 = vmatprep.subr.bf16.mxu1 %v9983_v8  ;;  %v9989_v59 = vld [vmem:[#allocation4 + $0x1ec] ss:$16 sps:$4 sm:$0xff]   ;;  %v10008_v8 = vld [vmem:[#allocation4 + $0x160] ss:$16 sps:$4 sm:$0xff]  }
 0x261   : > { %v10383_v20 = vpop.eup %10382  ;;  %v1341_v22 = vadd.f32 1.0, %v10381_v49 }
 0x262   : > { %v1355_v35 = vmul.f32 %v1339_v32, %v1227_v17  ;;  %v1340_v24 = vadd.f32 1.0, %v10383_v20  ;;  %v9984_v32 = vld [vmem:[#allocation4 + $0x1e0] ss:$16 sps:$4 sm:$0xff]  }
 0x263   : > { %v1357_v11 = vmul.f32 %v1341_v22, %v1229_v42  ;;  %2381 = vmatpush1.bf16.msra.mxu1 %v9981_v9  ;;  %v11666_v22 = vrot.slane %v1382_v55, %v11384_v29 }
 0x264   : > { %v1364_v21 = vpack.c.bf16 %v1355_v35, %v1354_v19  ;;  %v1356_v25 = vmul.f32 %v1340_v24, %v1228_v2  ;;  %v9987_v19 = vld [vmem:[#allocation4 + $0x1e8] ss:$16 sps:$4 sm:$0xff]   ;;  %2382 = vmatprep.subr.bf16.mxu1 %v9989_v59  ;;  %v9992_v24 = vld [vmem:[#allocation4 + $0x1c4] ss:$16 sps:$4 sm:$0xff]   ;;  %v9995_v2 = vld [vmem:[#allocation4 + $0x1cc] ss:$16 sps:$4 sm:$0xff]  }
 0x265   : > { %v10016_v59 = vld [vmem:[#allocation4 + $0x144] ss:$16 sps:$4 sm:$0xff]  }
 0x266   : > { %1567 = vmatmul.mubr.bf16.gmra.mxu1 %v1364_v21  ;;  %v1365_v27 = vpack.c.bf16 %v1357_v11, %v1356_v25 }
 0x267   : > { %1576 = vmatprep.mubr.bf16.mxu1 %v11121_v1  ;;  %v9950_v1 = vld [vmem:[#allocation4 + $0xa4] ss:$16 sps:$4 sm:$0xff]   ;;  %2383 = vmatpush2.bf16.msra.mxu1 %v9987_v19 }
 0x268   : > { %2329 = vmatprep.subr.bf16.mxu0 %v9950_v1  ;;  %2384 = vmatprep.subr.bf16.mxu1 %v9995_v2 }
 0x269   : > { %2330 = vmatpush1.bf16.msra.mxu0 %v9948_v40 }
 0x26a   : > { %2331 = vmatprep.subr.bf16.mxu0 %v9956_v43  ;;  %v9996_v43 = vld [vmem:[#allocation4 + $0x1a0] ss:$16 sps:$4 sm:$0xff]  }
 0x26b   : > { %2385 = vmatpush2.bf16.msra.mxu1 %v9993_v37  ;;  %v10028_v37 = vld [vmem:[#allocation4 + $0x104] ss:$16 sps:$4 sm:$0xff]  }
 0x26c   : > { %2386 = vmatprep.subr.bf16.mxu1 %v10001_v47 }
 0x26d   : > { %2332 = vmatpush1.bf16.msra.mxu0 %v9954_v33 }
 0x26e   : > { %1577 = vmatmul.mubr.bf16.gmra.mxu1 %v1365_v27  ;;  %2333 = vmatprep.subr.bf16.mxu0 %v9962_v45  ;;  %v9999_v45 = vld [vmem:[#allocation4 + $0x1a8] ss:$16 sps:$4 sm:$0xff]  }
 0x26f   : > { %2387 = vmatpush2.bf16.msra.mxu1 %v9999_v45 }
 0x271   : > { %2334 = vmatpush1.bf16.msra.mxu0 %v9960_v50 }
 0x272   : > { %2335 = vmatprep.subr.bf16.mxu0 %v9968_v58 }
 0x275   : > { %2336 = vmatpush1.bf16.msra.mxu0 %v9966_v18  ;;  %v10002_v18 = vld [vmem:[#allocation4 + $0x180] ss:$16 sps:$4 sm:$0xff]  }
 0x276   : > { %2337 = vmatprep.subr.bf16.mxu0 %v9974_v61 }
 0x279   : > { %2338 = vmatpush1.bf16.msra.mxu0 %v9972_v63  ;;  %v10007_v63 = vld [vmem:[#allocation4 + $0x18c] ss:$16 sps:$4 sm:$0xff]  }
 0x27a   : > { %2339 = vmatprep.subr.bf16.mxu0 %v9980_v7  ;;  %2388 = vmatprep.subr.bf16.mxu1 %v10007_v63 }
 0x27b   : > { %2389 = vmatpush2.bf16.msra.mxu1 %v10005_v12 }
 0x27d   : > { %2340 = vmatpush1.bf16.msra.mxu0 %v9978_v15 }
 0x27e   : > { %2341 = vmatprep.subr.bf16.mxu0 %v9986_v34  ;;  %v10013_v34 = vld [vmem:[#allocation4 + $0x16c] ss:$16 sps:$4 sm:$0xff]  }
 0x27f   : > { %2390 = vmatprep.subr.bf16.mxu1 %v10013_v34 }
 0x281   : > { %2342 = vmatpush2.bf16.msra.mxu0 %v9984_v32 }
 0x282   : > { %2343 = vmatprep.subr.bf16.mxu0 %v9992_v24 }
 0x285   : > { %2344 = vmatpush2.bf16.msra.mxu0 %v9990_v31  ;;  %v10023_v31 = vld [vmem:[#allocation4 + $0x128] ss:$16 sps:$4 sm:$0xff]  }
 0x286   : > { %2345 = vmatprep.subr.bf16.mxu0 %v9998_v56 }
 0x289   : > { %2346 = vmatpush2.bf16.msra.mxu0 %v9996_v43 }
 0x28a   : > { %2347 = vmatprep.subr.bf16.mxu0 %v10004_v60 }
 0x28d   : > { %2348 = vmatpush2.bf16.msra.mxu0 %v10002_v18 }
 0x2bf   : > { %v1508_v4 = vpop.f32.mrf.mxu1 }
 0x2c0   : > { %v11646_v6 = vadd.f32 %v1508_v4, %v11643_v57 }
 0x2c1   : > { %v11648_v62 = vpop.f32.mrf.mxu1 }
 0x2c2   : > { %v1619_v54 = vmul.f32 %v11646_v6, %v11646_v6 }
 0x2c3   : > { %v1512_v51 = vpop.f32.mrf.mxu1 }
 0x2c4   : > { %v1651_v16 = vmul.f32 %v1619_v54, %v11646_v6  ;;  %v11654_v14 = vadd.f32 %v1512_v51, %v11643_v57  ;;  %v10010_v54 = vld [vmem:[#allocation4 + $0x164] ss:$16 sps:$4 sm:$0xff]   ;;  %v10011_v51 = vld [vmem:[#allocation4 + $0x168] ss:$16 sps:$4 sm:$0xff]  }
 0x2c5   : > { %v11656_v38 = vpop.f32.mrf.mxu1  ;;  %2349 = vmatprep.subr.bf16.mxu0 %v10010_v54  ;;  %2391 = vmatpush2.bf16.msra.mxu1 %v10011_v51 }
 0x2c6   : > { %v1683_v5 = vmul.f32 0.044715, %v1651_v16  ;;  %v1621_v17 = vmul.f32 %v11654_v14, %v11654_v14  ;;  %2350 = vmatpush2.bf16.msra.mxu0 %v10008_v8 }
 0x2c7   : > { %v1518_v49 = vpop.f32.mrf.mxu1  ;;  %2351 = vmatprep.subr.bf16.mxu0 %v10016_v59 }
 0x2c8   : > { %v1715_v35 = vadd.f32 %v1683_v5, %v11646_v6  ;;  %v1653_v20 = vmul.f32 %v1621_v17, %v11654_v14  ;;  %v11663_v21 = vadd.f32 %v1518_v49, %v11643_v57  ;;  %v10019_v17 = vld [vmem:[#allocation4 + $0x14c] ss:$16 sps:$4 sm:$0xff]   ;;  %v10014_v49 = vld [vmem:[#allocation4 + $0x140] ss:$16 sps:$4 sm:$0xff]  }
 0x2c9   : > { %v1520_v42 = vpop.f32.mrf.mxu1  ;;  %2392 = vmatprep.subr.bf16.mxu1 %v10019_v17 }
 0x2ca   : > { %v1747_v11 = vmul.f32 0.7978846, %v1715_v35  ;;  %v1685_v25 = vmul.f32 0.044715, %v1653_v20  ;;  %v1623_v27 = vmul.f32 %v11663_v21, %v11663_v21  ;;  %v11671_v28 = vadd.f32 %v1520_v42, %v11666_v22  ;;  %v10017_v35 = vld [vmem:[#allocation4 + $0x148] ss:$16 sps:$4 sm:$0xff]   ;;  %2352 = vmatpush2.bf16.msra.mxu0 %v10014_v49 }
 0x2cb   : > { %v1522_v41 = vpop.f32.mrf.mxu1  ;;  %v10022_v20 = vld [vmem:[#allocation4 + $0x124] ss:$16 sps:$4 sm:$0xff]   ;;  %v10025_v42 = vld [vmem:[#allocation4 + $0x12c] ss:$16 sps:$4 sm:$0xff]   ;;  %2393 = vmatpush2.bf16.msra.mxu1 %v10017_v35  ;;  %v1591_v60 = vmul.f32 0.5, %v11663_v21 }
 0x2cc   : > { %10384 = vtanh.f32 %v1747_v11  ;;  %v1717_v3 = vadd.f32 %v1685_v25, %v11654_v14  ;;  %v11675_v13 = vadd.f32 %v1522_v41, %v11643_v57  ;;  %v1655_v39 = vmul.f32 %v1623_v27, %v11663_v21  ;;  %v10020_v25 = vld [vmem:[#allocation4 + $0x120] ss:$16 sps:$4 sm:$0xff]   ;;  %2353 = vmatprep.subr.bf16.mxu0 %v10022_v20  ;;  %2394 = vmatprep.subr.bf16.mxu1 %v10025_v42 }
 0x2cd   : > { %v1624_v10 = vmul.f32 %v11671_v28, %v11671_v28  ;;  %v1524_v1 = vpop.f32.mrf.mxu1  ;;  %v1587_v11 = vmul.f32 0.5, %v11646_v6  ;;  %v1589_v27 = vmul.f32 0.5, %v11654_v14  ;;  %v10026_v6 = vld [vmem:[#allocation4 + $0x100] ss:$16 sps:$4 sm:$0xff]   ;;  %v10029_v14 = vld [vmem:[#allocation4 + $0x108] ss:$16 sps:$4 sm:$0xff]  }
 0x2ce   : > { %v1749_v40 = vmul.f32 0.7978846, %v1717_v3  ;;  %v1625_v48 = vmul.f32 %v11675_v13, %v11675_v13  ;;  %v1687_v52 = vmul.f32 0.044715, %v1655_v39  ;;  %v11684_v44 = vadd.f32 %v1524_v1, %v11666_v22  ;;  %v10031_v3 = vld [vmem:[#allocation4 + $0x10c] ss:$16 sps:$4 sm:$0xff]   ;;  %2354 = vmatpush2.bf16.msra.mxu0 %v10020_v25 }
 0x2cf   : > { %v1656_v33 = vmul.f32 %v1624_v10, %v11671_v28  ;;  %2395 = vmatpush2.bf16.msra.mxu1 %v10023_v31  ;;  %2355 = vmatprep.subr.bf16.mxu0 %v10028_v37 }
 0x2d0   : > { %10386 = vtanh.f32 %v1749_v40  ;;  %v1657_v50 = vmul.f32 %v1625_v48, %v11675_v13  ;;  %v1719_v53 = vadd.f32 %v1687_v52, %v11663_v21  ;;  %v1626_v46 = vmul.f32 %v11684_v44, %v11684_v44  ;;  %2396 = vmatprep.subr.bf16.mxu1 %v10031_v3 }
 0x2d1   : > { %v1688_v55 = vmul.f32 0.044715, %v1656_v33 }
 0x2d2   : > { %v1689_v58 = vmul.f32 0.044715, %v1657_v50  ;;  %v1658_v4 = vmul.f32 %v1626_v46, %v11684_v44  ;;  %v1751_v7 = vmul.f32 0.7978846, %v1719_v53  ;;  %2356 = vmatpush2.bf16.msra.mxu0 %v10026_v6  ;;  %v10034_v53 = vld [vmem:[#allocation7 + $0xe4] ss:$16 sps:$4 sm:$0xff]  }
 0x2d3   : > { %v1720_v61 = vadd.f32 %v1688_v55, %v11671_v28  ;;  %v10037_v55 = vld [vmem:[#allocation7 + $0xec] ss:$16 sps:$4 sm:$0xff]   ;;  %2397 = vmatpush2.bf16.msra.mxu1 %v10029_v14  ;;  %2807 = vmatprep.subr.bf16.mxu0 %v10034_v53 }
 0x2d4   : > { %v1721_v0 = vadd.f32 %v1689_v58, %v11675_v13  ;;  %v1690_v9 = vmul.f32 0.044715, %v1658_v4  ;;  %2920 = vmatprep.subr.bf16.mxu1 %v10037_v55 }
 0x2d5   : > { %v1752_v16 = vmul.f32 0.7978846, %v1720_v61 }
 0x2d6   : > { %v1753_v15 = vmul.f32 0.7978846, %v1721_v0  ;;  %v1722_v5 = vadd.f32 %v1690_v9, %v11684_v44  ;;  %v1593_v9 = vmul.f32 0.5, %v11675_v13 }
 0x2d8   : > { %10388 = vtanh.f32 %v1753_v15  ;;  %v1754_v19 = vmul.f32 0.7978846, %v1722_v5  ;;  %v1592_v15 = vmul.f32 0.5, %v11671_v28 }
 0x2d9   : > { %v10385_v32 = vpop.eup %10384  ;;  %10390 = vtanh.f32 %v1751_v7 }
 0x2da   : > { %10392 = vtanh.f32 %v1752_v16  ;;  %v1811_v24 = vadd.f32 1.0, %v10385_v32  ;;  %v1594_v16 = vmul.f32 0.5, %v11684_v44 }
 0x2db   : > { %10394 = vtanh.f32 %v1754_v19 }
 0x2dc   : > { %v11696_v39 = vmul.f32 %v1811_v24, %v1587_v11 }
 0x2dd   : > { %v10387_v2 = vpop.eup %10386 }
 0x2de   : > { %v1813_v41 = vadd.f32 1.0, %v10387_v2 }
 0x2e0   : > { %v11698_v10 = vmul.f32 %v1813_v41, %v1589_v27  ;;  %v1528_v1 = vpop.f32.mrf.mxu1 }
 0x2e1   : > { %v11701_v56 = vadd.f32 %v1528_v1, %v11643_v57 }
 0x2e2   : > { %v1530_v40 = vpop.f32.mrf.mxu1  ;;  %v11705_v48 = vpack.c.bf16 %v11698_v10, %v11696_v39 }
 0x2e3   : > { %v1627_v43 = vmul.f32 %v11701_v56, %v11701_v56  ;;  %v11710_v52 = vadd.f32 %v1530_v40, %v11666_v22 }
 0x2e4   : > { %v1532_v33 = vpop.f32.mrf.mxu1 }
 0x2e5   : > { %v10389_v45 = vpop.eup %10388  ;;  %v1659_v47 = vmul.f32 %v1627_v43, %v11701_v56  ;;  %v11714_v50 = vadd.f32 %v1532_v33, %v11643_v57  ;;  %v1628_v58 = vmul.f32 %v11710_v52, %v11710_v52 }
 0x2e6   : > { %v1534_v46 = vpop.f32.mrf.mxu1  ;;  %v10391_v18 = vpop.eup %10390  ;;  %v1817_v63 = vadd.f32 1.0, %v10389_v45 }
 0x2e7   : > { %v1691_v61 = vmul.f32 0.044715, %v1659_v47  ;;  %v10393_v12 = vpop.eup %10392  ;;  %v1660_v0 = vmul.f32 %v1628_v58, %v11710_v52  ;;  %v1629_v4 = vmul.f32 %v11714_v50, %v11714_v50  ;;  %v11723_v7 = vadd.f32 %v1534_v46, %v11666_v22 }
 0x2e8   : > { %v1538_v8 = vpop.f32.mrf.mxu1  ;;  %v10395_v54 = vpop.eup %10394  ;;  %v1815_v32 = vadd.f32 1.0, %v10391_v18  ;;  %v1816_v49 = vadd.f32 1.0, %v10393_v12  ;;  %v11735_v35 = vmul.f32 %v1817_v63, %v1593_v9 }
 0x2e9   : > { %v1723_v21 = vadd.f32 %v1691_v61, %v11701_v56  ;;  %v11729_v51 = vadd.f32 %v1538_v8, %v11643_v57  ;;  %v1818_v34 = vadd.f32 1.0, %v10395_v54  ;;  %v1692_v59 = vmul.f32 0.044715, %v1660_v0 }
 0x2ea   : > { %v1661_v5 = vmul.f32 %v1629_v4, %v11714_v50  ;;  %v1540_v17 = vpop.f32.mrf.mxu1  ;;  %v1630_v28 = vmul.f32 %v11723_v7, %v11723_v7  ;;  %v11751_v3 = vmul.f32 %v1815_v32, %v1591_v60  ;;  %v11753_v1 = vmul.f32 %v1816_v49, %v1592_v15 }
 0x2eb   : > { %v1755_v19 = vmul.f32 0.7978846, %v1723_v21  ;;  %v1724_v13 = vadd.f32 %v1692_v59, %v11710_v52  ;;  %v1631_v42 = vmul.f32 %v11729_v51, %v11729_v51  ;;  %v11740_v24 = vmul.f32 %v1818_v34, %v1594_v16 }
 0x2ec   : > { %v1693_v20 = vmul.f32 0.044715, %v1661_v5  ;;  %v1542_v44 = vpop.f32.mrf.mxu1  ;;  %v1662_v2 = vmul.f32 %v1630_v28, %v11723_v7  ;;  %v11744_v11 = vadd.f32 %v1540_v17, %v11666_v22  ;;  %v11770_v18 = vpack.c.bf16 %v11735_v35, %v11751_v3 }
 0x2ed   : > { %v11747_v25 = vadd.f32 %v1542_v44, %v11643_v57  ;;  %10396 = vtanh.f32 %v1755_v19  ;;  %v1756_v27 = vmul.f32 0.7978846, %v1724_v13  ;;  %v1663_v31 = vmul.f32 %v1631_v42, %v11729_v51 }
 0x2ee   : > { %v1725_v41 = vadd.f32 %v1693_v20, %v11714_v50  ;;  %v1544_v37 = vpop.f32.mrf.mxu1  ;;  %v1694_v6 = vmul.f32 0.044715, %v1662_v2  ;;  %v1632_v40 = vmul.f32 %v11744_v11, %v11744_v11  ;;  %v11764_v55 = vpack.c.bf16 %v11740_v24, %v11753_v1 }
 0x2ef   : > { %10398 = vtanh.f32 %v1756_v27  ;;  %v1695_v43 = vmul.f32 0.044715, %v1663_v31  ;;  %v1633_v33 = vmul.f32 %v11747_v25, %v11747_v25  ;;  %v1545_v53 = vadd.f32 %v1544_v37, %v11666_v22 }
 0x2f0   : > { %v1757_v14 = vmul.f32 0.7978846, %v1725_v41  ;;  %v1726_v45 = vadd.f32 %v1694_v6, %v11723_v7  ;;  %v1664_v47 = vmul.f32 %v1632_v40, %v11744_v11  ;;  %v1595_v49 = vmul.f32 0.5, %v11701_v56 }
 0x2f1   : > { %v1727_v58 = vadd.f32 %v1695_v43, %v11729_v51  ;;  %v1665_v46 = vmul.f32 %v1633_v33, %v11747_v25  ;;  %v1634_v12 = vmul.f32 %v1545_v53, %v1545_v53  ;;  %v1597_v19 = vmul.f32 0.5, %v11714_v50 }
 0x2f2   : > { %10400 = vtanh.f32 %v1757_v14  ;;  %v1758_v60 = vmul.f32 0.7978846, %v1726_v45  ;;  %v1696_v61 = vmul.f32 0.044715, %v1664_v47  ;;  %v1596_v2 = vmul.f32 0.5, %v11710_v52 }
 0x2f3   : > { %v1759_v63 = vmul.f32 0.7978846, %v1727_v58  ;;  %v1697_v0 = vmul.f32 0.044715, %v1665_v46  ;;  %v1666_v8 = vmul.f32 %v1634_v12, %v1545_v53  ;;  %v1598_v27 = vmul.f32 0.5, %v11723_v7 }
 0x2f4   : > { %10402 = vtanh.f32 %v1758_v60  ;;  %v1728_v4 = vadd.f32 %v1696_v61, %v11744_v11  ;;  %v1601_v45 = vmul.f32 0.5, %v11747_v25  ;;  %v1599_v46 = vmul.f32 0.5, %v11729_v51 }
 0x2f5   : > { %v1729_v54 = vadd.f32 %v1697_v0, %v11747_v25  ;;  %10404 = vtanh.f32 %v1759_v63  ;;  %v1698_v9 = vmul.f32 0.044715, %v1666_v8  ;;  %v1602_v0 = vmul.f32 0.5, %v1545_v53 }
 0x2f6   : > { %v1760_v15 = vmul.f32 0.7978846, %v1728_v4 }
 0x2f7   : > { %v1761_v21 = vmul.f32 0.7978846, %v1729_v54  ;;  %v1730_v16 = vadd.f32 %v1698_v9, %v1545_v53 }
 0x2f9   : > { %10406 = vtanh.f32 %v1761_v21  ;;  %v1762_v59 = vmul.f32 0.7978846, %v1730_v16  ;;  %v1600_v21 = vmul.f32 0.5, %v11744_v11 }
 0x2fa   : > { %v10397_v34 = vpop.eup %10396  ;;  %10408 = vtanh.f32 %v1760_v15 }
 0x2fb   : > { %10410 = vtanh.f32 %v1762_v59  ;;  %v1819_v17 = vadd.f32 1.0, %v10397_v34 }
 0x2fc   : > { %v10399_v5 = vpop.eup %10398 }
 0x2fd   : > { %v1820_v13 = vadd.f32 1.0, %v10399_v5  ;;  %v11776_v42 = vmul.f32 %v1819_v17, %v1595_v49 }
 0x2ff   : > { %v10401_v32 = vpop.eup %10400  ;;  %v11786_v56 = vmul.f32 %v1820_v13, %v1596_v2 }
 0x300   : > { %v1821_v28 = vadd.f32 1.0, %v10401_v32 }
 0x301   : > { %v10403_v20 = vpop.eup %10402 }
 0x302   : > { %v11778_v44 = vmul.f32 %v1821_v28, %v1597_v19  ;;  %v1822_v41 = vadd.f32 1.0, %v10403_v20  ;;  %v10405_v31 = vpop.eup %10404  ;;  %v11834_v28 = vadd.f32 %v11648_v62, %v11666_v22 }
 0x303   : > { %v1823_v43 = vadd.f32 1.0, %v10405_v31 }
 0x304   : > { %v11784_v37 = vpack.c.bf16 %v11778_v44, %v11776_v42  ;;  %v11788_v50 = vmul.f32 %v1822_v41, %v1598_v27  ;;  %v11842_v41 = vadd.f32 %v11656_v38, %v11666_v22 }
 0x305   : > { %v1548_v6 = vpop.f32.mrf.mxu1  ;;  %v11810_v25 = vmul.f32 %v1823_v43, %v1599_v46 }
 0x306   : > { %v11791_v40 = vadd.f32 %v1548_v6, %v11643_v57  ;;  %v10407_v14 = vpop.eup %10406  ;;  %v11795_v52 = vpack.c.bf16 %v11788_v50, %v11786_v56 }
 0x307   : > { %v1550_v33 = vpop.f32.mrf.mxu1  ;;  %v10409_v7 = vpop.eup %10408  ;;  %v1825_v47 = vadd.f32 1.0, %v10407_v14 }
 0x308   : > { %v1635_v58 = vmul.f32 %v11791_v40, %v11791_v40  ;;  %v11802_v60 = vadd.f32 %v1550_v33, %v11666_v22  ;;  %v10411_v12 = vpop.eup %10410  ;;  %v1824_v54 = vadd.f32 1.0, %v10409_v7 }
 0x309   : > { %v1552_v61 = vpop.f32.mrf.mxu1  ;;  %v11804_v63 = vmul.f32 %v1825_v47, %v1601_v45  ;;  %v1826_v15 = vadd.f32 1.0, %v10411_v12 }
 0x30a   : > { %v1667_v4 = vmul.f32 %v1635_v58, %v11791_v40  ;;  %v11808_v8 = vadd.f32 %v1552_v61, %v11643_v57  ;;  %v1636_v51 = vmul.f32 %v11802_v60, %v11802_v60  ;;  %v11836_v13 = vmul.f32 %v1824_v54, %v1600_v21 }
 0x30b   : > { %v1554_v9 = vpop.f32.mrf.mxu1  ;;  %v11817_v53 = vmul.f32 %v1826_v15, %v1602_v0  ;;  %v11825_v32 = vpack.c.bf16 %v11804_v63, %v11810_v25 }
 0x30c   : > { %v1699_v16 = vmul.f32 0.044715, %v1667_v4  ;;  %v1637_v34 = vmul.f32 %v11808_v8, %v11808_v8  ;;  %v1668_v59 = vmul.f32 %v1636_v51, %v11802_v60  ;;  %v11821_v5 = vadd.f32 %v1554_v9, %v11666_v22 }
 0x30d   : > { %v1558_v17 = vpop.f32.mrf.mxu1  ;;  %v11853_v45 = vpack.c.bf16 %v11817_v53, %v11836_v13  ;;  %v1620_v51 = vmul.f32 %v11834_v28, %v11834_v28 }
 0x30e   : > { %v1731_v49 = vadd.f32 %v1699_v16, %v11791_v40  ;;  %v1669_v11 = vmul.f32 %v1637_v34, %v11808_v8  ;;  %v11830_v19 = vadd.f32 %v1558_v17, %v11643_v57  ;;  %v1700_v20 = vmul.f32 0.044715, %v1668_v59 }
 0x30f   : > { %v1638_v2 = vmul.f32 %v11821_v5, %v11821_v5  ;;  %v1560_v27 = vpop.f32.mrf.mxu1  ;;  %v1622_v34 = vmul.f32 %v11842_v41, %v11842_v41 }
 0x310   : > { %v1763_v31 = vmul.f32 0.7978846, %v1731_v49  ;;  %v1701_v6 = vmul.f32 0.044715, %v1669_v11  ;;  %v1639_v14 = vmul.f32 %v11830_v19, %v11830_v19  ;;  %v1732_v43 = vadd.f32 %v1700_v20, %v11802_v60 }
 0x311   : > { %v1670_v62 = vmul.f32 %v1638_v2, %v11821_v5  ;;  %v11849_v33 = vadd.f32 %v1560_v27, %v11666_v22  ;;  %v1562_v7 = vpop.f32.mrf.mxu1 }
 0x312   : > { %10412 = vtanh.f32 %v1763_v31  ;;  %v1733_v38 = vadd.f32 %v1701_v6, %v11808_v8  ;;  %v1671_v47 = vmul.f32 %v1639_v14, %v11830_v19  ;;  %v11858_v58 = vadd.f32 %v1562_v7, %v11643_v57 }
 0x313   : > { %v1764_v46 = vmul.f32 0.7978846, %v1732_v43  ;;  %v1702_v61 = vmul.f32 0.044715, %v1670_v62  ;;  %v1640_v12 = vmul.f32 %v11849_v33, %v11849_v33  ;;  %v1564_v0 = vpop.f32.mrf.mxu1  ;;  %v1652_v14 = vmul.f32 %v1620_v51, %v11834_v28 }
 0x314   : > { %v1765_v4 = vmul.f32 0.7978846, %v1733_v38  ;;  %v1703_v54 = vmul.f32 0.044715, %v1671_v47  ;;  %v1641_v15 = vmul.f32 %v11858_v58, %v11858_v58  ;;  %v11869_v16 = vadd.f32 %v1564_v0, %v11666_v22 }
 0x315   : > { %v1734_v9 = vadd.f32 %v1702_v61, %v11821_v5  ;;  %v1672_v21 = vmul.f32 %v1640_v12, %v11849_v33  ;;  %v1654_v43 = vmul.f32 %v1622_v34, %v11842_v41  ;;  %v1684_v61 = vmul.f32 0.044715, %v1652_v14 }
 0x316   : > { %10414 = vtanh.f32 %v1765_v4  ;;  %v1735_v59 = vadd.f32 %v1703_v54, %v11830_v19  ;;  %v1673_v17 = vmul.f32 %v1641_v15, %v11858_v58  ;;  %v1642_v20 = vmul.f32 %v11869_v16, %v11869_v16 }
 0x317   : > { %10416 = vtanh.f32 %v1764_v46  ;;  %v1766_v49 = vmul.f32 0.7978846, %v1734_v9  ;;  %v1704_v11 = vmul.f32 0.044715, %v1672_v21  ;;  %v1686_v12 = vmul.f32 0.044715, %v1654_v43 }
 0x318   : > { %v1767_v2 = vmul.f32 0.7978846, %v1735_v59  ;;  %v1705_v27 = vmul.f32 0.044715, %v1673_v17  ;;  %v1674_v6 = vmul.f32 %v1642_v20, %v11869_v16  ;;  %v1716_v54 = vadd.f32 %v1684_v61, %v11834_v28 }
 0x319   : > { %10418 = vtanh.f32 %v1766_v49  ;;  %v1736_v31 = vadd.f32 %v1704_v11, %v11849_v33  ;;  %v1718_v15 = vadd.f32 %v1686_v12, %v11842_v41  ;;  %v1603_v34 = vmul.f32 0.5, %v11791_v40 }
 0x31a   : > { %v1737_v62 = vadd.f32 %v1705_v27, %v11858_v58  ;;  %v1706_v38 = vmul.f32 0.044715, %v1674_v6  ;;  %10420 = vtanh.f32 %v1767_v2  ;;  %v1605_v59 = vmul.f32 0.5, %v11808_v8 }
 0x31b   : > { %v1768_v7 = vmul.f32 0.7978846, %v1736_v31  ;;  %v1748_v11 = vmul.f32 0.7978846, %v1716_v54  ;;  %v1750_v20 = vmul.f32 0.7978846, %v1718_v15 }
 0x31c   : > { %v1769_v47 = vmul.f32 0.7978846, %v1737_v62  ;;  %v1738_v46 = vadd.f32 %v1706_v38, %v11869_v16  ;;  %v1606_v14 = vmul.f32 0.5, %v11821_v5  ;;  %v1604_v38 = vmul.f32 0.5, %v11802_v60 }
 0x31e   : > { %10422 = vtanh.f32 %v1769_v47  ;;  %v1770_v4 = vmul.f32 0.7978846, %v1738_v46 }
 0x31f   : > { %v10413_v0 = vpop.eup %10412  ;;  %10424 = vtanh.f32 %v1768_v7 }
 0x320   : > { %10426 = vtanh.f32 %v1770_v4  ;;  %v1827_v51 = vadd.f32 1.0, %v10413_v0  ;;  %v1609_v4 = vmul.f32 0.5, %v11858_v58 }
 0x321   : > { %10428 = vtanh.f32 %v1748_v11 }
 0x322   : > { %v11887_v2 = vmul.f32 %v1827_v51, %v1603_v34  ;;  %10430 = vtanh.f32 %v1750_v20  ;;  %v1608_v20 = vmul.f32 0.5, %v11849_v33 }
 0x323   : > { %v10415_v9 = vpop.eup %10414 }
 0x324   : > { %v10417_v21 = vpop.eup %10416  ;;  %v1829_v17 = vadd.f32 1.0, %v10415_v9 }
 0x325   : > { %v1828_v6 = vadd.f32 1.0, %v10417_v21 }
 0x326   : > { %v10419_v49 = vpop.eup %10418  ;;  %v11889_v27 = vmul.f32 %v1829_v17, %v1605_v59  ;;  %v1568_v31 = vpop.f32.mrf.mxu1  ;;  %v1607_v59 = vmul.f32 0.5, %v11830_v19 }
 0x327   : > { %v1830_v43 = vadd.f32 1.0, %v10419_v49  ;;  %v11893_v62 = vadd.f32 %v1568_v31, %v11643_v57  ;;  %v10421_v8 = vpop.eup %10420  ;;  %v11907_v0 = vmul.f32 %v1828_v6, %v1604_v38 }
 0x328   : > { %v1570_v7 = vpop.f32.mrf.mxu1  ;;  %v11897_v40 = vpack.c.bf16 %v11889_v27, %v11887_v2  ;;  %v1831_v60 = vadd.f32 1.0, %v10421_v8 }
 0x329   : > { %v11900_v47 = vmul.f32 %v1830_v43, %v1606_v14  ;;  %v1643_v46 = vmul.f32 %v11893_v62, %v11893_v62  ;;  %v11905_v61 = vadd.f32 %v1570_v7, %v11666_v22  ;;  %v1610_v7 = vmul.f32 0.5, %v11869_v16 }
 0x32a   : > { %v1572_v5 = vpop.f32.mrf.mxu1 }
 0x32b   : > { %v10423_v12 = vpop.eup %10422  ;;  %v1675_v54 = vmul.f32 %v1643_v46, %v11893_v62  ;;  %v1644_v9 = vmul.f32 %v11905_v61, %v11905_v61  ;;  %v11914_v21 = vadd.f32 %v1572_v5, %v11643_v57  ;;  %v11922_v58 = vpack.c.bf16 %v11900_v47, %v11907_v0 }
 0x32c   : > { %v10425_v15 = vpop.eup %10424  ;;  %v1833_v51 = vadd.f32 1.0, %v10423_v12  ;;  %v1574_v34 = vpop.f32.mrf.mxu1  ;;  %v11932_v46 = vmul.f32 %v1831_v60, %v1607_v59 }
 0x32d   : > { %v1707_v17 = vmul.f32 0.044715, %v1675_v54  ;;  %v11918_v49 = vadd.f32 %v1574_v34, %v11666_v22  ;;  %v10427_v11 = vpop.eup %10426  ;;  %v1676_v6 = vmul.f32 %v1644_v9, %v11905_v61  ;;  %v1645_v14 = vmul.f32 %v11914_v21, %v11914_v21 }
 0x32e   : > { %v11925_v31 = vmul.f32 %v1833_v51, %v1609_v4  ;;  %v1578_v43 = vpop.f32.mrf.mxu1  ;;  %v1832_v19 = vadd.f32 1.0, %v10425_v15  ;;  %v1834_v8 = vadd.f32 1.0, %v10427_v11 }
 0x32f   : > { %v1739_v38 = vadd.f32 %v1707_v17, %v11893_v62  ;;  %v1708_v5 = vmul.f32 0.044715, %v1676_v6  ;;  %v1677_v12 = vmul.f32 %v1645_v14, %v11914_v21  ;;  %v1646_v33 = vmul.f32 %v11918_v49, %v11918_v49 }
 0x330   : > { %v1580_v4 = vpop.f32.mrf.mxu1  ;;  %v11937_v54 = vmul.f32 %v1834_v8, %v1610_v7  ;;  %v11940_v9 = vadd.f32 %v1578_v43, %v11643_v57  ;;  %v11949_v17 = vpack.c.bf16 %v11925_v31, %v11932_v46  ;;  %v11951_v11 = vmul.f32 %v1832_v19, %v1608_v20 }
 0x331   : > { %v1771_v51 = vmul.f32 0.7978846, %v1739_v38  ;;  %v11943_v16 = vadd.f32 %v1580_v4, %v11666_v22  ;;  %v1740_v15 = vadd.f32 %v1708_v5, %v11905_v61  ;;  %v1709_v60 = vmul.f32 0.044715, %v1677_v12 }
 0x332   : > { %v1678_v34 = vmul.f32 %v1646_v33, %v11918_v49  ;;  %v1582_v59 = vpop.f32.mrf.mxu1  ;;  %v1647_v6 = vmul.f32 %v11940_v9, %v11940_v9  ;;  %v11968_v4 = vpack.c.bf16 %v11937_v54, %v11951_v11 }
 0x333   : > { %10432 = vtanh.f32 %v1771_v51  ;;  %v1772_v14 = vmul.f32 0.7978846, %v1740_v15  ;;  %v1741_v43 = vadd.f32 %v1709_v60, %v11914_v21  ;;  %v1648_v5 = vmul.f32 %v11943_v16, %v11943_v16  ;;  %v10429_v51 = vpop.eup %10428 }
 0x334   : > { %v1710_v7 = vmul.f32 0.044715, %v1678_v34  ;;  %v1584_v8 = vpop.f32.mrf.mxu1  ;;  %v1679_v38 = vmul.f32 %v1647_v6, %v11940_v9  ;;  %v11960_v12 = vadd.f32 %v1582_v59, %v11643_v57  ;;  %v10431_v57 = vpop.eup %10430  ;;  %v1812_v36 = vadd.f32 1.0, %v10429_v51 }
 0x335   : > { %v11963_v20 = vadd.f32 %v1584_v8, %v11666_v22  ;;  %10434 = vtanh.f32 %v1772_v14  ;;  %v1773_v19 = vmul.f32 0.7978846, %v1741_v43  ;;  %v1680_v60 = vmul.f32 %v1648_v5, %v11943_v16 }
 0x336   : > { %v1742_v33 = vadd.f32 %v1710_v7, %v11918_v49  ;;  %v1711_v15 = vmul.f32 0.044715, %v1679_v38  ;;  %v1649_v34 = vmul.f32 %v11960_v12, %v11960_v12  ;;  %v1611_v51 = vmul.f32 0.5, %v11893_v62 }
 0x337   : > { %10436 = vtanh.f32 %v1773_v19  ;;  %v1650_v22 = vmul.f32 %v11963_v20, %v11963_v20  ;;  %v1712_v14 = vmul.f32 0.044715, %v1680_v60 }
 0x338   : > { %v1774_v59 = vmul.f32 0.7978846, %v1742_v33  ;;  %v1743_v6 = vadd.f32 %v1711_v15, %v11940_v9  ;;  %v1681_v43 = vmul.f32 %v1649_v34, %v11960_v12  ;;  %v1588_v34 = vmul.f32 0.5, %v11834_v28 }
 0x339   : > { %v1682_v7 = vmul.f32 %v1650_v22, %v11963_v20  ;;  %v1744_v38 = vadd.f32 %v1712_v14, %v11943_v16  ;;  %v1590_v14 = vmul.f32 0.5, %v11842_v41  ;;  %v1876_v28 = vmax.f32 %v11698_v10, %v11735_v35 }
 0x33a   : > { %10438 = vtanh.f32 %v1774_v59  ;;  %v1775_v8 = vmul.f32 0.7978846, %v1743_v6  ;;  %v1713_v5 = vmul.f32 0.044715, %v1681_v43  ;;  %v1814_v59 = vadd.f32 1.0, %v10431_v57 }
 0x33b   : > { %v1714_v23 = vmul.f32 0.044715, %v1682_v7  ;;  %v1776_v29 = vmul.f32 0.7978846, %v1744_v38  ;;  %v11982_v6 = vmul.f32 %v1812_v36, %v1588_v34  ;;  %v1613_v36 = vmul.f32 0.5, %v11914_v21 }
 0x33c   : > { %10440 = vtanh.f32 %v1775_v8  ;;  %v1745_v19 = vadd.f32 %v1713_v5, %v11960_v12  ;;  %v11985_v8 = vmul.f32 %v1814_v59, %v1590_v14  ;;  %v1614_v10 = vmul.f32 0.5, %v11918_v49 }
 0x33d   : > { %v1746_v33 = vadd.f32 %v1714_v23, %v11963_v20  ;;  %10442 = vtanh.f32 %v1776_v29  ;;  %v1875_v23 = vmax.f32 %v11696_v39, %v11751_v3  ;;  %v1896_v29 = vmax.f32 %v11982_v6, %v11753_v1 }
 0x33e   : > { %v1777_v15 = vmul.f32 0.7978846, %v1745_v19  ;;  %v1612_v3 = vmul.f32 0.5, %v11905_v61  ;;  %v1878_v62 = vmax.f32 %v1876_v28, %v11778_v44  ;;  %v1617_v28 = vmul.f32 0.5, %v11960_v12 }
 0x33f   : > { %v1778_v60 = vmul.f32 0.7978846, %v1746_v33  ;;  %v1877_v5 = vmax.f32 %v1875_v23, %v11776_v42  ;;  %v1898_v39 = vmax.f32 %v1896_v29, %v11786_v56 }
 0x340   : > { %v10433_v30 = vpop.eup %10432  ;;  %10444 = vtanh.f32 %v1777_v15  ;;  %v1880_v56 = vmax.f32 %v1878_v62, %v11804_v63 }
 0x341   : > { %10446 = vtanh.f32 %v1778_v60  ;;  %v1835_v43 = vadd.f32 1.0, %v10433_v30  ;;  %v1897_v30 = vmax.f32 %v11985_v8, %v11740_v24  ;;  %v1879_v33 = vmax.f32 %v1877_v5, %v11810_v25 }
 0x342   : > { %v10435_v22 = vpop.eup %10434  ;;  %v1900_v24 = vmax.f32 %v1898_v39, %v11836_v13  ;;  %v1882_v25 = vmax.f32 %v1880_v56, %v11889_v27  ;;  %v1615_v13 = vmul.f32 0.5, %v11940_v9 }
 0x343   : > { %v1836_v57 = vadd.f32 1.0, %v10435_v22  ;;  %v1867_v1 = vmul.f32 %v1835_v43, %v1611_v51  ;;  %v1899_v21 = vmax.f32 %v1897_v30, %v11788_v50  ;;  %v1881_v22 = vmax.f32 %v1879_v33, %v11887_v2 }
 0x344   : > { %v10437_v7 = vpop.eup %10436  ;;  %v1902_v44 = vmax.f32 %v1900_v24, %v11907_v0  ;;  %v1884_v2 = vmax.f32 %v1882_v25, %v11925_v31  ;;  %v10040_v25 = vld [vmem:[#allocation7 + $0xc4] ss:$16 sps:$4 sm:$0xff]  }
 0x345   : > { %v1837_v38 = vadd.f32 1.0, %v10437_v7  ;;  %v1868_v60 = vmul.f32 %v1836_v57, %v1612_v3  ;;  %v1901_v49 = vmax.f32 %v1899_v21, %v11817_v53  ;;  %v1883_v63 = vmax.f32 %v1881_v22, %v11932_v46  ;;  %v10035_v22 = vld [vmem:[#allocation7 + $0xe8] ss:$16 sps:$4 sm:$0xff]  }
 0x346   : > { %v1904_v23 = vmax.f32 %v1902_v44, %v11951_v11  ;;  %v1616_v53 = vmul.f32 0.5, %v11943_v16  ;;  %v1618_v57 = vmul.f32 0.5, %v11963_v20 }
 0x347   : > { %v10439_v41 = vpop.eup %10438  ;;  %v1869_v19 = vmul.f32 %v1837_v38, %v1613_v36  ;;  %v1903_v7 = vmax.f32 %v1901_v49, %v11900_v47  ;;  %v1885_v47 = vmax.f32 %v1883_v63, %v1867_v1  ;;  %v10032_v49 = vld [vmem:[#allocation7 + $0xe0] ss:$16 sps:$4 sm:$0xff]   ;;  %v10046_v63 = vld [vmem:[#allocation7 + $0xa4] ss:$16 sps:$4 sm:$0xff]  }
 0x348   : > { %v1838_v35 = vadd.f32 1.0, %v10439_v41  ;;  %v1906_v41 = vmax.f32 %v1904_v23, %v1868_v60  ;;  %v10049_v23 = vld [vmem:[#allocation7 + $0xac] ss:$16 sps:$4 sm:$0xff]  }
 0x349   : > { %v10441_v15 = vpop.eup %10440  ;;  %v12005_v34 = vpack.c.bf16 %v1869_v19, %v1867_v1  ;;  %v1905_v27 = vmax.f32 %v1903_v7, %v11937_v54  ;;  %v1886_v38 = vmax.f32 %v1884_v2, %v1869_v19  ;;  %v10041_v7 = vld [vmem:[#allocation7 + $0xc8] ss:$16 sps:$4 sm:$0xff]   ;;  %v10052_v2 = vld [vmem:[#allocation7 + $0x84] ss:$16 sps:$4 sm:$0xff]  }
 0x34a   : > { %v1870_v42 = vmul.f32 %v1838_v35, %v1614_v10  ;;  %v1839_v61 = vadd.f32 1.0, %v10441_v15  ;;  %v10443_v59 = vpop.eup %10442 }
 0x34b   : > { %v1840_v14 = vadd.f32 1.0, %v10443_v59 }
 0x34c   : > { %v12011_v50 = vpack.c.bf16 %v1870_v42, %v1868_v60  ;;  %v1871_v0 = vmul.f32 %v1839_v61, %v1615_v13  ;;  %v1907_v11 = vmax.f32 %v1905_v27, %v1870_v42  ;;  %v10043_v13 = vld [vmem:[#allocation7 + $0xcc] ss:$16 sps:$4 sm:$0xff]   ;;  %v10056_v27 = vld [vmem:[#allocation7 + $0x60] ss:$16 sps:$4 sm:$0xff]  }
 0x34d   : > { %v10445_v43 = vpop.eup %10444  ;;  %v1872_v9 = vmul.f32 %v1840_v14, %v1616_v53  ;;  %v2408_v14 = vpack.c.bf16 %v11985_v8, %v11982_v6  ;;  %v10044_v53 = vld [vmem:[#allocation7 + $0xa0] ss:$16 sps:$4 sm:$0xff]   ;;  %v10053_v8 = vld [vmem:[#allocation7 + $0x88] ss:$16 sps:$4 sm:$0xff]  }
 0x34e   : > { %v10447_v29 = vpop.eup %10446  ;;  %v1841_v51 = vadd.f32 1.0, %v10445_v43  ;;  %v1887_v16 = vmax.f32 %v1885_v47, %v1871_v0  ;;  %v10038_v43 = vld [vmem:[#allocation7 + $0xc0] ss:$16 sps:$4 sm:$0xff]  }
 0x34f   : > { %v1842_v36 = vadd.f32 1.0, %v10447_v29  ;;  %v1908_v31 = vmax.f32 %v1906_v41, %v1872_v9  ;;  %v10047_v29 = vld [vmem:[#allocation7 + $0xa8] ss:$16 sps:$4 sm:$0xff]   ;;  %v10050_v6 = vld [vmem:[#allocation7 + $0x80] ss:$16 sps:$4 sm:$0xff]  }
 0x350   : > { %v1873_v46 = vmul.f32 %v1841_v51, %v1617_v28  ;;  %v10058_v28 = vld [vmem:[#allocation7 + $0x64] ss:$16 sps:$4 sm:$0xff]   ;;  %v10061_v51 = vld [vmem:[#allocation7 + $0x6c] ss:$16 sps:$4 sm:$0xff]   ;;  %v10062_v47 = vld [vmem:[#allocation7 + $0x40] ss:$16 sps:$4 sm:$0xff]  }
 0x351   : > { %v1874_v30 = vmul.f32 %v1842_v36, %v1618_v57  ;;  %v10064_v57 = vld [vmem:[#allocation7 + $0x44] ss:$16 sps:$4 sm:$0xff]   ;;  %v10067_v36 = vld [vmem:[#allocation7 + $0x4c] ss:$16 sps:$4 sm:$0xff]  }
 0x352   : > { %v1888_v5 = vmax.f32 %v1886_v38, %v1873_v46  ;;  %v12023_v39 = vpack.c.bf16 %v1873_v46, %v1871_v0  ;;  %v10055_v0 = vld [vmem:[#allocation7 + $0x8c] ss:$16 sps:$4 sm:$0xff]   ;;  %v10065_v38 = vld [vmem:[#allocation7 + $0x48] ss:$16 sps:$4 sm:$0xff]   ;;  %v10070_v46 = vld [vmem:[#allocation7 + $0x24] ss:$16 sps:$4 sm:$0xff]  }
 0x353   : > { %v1909_v3 = vmax.f32 %v1907_v11, %v1874_v30  ;;  %v12025_v12 = vpack.c.bf16 %v1874_v30, %v1872_v9  ;;  %v10059_v9 = vld [vmem:[#allocation7 + $0x68] ss:$16 sps:$4 sm:$0xff]   ;;  %v10073_v41 = vld [vmem:[#allocation7 + $0x2c] ss:$16 sps:$4 sm:$0xff]   ;;  %v10068_v11 = vld [vmem:[#allocation7 + $0x20] ss:$16 sps:$4 sm:$0xff]  }
 0x354   : > { %v1889_v10 = vmax.f32 %v1887_v16, %v1888_v5  ;;  %v10071_v30 = vld [vmem:[#allocation7 + $0x28] ss:$16 sps:$4 sm:$0xff]   ;;  %v10076_v16 = vld [vmem:[#allocation7 + $0x4] ss:$16 sps:$4 sm:$0xff]   ;;  %v10079_v5 = vld [vmem:[#allocation7 + $0xc] ss:$16 sps:$4 sm:$0xff]  }
 0x355   : > { %v1910_v54 = vmax.f32 %v1908_v31, %v1909_v3  ;;  %v10074_v31 = vld [vmem:[#allocation7] ss:$16 sps:$4 sm:$0xff]   ;;  %v10077_v3 = vld [vmem:[#allocation7 + $0x8] ss:$16 sps:$4 sm:$0xff]  }
 0x356   : > { %v1890_v35 = vrot.slane %v1889_v10, 4 }
 0x357   : > { %v1911_v62 = vrot.slane %v1910_v54, 4 }
 0x358   : > { %v1891_v20 = vmax.f32 %v1889_v10, %v1890_v35  ;;  %v10082_v10 = vld [vmem:[#allocation7 + $0x1e4] ss:$16 sps:$4 sm:$0xff]   ;;  %v10080_v35 = vld [vmem:[#allocation7 + $0x1e0] ss:$16 sps:$4 sm:$0xff]  }
 0x359   : > { %v1912_v21 = vmax.f32 %v1910_v54, %v1911_v62  ;;  %v10085_v54 = vld [vmem:[#allocation7 + $0x1ec] ss:$16 sps:$4 sm:$0xff]   ;;  %v10083_v62 = vld [vmem:[#allocation7 + $0x1e8] ss:$16 sps:$4 sm:$0xff]  }
 0x35a   : > { %v1892_v1 = vrot.slane %v1891_v20, 2 }
 0x35b   : > { %v1913_v19 = vrot.slane %v1912_v21, 2 }
 0x35c   : > { %v1893_v33 = vmax.f32 %v1891_v20, %v1892_v1  ;;  %v10088_v20 = vld [vmem:[#allocation7 + $0x1c4] ss:$16 sps:$4 sm:$0xff]   ;;  %v10086_v1 = vld [vmem:[#allocation7 + $0x1c0] ss:$16 sps:$4 sm:$0xff]  }
 0x35d   : > { %v1914_v15 = vmax.f32 %v1912_v21, %v1913_v19  ;;  %v10091_v21 = vld [vmem:[#allocation7 + $0x1cc] ss:$16 sps:$4 sm:$0xff]   ;;  %v10089_v19 = vld [vmem:[#allocation7 + $0x1c8] ss:$16 sps:$4 sm:$0xff]  }
 0x35e   : > { %v1894_v24 = vrot.slane %v1893_v33, 1 }
 0x35f   : > { %v1915_v60 = vrot.slane %v1914_v15, 1 }
 0x360   : > { %v12027_v42 = vmax.f32 %v1893_v33, %v1894_v24  ;;  %v10094_v33 = vld [vmem:[#allocation7 + $0x1a4] ss:$16 sps:$4 sm:$0xff]   ;;  %v10092_v24 = vld [vmem:[#allocation7 + $0x1a0] ss:$16 sps:$4 sm:$0xff]  }
 0x361   : > { %v12029_v56 = vmax.f32 %v1914_v15, %v1915_v60  ;;  %v10097_v15 = vld [vmem:[#allocation7 + $0x1ac] ss:$16 sps:$4 sm:$0xff]   ;;  %v10095_v60 = vld [vmem:[#allocation7 + $0x1a8] ss:$16 sps:$4 sm:$0xff]  }
 0x362   : > { %15881 = vst [vmem:[#allocation27_spill] sm:$0xff] %v12027_v42  ;;  %v1917_v44 = vpack.c.bf16 %v12027_v42, %v12027_v42 }
 0x363   : > { %15882 = vst [vmem:[#allocation28_spill] sm:$0xff] %v12029_v56  ;;  %v1918_v61 = vpack.c.bf16 %v12029_v56, %v12029_v56 }
 0x365   : > { %2357 = vmatprep.mubr.bf16.mxu0 %v1918_v61  ;;  %2398 = vmatprep.mubr.bf16.mxu1 %v1918_v61  ;;  %v10100_v61 = vld [vmem:[#allocation7 + $0x184] ss:$16 sps:$4 sm:$0xff]  }
 0x366   : > { %2358 = vmatmul.mubr.bf16.vlgmr.msra.gmra.mxu0 %v1917_v44  ;;  %2399 = vmatmul.mubr.bf16.vlgmr.msra.gmra.mxu1 %v1917_v44  ;;  %v10101_v44 = vld [vmem:[#allocation7 + $0x188] ss:$16 sps:$4 sm:$0xff]  }
 0x367   : > { %2808 = vmatpush1.bf16.msra.mxu0 %v10032_v49  ;;  %2921 = vmatpush1.bf16.msra.mxu1 %v10035_v22  ;;  %v10103_v49 = vld [vmem:[#allocation7 + $0x18c] ss:$16 sps:$4 sm:$0xff]   ;;  %v10098_v22 = vld [vmem:[#allocation7 + $0x180] ss:$16 sps:$4 sm:$0xff]  }
 0x368   : > { %2839 = vmatprep.mubr.bf16.mxu0 %v2408_v14  ;;  %2952 = vmatprep.mubr.bf16.mxu1 %v2408_v14  ;;  %v10104_v14 = vld [vmem:[#allocation7 + $0x160] ss:$16 sps:$4 sm:$0xff]  }
 0x369   : > { %2809 = vmatprep.subr.bf16.mxu0 %v10040_v25  ;;  %2922 = vmatprep.subr.bf16.mxu1 %v10043_v13  ;;  %v10106_v25 = vld [vmem:[#allocation7 + $0x164] ss:$16 sps:$4 sm:$0xff]   ;;  %v10109_v13 = vld [vmem:[#allocation7 + $0x16c] ss:$16 sps:$4 sm:$0xff]  }
 0x36b   : > { %2810 = vmatpush1.bf16.msra.mxu0 %v10038_v43  ;;  %2923 = vmatpush1.bf16.msra.mxu1 %v10041_v7  ;;  %v10107_v43 = vld [vmem:[#allocation7 + $0x168] ss:$16 sps:$4 sm:$0xff]   ;;  %v10112_v7 = vld [vmem:[#allocation7 + $0x144] ss:$16 sps:$4 sm:$0xff]  }
 0x36c   : > { %2811 = vmatprep.subr.bf16.mxu0 %v10046_v63  ;;  %2924 = vmatprep.subr.bf16.mxu1 %v10049_v23  ;;  %v10115_v63 = vld [vmem:[#allocation7 + $0x14c] ss:$16 sps:$4 sm:$0xff]   ;;  %v10110_v23 = vld [vmem:[#allocation7 + $0x140] ss:$16 sps:$4 sm:$0xff]  }
 0x36f   : > { %2812 = vmatpush1.bf16.msra.mxu0 %v10044_v53  ;;  %2925 = vmatpush1.bf16.msra.mxu1 %v10047_v29  ;;  %v10113_v53 = vld [vmem:[#allocation7 + $0x148] ss:$16 sps:$4 sm:$0xff]   ;;  %v10118_v29 = vld [vmem:[#allocation7 + $0x124] ss:$16 sps:$4 sm:$0xff]  }
 0x370   : > { %2813 = vmatprep.subr.bf16.mxu0 %v10052_v2  ;;  %2926 = vmatprep.subr.bf16.mxu1 %v10055_v0  ;;  %v10121_v2 = vld [vmem:[#allocation7 + $0x12c] ss:$16 sps:$4 sm:$0xff]   ;;  %v10116_v0 = vld [vmem:[#allocation7 + $0x120] ss:$16 sps:$4 sm:$0xff]  }
 0x373   : > { %2814 = vmatpush1.bf16.msra.mxu0 %v10050_v6  ;;  %2927 = vmatpush1.bf16.msra.mxu1 %v10053_v8  ;;  %v10119_v6 = vld [vmem:[#allocation7 + $0x128] ss:$16 sps:$4 sm:$0xff]   ;;  %v10124_v8 = vld [vmem:[#allocation7 + $0x104] ss:$16 sps:$4 sm:$0xff]  }
 0x374   : > { %2815 = vmatprep.subr.bf16.mxu0 %v10058_v28  ;;  %2928 = vmatprep.subr.bf16.mxu1 %v10061_v51  ;;  %v10127_v28 = vld [vmem:[#allocation7 + $0x10c] ss:$16 sps:$4 sm:$0xff]   ;;  %v10122_v51 = vld [vmem:[#allocation7 + $0x100] ss:$16 sps:$4 sm:$0xff]  }
 0x377   : > { %2816 = vmatpush1.bf16.msra.mxu0 %v10056_v27  ;;  %2929 = vmatpush1.bf16.msra.mxu1 %v10059_v9  ;;  %v10125_v27 = vld [vmem:[#allocation7 + $0x108] ss:$16 sps:$4 sm:$0xff]   ;;  %v3777_v9 = vld [vmem:[#allocation9 + $0x1c0] sm:$0xff] }
 0x378   : > { %2817 = vmatprep.subr.bf16.mxu0 %v10064_v57  ;;  %2930 = vmatprep.subr.bf16.mxu1 %v10067_v36  ;;  %v3781_v57 = vld [vmem:[#allocation9 + $0x1e0] sm:$0xff] }
 0x379   : > { %v3905_v36 = vld [vmem:[#allocation9 + $0x5c0] sm:$0xff] }
 0x37b   : > { %2818 = vmatpush1.bf16.msra.mxu0 %v10062_v47  ;;  %2931 = vmatpush1.bf16.msra.mxu1 %v10065_v38  ;;  %v9374_v47 = vcombine.low %v3777_v9, %v3781_v57  ;;  %v9375_v38 = vcombine.high %v3777_v9, %v3781_v57  ;;  %v3721_v9 = vld [vmem:[#allocation9] sm:$0xff] }
 0x37c   : > { %2819 = vmatprep.subr.bf16.mxu0 %v10070_v46  ;;  %2932 = vmatprep.subr.bf16.mxu1 %v10073_v41  ;;  %v3909_v46 = vld [vmem:[#allocation9 + $0x5e0] sm:$0xff] }
 0x37d   : > { %v3769_v41 = vld [vmem:[#allocation9 + $0x180] sm:$0xff] }
 0x37e   : > { %v3849_v57 = vld [vmem:[#allocation9 + $0x400] sm:$0xff] }
 0x37f   : > { %2820 = vmatpush1.bf16.msra.mxu0 %v10068_v11  ;;  %2933 = vmatpush1.bf16.msra.mxu1 %v10071_v30  ;;  %v3773_v11 = vld [vmem:[#allocation9 + $0x1a0] sm:$0xff]  ;;  %v9502_v30 = vcombine.low %v3905_v36, %v3909_v46 }
 0x380   : > { %2821 = vmatprep.subr.bf16.mxu0 %v10076_v16  ;;  %2934 = vmatprep.subr.bf16.mxu1 %v10079_v5  ;;  %v9503_v16 = vcombine.high %v3905_v36, %v3909_v46  ;;  %v3897_v5 = vld [vmem:[#allocation9 + $0x580] sm:$0xff] }
 0x383   : > { %2822 = vmatpush1.bf16.msra.mxu0 %v10074_v31  ;;  %2935 = vmatpush1.bf16.msra.mxu1 %v10077_v3  ;;  %v3761_v3 = vld [vmem:[#allocation9 + $0x140] sm:$0xff] }
 0x384   : > { %2823 = vmatprep.subr.bf16.mxu0 %v10082_v10  ;;  %2936 = vmatprep.subr.bf16.mxu1 %v10085_v54  ;;  %v9366_v10 = vcombine.low %v3769_v41, %v3773_v11 }
 0x387   : > { %2824 = vmatpush2.bf16.msra.mxu0 %v10080_v35  ;;  %2937 = vmatpush2.bf16.msra.mxu1 %v10083_v62  ;;  %v3765_v35 = vld [vmem:[#allocation9 + $0x160] sm:$0xff] }
 0x388   : > { %2825 = vmatprep.subr.bf16.mxu0 %v10088_v20  ;;  %2938 = vmatprep.subr.bf16.mxu1 %v10091_v21  ;;  %v3889_v62 = vld [vmem:[#allocation9 + $0x540] sm:$0xff] }
 0x389   : > { %v3753_v20 = vld [vmem:[#allocation9 + $0x100] sm:$0xff] }
 0x38a   : > { %v3757_v21 = vld [vmem:[#allocation9 + $0x120] sm:$0xff] }
 0x38b   : > { %2826 = vmatpush2.bf16.msra.mxu0 %v10086_v1  ;;  %2939 = vmatpush2.bf16.msra.mxu1 %v10089_v19  ;;  %v3881_v1 = vld [vmem:[#allocation9 + $0x500] sm:$0xff] }
 0x38c   : > { %2827 = vmatprep.subr.bf16.mxu0 %v10094_v33  ;;  %2940 = vmatprep.subr.bf16.mxu1 %v10097_v15  ;;  %v3885_v19 = vld [vmem:[#allocation9 + $0x520] sm:$0xff]  ;;  %v9359_v33 = vcombine.high %v3761_v3, %v3765_v35  ;;  %v9358_v15 = vcombine.low %v3761_v3, %v3765_v35 }
 0x38f   : > { %2828 = vmatpush2.bf16.msra.mxu0 %v10092_v24  ;;  %2941 = vmatpush2.bf16.msra.mxu1 %v10095_v60  ;;  %v9351_v60 = vcombine.high %v3753_v20, %v3757_v21 }
 0x390   : > { %2829 = vmatprep.subr.bf16.mxu0 %v10100_v61  ;;  %2942 = vmatprep.subr.bf16.mxu1 %v10103_v49  ;;  %v9479_v61 = vcombine.high %v3881_v1, %v3885_v19  ;;  %v3745_v49 = vld [vmem:[#allocation9 + $0xc0] sm:$0xff] }
 0x393   : > { %2830 = vmatpush2.bf16.msra.mxu0 %v10098_v22  ;;  %2943 = vmatpush2.bf16.msra.mxu1 %v10101_v44  ;;  %v9350_v22 = vcombine.low %v3753_v20, %v3757_v21  ;;  %v9478_v44 = vcombine.low %v3881_v1, %v3885_v19  ;;  %v3825_v20 = vld [vmem:[#allocation9 + $0x340] sm:$0xff] }
 0x394   : > { %2831 = vmatprep.subr.bf16.mxu0 %v10106_v25  ;;  %2944 = vmatprep.subr.bf16.mxu1 %v10109_v13  ;;  %v3749_v25 = vld [vmem:[#allocation9 + $0xe0] sm:$0xff] }
 0x395   : > { %v3873_v13 = vld [vmem:[#allocation9 + $0x4c0] sm:$0xff] }
 0x396   : > { %v3829_v21 = vld [vmem:[#allocation9 + $0x360] sm:$0xff] }
 0x397   : > { %2832 = vmatpush2.bf16.msra.mxu0 %v10104_v14  ;;  %2945 = vmatpush2.bf16.msra.mxu1 %v10107_v43  ;;  %v3877_v14 = vld [vmem:[#allocation9 + $0x4e0] sm:$0xff]  ;;  %v9423_v1 = vcombine.high %v3825_v20, %v3829_v21 }
 0x398   : > { %2833 = vmatprep.subr.bf16.mxu0 %v10112_v7  ;;  %2946 = vmatprep.subr.bf16.mxu1 %v10115_v63  ;;  %v3737_v43 = vld [vmem:[#allocation9 + $0x80] sm:$0xff] }
 0x399   : > { %v3865_v7 = vld [vmem:[#allocation9 + $0x480] sm:$0xff] }
 0x39a   : > { %v3869_v63 = vld [vmem:[#allocation9 + $0x4a0] sm:$0xff] }
 0x39b   : > { %2834 = vmatpush2.bf16.msra.mxu0 %v10110_v23  ;;  %2947 = vmatpush2.bf16.msra.mxu1 %v10113_v53  ;;  %v9343_v23 = vcombine.high %v3745_v49, %v3749_v25  ;;  %v9471_v53 = vcombine.high %v3873_v13, %v3877_v14  ;;  %v3953_v19 = vld [vmem:[#allocation9 + $0x740] sm:$0xff] }
 0x39c   : > { %2835 = vmatprep.subr.bf16.mxu0 %v10118_v29  ;;  %2948 = vmatprep.subr.bf16.mxu1 %v10121_v2  ;;  %v9470_v29 = vcombine.low %v3873_v13, %v3877_v14 }
 0x39f   : > { %2836 = vmatpush2.bf16.msra.mxu0 %v10116_v0  ;;  %2949 = vmatpush2.bf16.msra.mxu1 %v10119_v6  ;;  %v9463_v0 = vcombine.high %v3865_v7, %v3869_v63 }
 0x3a0   : > { %2837 = vmatprep.subr.bf16.mxu0 %v10124_v8  ;;  %2950 = vmatprep.subr.bf16.mxu1 %v10127_v28  ;;  %v9462_v8 = vcombine.low %v3865_v7, %v3869_v63  ;;  %v3729_v28 = vld [vmem:[#allocation9 + $0x40] sm:$0xff] }
 0x3a3   : > { %2838 = vmatpush2.bf16.msra.mxu0 %v10122_v51  ;;  %2951 = vmatpush2.bf16.msra.mxu1 %v10125_v27  ;;  %v3733_v51 = vld [vmem:[#allocation9 + $0x60] sm:$0xff] }
 0x3a4   : > { %5299 = vmatprep.subr.bf16.mxu0 %v9375_v38  ;;  %5412 = vmatprep.subr.bf16.mxu1 %v9503_v16  ;;  %v9327_v27 = vcombine.high %v3729_v28, %v3733_v51  ;;  %v3973_v16 = vld [vmem:[#allocation9 + $0x7e0] sm:$0xff] }
 0x3a6   : > { %2840 = vmatmul.mubr.bf16.vlgmr.msra.gmra.mxu0 %v11705_v48  ;;  %2953 = vmatmul.mubr.bf16.vlgmr.msra.gmra.mxu1 %v11705_v48  ;;  %v3901_v48 = vld [vmem:[#allocation9 + $0x5a0] sm:$0xff] }
 0x3a7   : > { %2849 = vmatprep.mubr.bf16.mxu0 %v11764_v55  ;;  %2962 = vmatprep.mubr.bf16.mxu1 %v11764_v55  ;;  %v9367_v55 = vcombine.high %v3769_v41, %v3773_v11  ;;  %v9495_v31 = vcombine.high %v3897_v5, %v3901_v48  ;;  %v9494_v54 = vcombine.low %v3897_v5, %v3901_v48  ;;  %v3845_v41 = vld [vmem:[#allocation9 + $0x3e0] sm:$0xff] }
 0x3a8   : > { %5300 = vmatpush1.bf16.msra.mxu0 %v9374_v47  ;;  %5413 = vmatpush1.bf16.msra.mxu1 %v9502_v30  ;;  %v3853_v47 = vld [vmem:[#allocation9 + $0x420] sm:$0xff] }
 0x3a9   : > { %5301 = vmatprep.subr.bf16.mxu0 %v9367_v55  ;;  %5414 = vmatprep.subr.bf16.mxu1 %v9495_v31  ;;  %v9446_v38 = vcombine.low %v3849_v57, %v3853_v47  ;;  %v9447_v46 = vcombine.high %v3849_v57, %v3853_v47  ;;  %v3969_v30 = vld [vmem:[#allocation9 + $0x7c0] sm:$0xff] }
 0x3aa   : > { %v9567_v5 = vcombine.high %v3969_v30, %v3973_v16  ;;  %v9566_v48 = vcombine.low %v3969_v30, %v3973_v16  ;;  %v3833_v55 = vld [vmem:[#allocation9 + $0x380] sm:$0xff] }
 0x3ab   : > { %v3837_v31 = vld [vmem:[#allocation9 + $0x3a0] sm:$0xff] }
 0x3ac   : > { %5302 = vmatpush1.bf16.msra.mxu0 %v9366_v10  ;;  %5415 = vmatpush1.bf16.msra.mxu1 %v9494_v54  ;;  %v9431_v3 = vcombine.high %v3833_v55, %v3837_v31  ;;  %v3961_v10 = vld [vmem:[#allocation9 + $0x780] sm:$0xff]  ;;  %v9430_v35 = vcombine.low %v3833_v55, %v3837_v31 }
 0x3ad   : > { %5303 = vmatprep.subr.bf16.mxu0 %v9359_v33  ;;  %v3965_v54 = vld [vmem:[#allocation9 + $0x7a0] sm:$0xff] }
 0x3ae   : > { %2850 = vmatmul.mubr.bf16.gmra.mxu0 %v11770_v18  ;;  %2963 = vmatmul.mubr.bf16.gmra.mxu1 %v11770_v18  ;;  %v3893_v18 = vld [vmem:[#allocation9 + $0x560] sm:$0xff] }
 0x3af   : > { %2859 = vmatprep.mubr.bf16.mxu0 %v11795_v52  ;;  %2972 = vmatprep.mubr.bf16.mxu1 %v11795_v52  ;;  %v9487_v52 = vcombine.high %v3889_v62, %v3893_v18  ;;  %v9486_v24 = vcombine.low %v3889_v62, %v3893_v18  ;;  %v9559_v62 = vcombine.high %v3961_v10, %v3965_v54  ;;  %v3957_v33 = vld [vmem:[#allocation9 + $0x760] sm:$0xff] }
 0x3b0   : > { %5304 = vmatpush1.bf16.msra.mxu0 %v9358_v15  ;;  %v9558_v18 = vcombine.low %v3961_v10, %v3965_v54  ;;  %v9551_v15 = vcombine.high %v3953_v19, %v3957_v33  ;;  %v3913_v55 = vld [vmem:[#allocation9 + $0x600] sm:$0xff]  ;;  %v12069_v54 = vld [vmem:[#allocation9 + $0x1c8] sm:$0xff] }
 0x3b1   : > { %5416 = vmatprep.subr.bf16.mxu1 %v9487_v52  ;;  %5305 = vmatprep.subr.bf16.mxu0 %v9351_v60  ;;  %v9422_v52 = vcombine.low %v3825_v20, %v3829_v21  ;;  %v3817_v60 = vld [vmem:[#allocation9 + $0x300] sm:$0xff]  ;;  %v12077_v20 = vld [vmem:[#allocation9 + $0x5c8] sm:$0xff] }
 0x3b2   : > { %5417 = vmatpush1.bf16.msra.mxu1 %v9486_v24  ;;  %v9550_v24 = vcombine.low %v3953_v19, %v3957_v33  ;;  %v3917_v31 = vld [vmem:[#allocation9 + $0x620] sm:$0xff]  ;;  %v12079_v21 = vld [vmem:[#allocation9 + $0x5e8] sm:$0xff] }
 0x3b3   : > { %5418 = vmatprep.subr.bf16.mxu1 %v9479_v61  ;;  %v3821_v61 = vld [vmem:[#allocation9 + $0x320] sm:$0xff]  ;;  %v9510_v10 = vcombine.low %v3913_v55, %v3917_v31 }
 0x3b4   : > { %5306 = vmatpush1.bf16.msra.mxu0 %v9350_v22  ;;  %v3945_v22 = vld [vmem:[#allocation9 + $0x700] sm:$0xff] }
 0x3b5   : > { %5307 = vmatprep.subr.bf16.mxu0 %v9343_v23  ;;  %v3937_v23 = vld [vmem:[#allocation9 + $0x6c0] sm:$0xff] }
 0x3b6   : > { %2860 = vmatmul.mubr.bf16.gmra.mxu0 %v11784_v37  ;;  %2973 = vmatmul.mubr.bf16.gmra.mxu1 %v11784_v37  ;;  %v3741_v37 = vld [vmem:[#allocation9 + $0xa0] sm:$0xff] }
 0x3b7   : > { %2869 = vmatprep.mubr.bf16.mxu0 %v11853_v45  ;;  %2982 = vmatprep.mubr.bf16.mxu1 %v11853_v45  ;;  %v9342_v45 = vcombine.low %v3745_v49, %v3749_v25  ;;  %v9335_v2 = vcombine.high %v3737_v43, %v3741_v37  ;;  %v9334_v6 = vcombine.low %v3737_v43, %v3741_v37  ;;  %v3809_v43 = vld [vmem:[#allocation9 + $0x2c0] sm:$0xff] }
 0x3b8   : > { %5419 = vmatpush1.bf16.msra.mxu1 %v9478_v44  ;;  %v9415_v49 = vcombine.high %v3817_v60, %v3821_v61  ;;  %v3949_v44 = vld [vmem:[#allocation9 + $0x720] sm:$0xff]  ;;  %v9414_v25 = vcombine.low %v3817_v60, %v3821_v61 }
 0x3b9   : > { %5420 = vmatprep.subr.bf16.mxu1 %v9471_v53  ;;  %5308 = vmatpush1.bf16.msra.mxu0 %v9342_v45  ;;  %v9543_v13 = vcombine.high %v3945_v22, %v3949_v44  ;;  %v9542_v14 = vcombine.low %v3945_v22, %v3949_v44  ;;  %v3813_v37 = vld [vmem:[#allocation9 + $0x2e0] sm:$0xff] }
 0x3ba   : > { %5309 = vmatprep.subr.bf16.mxu0 %v9335_v2  ;;  %v9407_v7 = vcombine.high %v3809_v43, %v3813_v37  ;;  %v9406_v63 = vcombine.low %v3809_v43, %v3813_v37  ;;  %v3941_v53 = vld [vmem:[#allocation9 + $0x6e0] sm:$0xff]  ;;  %v12094_v37 = vld [vmem:[#allocation9 + $0x188] sm:$0xff] }
 0x3bb   : > { %v9535_v45 = vcombine.high %v3937_v23, %v3941_v53  ;;  %v3801_v2 = vld [vmem:[#allocation9 + $0x280] sm:$0xff] }
 0x3bc   : > { %5421 = vmatpush1.bf16.msra.mxu1 %v9470_v29  ;;  %v9534_v29 = vcombine.low %v3937_v23, %v3941_v53  ;;  %v1983_v33 = vld [vmem:[%s15769_s9] sm:$0xf]  ;;  %v12102_v23 = vld [vmem:[#allocation9 + $0x1a8] sm:$0xff] }
 0x3bd   : > { %5422 = vmatprep.subr.bf16.mxu1 %v9463_v0  ;;  %5310 = vmatpush1.bf16.msra.mxu0 %v9334_v6  ;;  %v3805_v0 = vld [vmem:[#allocation9 + $0x2a0] sm:$0xff]  ;;  %v12104_v53 = vld [vmem:[#allocation9 + $0x588] sm:$0xff] }
 0x3be   : > { %2870 = vmatmul.mubr.bf16.gmra.mxu0 %v11825_v32  ;;  %2983 = vmatmul.mubr.bf16.gmra.mxu1 %v11825_v32  ;;  %v9326_v32 = vcombine.low %v3729_v28, %v3733_v51  ;;  %v9399_v6 = vcombine.high %v3801_v2, %v3805_v0  ;;  %v3929_v28 = vld [vmem:[#allocation9 + $0x680] sm:$0xff] }
 0x3bf   : > { %2879 = vmatprep.mubr.bf16.mxu0 %v11922_v58  ;;  %2992 = vmatprep.mubr.bf16.mxu1 %v11922_v58  ;;  %v3861_v58 = vld [vmem:[#allocation9 + $0x460] sm:$0xff] }
 0x3c0   : > { %5423 = vmatpush1.bf16.msra.mxu1 %v9462_v8  ;;  %5311 = vmatprep.subr.bf16.mxu0 %v9327_v27  ;;  %v9398_v8 = vcombine.low %v3801_v2, %v3805_v0  ;;  %v3933_v51 = vld [vmem:[#allocation9 + $0x6a0] sm:$0xff]  ;;  %v12108_v0 = vld [vmem:[#allocation9 + $0x148] sm:$0xff] }
 0x3c1   : > { %5312 = vmatpush1.bf16.msra.mxu0 %v9326_v32  ;;  %v9527_v27 = vcombine.high %v3929_v28, %v3933_v51  ;;  %v9526_v32 = vcombine.low %v3929_v28, %v3933_v51  ;;  %v15884_v60 = vld [vmem:[#allocation26_spill] sm:$0xff] }
 0x3c2   : > { %v2316_v61 = vrot.slane %v1983_v33, %v15884_v60 }
 0x3c6   : > { %2880 = vmatmul.mubr.bf16.gmra.mxu0 %v11897_v40  ;;  %2993 = vmatmul.mubr.bf16.gmra.mxu1 %v11897_v40  ;;  %v3857_v40 = vld [vmem:[#allocation9 + $0x440] sm:$0xff] }
 0x3c7   : > { %2889 = vmatprep.mubr.bf16.mxu0 %v11968_v4  ;;  %3002 = vmatprep.mubr.bf16.mxu1 %v11968_v4  ;;  %v9455_v4 = vcombine.high %v3857_v40, %v3861_v58 }
 0x3c9   : > { %5424 = vmatprep.subr.bf16.mxu1 %v9455_v4 }
 0x3ce   : > { %2890 = vmatmul.mubr.bf16.gmra.mxu0 %v11949_v17  ;;  %3003 = vmatmul.mubr.bf16.gmra.mxu1 %v11949_v17  ;;  %v9454_v17 = vcombine.low %v3857_v40, %v3861_v58  ;;  %v3793_v40 = vld [vmem:[#allocation9 + $0x240] sm:$0xff] }
 0x3cf   : > { %2899 = vmatprep.mubr.bf16.mxu0 %v12011_v50  ;;  %3012 = vmatprep.mubr.bf16.mxu1 %v12011_v50  ;;  %v3725_v50 = vld [vmem:[#allocation9 + $0x20] sm:$0xff] }
 0x3d0   : > { %5425 = vmatpush1.bf16.msra.mxu1 %v9454_v17  ;;  %v9319_v36 = vcombine.high %v3721_v9, %v3725_v50  ;;  %v3797_v58 = vld [vmem:[#allocation9 + $0x260] sm:$0xff] }
 0x3d1   : > { %5426 = vmatprep.subr.bf16.mxu1 %v9447_v46  ;;  %v9391_v4 = vcombine.high %v3793_v40, %v3797_v58  ;;  %v3921_v17 = vld [vmem:[#allocation9 + $0x640] sm:$0xff] }
 0x3d2   : > { %5313 = vmatprep.subr.bf16.mxu0 %v9319_v36 }
 0x3d4   : > { %5427 = vmatpush1.bf16.msra.mxu1 %v9446_v38 }
 0x3d5   : > { %5428 = vmatprep.subr.bf16.mxu1 %v9567_v5 }
 0x3d6   : > { %2900 = vmatmul.mubr.bf16.gmra.mxu0 %v12005_v34  ;;  %3013 = vmatmul.mubr.bf16.gmra.mxu1 %v12005_v34  ;;  %v9318_v34 = vcombine.low %v3721_v9, %v3725_v50  ;;  %v3925_v9 = vld [vmem:[#allocation9 + $0x660] sm:$0xff]  ;;  %v9390_v50 = vcombine.low %v3793_v40, %v3797_v58  ;;  %v12122_v40 = vld [vmem:[#allocation9 + $0x568] sm:$0xff] }
 0x3d7   : > { %2909 = vmatprep.mubr.bf16.mxu0 %v12025_v12  ;;  %3022 = vmatprep.mubr.bf16.mxu1 %v12025_v12  ;;  %v3841_v12 = vld [vmem:[#allocation9 + $0x3c0] sm:$0xff]  ;;  %v9519_v57 = vcombine.high %v3921_v17, %v3925_v9  ;;  %v9518_v36 = vcombine.low %v3921_v17, %v3925_v9 }
 0x3d8   : > { %5314 = vmatpush1.bf16.msra.mxu0 %v9318_v34  ;;  %v9438_v11 = vcombine.low %v3841_v12, %v3845_v41  ;;  %5429 = vmatpush2.bf16.msra.mxu1 %v9566_v48 }
 0x3d9   : > { %5430 = vmatprep.subr.bf16.mxu1 %v9559_v62 }
 0x3dc   : > { %5431 = vmatpush2.bf16.msra.mxu1 %v9558_v18 }
 0x3dd   : > { %5432 = vmatprep.subr.bf16.mxu1 %v9551_v15  ;;  %v15883_v15 = vld [vmem:[#allocation25_spill] sm:$0xff] }
 0x3de   : > { %2910 = vmatmul.mubr.bf16.gmra.mxu0 %v12023_v39  ;;  %3023 = vmatmul.mubr.bf16.gmra.mxu1 %v12023_v39  ;;  %v9439_v39 = vcombine.high %v3841_v12, %v3845_v41 }
 0x3e0   : > { %5315 = vmatprep.subr.bf16.mxu0 %v9439_v39  ;;  %5433 = vmatpush2.bf16.msra.mxu1 %v9550_v24  ;;  %v3785_v39 = vld [vmem:[#allocation9 + $0x200] sm:$0xff]  ;;  %v2308_v24 = vrot.slane %v1983_v33, %v15883_v15 }
 0x3e1   : > { %5316 = vmatpush2.bf16.msra.mxu0 %v9438_v11  ;;  %5434 = vmatprep.subr.bf16.mxu1 %v9543_v13  ;;  %v3789_v11 = vld [vmem:[#allocation9 + $0x220] sm:$0xff] }
 0x3e2   : > { %5317 = vmatprep.subr.bf16.mxu0 %v9431_v3  ;;  %v9383_v30 = vcombine.high %v3785_v39, %v3789_v11  ;;  %v9382_v48 = vcombine.low %v3785_v39, %v3789_v11  ;;  %v9511_v3 = vcombine.high %v3913_v55, %v3917_v31  ;;  %v12150_v55 = vld [vmem:[#allocation9 + $0x528] sm:$0xff] }
 0x3e3   : > { %15886 = vst [vmem:[#allocation29_spill] sm:$0xff] %v12150_v55 }
 0x3e4   : > { %5435 = vmatpush2.bf16.msra.mxu1 %v9542_v14 }
 0x3e5   : > { %5318 = vmatpush2.bf16.msra.mxu0 %v9430_v35  ;;  %5436 = vmatprep.subr.bf16.mxu1 %v9535_v45  ;;  %v12071_v35 = vld [vmem:[#allocation9 + $0x1e8] sm:$0xff] }
 0x3e6   : > { %5319 = vmatprep.subr.bf16.mxu0 %v9423_v1  ;;  %v9377_v18 = vcombine.high %v12069_v54, %v12071_v35  ;;  %v9505_v1 = vcombine.high %v12077_v20, %v12079_v21  ;;  %v12106_v45 = vld [vmem:[#allocation9 + $0x5a8] sm:$0xff] }
 0x3e8   : > { %5437 = vmatpush2.bf16.msra.mxu1 %v9534_v29 }
 0x3e9   : > { %5320 = vmatpush2.bf16.msra.mxu0 %v9422_v52  ;;  %5438 = vmatprep.subr.bf16.mxu1 %v9527_v27  ;;  %v15787_v52 = vsub.s32 3, %v11381_v26 }
 0x3ea   : > { %5321 = vmatprep.subr.bf16.mxu0 %v9415_v49  ;;  %v15885_v49 = vld [vmem:[#allocation24_spill] sm:$0xff] }
 0x3eb   : > { %v2312_v22 = vrot.slane %v1983_v33, %v15885_v49  ;;  %v2320_v44 = vrot.slane %v1983_v33, %v15787_v52  ;;  %v12166_v52 = vld [vmem:[#allocation9 + $0xc8] sm:$0xff] }
 0x3ec   : > { %5439 = vmatpush2.bf16.msra.mxu1 %v9526_v32  ;;  %v12120_v32 = vld [vmem:[#allocation9 + $0x548] sm:$0xff]  ;;  %15887 = vst [vmem:[#allocation30_spill] sm:$0xff] %v12166_v52 }
 0x3ed   : > { %5322 = vmatpush2.bf16.msra.mxu0 %v9414_v25  ;;  %5440 = vmatprep.subr.bf16.mxu1 %v9519_v57 }
 0x3ee   : > { %5323 = vmatprep.subr.bf16.mxu0 %v9407_v7 }
 0x3f0   : > { %5441 = vmatpush2.bf16.msra.mxu1 %v9518_v36 }
 0x3f1   : > { %5324 = vmatpush2.bf16.msra.mxu0 %v9406_v63  ;;  %5442 = vmatprep.subr.bf16.mxu1 %v9511_v3 }
 0x3f2   : > { %5325 = vmatprep.subr.bf16.mxu0 %v9399_v6  ;;  %v12110_v6 = vld [vmem:[#allocation9 + $0x168] sm:$0xff] }
 0x3f4   : > { %5443 = vmatpush2.bf16.msra.mxu1 %v9510_v10 }
 0x3f5   : > { %5326 = vmatpush2.bf16.msra.mxu0 %v9398_v8  ;;  %5638 = vmatprep.subr.bf16.mxu1 %v9505_v1 }
 0x3f6   : > { %5327 = vmatprep.subr.bf16.mxu0 %v9391_v4 }
 0x3f9   : > { %5328 = vmatpush2.bf16.msra.mxu0 %v9390_v50 }
 0x3fa   : > { %5329 = vmatprep.subr.bf16.mxu0 %v9383_v30 }
 0x3fd   : > { %5330 = vmatpush2.bf16.msra.mxu0 %v9382_v48  ;;  %v12148_v48 = vld [vmem:[#allocation9 + $0x508] sm:$0xff] }
 0x3fe   : > { %5525 = vmatprep.subr.bf16.mxu0 %v9377_v18 }
 0x426   : > { %v2359_v47 = vpop.f32.mrf.mxu0  ;;  %v2400_v34 = vpop.f32.mrf.mxu1 }
 0x427   : > { %v2360_v25 = vadd.f32 %v2359_v47, %v2308_v24  ;;  %v2401_v13 = vadd.f32 %v2400_v34, %v2316_v61 }
 0x428   : > { %v2361_v38 = vpop.f32.mrf.mxu0  ;;  %v2402_v46 = vpop.f32.mrf.mxu1 }
 0x429   : > { %v2362_v14 = vadd.f32 %v2361_v38, %v2312_v22  ;;  %v2403_v43 = vadd.f32 %v2402_v46, %v2320_v44  ;;  %v12097_v7 = vrot.slane %v2360_v25, %v15883_v15  ;;  %v12100_v63 = vrot.slane %v2401_v13, %v15883_v15  ;;  %v12136_v46 = vld [vmem:[#allocation9 + $0x108] sm:$0xff] }
 0x42a   : > { %v2363_v12 = vpop.f32.mrf.mxu0  ;;  %v2404_v41 = vpop.f32.mrf.mxu1 }
 0x42b   : > { %v12113_v8 = vrot.slane %v2362_v14, %v15883_v15  ;;  %v12116_v28 = vrot.slane %v2403_v43, %v15883_v15  ;;  %v12138_v12 = vld [vmem:[#allocation9 + $0x128] sm:$0xff] }
 0x42c   : > { %v2364_v16 = vpop.f32.mrf.mxu0  ;;  %v2405_v5 = vpop.f32.mrf.mxu1 }
 0x466   : > { %v2841_v29 = vpop.f32.mrf.mxu0  ;;  %v2954_v2 = vpop.f32.mrf.mxu1 }
 0x467   : > { %v3049_v51 = vadd.f32 %v12097_v7, %v2841_v29  ;;  %v3051_v27 = vadd.f32 %v12100_v63, %v2954_v2 }
 0x468   : > { %v2843_v58 = vpop.f32.mrf.mxu0  ;;  %v2956_v4 = vpop.f32.mrf.mxu1 }
 0x469   : > { %v3177_v36 = vmul.f32 %v3049_v51, %v3049_v51  ;;  %v3179_v47 = vmul.f32 %v3051_v27, %v3051_v27  ;;  %v3050_v41 = vadd.f32 %v12113_v8, %v2843_v58  ;;  %v12142_v39 = vadd.f32 %v12116_v28, %v2956_v4 }
 0x46a   : > { %v2845_v11 = vpop.f32.mrf.mxu0  ;;  %v2958_v30 = vpop.f32.mrf.mxu1 }
 0x46b   : > { %v3241_v31 = vmul.f32 %v3177_v36, %v3049_v51  ;;  %v3243_v3 = vmul.f32 %v3179_v47, %v3051_v27  ;;  %v3053_v10 = vadd.f32 %v12097_v7, %v2845_v11  ;;  %v3055_v18 = vadd.f32 %v12100_v63, %v2958_v30 }
 0x46c   : > { %v3178_v1 = vmul.f32 %v3050_v41, %v3050_v41  ;;  %v3180_v33 = vmul.f32 %v12142_v39, %v12142_v39  ;;  %v2847_v24 = vpop.f32.mrf.mxu0  ;;  %v2960_v61 = vpop.f32.mrf.mxu1  ;;  %v12181_v38 = vmul.f32 0.5, %v3050_v41 }
 0x46d   : > { %v3305_v25 = vmul.f32 0.044715, %v3241_v31  ;;  %v3307_v13 = vmul.f32 0.044715, %v3243_v3  ;;  %v3181_v14 = vmul.f32 %v3053_v10, %v3053_v10  ;;  %v3183_v58 = vmul.f32 %v3055_v18, %v3055_v18  ;;  %v12168_v31 = vld [vmem:[#allocation9 + $0xe8] sm:$0xff] }
 0x46e   : > { %v3242_v29 = vmul.f32 %v3178_v1, %v3050_v41  ;;  %v3244_v2 = vmul.f32 %v3180_v33, %v12142_v39  ;;  %v3054_v30 = vadd.f32 %v12113_v8, %v2847_v24  ;;  %v2851_v59 = vpop.f32.mrf.mxu0  ;;  %15888 = vst [vmem:[#allocation31_spill] sm:$0xff] %v12168_v31  ;;  %v3056_v1 = vadd.f32 %v12116_v28, %v2960_v61  ;;  %v2964_v33 = vpop.f32.mrf.mxu1 }
 0x46f   : > { %v3369_v36 = vadd.f32 %v3305_v25, %v3049_v51  ;;  %v3371_v47 = vadd.f32 %v3307_v13, %v3051_v27  ;;  %v3245_v11 = vmul.f32 %v3181_v14, %v3053_v10  ;;  %v3247_v43 = vmul.f32 %v3183_v58, %v3055_v18 }
 0x470   : > { %v3306_v3 = vmul.f32 0.044715, %v3242_v29  ;;  %v3308_v22 = vmul.f32 0.044715, %v3244_v2  ;;  %v3182_v4 = vmul.f32 %v3054_v30, %v3054_v30  ;;  %v12171_v25 = vmul.f32 0.5, %v3049_v51  ;;  %v2853_v58 = vpop.f32.mrf.mxu0 }
 0x471   : > { %v3433_v16 = vmul.f32 0.7978846, %v3369_v36  ;;  %v3435_v44 = vmul.f32 0.7978846, %v3371_v47  ;;  %v3309_v34 = vmul.f32 0.044715, %v3245_v11  ;;  %v2966_v47 = vpop.f32.mrf.mxu1  ;;  %v3184_v50 = vmul.f32 %v3056_v1, %v3056_v1 }
 0x472   : > { %v12173_v13 = vmul.f32 0.5, %v3051_v27  ;;  %v3311_v24 = vmul.f32 0.044715, %v3247_v43  ;;  %v3370_v5 = vadd.f32 %v3306_v3, %v3050_v41  ;;  %v3246_v2 = vmul.f32 %v3182_v4, %v3054_v30 }
 0x473   : > { %10448 = vtanh.f32 %v3433_v16  ;;  %v3373_v29 = vadd.f32 %v3309_v34, %v3053_v10  ;;  %v3372_v61 = vadd.f32 %v3308_v22, %v12142_v39  ;;  %v3057_v43 = vadd.f32 %v12097_v7, %v2851_v59  ;;  %v2855_v59 = vpop.f32.mrf.mxu0  ;;  %v2968_v41 = vpop.f32.mrf.mxu1 }
 0x474   : > { %10450 = vtanh.f32 %v3435_v44  ;;  %v3375_v36 = vadd.f32 %v3311_v24, %v3055_v18  ;;  %v3310_v27 = vmul.f32 0.044715, %v3246_v2  ;;  %v3059_v34 = vadd.f32 %v12100_v63, %v2964_v33 }
 0x475   : > { %v3437_v11 = vmul.f32 0.7978846, %v3373_v29  ;;  %v3058_v4 = vadd.f32 %v12113_v8, %v2853_v58  ;;  %v3434_v44 = vmul.f32 0.7978846, %v3370_v5  ;;  %v12186_v22 = vmul.f32 0.5, %v12142_v39  ;;  %v2970_v9 = vpop.f32.mrf.mxu1 }
 0x476   : > { %v3439_v16 = vmul.f32 0.7978846, %v3375_v36  ;;  %v12188_v3 = vmul.f32 0.5, %v3053_v10  ;;  %v3248_v24 = vmul.f32 %v3184_v50, %v3056_v1  ;;  %v12190_v29 = vmul.f32 0.5, %v3055_v18 }
 0x477   : > { %10452 = vtanh.f32 %v3437_v11  ;;  %v3185_v2 = vmul.f32 %v3057_v43, %v3057_v43  ;;  %v3187_v14 = vmul.f32 %v3059_v34, %v3059_v34  ;;  %v3436_v51 = vmul.f32 0.7978846, %v3372_v61 }
 0x478   : > { %10454 = vtanh.f32 %v3439_v16  ;;  %v3374_v36 = vadd.f32 %v3310_v27, %v3054_v30  ;;  %v3312_v33 = vmul.f32 0.044715, %v3248_v24  ;;  %v3186_v5 = vmul.f32 %v3058_v4, %v3058_v4  ;;  %v2857_v24 = vpop.f32.mrf.mxu0 }
 0x479   : > { %v3249_v17 = vmul.f32 %v3185_v2, %v3057_v43  ;;  %v3251_v58 = vmul.f32 %v3187_v14, %v3059_v34  ;;  %v3060_v39 = vadd.f32 %v12116_v28, %v2966_v47  ;;  %10456 = vtanh.f32 %v3434_v44 }
 0x47a   : > { %v12193_v10 = vmul.f32 0.5, %v3054_v30  ;;  %v3061_v50 = vadd.f32 %v12097_v7, %v2855_v59  ;;  %v12197_v18 = vadd.f32 %v12100_v63, %v2968_v41  ;;  %v3376_v11 = vadd.f32 %v3312_v33, %v3056_v1 }
 0x47b   : > { %v3313_v57 = vmul.f32 0.044715, %v3249_v17  ;;  %v3315_v19 = vmul.f32 0.044715, %v3251_v58  ;;  %v3250_v61 = vmul.f32 %v3186_v5, %v3058_v4  ;;  %10458 = vtanh.f32 %v3436_v51 }
 0x47c   : > { %v12199_v27 = vmul.f32 0.5, %v3056_v1  ;;  %v3188_v16 = vmul.f32 %v3060_v39, %v3060_v39  ;;  %v3189_v14 = vmul.f32 %v3061_v50, %v3061_v50  ;;  %v3438_v2 = vmul.f32 0.7978846, %v3374_v36 }
 0x47d   : > { %v12201_v47 = vmul.f32 0.5, %v3057_v43  ;;  %v3377_v30 = vadd.f32 %v3313_v57, %v3057_v43  ;;  %v3314_v44 = vmul.f32 0.044715, %v3250_v61  ;;  %v3379_v59 = vadd.f32 %v3315_v19, %v3059_v34  ;;  %v2861_v19 = vpop.f32.mrf.mxu0 }
 0x47e   : > { %v3252_v62 = vmul.f32 %v3188_v16, %v3060_v39  ;;  %v3253_v41 = vmul.f32 %v3189_v14, %v3061_v50  ;;  %v3191_v17 = vmul.f32 %v12197_v18, %v12197_v18  ;;  %v3440_v58 = vmul.f32 0.7978846, %v3376_v11  ;;  %v2974_v11 = vpop.f32.mrf.mxu1 }
 0x47f   : > { %15889 = vst [vmem:[#allocation32_spill] sm:$0xff] %v12201_v47  ;;  %v12205_v51 = vmul.f32 0.5, %v3059_v34  ;;  %v3378_v1 = vadd.f32 %v3314_v44, %v3058_v4  ;;  %v3062_v5 = vadd.f32 %v12113_v8, %v2857_v24  ;;  %v12208_v36 = vmul.f32 0.5, %v3058_v4  ;;  %v2863_v15 = vpop.f32.mrf.mxu0 }
 0x480   : > { %v10449_v33 = vpop.eup %10448  ;;  %v3316_v42 = vmul.f32 0.044715, %v3252_v62  ;;  %v3317_v57 = vmul.f32 0.044715, %v3253_v41  ;;  %v3255_v43 = vmul.f32 %v3191_v17, %v12197_v18  ;;  %10460 = vtanh.f32 %v3438_v2 }
 0x481   : > { %15890 = vst [vmem:[#allocation33_spill] sm:$0xff] %v12205_v51  ;;  %v10451_v56 = vpop.eup %10450  ;;  %15891 = vst [vmem:[#allocation34_spill] sm:$0xff] %v12208_v36  ;;  %v3441_v61 = vmul.f32 0.7978846, %v3377_v30  ;;  %v12211_v16 = vmul.f32 0.5, %v3060_v39  ;;  %v12213_v14 = vmul.f32 0.5, %v3061_v50  ;;  %10462 = vtanh.f32 %v3440_v58 }
 0x482   : > { %v3561_v34 = vadd.f32 1.0, %v10449_v33  ;;  %v3443_v60 = vmul.f32 0.7978846, %v3379_v59  ;;  %v3380_v44 = vadd.f32 %v3316_v42, %v3060_v39  ;;  %v12216_v24 = vmul.f32 0.5, %v12197_v18  ;;  %v2976_v39 = vpop.f32.mrf.mxu1 }
 0x483   : > { %15892 = vst [vmem:[#allocation35_spill] sm:$0xff] %v12211_v16  ;;  %15893 = vst [vmem:[#allocation36_spill] sm:$0xff] %v12213_v14  ;;  %v3563_v4 = vadd.f32 1.0, %v10451_v56  ;;  %v3442_v62 = vmul.f32 0.7978846, %v3378_v1  ;;  %v3190_v41 = vmul.f32 %v3062_v5, %v3062_v5  ;;  %v3381_v17 = vadd.f32 %v3317_v57, %v3061_v50 }
 0x484   : > { %15894 = vst [vmem:[#allocation37_spill] sm:$0xff] %v12216_v24  ;;  %v10453_v26 = vpop.eup %10452  ;;  %v3319_v49 = vmul.f32 0.044715, %v3255_v43  ;;  %v3064_v2 = vadd.f32 %v12116_v28, %v2970_v9  ;;  %v3065_v30 = vadd.f32 %v12097_v7, %v2861_v19  ;;  %10464 = vtanh.f32 %v3441_v61  ;;  %v2978_v14 = vpop.f32.mrf.mxu1 }
 0x485   : > { %v10455_v51 = vpop.eup %10454  ;;  %v3444_v33 = vmul.f32 0.7978846, %v3380_v44  ;;  %v3254_v59 = vmul.f32 %v3190_v41, %v3062_v5  ;;  %v3067_v42 = vadd.f32 %v12100_v63, %v2974_v11  ;;  %v12222_v56 = vmul.f32 %v3561_v34, %v12171_v25  ;;  %v2865_v41 = vpop.f32.mrf.mxu0 }
 0x486   : > { %10466 = vtanh.f32 %v3443_v60  ;;  %v12224_v58 = vmul.f32 0.5, %v3062_v5  ;;  %v3192_v50 = vmul.f32 %v3064_v2, %v3064_v2  ;;  %v12226_v1 = vpop.eup %10456  ;;  %v12229_v9 = vmul.f32 %v3563_v4, %v12173_v13 }
 0x487   : > { %v3565_v57 = vadd.f32 1.0, %v10453_v26  ;;  %10468 = vtanh.f32 %v3442_v62  ;;  %v3318_v43 = vmul.f32 0.044715, %v3254_v59  ;;  %v3445_v19 = vmul.f32 0.7978846, %v3381_v17  ;;  %v2867_v16 = vpop.f32.mrf.mxu0 }
 0x488   : > { %15895 = vst [vmem:[#allocation38_spill] sm:$0xff] %v12224_v58  ;;  %v3383_v61 = vadd.f32 %v3319_v49, %v12197_v18  ;;  %v3256_v11 = vmul.f32 %v3192_v50, %v3064_v2  ;;  %v3193_v44 = vmul.f32 %v3065_v30, %v3065_v30  ;;  %v12232_v25 = vpop.eup %10458  ;;  %v3567_v60 = vadd.f32 1.0, %v10455_v51 }
 0x489   : > { %10470 = vtanh.f32 %v3444_v33  ;;  %v12234_v34 = vmul.f32 0.5, %v3064_v2  ;;  %v3195_v24 = vmul.f32 %v3067_v42, %v3067_v42  ;;  %v3066_v26 = vadd.f32 %v12113_v8, %v2863_v15 }
 0x48a   : > { %v3320_v47 = vmul.f32 0.044715, %v3256_v11  ;;  %v3257_v13 = vmul.f32 %v3193_v44, %v3065_v30  ;;  %v3068_v4 = vadd.f32 %v12116_v28, %v2976_v39  ;;  %v12239_v62 = vmul.f32 %v3565_v57, %v12188_v3 }
 0x48b   : > { %15896 = vst [vmem:[#allocation39_spill] sm:$0xff] %v12234_v34  ;;  %v3382_v49 = vadd.f32 %v3318_v43, %v3062_v5  ;;  %v3259_v18 = vmul.f32 %v3195_v24, %v3067_v42  ;;  %v3069_v17 = vadd.f32 %v12097_v7, %v2865_v41  ;;  %v3447_v59 = vmul.f32 0.7978846, %v3383_v61 }
 0x48c   : > { %v3321_v51 = vmul.f32 0.044715, %v3257_v13  ;;  %v3194_v33 = vmul.f32 %v3066_v26, %v3066_v26  ;;  %v3071_v50 = vadd.f32 %v12100_v63, %v2978_v14  ;;  %10472 = vtanh.f32 %v3445_v19  ;;  %v2980_v13 = vpop.f32.mrf.mxu1 }
 0x48d   : > { %v3384_v34 = vadd.f32 %v3320_v47, %v3064_v2  ;;  %v3323_v11 = vmul.f32 0.044715, %v3259_v18  ;;  %v3196_v44 = vmul.f32 %v3068_v4, %v3068_v4  ;;  %v12243_v15 = vpop.eup %10460  ;;  %v12246_v39 = vmul.f32 %v3567_v60, %v12190_v29 }
 0x48e   : > { %v12248_v3 = vmul.f32 0.5, %v3065_v30  ;;  %v3385_v5 = vadd.f32 %v3321_v51, %v3065_v30  ;;  %v3258_v24 = vmul.f32 %v3194_v33, %v3066_v26  ;;  %v3446_v57 = vmul.f32 0.7978846, %v3382_v49  ;;  %v12250_v14 = vpop.eup %10462 }
 0x48f   : > { %v3387_v43 = vadd.f32 %v3323_v11, %v3067_v42  ;;  %v3260_v61 = vmul.f32 %v3196_v44, %v3068_v4  ;;  %v3197_v41 = vmul.f32 %v3069_v17, %v3069_v17  ;;  %10474 = vtanh.f32 %v3447_v59 }
 0x490   : > { %15897 = vst [vmem:[#allocation40_spill] sm:$0xff] %v12248_v3  ;;  %v12252_v47 = vmul.f32 0.5, %v3067_v42  ;;  %v3322_v2 = vmul.f32 0.044715, %v3258_v24  ;;  %v3199_v19 = vmul.f32 %v3071_v50, %v3071_v50  ;;  %v3448_v18 = vmul.f32 0.7978846, %v3384_v34  ;;  %v2871_v3 = vpop.f32.mrf.mxu0  ;;  %v2984_v24 = vpop.f32.mrf.mxu1 }
 0x491   : > { %v3324_v31 = vmul.f32 0.044715, %v3260_v61  ;;  %v3261_v29 = vmul.f32 %v3197_v41, %v3069_v17  ;;  %v3070_v60 = vadd.f32 %v12113_v8, %v2867_v16  ;;  %v12255_v30 = vpop.eup %10464  ;;  %v3449_v49 = vmul.f32 0.7978846, %v3385_v5 }
 0x492   : > { %15898 = vst [vmem:[#allocation41_spill] sm:$0xff] %v12252_v47  ;;  %15899 = vst [vmem:[#allocation42_spill] sm:$0xff] %v12255_v30  ;;  %v12257_v51 = vmul.f32 0.5, %v3066_v26  ;;  %v3263_v33 = vmul.f32 %v3199_v19, %v3071_v50  ;;  %v3072_v11 = vadd.f32 %v12116_v28, %v2980_v13  ;;  %10476 = vtanh.f32 %v3446_v57  ;;  %v2873_v30 = vpop.f32.mrf.mxu0 }
 0x493   : > { %v12260_v44 = vpop.eup %10466  ;;  %v3451_v42 = vmul.f32 0.7978846, %v3387_v43  ;;  %v12262_v59 = vmul.f32 0.5, %v3068_v4  ;;  %v3325_v34 = vmul.f32 0.044715, %v3261_v29  ;;  %v3386_v16 = vadd.f32 %v3322_v2, %v3066_v26 }
 0x494   : > { %15900 = vst [vmem:[#allocation43_spill] sm:$0xff] %v12257_v51  ;;  %15901 = vst [vmem:[#allocation44_spill] sm:$0xff] %v12260_v44  ;;  %v12264_v61 = vpop.eup %10468  ;;  %v12266_v41 = vmul.f32 0.5, %v3069_v17  ;;  %v3327_v47 = vmul.f32 0.044715, %v3263_v33  ;;  %v3198_v5 = vmul.f32 %v3070_v60, %v3070_v60  ;;  %10478 = vtanh.f32 %v3448_v18  ;;  %v2875_v36 = vpop.f32.mrf.mxu0 }
 0x495   : > { %15902 = vst [vmem:[#allocation45_spill] sm:$0xff] %v12262_v59  ;;  %v3388_v51 = vadd.f32 %v3324_v31, %v3068_v4  ;;  %v3200_v19 = vmul.f32 %v3072_v11, %v3072_v11  ;;  %v3073_v13 = vadd.f32 %v12097_v7, %v2871_v3  ;;  %10480 = vtanh.f32 %v3449_v49 }
 0x496   : > { %15903 = vst [vmem:[#allocation46_spill] sm:$0xff] %v12266_v41  ;;  %v12269_v44 = vpop.eup %10470  ;;  %v12271_v57 = vmul.f32 0.5, %v3071_v50  ;;  %v3262_v43 = vmul.f32 %v3198_v5, %v3070_v60  ;;  %v3075_v29 = vadd.f32 %v12100_v63, %v2984_v24  ;;  %10482 = vtanh.f32 %v3451_v42  ;;  %v2986_v41 = vpop.f32.mrf.mxu1 }
 0x497   : > { %15904 = vst [vmem:[#allocation47_spill] sm:$0xff] %v12269_v44  ;;  %v3389_v26 = vadd.f32 %v3325_v34, %v3069_v17  ;;  %v12274_v2 = vmul.f32 0.5, %v3070_v60  ;;  %v3264_v33 = vmul.f32 %v3200_v19, %v3072_v11  ;;  %v3450_v18 = vmul.f32 0.7978846, %v3386_v16 }
 0x498   : > { %15905 = vst [vmem:[#allocation48_spill] sm:$0xff] %v12271_v57  ;;  %v3391_v31 = vadd.f32 %v3327_v47, %v3071_v50  ;;  %v3326_v4 = vmul.f32 0.044715, %v3262_v43  ;;  %v3201_v59 = vmul.f32 %v3073_v13, %v3073_v13  ;;  %v3452_v3 = vmul.f32 0.7978846, %v3388_v51  ;;  %v2988_v47 = vpop.f32.mrf.mxu1 }
 0x499   : > { %15906 = vst [vmem:[#allocation49_spill] sm:$0xff] %v12274_v2  ;;  %v3328_v52 = vmul.f32 0.044715, %v3264_v33  ;;  %v3203_v58 = vmul.f32 %v3075_v29, %v3075_v29  ;;  %v3074_v49 = vadd.f32 %v12113_v8, %v2873_v30  ;;  %v12277_v57 = vpop.eup %10472  ;;  %v12279_v24 = vmul.f32 0.5, %v3072_v11 }
 0x49a   : > { %15907 = vst [vmem:[#allocation50_spill] sm:$0xff] %v12277_v57  ;;  %v3390_v5 = vadd.f32 %v3326_v4, %v3070_v60  ;;  %v3265_v17 = vmul.f32 %v3201_v59, %v3073_v13  ;;  %v3076_v42 = vadd.f32 %v12116_v28, %v2986_v41  ;;  %v3453_v34 = vmul.f32 0.7978846, %v3389_v26  ;;  %v2877_v59 = vpop.f32.mrf.mxu0 }
 0x49b   : > { %15908 = vst [vmem:[#allocation51_spill] sm:$0xff] %v12279_v24  ;;  %v3392_v19 = vadd.f32 %v3328_v52, %v3072_v11  ;;  %v3267_v16 = vmul.f32 %v3203_v58, %v3075_v29  ;;  %v3202_v50 = vmul.f32 %v3074_v49, %v3074_v49  ;;  %10484 = vtanh.f32 %v3450_v18 }
 0x49c   : > { %v3455_v51 = vmul.f32 0.7978846, %v3391_v31  ;;  %v3329_v43 = vmul.f32 0.044715, %v3265_v17  ;;  %v3204_v33 = vmul.f32 %v3076_v42, %v3076_v42  ;;  %v12282_v2 = vpop.eup %10474  ;;  %10486 = vtanh.f32 %v3452_v3  ;;  %v2990_v31 = vpop.f32.mrf.mxu1 }
 0x49d   : > { %15909 = vst [vmem:[#allocation52_spill] sm:$0xff] %v12282_v2  ;;  %v12284_v30 = vmul.f32 0.5, %v3073_v13  ;;  %v3266_v60 = vmul.f32 %v3202_v50, %v3074_v49  ;;  %v3077_v4 = vadd.f32 %v12097_v7, %v2875_v36  ;;  %v3454_v24 = vmul.f32 0.7978846, %v3390_v5 }
 0x49e   : > { %v3331_v41 = vmul.f32 0.044715, %v3267_v16  ;;  %v3268_v26 = vmul.f32 %v3204_v33, %v3076_v42  ;;  %v3079_v52 = vadd.f32 %v12100_v63, %v2988_v47  ;;  %10488 = vtanh.f32 %v3453_v34  ;;  %v2881_v47 = vpop.f32.mrf.mxu0 }
 0x49f   : > { %15910 = vst [vmem:[#allocation53_spill] sm:$0xff] %v12284_v30  ;;  %v3456_v58 = vmul.f32 0.7978846, %v3392_v19  ;;  %v12288_v11 = vmul.f32 0.5, %v3075_v29  ;;  %v3330_v18 = vmul.f32 0.044715, %v3266_v60  ;;  %v12290_v17 = vpop.eup %10476  ;;  %10490 = vtanh.f32 %v3455_v51 }
 0x4a0   : > { %v3393_v3 = vadd.f32 %v3329_v43, %v3073_v13  ;;  %v3332_v30 = vmul.f32 0.044715, %v3268_v26  ;;  %v3205_v50 = vmul.f32 %v3077_v4, %v3077_v4  ;;  %v12292_v2 = vmul.f32 0.5, %v3074_v49  ;;  %v2994_v26 = vpop.f32.mrf.mxu1 }
 0x4a1   : > { %15911 = vst [vmem:[#allocation54_spill] sm:$0xff] %v12288_v11  ;;  %v12294_v36 = vmul.f32 0.5, %v3076_v42  ;;  %v3207_v5 = vmul.f32 %v3079_v52, %v3079_v52  ;;  %v3078_v16 = vadd.f32 %v12113_v8, %v2877_v59  ;;  %v12297_v34 = vpop.eup %10478  ;;  %10492 = vtanh.f32 %v3454_v24 }
 0x4a2   : > { %15912 = vst [vmem:[#allocation55_spill] sm:$0xff] %v12292_v2  ;;  %15914 = vst [vmem:[#allocation57_spill] sm:$0xff] %v12297_v34  ;;  %v3395_v19 = vadd.f32 %v3331_v41, %v3075_v29  ;;  %v3269_v33 = vmul.f32 %v3205_v50, %v3077_v4  ;;  %v3080_v60 = vadd.f32 %v12116_v28, %v2990_v31  ;;  %v12300_v11 = vpop.eup %10480  ;;  %10494 = vtanh.f32 %v3456_v58  ;;  %v2883_v31 = vpop.f32.mrf.mxu0 }
 0x4a3   : > { %15913 = vst [vmem:[#allocation56_spill] sm:$0xff] %v12294_v36  ;;  %15915 = vst [vmem:[#allocation58_spill] sm:$0xff] %v12300_v11  ;;  %v3394_v13 = vadd.f32 %v3330_v18, %v3074_v49  ;;  %v12302_v51 = vmul.f32 0.5, %v3077_v4  ;;  %v3271_v43 = vmul.f32 %v3207_v5, %v3079_v52  ;;  %v12304_v36 = vpop.eup %10482  ;;  %v3457_v2 = vmul.f32 0.7978846, %v3393_v3  ;;  %v2996_v3 = vpop.f32.mrf.mxu1 }
 0x4a4   : > { %15917 = vst [vmem:[#allocation60_spill] sm:$0xff] %v12304_v36  ;;  %v3396_v59 = vadd.f32 %v3332_v30, %v3076_v42  ;;  %v3333_v57 = vmul.f32 0.044715, %v3269_v33  ;;  %v3206_v44 = vmul.f32 %v3078_v16, %v3078_v16  ;;  %v12306_v34 = vmul.f32 0.5, %v3079_v52 }
 0x4a5   : > { %15916 = vst [vmem:[#allocation59_spill] sm:$0xff] %v12302_v51  ;;  %v3335_v29 = vmul.f32 0.044715, %v3271_v43  ;;  %v3208_v24 = vmul.f32 %v3080_v60, %v3080_v60  ;;  %v3081_v41 = vadd.f32 %v12097_v7, %v2881_v47  ;;  %v3459_v50 = vmul.f32 0.7978846, %v3395_v19 }
 0x4a6   : > { %15918 = vst [vmem:[#allocation61_spill] sm:$0xff] %v12306_v34  ;;  %v3397_v58 = vadd.f32 %v3333_v57, %v3077_v4  ;;  %v3270_v49 = vmul.f32 %v3206_v44, %v3078_v16  ;;  %v3083_v18 = vadd.f32 %v12100_v63, %v2994_v26  ;;  %v3458_v5 = vmul.f32 0.7978846, %v3394_v13  ;;  %v2885_v57 = vpop.f32.mrf.mxu0 }
 0x4a7   : > { %v3399_v51 = vadd.f32 %v3335_v29, %v3079_v52  ;;  %v3272_v11 = vmul.f32 %v3208_v24, %v3080_v60  ;;  %v3209_v36 = vmul.f32 %v3081_v41, %v3081_v41  ;;  %10496 = vtanh.f32 %v3457_v2  ;;  %v2998_v29 = vpop.f32.mrf.mxu1 }
 0x4a8   : > { %v3460_v42 = vmul.f32 0.7978846, %v3396_v59  ;;  %v3334_v30 = vmul.f32 0.044715, %v3270_v49  ;;  %v3211_v33 = vmul.f32 %v3083_v18, %v3083_v18  ;;  %v12310_v34 = vpop.eup %10484  ;;  %v3461_v43 = vmul.f32 0.7978846, %v3397_v58 }
 0x4a9   : > { %v3336_v55 = vmul.f32 0.044715, %v3272_v11  ;;  %v3273_v47 = vmul.f32 %v3209_v36, %v3081_v41  ;;  %v3082_v19 = vadd.f32 %v12113_v8, %v2883_v31  ;;  %v12313_v44 = vpop.eup %10486  ;;  %10498 = vtanh.f32 %v3459_v50 }
 0x4aa   : > { %v3398_v4 = vadd.f32 %v3334_v30, %v3078_v16  ;;  %v3275_v52 = vmul.f32 %v3211_v33, %v3083_v18  ;;  %v3084_v13 = vadd.f32 %v12116_v28, %v2996_v3  ;;  %10500 = vtanh.f32 %v3458_v5 }
 0x4ab   : > { %v3463_v2 = vmul.f32 0.7978846, %v3399_v51  ;;  %v12316_v26 = vmul.f32 0.5, %v3078_v16  ;;  %v3337_v59 = vmul.f32 0.044715, %v3273_v47  ;;  %v12318_v24 = vpop.eup %10488  ;;  %10502 = vtanh.f32 %v3460_v42  ;;  %v2887_v51 = vpop.f32.mrf.mxu0 }
 0x4ac   : > { %15920 = vst [vmem:[#allocation63_spill] sm:$0xff] %v12318_v24  ;;  %v12320_v11 = vmul.f32 0.5, %v3080_v60  ;;  %v3400_v36 = vadd.f32 %v3336_v55, %v3080_v60  ;;  %v3210_v31 = vmul.f32 %v3082_v19, %v3082_v19  ;;  %v12322_v58 = vpop.eup %10490  ;;  %10504 = vtanh.f32 %v3461_v43 }
 0x4ad   : > { %15919 = vst [vmem:[#allocation62_spill] sm:$0xff] %v12316_v26  ;;  %15922 = vst [vmem:[#allocation65_spill] sm:$0xff] %v12322_v58  ;;  %v12324_v50 = vmul.f32 0.5, %v3081_v41  ;;  %v3212_v49 = vmul.f32 %v3084_v13, %v3084_v13  ;;  %v3085_v5 = vadd.f32 %v12097_v7, %v2885_v57  ;;  %v3462_v16 = vmul.f32 0.7978846, %v3398_v4  ;;  %v2891_v24 = vpop.f32.mrf.mxu0 }
 0x4ae   : > { %15921 = vst [vmem:[#allocation64_spill] sm:$0xff] %v12320_v11  ;;  %v3339_v3 = vmul.f32 0.044715, %v3275_v52  ;;  %v3274_v30 = vmul.f32 %v3210_v31, %v3082_v19  ;;  %v3087_v33 = vadd.f32 %v12100_v63, %v2998_v29  ;;  %v12328_v47 = vpop.eup %10492  ;;  %10506 = vtanh.f32 %v3463_v2  ;;  %v3000_v11 = vpop.f32.mrf.mxu1 }
 0x4af   : > { %15923 = vst [vmem:[#allocation66_spill] sm:$0xff] %v12324_v50  ;;  %v3401_v42 = vadd.f32 %v3337_v59, %v3081_v41  ;;  %v12330_v55 = vmul.f32 0.5, %v3083_v18  ;;  %v3276_v60 = vmul.f32 %v3212_v49, %v3084_v13  ;;  %v12332_v43 = vpop.eup %10494  ;;  %v3464_v50 = vmul.f32 0.7978846, %v3400_v36 }
 0x4b0   : > { %15925 = vst [vmem:[#allocation68_spill] sm:$0xff] %v12332_v43  ;;  %v12334_v26 = vmul.f32 0.5, %v3082_v19  ;;  %v3338_v57 = vmul.f32 0.044715, %v3274_v30  ;;  %v3213_v58 = vmul.f32 %v3085_v5, %v3085_v5  ;;  %v12336_v4 = vmul.f32 0.5, %v3084_v13 }
 0x4b1   : > { %15924 = vst [vmem:[#allocation67_spill] sm:$0xff] %v12330_v55  ;;  %v3340_v52 = vmul.f32 0.044715, %v3276_v60  ;;  %v3215_v31 = vmul.f32 %v3087_v33, %v3087_v33  ;;  %v3086_v29 = vadd.f32 %v12113_v8, %v2887_v51  ;;  %10508 = vtanh.f32 %v3462_v16 }
 0x4b2   : > { %15926 = vst [vmem:[#allocation69_spill] sm:$0xff] %v12334_v26  ;;  %15927 = vst [vmem:[#allocation70_spill] sm:$0xff] %v12336_v4  ;;  %v3403_v41 = vadd.f32 %v3339_v3, %v3083_v18  ;;  %v3277_v2 = vmul.f32 %v3213_v58, %v3085_v5  ;;  %v12340_v59 = vadd.f32 %v12116_v28, %v3000_v11  ;;  %v3465_v49 = vmul.f32 0.7978846, %v3401_v42  ;;  %v3004_v11 = vpop.f32.mrf.mxu1  ;;  %v2893_v3 = vpop.f32.mrf.mxu0 }
 0x4b3   : > { %v3402_v55 = vadd.f32 %v3338_v57, %v3082_v19  ;;  %v3279_v36 = vmul.f32 %v3215_v31, %v3087_v33  ;;  %v3214_v43 = vmul.f32 %v3086_v29, %v3086_v29  ;;  %10510 = vtanh.f32 %v3464_v50 }
 0x4b4   : > { %v3404_v30 = vadd.f32 %v3340_v52, %v3084_v13  ;;  %v3341_v26 = vmul.f32 0.044715, %v3277_v2  ;;  %v3216_v60 = vmul.f32 %v12340_v59, %v12340_v59  ;;  %v12344_v4 = vpop.eup %10496  ;;  %v12346_v51 = vmul.f32 0.5, %v3085_v5 }
 0x4b5   : > { %v3343_v16 = vmul.f32 0.044715, %v3279_v36  ;;  %v3278_v18 = vmul.f32 %v3214_v43, %v3086_v29  ;;  %v3562_v58 = vadd.f32 1.0, %v12226_v1  ;;  %v3467_v42 = vmul.f32 0.7978846, %v3403_v41 }
 0x4b6   : > { %15928 = vst [vmem:[#allocation71_spill] sm:$0xff] %v12346_v51  ;;  %v3405_v19 = vadd.f32 %v3341_v26, %v3085_v5  ;;  %v3280_v57 = vmul.f32 %v3216_v60, %v12340_v59  ;;  %v3566_v13 = vadd.f32 1.0, %v12243_v15  ;;  %v12351_v50 = vpop.eup %10498  ;;  %10512 = vtanh.f32 %v3465_v49  ;;  %v3006_v49 = vpop.f32.mrf.mxu1 }
 0x4b7   : > { %v3466_v52 = vmul.f32 0.7978846, %v3402_v55  ;;  %v12353_v31 = vmul.f32 0.5, %v3087_v33  ;;  %v3342_v2 = vmul.f32 0.044715, %v3278_v18  ;;  %v12355_v51 = vpop.eup %10500  ;;  %v3626_v1 = vmul.f32 %v3562_v58, %v12181_v38  ;;  %v2895_v18 = vpop.f32.mrf.mxu0 }
 0x4b8   : > { %v3468_v43 = vmul.f32 0.7978846, %v3404_v30  ;;  %v3630_v36 = vmul.f32 %v3566_v13, %v12193_v10  ;;  %v3564_v26 = vadd.f32 1.0, %v12232_v25  ;;  %v12360_v5 = vpop.eup %10502  ;;  %v3469_v41 = vmul.f32 0.7978846, %v3405_v19 }
 0x4b9   : > { %15929 = vst [vmem:[#allocation72_spill] sm:$0xff] %v12353_v31  ;;  %v3407_v15 = vadd.f32 %v3343_v16, %v3087_v33  ;;  %v3568_v60 = vadd.f32 1.0, %v12250_v14  ;;  %v12364_v55 = vadd.f32 %v12097_v7, %v2891_v24  ;;  %v12366_v31 = vpop.eup %10504  ;;  %10514 = vtanh.f32 %v3467_v42 }
 0x4ba   : > { %v12368_v30 = vmul.f32 0.5, %v3086_v29  ;;  %v3344_v38 = vmul.f32 0.044715, %v3280_v57  ;;  %v12370_v10 = vpack.c.bf16 %v3630_v36, %v3626_v1  ;;  %10516 = vtanh.f32 %v3466_v52  ;;  %v2897_v57 = vpop.f32.mrf.mxu0 }
 0x4bb   : > { %v3406_v25 = vadd.f32 %v3342_v2, %v3086_v29  ;;  %v3628_v58 = vmul.f32 %v3564_v26, %v12186_v22  ;;  %v3632_v33 = vmul.f32 %v3568_v60, %v12199_v27  ;;  %v12374_v14 = vpop.eup %10506  ;;  %10518 = vtanh.f32 %v3468_v43  ;;  %v3008_v27 = vpop.f32.mrf.mxu1 }
 0x4bc   : > { %15930 = vst [vmem:[#allocation73_spill] sm:$0xff] %v12370_v10  ;;  %5331 = vmatprep.mubr.bf16.mxu0 %v12370_v10  ;;  %v3217_v24 = vmul.f32 %v12364_v55, %v12364_v55  ;;  %v3091_v16 = vadd.f32 %v12100_v63, %v3004_v11  ;;  %v12382_v42 = vpack.c.bf16 %v12239_v62, %v12222_v56  ;;  %10520 = vtanh.f32 %v3469_v41 }
 0x4bd   : > { %v3471_v29 = vmul.f32 0.7978846, %v3407_v15  ;;  %v12384_v19 = vpack.c.bf16 %v3632_v33, %v3628_v58  ;;  %v3090_v22 = vadd.f32 %v12113_v8, %v2893_v3  ;;  %v3408_v13 = vadd.f32 %v3344_v38, %v12340_v59 }
 0x4be   : > { %15931 = vst [vmem:[#allocation74_spill] sm:$0xff] %v12382_v42  ;;  %v3281_v52 = vmul.f32 %v3217_v24, %v12364_v55  ;;  %v3219_v2 = vmul.f32 %v3091_v16, %v3091_v16  ;;  %5332 = vmatmul.mubr.bf16.vlgmr.msra.gmra.mxu0 %v12382_v42  ;;  %v12392_v11 = vpack.c.bf16 %v12246_v39, %v12229_v9  ;;  %v12394_v56 = vpop.eup %10508  ;;  %v3470_v62 = vmul.f32 0.7978846, %v3406_v25 }
 0x4bf   : > { %15932 = vst [vmem:[#allocation75_spill] sm:$0xff] %v12384_v19  ;;  %5444 = vmatprep.mubr.bf16.mxu1 %v12384_v19  ;;  %v15934_v3 = vcombine.low %v12069_v54, %v12071_v35  ;;  %v3218_v43 = vmul.f32 %v3090_v22, %v3090_v22  ;;  %v3092_v1 = vadd.f32 %v12116_v28, %v3006_v49  ;;  %10522 = vtanh.f32 %v3471_v29  ;;  %v3010_v29 = vpop.f32.mrf.mxu1 }
 0x4c0   : > { %15933 = vst [vmem:[#allocation76_spill] sm:$0xff] %v12392_v11  ;;  %v12402_v36 = vadd.f32 %v12097_v7, %v2895_v18  ;;  %v3345_v26 = vmul.f32 0.044715, %v3281_v52  ;;  %v3283_v41 = vmul.f32 %v3219_v2, %v3091_v16  ;;  %5445 = vmatmul.mubr.bf16.vlgmr.msra.gmra.mxu1 %v12392_v11  ;;  %v15935_v9 = vcombine.high %v12094_v37, %v12102_v23  ;;  %v12412_v54 = vpop.eup %10510 }
 0x4c1   : > { %5526 = vmatpush1.bf16.msra.mxu0 %v15934_v3  ;;  %v3095_v39 = vadd.f32 %v12100_v63, %v3008_v27  ;;  %v12410_v15 = vadd.f32 %v12113_v8, %v2897_v57  ;;  %v12415_v35 = vmul.f32 0.5, %v12340_v59  ;;  %v15936_v60 = vcombine.low %v12077_v20, %v12079_v21 }
 0x4c2   : > { %5527 = vmatprep.subr.bf16.mxu0 %v15935_v9  ;;  %v3282_v49 = vmul.f32 %v3218_v43, %v3090_v22  ;;  %v3220_v18 = vmul.f32 %v3092_v1, %v3092_v1  ;;  %v3472_v38 = vmul.f32 0.7978846, %v3408_v13  ;;  %v3409_v25 = vadd.f32 %v3345_v26, %v12364_v55 }
 0x4c3   : > { %5639 = vmatpush1.bf16.msra.mxu1 %v15936_v60  ;;  %v3347_v58 = vmul.f32 0.044715, %v3283_v41  ;;  %v3221_v33 = vmul.f32 %v12402_v36, %v12402_v36  ;;  %v15937_v24 = vcombine.high %v12104_v53, %v12106_v45  ;;  %10524 = vtanh.f32 %v3470_v62  ;;  %v12429_v21 = vpop.eup %10512 }
 0x4c4   : > { %v3346_v59 = vmul.f32 0.044715, %v3282_v49  ;;  %v3284_v27 = vmul.f32 %v3220_v18, %v3092_v1  ;;  %v3223_v57 = vmul.f32 %v3095_v39, %v3095_v39  ;;  %v15938_v20 = vcombine.low %v12094_v37, %v12102_v23 }
 0x4c5   : > { %5640 = vmatprep.subr.bf16.mxu1 %v15937_v24  ;;  %v3473_v13 = vmul.f32 0.7978846, %v3409_v25  ;;  %v3411_v52 = vadd.f32 %v3347_v58, %v3091_v16  ;;  %v3285_v2 = vmul.f32 %v3221_v33, %v12402_v36  ;;  %v3222_v3 = vmul.f32 %v12410_v15, %v12410_v15 }
 0x4c6   : > { %5528 = vmatpush1.bf16.msra.mxu0 %v15938_v20  ;;  %v15939_v43 = vcombine.high %v12108_v0, %v12110_v6  ;;  %v3410_v62 = vadd.f32 %v3346_v59, %v3090_v22  ;;  %v3348_v26 = vmul.f32 0.044715, %v3284_v27  ;;  %v3287_v41 = vmul.f32 %v3223_v57, %v3095_v39  ;;  %v12450_v25 = vpop.eup %10514 }
 0x4c7   : > { %v15940_v37 = vcombine.low %v12104_v53, %v12106_v45  ;;  %v12441_v23 = vadd.f32 %v12116_v28, %v3010_v29  ;;  %10526 = vtanh.f32 %v3472_v38  ;;  %v12444_v9 = vmul.f32 0.5, %v12364_v55  ;;  %v12457_v55 = vpop.eup %10516 }
 0x4c8   : > { %5529 = vmatprep.subr.bf16.mxu0 %v15939_v43  ;;  %v3349_v60 = vmul.f32 0.044715, %v3285_v2  ;;  %v3286_v49 = vmul.f32 %v3222_v3, %v12410_v15  ;;  %v15942_v18 = vcombine.high %v12120_v32, %v12122_v40  ;;  %v12452_v58 = vmul.f32 0.5, %v3091_v16  ;;  %v12467_v57 = vpop.eup %10518 }
 0x4c9   : > { %5641 = vmatpush1.bf16.msra.mxu1 %v15940_v37  ;;  %15941 = vst [vmem:[#allocation77_spill] sm:$0xff] %v12444_v9  ;;  %v3475_v53 = vmul.f32 0.7978846, %v3411_v52  ;;  %v3412_v45 = vadd.f32 %v3348_v26, %v3092_v1  ;;  %v3351_v33 = vmul.f32 0.044715, %v3287_v41  ;;  %v15944_v38 = vcombine.low %v12108_v0, %v12110_v6  ;;  %v3014_v52 = vpop.f32.mrf.mxu1  ;;  %v12475_v3 = vpop.eup %10520  ;;  %v16001_v9 = vld [vmem:[#allocation48_spill] sm:$0xff] }
 0x4ca   : > { %5642 = vmatprep.subr.bf16.mxu1 %v15942_v18  ;;  %15943 = vst [vmem:[#allocation78_spill] sm:$0xff] %v12452_v58  ;;  %v12459_v24 = vmul.f32 0.5, %v3090_v22  ;;  %v3413_v29 = vadd.f32 %v3349_v60, %v12402_v36  ;;  %v3350_v59 = vmul.f32 0.044715, %v3286_v49  ;;  %v3224_v27 = vmul.f32 %v12441_v23, %v12441_v23  ;;  %v2901_v22 = vpop.f32.mrf.mxu0 }
 0x4cb   : > { %5530 = vmatpush1.bf16.msra.mxu0 %v15944_v38  ;;  %v15945_v16 = vcombine.high %v12136_v46, %v12138_v12  ;;  %10528 = vtanh.f32 %v3473_v13  ;;  %v3474_v20 = vmul.f32 0.7978846, %v3410_v62  ;;  %v12469_v0 = vmul.f32 0.5, %v3092_v1  ;;  %v15947_v13 = vld [vmem:[#allocation29_spill] sm:$0xff] }
 0x4cc   : > { %v3570_v6 = vadd.f32 1.0, %v12264_v61  ;;  %v15946_v2 = vcombine.low %v12120_v32, %v12122_v40  ;;  %v3476_v43 = vmul.f32 0.7978846, %v3412_v45  ;;  %v3415_v26 = vadd.f32 %v3351_v33, %v3095_v39  ;;  %v15951_v32 = vld [vmem:[#allocation47_spill] sm:$0xff]  ;;  %v15954_v33 = vld [vmem:[#allocation38_spill] sm:$0xff] }
 0x4cd   : > { %5531 = vmatprep.subr.bf16.mxu0 %v15945_v16  ;;  %v3288_v41 = vmul.f32 %v3224_v27, %v12441_v23  ;;  %v3574_v37 = vadd.f32 1.0, %v12290_v17  ;;  %v15948_v1 = vcombine.high %v12148_v48, %v15947_v13  ;;  %10530 = vtanh.f32 %v3475_v53  ;;  %v15953_v17 = vld [vmem:[#allocation34_spill] sm:$0xff]  ;;  %v15956_v53 = vld [vmem:[#allocation31_spill] sm:$0xff] }
 0x4ce   : > { %5643 = vmatpush1.bf16.msra.mxu1 %v15946_v2  ;;  %v12483_v61 = vmul.f32 0.5, %v12402_v36  ;;  %v12485_v62 = vmul.f32 0.5, %v3095_v39  ;;  %v3572_v40 = vadd.f32 1.0, %v15951_v32  ;;  %v15952_v60 = vcombine.low %v12136_v46, %v12138_v12  ;;  %v15955_v27 = vld [vmem:[#allocation30_spill] sm:$0xff]  ;;  %v15958_v39 = vld [vmem:[#allocation57_spill] sm:$0xff]  ;;  %v2903_v32 = vpop.f32.mrf.mxu0  ;;  %v3016_v46 = vpop.f32.mrf.mxu1 }
 0x4cf   : > { %5644 = vmatprep.subr.bf16.mxu1 %v15948_v1  ;;  %v3477_v49 = vmul.f32 0.7978846, %v3413_v29  ;;  %v3414_v18 = vadd.f32 %v3350_v59, %v12410_v15  ;;  %v3634_v45 = vmul.f32 %v3570_v6, %v15953_v17  ;;  %v3638_v38 = vmul.f32 %v3574_v37, %v15954_v33  ;;  %v12502_v29 = vpop.eup %10522 }
 0x4d0   : > { %15949 = vst [vmem:[#allocation29_spill] sm:$0xff] %v12483_v61  ;;  %15950 = vst [vmem:[#allocation79_spill] sm:$0xff] %v12485_v62  ;;  %5532 = vmatpush1.bf16.msra.mxu0 %v15952_v60  ;;  %v15957_v16 = vcombine.high %v15955_v27, %v15956_v53  ;;  %10532 = vtanh.f32 %v3474_v20  ;;  %v3352_v36 = vmul.f32 0.044715, %v3288_v41  ;;  %v3576_v2 = vadd.f32 1.0, %v15958_v39  ;;  %v15961_v20 = vld [vmem:[#allocation35_spill] sm:$0xff] }
 0x4d1   : > { %v3097_v1 = vadd.f32 %v12097_v7, %v2901_v22  ;;  %v15959_v12 = vcombine.low %v12148_v48, %v15947_v13  ;;  %10534 = vtanh.f32 %v3476_v43  ;;  %v3479_v59 = vmul.f32 0.7978846, %v3415_v26  ;;  %v15962_v60 = vld [vmem:[#allocation39_spill] sm:$0xff]  ;;  %v15963_v22 = vld [vmem:[#allocation42_spill] sm:$0xff]  ;;  %v12513_v48 = vpop.eup %10524 }
 0x4d2   : > { %5533 = vmatprep.subr.bf16.mxu0 %v15957_v16  ;;  %v12504_v6 = vpack.c.bf16 %v3638_v38, %v3634_v45  ;;  %v3099_v37 = vadd.f32 %v12100_v63, %v3014_v52  ;;  %v3636_v41 = vmul.f32 %v3572_v40, %v15961_v20  ;;  %v3640_v17 = vmul.f32 %v3576_v2, %v15962_v60  ;;  %v15965_v13 = vld [vmem:[#allocation50_spill] sm:$0xff]  ;;  %v15967_v2 = vld [vmem:[#allocation44_spill] sm:$0xff]  ;;  %v2905_v20 = vpop.f32.mrf.mxu0  ;;  %v3018_v60 = vpop.f32.mrf.mxu1 }
 0x4d3   : > { %5645 = vmatpush1.bf16.msra.mxu1 %v15959_v12  ;;  %v3225_v33 = vmul.f32 %v3097_v1, %v3097_v1  ;;  %v3569_v16 = vadd.f32 1.0, %v15963_v22  ;;  %v15964_v39 = vcombine.low %v15955_v27, %v15956_v53  ;;  %10536 = vtanh.f32 %v3477_v49  ;;  %v15968_v53 = vld [vmem:[#allocation32_spill] sm:$0xff] }
 0x4d4   : > { %15960 = vst [vmem:[#allocation47_spill] sm:$0xff] %v12504_v6  ;;  %v3478_v43 = vmul.f32 0.7978846, %v3414_v18  ;;  %5341 = vmatprep.mubr.bf16.mxu0 %v12504_v6  ;;  %v3227_v26 = vmul.f32 %v3099_v37, %v3099_v37  ;;  %v3573_v52 = vadd.f32 1.0, %v15965_v13  ;;  %v3416_v40 = vadd.f32 %v3352_v36, %v12441_v23  ;;  %v15970_v18 = vld [vmem:[#allocation52_spill] sm:$0xff]  ;;  %v12524_v6 = vpop.eup %10526  ;;  %v15971_v36 = vld [vmem:[#allocation33_spill] sm:$0xff] }
 0x4d5   : > { %5534 = vmatpush1.bf16.msra.mxu0 %v15964_v39  ;;  %v12518_v45 = vpack.c.bf16 %v3640_v17, %v3636_v41  ;;  %v3289_v38 = vmul.f32 %v3225_v33, %v3097_v1  ;;  %v3571_v12 = vadd.f32 1.0, %v15967_v2  ;;  %v3633_v22 = vmul.f32 %v3569_v16, %v15968_v53  ;;  %v15969_v39 = vld [vmem:[#allocation36_spill] sm:$0xff] }
 0x4d6   : > { %v3291_v27 = vmul.f32 %v3227_v26, %v3099_v37  ;;  %v3637_v49 = vmul.f32 %v3573_v52, %v15969_v39  ;;  %v3575_v11 = vadd.f32 1.0, %v15970_v18  ;;  %v3098_v17 = vadd.f32 %v12113_v8, %v2903_v32  ;;  %v15973_v26 = vld [vmem:[#allocation37_spill] sm:$0xff]  ;;  %v3020_v18 = vpop.f32.mrf.mxu1 }
 0x4d7   : > { %15966 = vst [vmem:[#allocation34_spill] sm:$0xff] %v12518_v45  ;;  %5454 = vmatprep.mubr.bf16.mxu1 %v12518_v45  ;;  %v3353_v13 = vmul.f32 0.044715, %v3289_v38  ;;  %v3635_v41 = vmul.f32 %v3571_v12, %v15971_v36  ;;  %v3100_v33 = vadd.f32 %v12116_v28, %v3016_v46  ;;  %v3101_v52 = vadd.f32 %v12097_v7, %v2905_v20  ;;  %v2907_v12 = vpop.f32.mrf.mxu0 }
 0x4d8   : > { %v3355_v2 = vmul.f32 0.044715, %v3291_v27  ;;  %v12530_v42 = vpack.c.bf16 %v3637_v49, %v3633_v22  ;;  %v3639_v16 = vmul.f32 %v3575_v11, %v15973_v26  ;;  %10538 = vtanh.f32 %v3479_v59  ;;  %v12540_v32 = vpop.eup %10528 }
 0x4d9   : > { %v12535_v53 = vmul.f32 0.5, %v12410_v15  ;;  %v12538_v39 = vmul.f32 0.5, %v12441_v23  ;;  %v3226_v38 = vmul.f32 %v3098_v17, %v3098_v17  ;;  %v3480_v46 = vmul.f32 0.7978846, %v3416_v40 }
 0x4da   : > { %15972 = vst [vmem:[#allocation38_spill] sm:$0xff] %v12530_v42  ;;  %v3417_v27 = vadd.f32 %v3353_v13, %v3097_v1  ;;  %5342 = vmatmul.mubr.bf16.gmra.mxu0 %v12530_v42  ;;  %v12543_v22 = vpack.c.bf16 %v3639_v16, %v3635_v41  ;;  %v3228_v11 = vmul.f32 %v3100_v33, %v3100_v33  ;;  %v12546_v36 = vpop.eup %10530  ;;  %10540 = vtanh.f32 %v3478_v43 }
 0x4db   : > { %15974 = vst [vmem:[#allocation30_spill] sm:$0xff] %v12538_v39  ;;  %v3419_v20 = vadd.f32 %v3355_v2, %v3099_v37  ;;  %v3290_v59 = vmul.f32 %v3226_v38, %v3098_v17  ;;  %v3229_v49 = vmul.f32 %v3101_v52, %v3101_v52  ;;  %v3103_v15 = vadd.f32 %v12100_v63, %v3018_v60 }
 0x4dc   : > { %15975 = vst [vmem:[#allocation31_spill] sm:$0xff] %v12543_v22  ;;  %15976 = vst [vmem:[#allocation57_spill] sm:$0xff] %v12546_v36  ;;  %5455 = vmatmul.mubr.bf16.gmra.mxu1 %v12543_v22  ;;  %v3292_v23 = vmul.f32 %v3228_v11, %v3100_v33  ;;  %v3102_v26 = vadd.f32 %v12113_v8, %v2907_v12  ;;  %v12551_v40 = vadd.f32 %v12116_v28, %v3020_v18  ;;  %v3742_v36 = vld [vmem:[#allocation9 + $0xa8] sm:$0xff] }
 0x4dd   : > { %v12553_v13 = vmul.f32 0.5, %v3097_v1  ;;  %v12555_v41 = vmul.f32 0.5, %v3099_v37  ;;  %v3354_v2 = vmul.f32 0.044715, %v3290_v59  ;;  %v3293_v16 = vmul.f32 %v3229_v49, %v3101_v52  ;;  %v12557_v38 = vpop.eup %10532 }
 0x4de   : > { %10542 = vtanh.f32 %v3480_v46  ;;  %v3481_v60 = vmul.f32 0.7978846, %v3417_v27  ;;  %v3356_v42 = vmul.f32 0.044715, %v3292_v23  ;;  %v3231_v43 = vmul.f32 %v3103_v15, %v3103_v15  ;;  %v12559_v45 = vpop.eup %10534 }
 0x4df   : > { %15977 = vst [vmem:[#allocation35_spill] sm:$0xff] %v12553_v13  ;;  %15978 = vst [vmem:[#allocation39_spill] sm:$0xff] %v12555_v41  ;;  %v3483_v11 = vmul.f32 0.7978846, %v3419_v20  ;;  %v3418_v22 = vadd.f32 %v3354_v2, %v3098_v17  ;;  %v3357_v12 = vmul.f32 0.044715, %v3293_v16  ;;  %v3230_v19 = vmul.f32 %v3102_v26, %v3102_v26 }
 0x4e0   : > { %v3420_v18 = vadd.f32 %v3356_v42, %v3100_v33  ;;  %v3295_v10 = vmul.f32 %v3231_v43, %v3103_v15  ;;  %v3232_v1 = vmul.f32 %v12551_v40, %v12551_v40  ;;  %v3578_v37 = vadd.f32 1.0, %v12310_v34  ;;  %v12564_v59 = vpop.eup %10536  ;;  %v15983_v41 = vld [vmem:[#allocation43_spill] sm:$0xff]  ;;  %v15984_v13 = vld [vmem:[#allocation49_spill] sm:$0xff] }
 0x4e1   : > { %v12566_v49 = vmul.f32 0.5, %v3098_v17  ;;  %v12568_v46 = vmul.f32 0.5, %v3100_v33  ;;  %v3294_v27 = vmul.f32 %v3230_v19, %v3102_v26  ;;  %v3582_v23 = vadd.f32 1.0, %v12328_v47  ;;  %v2911_v17 = vpop.f32.mrf.mxu0  ;;  %v3024_v47 = vpop.f32.mrf.mxu1 }
 0x4e2   : > { %v3482_v20 = vmul.f32 0.7978846, %v3418_v22  ;;  %v12571_v2 = vmul.f32 0.5, %v3101_v52  ;;  %v3359_v16 = vmul.f32 0.044715, %v3295_v10  ;;  %v3296_v42 = vmul.f32 %v3232_v1, %v12551_v40  ;;  %v15986_v10 = vld [vmem:[#allocation68_spill] sm:$0xff] }
 0x4e3   : > { %15979 = vst [vmem:[#allocation42_spill] sm:$0xff] %v12566_v49  ;;  %15980 = vst [vmem:[#allocation50_spill] sm:$0xff] %v12568_v46  ;;  %10544 = vtanh.f32 %v3481_v60  ;;  %v12574_v43 = vmul.f32 0.5, %v3103_v15  ;;  %v3642_v34 = vmul.f32 %v3578_v37, %v15983_v41  ;;  %v3646_v62 = vmul.f32 %v3582_v23, %v15984_v13 }
 0x4e4   : > { %15981 = vst [vmem:[#allocation44_spill] sm:$0xff] %v12571_v2  ;;  %10546 = vtanh.f32 %v3483_v11  ;;  %v3484_v33 = vmul.f32 0.7978846, %v3420_v18  ;;  %v3421_v46 = vadd.f32 %v3357_v12, %v3101_v52  ;;  %v3580_v19 = vadd.f32 1.0, %v12313_v44  ;;  %v15989_v52 = vld [vmem:[#allocation45_spill] sm:$0xff]  ;;  %v15990_v11 = vld [vmem:[#allocation51_spill] sm:$0xff] }
 0x4e5   : > { %15982 = vst [vmem:[#allocation32_spill] sm:$0xff] %v12574_v43  ;;  %v3423_v22 = vadd.f32 %v3359_v16, %v3103_v15  ;;  %v3358_v49 = vmul.f32 0.044715, %v3294_v27  ;;  %v12579_v2 = vpack.c.bf16 %v3646_v62, %v3642_v34  ;;  %v3584_v1 = vadd.f32 1.0, %v15986_v10  ;;  %v12582_v60 = vpop.eup %10538  ;;  %v15992_v12 = vld [vmem:[#allocation58_spill] sm:$0xff]  ;;  %v3878_v16 = vld [vmem:[#allocation9 + $0x4e8] sm:$0xff]  ;;  %v2913_v10 = vpop.f32.mrf.mxu0 }
 0x4e6   : > { %15987 = vst [vmem:[#allocation52_spill] sm:$0xff] %v12582_v60  ;;  %10548 = vtanh.f32 %v3482_v20  ;;  %v12584_v43 = vmul.f32 0.5, %v3102_v26  ;;  %v3360_v41 = vmul.f32 0.044715, %v3296_v42  ;;  %v12587_v13 = vadd.f32 %v12097_v7, %v2911_v17  ;;  %v3874_v20 = vld [vmem:[#allocation9 + $0x4c8] sm:$0xff] }
 0x4e7   : > { %15985 = vst [vmem:[#allocation36_spill] sm:$0xff] %v12579_v2  ;;  %5351 = vmatprep.mubr.bf16.mxu0 %v12579_v2  ;;  %v3644_v44 = vmul.f32 %v3580_v19, %v15989_v52  ;;  %v3648_v15 = vmul.f32 %v3584_v1, %v15990_v11  ;;  %v12593_v62 = vadd.f32 %v12100_v63, %v3024_v47  ;;  %v3577_v18 = vadd.f32 1.0, %v15992_v12  ;;  %v12601_v42 = vpop.eup %10540  ;;  %v15995_v1 = vld [vmem:[#allocation63_spill] sm:$0xff]  ;;  %v15996_v11 = vld [vmem:[#allocation40_spill] sm:$0xff]  ;;  %v3026_v2 = vpop.f32.mrf.mxu1 }
 0x4e8   : > { %15988 = vst [vmem:[#allocation33_spill] sm:$0xff] %v12584_v43  ;;  %10550 = vtanh.f32 %v3484_v33  ;;  %v3485_v37 = vmul.f32 0.7978846, %v3421_v46  ;;  %v12597_v27 = vmul.f32 0.5, %v12551_v40  ;;  %v3233_v23 = vmul.f32 %v12587_v13, %v12587_v13 }
 0x4e9   : > { %15991 = vst [vmem:[#allocation37_spill] sm:$0xff] %v12593_v62  ;;  %v3487_v34 = vmul.f32 0.7978846, %v3423_v22  ;;  %v3422_v17 = vadd.f32 %v3358_v49, %v3102_v26  ;;  %v12603_v19 = vpack.c.bf16 %v3648_v15, %v3644_v44  ;;  %v3235_v47 = vmul.f32 %v12593_v62, %v12593_v62  ;;  %v15997_v49 = vld [vmem:[#allocation60_spill] sm:$0xff]  ;;  %v15998_v44 = vld [vmem:[#allocation65_spill] sm:$0xff] }
 0x4ea   : > { %15993 = vst [vmem:[#allocation43_spill] sm:$0xff] %v12597_v27  ;;  %v3424_v46 = vadd.f32 %v3360_v41, %v12551_v40  ;;  %v3297_v33 = vmul.f32 %v3233_v23, %v12587_v13  ;;  %v3581_v52 = vadd.f32 1.0, %v15995_v1  ;;  %v3641_v12 = vmul.f32 %v3577_v18, %v15996_v11  ;;  %v15999_v40 = vld [vmem:[#allocation46_spill] sm:$0xff]  ;;  %v16000_v18 = vld [vmem:[#allocation41_spill] sm:$0xff] }
 0x4eb   : > { %15994 = vst [vmem:[#allocation49_spill] sm:$0xff] %v12603_v19  ;;  %v12611_v27 = vpop.eup %10542  ;;  %5464 = vmatprep.mubr.bf16.mxu1 %v12603_v19  ;;  %v3299_v26 = vmul.f32 %v3235_v47, %v12593_v62  ;;  %v3579_v22 = vadd.f32 1.0, %v15997_v49  ;;  %v3583_v15 = vadd.f32 1.0, %v15998_v44  ;;  %v9472_v43 = vcombine.low %v3874_v20, %v3878_v16  ;;  %v3738_v47 = vld [vmem:[#allocation9 + $0x88] sm:$0xff]  ;;  %v2915_v49 = vpop.f32.mrf.mxu0 }
 0x4ec   : > { %v3361_v58 = vmul.f32 0.044715, %v3297_v33  ;;  %v3645_v41 = vmul.f32 %v3581_v52, %v15999_v40  ;;  %v9473_v23 = vcombine.high %v3874_v20, %v3878_v16  ;;  %v3106_v1 = vadd.f32 %v12113_v8, %v2913_v10  ;;  %v3028_v20 = vpop.f32.mrf.mxu1 }
 0x4ed   : > { %v3363_v61 = vmul.f32 0.044715, %v3299_v26  ;;  %v3643_v11 = vmul.f32 %v3579_v22, %v16000_v18  ;;  %v3647_v60 = vmul.f32 %v3583_v15, %v16001_v9  ;;  %v12622_v19 = vadd.f32 %v12116_v28, %v3026_v2  ;;  %v3866_v2 = vld [vmem:[#allocation9 + $0x488] sm:$0xff]  ;;  %v2917_v40 = vpop.f32.mrf.mxu0 }
 0x4ee   : > { %10552 = vtanh.f32 %v3485_v37  ;;  %v3486_v44 = vmul.f32 0.7978846, %v3422_v17  ;;  %v12624_v39 = vpack.c.bf16 %v3645_v41, %v3641_v12  ;;  %5646 = vmatprep.subr.bf16.mxu1 %v9473_v23  ;;  %v3234_v33 = vmul.f32 %v3106_v1, %v3106_v1  ;;  %v3870_v26 = vld [vmem:[#allocation9 + $0x4a8] sm:$0xff] }
 0x4ef   : > { %v3488_v16 = vmul.f32 0.7978846, %v3424_v46  ;;  %v3425_v10 = vadd.f32 %v3361_v58, %v12587_v13  ;;  %v12627_v52 = vpack.c.bf16 %v3647_v60, %v3643_v11  ;;  %5647 = vmatpush1.bf16.msra.mxu1 %v9472_v43  ;;  %v3236_v9 = vmul.f32 %v12622_v19, %v12622_v19 }
 0x4f0   : > { %16002 = vst [vmem:[#allocation68_spill] sm:$0xff] %v12624_v39  ;;  %v12631_v22 = vpop.eup %10544  ;;  %v3427_v37 = vadd.f32 %v3363_v61, %v12593_v62  ;;  %5352 = vmatmul.mubr.bf16.gmra.mxu0 %v12624_v39  ;;  %v3298_v17 = vmul.f32 %v3234_v33, %v3106_v1  ;;  %v9336_v12 = vcombine.low %v3738_v47, %v3742_v36  ;;  %10554 = vtanh.f32 %v3487_v34 }
 0x4f1   : > { %16003 = vst [vmem:[#allocation45_spill] sm:$0xff] %v12627_v52  ;;  %v9337_v15 = vcombine.high %v3738_v47, %v3742_v36  ;;  %v12635_v46 = vpop.eup %10546  ;;  %5465 = vmatmul.mubr.bf16.gmra.mxu1 %v12627_v52  ;;  %v3300_v58 = vmul.f32 %v3236_v9, %v12622_v19  ;;  %v12640_v43 = vadd.f32 %v12097_v7, %v2915_v49  ;;  %10556 = vtanh.f32 %v3486_v44  ;;  %v3030_v36 = vpop.f32.mrf.mxu1 }
 0x4f2   : > { %v12643_v60 = vadd.f32 %v12100_v63, %v3028_v20  ;;  %v3362_v61 = vmul.f32 0.044715, %v3298_v17  ;;  %v9464_v41 = vcombine.low %v3866_v2, %v3870_v26  ;;  %v9465_v23 = vcombine.high %v3866_v2, %v3870_v26 }
 0x4f3   : > { %5535 = vmatprep.subr.bf16.mxu0 %v9337_v15  ;;  %v12645_v18 = vpop.eup %10548  ;;  %10558 = vtanh.f32 %v3488_v16  ;;  %v3489_v34 = vmul.f32 0.7978846, %v3425_v10  ;;  %v3364_v11 = vmul.f32 0.044715, %v3300_v58  ;;  %v3237_v47 = vmul.f32 %v12640_v43, %v12640_v43 }
 0x4f4   : > { %5536 = vmatpush1.bf16.msra.mxu0 %v9336_v12  ;;  %v3491_v7 = vmul.f32 0.7978846, %v3427_v37  ;;  %v3426_v49 = vadd.f32 %v3362_v61, %v3106_v1  ;;  %v3239_v63 = vmul.f32 %v12643_v60, %v12643_v60  ;;  %5648 = vmatprep.subr.bf16.mxu1 %v9465_v23  ;;  %v12652_v44 = vadd.f32 %v12113_v8, %v2917_v40  ;;  %v16004_v61 = vld [vmem:[#allocation55_spill] sm:$0xff] }
 0x4f5   : > { %v12654_v33 = vpop.eup %10550  ;;  %v3428_v20 = vadd.f32 %v3364_v11, %v12622_v19  ;;  %v3301_v16 = vmul.f32 %v3237_v47, %v12640_v43  ;;  %5649 = vmatpush1.bf16.msra.mxu1 %v9464_v41  ;;  %v12659_v10 = vadd.f32 %v12116_v28, %v3030_v36  ;;  %v3586_v9 = vadd.f32 1.0, %v12355_v51  ;;  %v3730_v23 = vld [vmem:[#allocation9 + $0x48] sm:$0xff]  ;;  %v16005_v47 = vld [vmem:[#allocation62_spill] sm:$0xff] }
 0x4f6   : > { %v12662_v2 = vmul.f32 0.5, %v3106_v1  ;;  %v3490_v26 = vmul.f32 0.7978846, %v3426_v49  ;;  %v3303_v37 = vmul.f32 %v3239_v63, %v12643_v60  ;;  %v3238_v8 = vmul.f32 %v12652_v44, %v12652_v44  ;;  %v3734_v36 = vld [vmem:[#allocation9 + $0x68] sm:$0xff] }
 0x4f7   : > { %10560 = vtanh.f32 %v3489_v34  ;;  %v3492_v17 = vmul.f32 0.7978846, %v3428_v20  ;;  %v3365_v12 = vmul.f32 0.044715, %v3301_v16  ;;  %v3240_v15 = vmul.f32 %v12659_v10, %v12659_v10 }
 0x4f8   : > { %10562 = vtanh.f32 %v3491_v7  ;;  %v3367_v58 = vmul.f32 0.044715, %v3303_v37  ;;  %v3302_v28 = vmul.f32 %v3238_v8, %v12652_v44  ;;  %v3590_v51 = vadd.f32 1.0, %v12394_v56 }
 0x4f9   : > { %10564 = vtanh.f32 %v3490_v26  ;;  %v3429_v1 = vadd.f32 %v3365_v12, %v12640_v43  ;;  %v3304_v40 = vmul.f32 %v3240_v15, %v12659_v10  ;;  %v3650_v41 = vmul.f32 %v3586_v9, %v16004_v61  ;;  %v16007_v15 = vld [vmem:[#allocation56_spill] sm:$0xff]  ;;  %v3858_v61 = vld [vmem:[#allocation9 + $0x448] sm:$0xff] }
 0x4fa   : > { %v3431_v34 = vadd.f32 %v3367_v58, %v12643_v60  ;;  %v3366_v11 = vmul.f32 0.044715, %v3302_v28  ;;  %v3654_v49 = vmul.f32 %v3590_v51, %v16005_v47  ;;  %v3588_v7 = vadd.f32 1.0, %v12360_v5  ;;  %v16008_v28 = vld [vmem:[#allocation64_spill] sm:$0xff]  ;;  %v3862_v47 = vld [vmem:[#allocation9 + $0x468] sm:$0xff] }
 0x4fb   : > { %v12677_v63 = vpop.eup %10552  ;;  %10566 = vtanh.f32 %v3492_v17  ;;  %v3493_v56 = vmul.f32 0.7978846, %v3429_v1  ;;  %v3368_v20 = vmul.f32 0.044715, %v3304_v40  ;;  %v3592_v16 = vadd.f32 1.0, %v12412_v54 }
 0x4fc   : > { %v3495_v26 = vmul.f32 0.7978846, %v3431_v34  ;;  %v3430_v37 = vadd.f32 %v3366_v11, %v12652_v44  ;;  %v12681_v9 = vpack.c.bf16 %v3654_v49, %v3650_v41  ;;  %v9328_v8 = vcombine.low %v3730_v23, %v3734_v36  ;;  %v3722_v41 = vld [vmem:[#allocation9 + $0x8] sm:$0xff] }
 0x4fd   : > { %v3432_v12 = vadd.f32 %v3368_v20, %v12659_v10  ;;  %v3652_v58 = vmul.f32 %v3588_v7, %v16007_v15  ;;  %v3656_v51 = vmul.f32 %v3592_v16, %v16008_v28  ;;  %v9329_v5 = vcombine.high %v3730_v23, %v3734_v36  ;;  %v12686_v17 = vpop.eup %10554  ;;  %v3726_v49 = vld [vmem:[#allocation9 + $0x28] sm:$0xff] }
 0x4fe   : > { %16006 = vst [vmem:[#allocation51_spill] sm:$0xff] %v12681_v9  ;;  %10568 = vtanh.f32 %v3493_v56  ;;  %v3494_v1 = vmul.f32 0.7978846, %v3430_v37  ;;  %5361 = vmatprep.mubr.bf16.mxu0 %v12681_v9  ;;  %v3585_v54 = vadd.f32 1.0, %v12344_v4  ;;  %v3589_v40 = vadd.f32 1.0, %v12366_v31  ;;  %v12691_v34 = vpop.eup %10556  ;;  %v3850_v7 = vld [vmem:[#allocation9 + $0x408] sm:$0xff] }
 0x4ff   : > { %10570 = vtanh.f32 %v3495_v26  ;;  %v12693_v11 = vpack.c.bf16 %v3656_v51, %v3652_v58  ;;  %5537 = vmatprep.subr.bf16.mxu0 %v9329_v5  ;;  %v3587_v23 = vadd.f32 1.0, %v12351_v50  ;;  %v3591_v36 = vadd.f32 1.0, %v12374_v14  ;;  %v3854_v56 = vld [vmem:[#allocation9 + $0x428] sm:$0xff]  ;;  %v16009_v4 = vld [vmem:[#allocation53_spill] sm:$0xff]  ;;  %v16011_v26 = vld [vmem:[#allocation54_spill] sm:$0xff] }
 0x500   : > { %v12697_v20 = vpop.eup %10558  ;;  %v3496_v16 = vmul.f32 0.7978846, %v3432_v12  ;;  %v3649_v37 = vmul.f32 %v3585_v54, %v16009_v4  ;;  %v16010_v31 = vld [vmem:[#allocation59_spill] sm:$0xff]  ;;  %5538 = vmatpush1.bf16.msra.mxu0 %v9328_v8  ;;  %v9456_v28 = vcombine.low %v3858_v61, %v3862_v47  ;;  %10572 = vtanh.f32 %v3494_v1  ;;  %v16012_v50 = vld [vmem:[#allocation61_spill] sm:$0xff] }
 0x501   : > { %v3653_v15 = vmul.f32 %v3589_v40, %v16010_v31  ;;  %5474 = vmatprep.mubr.bf16.mxu1 %v12693_v11  ;;  %v3651_v58 = vmul.f32 %v3587_v23, %v16011_v26  ;;  %v3655_v51 = vmul.f32 %v3591_v36, %v16012_v50  ;;  %v9457_v14 = vcombine.high %v3858_v61, %v3862_v47  ;;  %v3842_v5 = vld [vmem:[#allocation9 + $0x3c8] sm:$0xff] }
 0x502   : > { %v3846_v9 = vld [vmem:[#allocation9 + $0x3e8] sm:$0xff]  ;;  %v9320_v39 = vcombine.low %v3722_v41, %v3726_v49  ;;  %v9321_v12 = vcombine.high %v3722_v41, %v3726_v49  ;;  %v9448_v62 = vcombine.low %v3850_v7, %v3854_v56  ;;  %v9449_v8 = vcombine.high %v3850_v7, %v3854_v56  ;;  %v16013_v49 = vld [vmem:[#allocation69_spill] sm:$0xff] }
 0x503   : > { %v12704_v52 = vpack.c.bf16 %v3653_v15, %v3649_v37  ;;  %v12706_v54 = vpack.c.bf16 %v3655_v51, %v3651_v58  ;;  %5650 = vmatprep.subr.bf16.mxu1 %v9457_v14  ;;  %v3594_v1 = vadd.f32 1.0, %v12457_v55  ;;  %v3598_v40 = vadd.f32 1.0, %v12513_v48  ;;  %v3970_v37 = vld [vmem:[#allocation9 + $0x7c8] sm:$0xff] }
 0x504   : > { %v12710_v4 = vpop.eup %10560  ;;  %5651 = vmatpush1.bf16.msra.mxu1 %v9456_v28  ;;  %v3596_v61 = vadd.f32 1.0, %v12467_v57  ;;  %v3600_v47 = vadd.f32 1.0, %v12524_v6  ;;  %v9440_v23 = vcombine.low %v3842_v5, %v3846_v9  ;;  %v9441_v41 = vcombine.high %v3842_v5, %v3846_v9  ;;  %5539 = vmatprep.subr.bf16.mxu0 %v9321_v12  ;;  %v3974_v31 = vld [vmem:[#allocation9 + $0x7e8] sm:$0xff]  ;;  %v16014_v6 = vld [vmem:[#allocation70_spill] sm:$0xff] }
 0x505   : > { %5362 = vmatmul.mubr.bf16.gmra.mxu0 %v12704_v52  ;;  %v12715_v36 = vpop.eup %10562  ;;  %5475 = vmatmul.mubr.bf16.gmra.mxu1 %v12706_v54  ;;  %v3658_v55 = vmul.f32 %v3594_v1, %v16013_v49  ;;  %v3662_v48 = vmul.f32 %v3598_v40, %v12368_v30  ;;  %v3593_v7 = vadd.f32 1.0, %v12429_v21  ;;  %v3597_v56 = vadd.f32 1.0, %v12475_v3  ;;  %v3834_v58 = vld [vmem:[#allocation9 + $0x388] sm:$0xff]  ;;  %v16015_v3 = vld [vmem:[#allocation66_spill] sm:$0xff] }
 0x506   : > { %v12722_v57 = vpop.eup %10564  ;;  %5540 = vmatpush1.bf16.msra.mxu0 %v9320_v39  ;;  %5652 = vmatprep.subr.bf16.mxu1 %v9449_v8  ;;  %v3660_v9 = vmul.f32 %v3596_v61, %v16014_v6  ;;  %v3664_v15 = vmul.f32 %v3600_v47, %v12415_v35  ;;  %v3595_v28 = vadd.f32 1.0, %v12450_v25  ;;  %v3599_v26 = vadd.f32 1.0, %v12502_v29  ;;  %v3838_v30 = vld [vmem:[#allocation9 + $0x3a8] sm:$0xff]  ;;  %v16017_v25 = vld [vmem:[#allocation72_spill] sm:$0xff] }
 0x507   : > { %10574 = vtanh.f32 %v3496_v16  ;;  %v12728_v21 = vpack.c.bf16 %v3662_v48, %v3658_v55  ;;  %5541 = vmatprep.subr.bf16.mxu0 %v9441_v41  ;;  %v3657_v50 = vmul.f32 %v3593_v7, %v16015_v3  ;;  %v16016_v51 = vld [vmem:[#allocation71_spill] sm:$0xff]  ;;  %v9568_v29 = vcombine.low %v3970_v37, %v3974_v31 }
 0x508   : > { %v3661_v14 = vmul.f32 %v3597_v56, %v16016_v51  ;;  %v3962_v39 = vld [vmem:[#allocation9 + $0x788] sm:$0xff]  ;;  %v12732_v12 = vpop.eup %10566  ;;  %5653 = vmatpush1.bf16.msra.mxu1 %v9448_v62  ;;  %v12734_v35 = vpack.c.bf16 %v3664_v15, %v3660_v9  ;;  %v3663_v8 = vmul.f32 %v3599_v26, %v16017_v25  ;;  %v9569_v1 = vcombine.high %v3970_v37, %v3974_v31  ;;  %v16022_v25 = vld [vmem:[#allocation77_spill] sm:$0xff] }
 0x509   : > { %v3966_v5 = vld [vmem:[#allocation9 + $0x7a8] sm:$0xff]  ;;  %5371 = vmatprep.mubr.bf16.mxu0 %v12728_v21  ;;  %v9432_v49 = vcombine.low %v3834_v58, %v3838_v30  ;;  %v9433_v55 = vcombine.high %v3834_v58, %v3838_v30  ;;  %v3602_v7 = vadd.f32 1.0, %v12557_v38  ;;  %v3606_v56 = vadd.f32 1.0, %v12601_v42  ;;  %v16019_v30 = vld [vmem:[#allocation30_spill] sm:$0xff] }
 0x50a   : > { %v12737_v40 = vld [vmem:[#allocation9 + $0x348] sm:$0xff]  ;;  %v12742_v61 = vpack.c.bf16 %v3661_v14, %v3657_v50  ;;  %5484 = vmatprep.mubr.bf16.mxu1 %v12734_v35  ;;  %5542 = vmatpush2.bf16.msra.mxu0 %v9440_v23  ;;  %v9560_v62 = vcombine.low %v3962_v39, %v3966_v5  ;;  %v9561_v48 = vcombine.high %v3962_v39, %v3966_v5  ;;  %v3604_v6 = vadd.f32 1.0, %v12559_v45  ;;  %v16020_v50 = vld [vmem:[#allocation57_spill] sm:$0xff]  ;;  %v16021_v14 = vld [vmem:[#allocation52_spill] sm:$0xff] }
 0x50b   : > { %v12739_v16 = vld [vmem:[#allocation9 + $0x368] sm:$0xff]  ;;  %v12748_v37 = vpop.eup %10568  ;;  %5654 = vmatprep.subr.bf16.mxu1 %v9569_v1  ;;  %5543 = vmatprep.subr.bf16.mxu0 %v9433_v55  ;;  %v3608_v9 = vadd.f32 1.0, %v12611_v27  ;;  %v3666_v38 = vmul.f32 %v3602_v7, %v12459_v24  ;;  %v3670_v42 = vmul.f32 %v3606_v56, %v12535_v53  ;;  %v3605_v26 = vadd.f32 1.0, %v12564_v59  ;;  %v16024_v55 = vld [vmem:[#allocation78_spill] sm:$0xff] }
 0x50c   : > { %v16018_v47 = vld [vmem:[#allocation67_spill] sm:$0xff]  ;;  %v9425_v15 = vcombine.high %v12737_v40, %v12739_v16  ;;  %v12756_v23 = vpop.eup %10570  ;;  %5655 = vmatpush2.bf16.msra.mxu1 %v9568_v29  ;;  %v3668_v27 = vmul.f32 %v3604_v6, %v12469_v0  ;;  %v3603_v51 = vadd.f32 1.0, %v16020_v50  ;;  %v3607_v39 = vadd.f32 1.0, %v16021_v14  ;;  %v16023_v29 = vld [vmem:[#allocation29_spill] sm:$0xff] }
 0x50d   : > { %v3659_v41 = vmul.f32 %v3595_v28, %v16018_v47  ;;  %5372 = vmatmul.mubr.bf16.gmra.mxu0 %v12742_v61  ;;  %v3601_v28 = vadd.f32 1.0, %v12540_v32  ;;  %v3954_v58 = vld [vmem:[#allocation9 + $0x748] sm:$0xff]  ;;  %5656 = vmatprep.subr.bf16.mxu1 %v9561_v48  ;;  %v3672_v3 = vmul.f32 %v3608_v9, %v16019_v30  ;;  %v12768_v53 = vpop.eup %10572  ;;  %v12770_v32 = vpack.c.bf16 %v3670_v42, %v3666_v38  ;;  %v16028_v30 = vld [vmem:[#allocation42_spill] sm:$0xff] }
 0x50e   : > { %v3958_v45 = vld [vmem:[#allocation9 + $0x768] sm:$0xff]  ;;  %5544 = vmatpush2.bf16.msra.mxu0 %v9432_v49  ;;  %v9424_v59 = vcombine.low %v12737_v40, %v12739_v16  ;;  %v3669_v0 = vmul.f32 %v3605_v26, %v16023_v29  ;;  %v3667_v48 = vmul.f32 %v3603_v51, %v16024_v55  ;;  %v3610_v9 = vadd.f32 1.0, %v12645_v18 }
 0x50f   : > { %v12750_v31 = vpack.c.bf16 %v3663_v8, %v3659_v41  ;;  %v3818_v24 = vld [vmem:[#allocation9 + $0x308] sm:$0xff]  ;;  %v3665_v8 = vmul.f32 %v3601_v28, %v16022_v25  ;;  %v12776_v41 = vpack.c.bf16 %v3672_v3, %v3668_v27  ;;  %5545 = vmatprep.subr.bf16.mxu0 %v9425_v15  ;;  %v9553_v6 = vcombine.high %v3954_v58, %v3958_v45 }
 0x510   : > { %v3822_v5 = vld [vmem:[#allocation9 + $0x328] sm:$0xff]  ;;  %5657 = vmatpush2.bf16.msra.mxu1 %v9560_v62  ;;  %5381 = vmatprep.mubr.bf16.mxu0 %v12770_v32  ;;  %v9552_v40 = vcombine.low %v3954_v58, %v3958_v45  ;;  %v3614_v62 = vadd.f32 1.0, %v12691_v34  ;;  %v3674_v3 = vmul.f32 %v3610_v9, %v16028_v30  ;;  %v3612_v58 = vadd.f32 1.0, %v12654_v33  ;;  %v16029_v45 = vld [vmem:[#allocation33_spill] sm:$0xff]  ;;  %v16030_v34 = vld [vmem:[#allocation50_spill] sm:$0xff] }
 0x511   : > { %5485 = vmatmul.mubr.bf16.gmra.mxu1 %v12750_v31  ;;  %v3946_v1 = vld [vmem:[#allocation9 + $0x708] sm:$0xff]  ;;  %v12781_v49 = vpack.c.bf16 %v3669_v0, %v3665_v8  ;;  %v9417_v16 = vcombine.high %v3818_v24, %v3822_v5  ;;  %5658 = vmatprep.subr.bf16.mxu1 %v9553_v6  ;;  %v9416_v28 = vcombine.low %v3818_v24, %v3822_v5  ;;  %v3616_v18 = vadd.f32 1.0, %v12697_v20 }
 0x512   : > { %v3950_v47 = vld [vmem:[#allocation9 + $0x728] sm:$0xff]  ;;  %5494 = vmatprep.mubr.bf16.mxu1 %v12776_v41  ;;  %5546 = vmatpush2.bf16.msra.mxu0 %v9424_v59  ;;  %v3678_v50 = vmul.f32 %v3614_v62, %v16029_v45  ;;  %v3609_v14 = vadd.f32 1.0, %v12631_v22  ;;  %v3676_v5 = vmul.f32 %v3612_v58, %v16030_v34  ;;  %v3611_v33 = vadd.f32 1.0, %v12635_v46 }
 0x513   : > { %v16025_v7 = vld [vmem:[#allocation79_spill] sm:$0xff]  ;;  %16026 = vst [vmem:[#allocation58_spill] sm:$0xff] %v12781_v49  ;;  %v9545_v26 = vcombine.high %v3946_v1, %v3950_v47  ;;  %v9544_v27 = vcombine.low %v3946_v1, %v3950_v47  ;;  %5547 = vmatprep.subr.bf16.mxu0 %v9417_v16  ;;  %v3615_v20 = vadd.f32 1.0, %v12686_v17  ;;  %v3172_v0 = vmul.f32 0.5, %v12622_v19  ;;  %v16034_v17 = vld [vmem:[#allocation44_spill] sm:$0xff] }
 0x514   : > { %v3671_v56 = vmul.f32 %v3607_v39, %v16025_v7  ;;  %v12784_v38 = vld [vmem:[#allocation9 + $0x2c8] sm:$0xff]  ;;  %v3613_v39 = vadd.f32 1.0, %v12677_v63  ;;  %v10575_v24 = vpop.eup %10574  ;;  %5659 = vmatpush2.bf16.msra.mxu1 %v9552_v40  ;;  %v3174_v22 = vmul.f32 0.5, %v12652_v44  ;;  %v12805_v63 = vpack.c.bf16 %v3678_v50, %v3674_v3 }
 0x515   : > { %v3814_v42 = vld [vmem:[#allocation9 + $0x2e8] sm:$0xff]  ;;  %5382 = vmatmul.mubr.bf16.gmra.mxu0 %v12781_v49  ;;  %5660 = vmatprep.subr.bf16.mxu1 %v9545_v26  ;;  %v3618_v55 = vadd.f32 1.0, %v12722_v57  ;;  %v3176_v40 = vmul.f32 0.5, %v12659_v10  ;;  %v3622_v57 = vadd.f32 1.0, %v12768_v53  ;;  %v3620_v30 = vadd.f32 1.0, %v12732_v12 }
 0x516   : > { %v12787_v15 = vpack.c.bf16 %v3671_v56, %v3667_v48  ;;  %v9409_v51 = vcombine.high %v12784_v38, %v3814_v42  ;;  %v16031_v59 = vld [vmem:[#allocation43_spill] sm:$0xff]  ;;  %16032 = vst [vmem:[#allocation40_spill] sm:$0xff] %v12805_v63  ;;  %5548 = vmatpush2.bf16.msra.mxu0 %v9416_v28  ;;  %v9408_v46 = vcombine.low %v12784_v38, %v3814_v42  ;;  %v16035_v56 = vld [vmem:[#allocation32_spill] sm:$0xff]  ;;  %v3624_v50 = vadd.f32 1.0, %v10575_v24 }
 0x517   : > { %v3680_v25 = vmul.f32 %v3616_v18, %v16031_v59  ;;  %v3938_v8 = vld [vmem:[#allocation9 + $0x6c8] sm:$0xff]  ;;  %v3677_v7 = vmul.f32 %v3613_v39, %v16034_v17  ;;  %v3679_v19 = vmul.f32 %v3615_v20, %v16035_v56  ;;  %5391 = vmatprep.mubr.bf16.mxu0 %v12805_v63  ;;  %v3682_v18 = vmul.f32 %v3618_v55, %v12662_v2 }
 0x518   : > { %16027 = vst [vmem:[#allocation63_spill] sm:$0xff] %v12787_v15  ;;  %v3942_v29 = vld [vmem:[#allocation9 + $0x6e8] sm:$0xff]  ;;  %5549 = vmatprep.subr.bf16.mxu0 %v9409_v51  ;;  %5661 = vmatpush2.bf16.msra.mxu1 %v9544_v27  ;;  %v3686_v45 = vmul.f32 %v3622_v57, %v3174_v22  ;;  %v3688_v12 = vmul.f32 %v3624_v50, %v3176_v40  ;;  %v3173_v2 = vmul.f32 0.5, %v12640_v43  ;;  %v3623_v20 = vadd.f32 1.0, %v12756_v23  ;;  %v16042_v23 = vld [vmem:[#allocation37_spill] sm:$0xff] }
 0x519   : > { %5495 = vmatmul.mubr.bf16.gmra.mxu1 %v12787_v15  ;;  %v3802_v1 = vld [vmem:[#allocation9 + $0x288] sm:$0xff]  ;;  %v12808_v48 = vpack.c.bf16 %v3680_v25, %v3676_v5  ;;  %v9537_v26 = vcombine.high %v3938_v8, %v3942_v29  ;;  %v9536_v28 = vcombine.low %v3938_v8, %v3942_v29  ;;  %v3621_v25 = vadd.f32 1.0, %v12748_v37 }
 0x51a   : > { %v3806_v47 = vld [vmem:[#allocation9 + $0x2a8] sm:$0xff]  ;;  %5550 = vmatpush2.bf16.msra.mxu0 %v9408_v46  ;;  %v12825_v5 = vpack.c.bf16 %v3686_v45, %v3682_v18  ;;  %v3619_v37 = vadd.f32 1.0, %v12715_v36  ;;  %v3171_v55 = vmul.f32 0.5, %v16042_v23  ;;  %v3899_v18 = vld [vmem:[#allocation9 + $0x590] sm:$0xff] }
 0x51b   : > { %16033 = vst [vmem:[#allocation60_spill] sm:$0xff] %v12808_v48  ;;  %v3930_v6 = vld [vmem:[#allocation9 + $0x688] sm:$0xff]  ;;  %5504 = vmatprep.mubr.bf16.mxu1 %v12808_v48  ;;  %v9401_v62 = vcombine.high %v3802_v1, %v3806_v47  ;;  %5662 = vmatprep.subr.bf16.mxu1 %v9537_v26  ;;  %v9400_v27 = vcombine.low %v3802_v1, %v3806_v47  ;;  %v3169_v1 = vmul.f32 0.5, %v12587_v13  ;;  %v3903_v45 = vld [vmem:[#allocation9 + $0x5b0] sm:$0xff] }
 0x51c   : > { %v3934_v44 = vld [vmem:[#allocation9 + $0x6a8] sm:$0xff]  ;;  %16040 = vst [vmem:[#allocation41_spill] sm:$0xff] %v12825_v5  ;;  %5663 = vmatpush2.bf16.msra.mxu1 %v9536_v28  ;;  %v3685_v47 = vmul.f32 %v3621_v25, %v3173_v2  ;;  %v3683_v13 = vmul.f32 %v3619_v37, %v3171_v55  ;;  %v16043_v28 = vld [vmem:[#allocation73_spill] sm:$0xff]  ;;  %v3891_v2 = vld [vmem:[#allocation9 + $0x550] sm:$0xff] }
 0x51d   : > { %v16036_v16 = vld [vmem:[#allocation35_spill] sm:$0xff]  ;;  %v9529_v10 = vcombine.high %v3930_v6, %v3934_v44  ;;  %5551 = vmatprep.subr.bf16.mxu0 %v9401_v62  ;;  %v9528_v24 = vcombine.low %v3930_v6, %v3934_v44  ;;  %v3783_v6 = vld [vmem:[#allocation9 + $0x1f0] sm:$0xff] }
 0x51e   : > { %v3673_v9 = vmul.f32 %v3609_v14, %v16036_v16  ;;  %v16037_v38 = vld [vmem:[#allocation39_spill] sm:$0xff]  ;;  %v3684_v14 = vmul.f32 %v3620_v30, %v3172_v0  ;;  %v3175_v0 = vmul.f32 0.5, %v12643_v60  ;;  %5552 = vmatpush2.bf16.msra.mxu0 %v9400_v27  ;;  %v3907_v16 = vld [vmem:[#allocation9 + $0x5d0] sm:$0xff] }
 0x51f   : > { %v3675_v42 = vmul.f32 %v3611_v33, %v16037_v38  ;;  %v3794_v3 = vld [vmem:[#allocation9 + $0x248] sm:$0xff]  ;;  %v3617_v33 = vadd.f32 1.0, %v12710_v4  ;;  %5664 = vmatprep.subr.bf16.mxu1 %v9529_v10  ;;  %v3755_v37 = vld [vmem:[#allocation9 + $0x110] sm:$0xff] }
 0x520   : > { %v3798_v58 = vld [vmem:[#allocation9 + $0x268] sm:$0xff]  ;;  %v12821_v51 = vpack.c.bf16 %v3677_v7, %v3673_v9  ;;  %v12834_v22 = vpack.c.bf16 %v3688_v12, %v3684_v14  ;;  %v3687_v60 = vmul.f32 %v3623_v20, %v3175_v0  ;;  %5665 = vmatpush2.bf16.msra.mxu1 %v9528_v24  ;;  %v3911_v9 = vld [vmem:[#allocation9 + $0x5f0] sm:$0xff]  ;;  %v9499_v12 = vcombine.high %v3899_v18, %v3903_v45  ;;  %v16048_v20 = vld [vmem:[#allocation34_spill] sm:$0xff] }
 0x521   : > { %v12823_v53 = vpack.c.bf16 %v3679_v19, %v3675_v42  ;;  %v3922_v39 = vld [vmem:[#allocation9 + $0x648] sm:$0xff]  ;;  %v9393_v59 = vcombine.high %v3794_v3, %v3798_v58  ;;  %v9392_v4 = vcombine.low %v3794_v3, %v3798_v58  ;;  %v3681_v7 = vmul.f32 %v3617_v33, %v3169_v1  ;;  %v3779_v19 = vld [vmem:[#allocation9 + $0x1d0] sm:$0xff] }
 0x522   : > { %16038 = vst [vmem:[#allocation65_spill] sm:$0xff] %v12821_v51  ;;  %v3926_v34 = vld [vmem:[#allocation9 + $0x668] sm:$0xff]  ;;  %5392 = vmatmul.mubr.bf16.gmra.mxu0 %v12821_v51  ;;  %16041 = vst [vmem:[#allocation48_spill] sm:$0xff] %v12834_v22  ;;  %v12843_v26 = vpack.c.bf16 %v3687_v60, %v3683_v13  ;;  %v9379_v38 = vcombine.high %v3779_v19, %v3783_v6  ;;  %v9507_v62 = vcombine.high %v3907_v16, %v3911_v9  ;;  %v3771_v3 = vld [vmem:[#allocation9 + $0x190] sm:$0xff] }
 0x523   : > { %16039 = vst [vmem:[#allocation46_spill] sm:$0xff] %v12823_v53  ;;  %v3786_v8 = vld [vmem:[#allocation9 + $0x208] sm:$0xff]  ;;  %5505 = vmatmul.mubr.bf16.gmra.mxu1 %v12823_v53  ;;  %v9521_v43 = vcombine.high %v3922_v39, %v3926_v34  ;;  %5401 = vmatprep.mubr.bf16.mxu0 %v12825_v5  ;;  %v9520_v56 = vcombine.low %v3922_v39, %v3926_v34  ;;  %v3775_v58 = vld [vmem:[#allocation9 + $0x1b0] sm:$0xff]  ;;  %v16045_v34 = vld [vmem:[#allocation74_spill] sm:$0xff] }
 0x524   : > { %v3790_v29 = vld [vmem:[#allocation9 + $0x228] sm:$0xff]  ;;  %5514 = vmatprep.mubr.bf16.mxu1 %v12834_v22  ;;  %5553 = vmatprep.subr.bf16.mxu0 %v9393_v59  ;;  %v12841_v44 = vpack.c.bf16 %v3685_v47, %v3681_v7  ;;  %v9378_v10 = vcombine.low %v3779_v19, %v3783_v6  ;;  %v9506_v50 = vcombine.low %v3907_v16, %v3911_v9  ;;  %v3763_v14 = vld [vmem:[#allocation9 + $0x150] sm:$0xff] }
 0x525   : > { %v9385_v46 = vcombine.high %v3786_v8, %v3790_v29  ;;  %v3914_v17 = vld [vmem:[#allocation9 + $0x608] sm:$0xff]  ;;  %5666 = vmatprep.subr.bf16.mxu1 %v9521_v43  ;;  %5554 = vmatpush2.bf16.msra.mxu0 %v9392_v4  ;;  %v9384_v40 = vcombine.low %v3786_v8, %v3790_v29  ;;  %v9371_v27 = vcombine.high %v3771_v3, %v3775_v58  ;;  %v3767_v39 = vld [vmem:[#allocation9 + $0x170] sm:$0xff] }
 0x526   : > { %v3918_v36 = vld [vmem:[#allocation9 + $0x628] sm:$0xff]  ;;  %5667 = vmatpush2.bf16.msra.mxu1 %v9520_v56  ;;  %v16046_v59 = vld [vmem:[#allocation76_spill] sm:$0xff]  ;;  %v9370_v25 = vcombine.low %v3771_v3, %v3775_v58  ;;  %v9363_v8 = vcombine.high %v3763_v14, %v3767_v39  ;;  %v9498_v29 = vcombine.low %v3899_v18, %v3903_v45  ;;  %v9362_v1 = vcombine.low %v3763_v14, %v3767_v39  ;;  %v16054_v39 = vld [vmem:[#allocation45_spill] sm:$0xff] }
 0x527   : > { %5555 = vmatprep.subr.bf16.mxu0 %v9385_v46  ;;  %v9513_v57 = vcombine.high %v3914_v17, %v3918_v36  ;;  %v9512_v42 = vcombine.low %v3914_v17, %v3918_v36  ;;  %v16044_v30 = vld [vmem:[#allocation75_spill] sm:$0xff]  ;;  %v3895_v24 = vld [vmem:[#allocation9 + $0x570] sm:$0xff]  ;;  %v16049_v17 = vld [vmem:[#allocation38_spill] sm:$0xff] }
 0x528   : > { %v16047_v33 = vld [vmem:[#allocation47_spill] sm:$0xff]  ;;  %v9491_v0 = vcombine.high %v3891_v2, %v3895_v24  ;;  %v3759_v43 = vld [vmem:[#allocation9 + $0x130] sm:$0xff]  ;;  %v9490_v23 = vcombine.low %v3891_v2, %v3895_v24 }
 0x529   : > { %5556 = vmatpush2.bf16.msra.mxu0 %v9384_v40  ;;  %5668 = vmatprep.subr.bf16.mxu1 %v9513_v57  ;;  %v3883_v4 = vld [vmem:[#allocation9 + $0x510] sm:$0xff]  ;;  %v9355_v55 = vcombine.high %v3755_v37, %v3759_v43  ;;  %v16050_v56 = vld [vmem:[#allocation31_spill] sm:$0xff]  ;;  %v9354_v36 = vcombine.low %v3755_v37, %v3759_v43  ;;  %v16052_v40 = vld [vmem:[#allocation49_spill] sm:$0xff] }
 0x52a   : > { %5402 = vmatmul.mubr.bf16.gmra.mxu0 %v12841_v44  ;;  %5751 = vmatprep.subr.bf16.mxu0 %v9379_v38  ;;  %v3887_v47 = vld [vmem:[#allocation9 + $0x530] sm:$0xff]  ;;  %v16055_v24 = vld [vmem:[#allocation51_spill] sm:$0xff] }
 0x52b   : > { %5515 = vmatmul.mubr.bf16.gmra.mxu1 %v12843_v26  ;;  %5557 = vmatprep.mubr.bf16.mxu0 %v16043_v28  ;;  %v3747_v60 = vld [vmem:[#allocation9 + $0xd0] sm:$0xff]  ;;  %v9483_v7 = vcombine.high %v3883_v4, %v3887_v47  ;;  %v9482_v9 = vcombine.low %v3883_v4, %v3887_v47 }
 0x52c   : > { %5670 = vmatprep.mubr.bf16.mxu1 %v16044_v30  ;;  %5669 = vmatpush2.bf16.msra.mxu1 %v9512_v42  ;;  %v3751_v46 = vld [vmem:[#allocation9 + $0xf0] sm:$0xff] }
 0x52d   : > { %5864 = vmatprep.subr.bf16.mxu1 %v9507_v62  ;;  %v3875_v19 = vld [vmem:[#allocation9 + $0x4d0] sm:$0xff]  ;;  %v9347_v16 = vcombine.high %v3747_v60, %v3751_v46  ;;  %v9346_v62 = vcombine.low %v3747_v60, %v3751_v46 }
 0x52e   : > { %v3879_v6 = vld [vmem:[#allocation9 + $0x4f0] sm:$0xff] }
 0x52f   : > { %v16051_v13 = vld [vmem:[#allocation36_spill] sm:$0xff]  ;;  %v9475_v57 = vcombine.high %v3875_v19, %v3879_v6 }
 0x530   : > { %v3739_v38 = vld [vmem:[#allocation9 + $0x90] sm:$0xff] }
 0x531   : > { %v3743_v42 = vld [vmem:[#allocation9 + $0xb0] sm:$0xff] }
 0x532   : > { %5558 = vmatmul.mubr.bf16.vlgmr.msra.gmra.mxu0 %v16045_v34  ;;  %v3867_v3 = vld [vmem:[#allocation9 + $0x490] sm:$0xff]  ;;  %v9339_v18 = vcombine.high %v3739_v38, %v3743_v42 }
 0x533   : > { %5671 = vmatmul.mubr.bf16.vlgmr.msra.gmra.mxu1 %v16046_v59  ;;  %5752 = vmatpush1.bf16.msra.mxu0 %v9378_v10  ;;  %v3871_v58 = vld [vmem:[#allocation9 + $0x4b0] sm:$0xff]  ;;  %v9474_v10 = vcombine.low %v3875_v19, %v3879_v6 }
 0x534   : > { %5567 = vmatprep.mubr.bf16.mxu0 %v16047_v33  ;;  %5680 = vmatprep.mubr.bf16.mxu1 %v16048_v20  ;;  %v3731_v45 = vld [vmem:[#allocation9 + $0x50] sm:$0xff]  ;;  %v9467_v14 = vcombine.high %v3867_v3, %v3871_v58 }
 0x535   : > { %5865 = vmatpush1.bf16.msra.mxu1 %v9506_v50  ;;  %5753 = vmatprep.subr.bf16.mxu0 %v9371_v27  ;;  %v3735_v50 = vld [vmem:[#allocation9 + $0x70] sm:$0xff] }
 0x536   : > { %5866 = vmatprep.subr.bf16.mxu1 %v9499_v12  ;;  %v16053_v27 = vld [vmem:[#allocation68_spill] sm:$0xff]  ;;  %v9338_v12 = vcombine.low %v3739_v38, %v3743_v42 }
 0x537   : > { %5754 = vmatpush1.bf16.msra.mxu0 %v9370_v25  ;;  %v3859_v25 = vld [vmem:[#allocation9 + $0x450] sm:$0xff] }
 0x538   : > { %5755 = vmatprep.subr.bf16.mxu0 %v9363_v8  ;;  %v3863_v2 = vld [vmem:[#allocation9 + $0x470] sm:$0xff]  ;;  %v9331_v8 = vcombine.high %v3731_v45, %v3735_v50 }
 0x539   : > { %5867 = vmatpush1.bf16.msra.mxu1 %v9498_v29  ;;  %v9466_v29 = vcombine.low %v3867_v3, %v3871_v58  ;;  %v3723_v37 = vld [vmem:[#allocation9 + $0x10] sm:$0xff] }
 0x53a   : > { %5568 = vmatmul.mubr.bf16.gmra.mxu0 %v16049_v17  ;;  %5868 = vmatprep.subr.bf16.mxu1 %v9491_v0  ;;  %v9459_v0 = vcombine.high %v3859_v25, %v3863_v2  ;;  %v3727_v43 = vld [vmem:[#allocation9 + $0x30] sm:$0xff] }
 0x53b   : > { %5681 = vmatmul.mubr.bf16.gmra.mxu1 %v16050_v56  ;;  %5756 = vmatpush1.bf16.msra.mxu0 %v9362_v1  ;;  %v9330_v1 = vcombine.low %v3731_v45, %v3735_v50  ;;  %v3851_v4 = vld [vmem:[#allocation9 + $0x410] sm:$0xff] }
 0x53c   : > { %5577 = vmatprep.mubr.bf16.mxu0 %v16051_v13  ;;  %5690 = vmatprep.mubr.bf16.mxu1 %v16052_v40  ;;  %v3855_v47 = vld [vmem:[#allocation9 + $0x430] sm:$0xff] }
 0x53d   : > { %5869 = vmatpush1.bf16.msra.mxu1 %v9490_v23  ;;  %5757 = vmatprep.subr.bf16.mxu0 %v9355_v55  ;;  %v9458_v23 = vcombine.low %v3859_v25, %v3863_v2  ;;  %v9323_v55 = vcombine.high %v3723_v37, %v3727_v43  ;;  %v3843_v60 = vld [vmem:[#allocation9 + $0x3d0] sm:$0xff] }
 0x53e   : > { %5870 = vmatprep.subr.bf16.mxu1 %v9483_v7  ;;  %v3847_v46 = vld [vmem:[#allocation9 + $0x3f0] sm:$0xff]  ;;  %v9451_v7 = vcombine.high %v3851_v4, %v3855_v47 }
 0x53f   : > { %5758 = vmatpush1.bf16.msra.mxu0 %v9354_v36  ;;  %v9322_v36 = vcombine.low %v3723_v37, %v3727_v43  ;;  %v3971_v19 = vld [vmem:[#allocation9 + $0x7d0] sm:$0xff] }
 0x540   : > { %5759 = vmatprep.subr.bf16.mxu0 %v9347_v16  ;;  %v3975_v6 = vld [vmem:[#allocation9 + $0x7f0] sm:$0xff]  ;;  %v9443_v16 = vcombine.high %v3843_v60, %v3847_v46 }
 0x541   : > { %5871 = vmatpush1.bf16.msra.mxu1 %v9482_v9  ;;  %v9450_v9 = vcombine.low %v3851_v4, %v3855_v47  ;;  %v3835_v38 = vld [vmem:[#allocation9 + $0x390] sm:$0xff] }
 0x542   : > { %5578 = vmatmul.mubr.bf16.gmra.mxu0 %v16053_v27  ;;  %5872 = vmatprep.subr.bf16.mxu1 %v9475_v57  ;;  %v9571_v57 = vcombine.high %v3971_v19, %v3975_v6  ;;  %v3839_v42 = vld [vmem:[#allocation9 + $0x3b0] sm:$0xff] }
 0x543   : > { %5691 = vmatmul.mubr.bf16.gmra.mxu1 %v16054_v39  ;;  %5760 = vmatpush1.bf16.msra.mxu0 %v9346_v62  ;;  %v9442_v62 = vcombine.low %v3843_v60, %v3847_v46  ;;  %v3963_v3 = vld [vmem:[#allocation9 + $0x790] sm:$0xff] }
 0x544   : > { %5587 = vmatprep.mubr.bf16.mxu0 %v16055_v24  ;;  %5700 = vmatprep.mubr.bf16.mxu1 %v12693_v11  ;;  %v3967_v58 = vld [vmem:[#allocation9 + $0x7b0] sm:$0xff] }
 0x545   : > { %5873 = vmatpush1.bf16.msra.mxu1 %v9474_v10  ;;  %5761 = vmatprep.subr.bf16.mxu0 %v9339_v18  ;;  %v9570_v10 = vcombine.low %v3971_v19, %v3975_v6  ;;  %v9435_v18 = vcombine.high %v3835_v38, %v3839_v42  ;;  %v3827_v45 = vld [vmem:[#allocation9 + $0x350] sm:$0xff] }
 0x546   : > { %5874 = vmatprep.subr.bf16.mxu1 %v9467_v14  ;;  %v3831_v50 = vld [vmem:[#allocation9 + $0x370] sm:$0xff]  ;;  %v9563_v14 = vcombine.high %v3963_v3, %v3967_v58 }
 0x547   : > { %5762 = vmatpush1.bf16.msra.mxu0 %v9338_v12  ;;  %v9434_v12 = vcombine.low %v3835_v38, %v3839_v42  ;;  %v3955_v25 = vld [vmem:[#allocation9 + $0x750] sm:$0xff] }
 0x548   : > { %5763 = vmatprep.subr.bf16.mxu0 %v9331_v8  ;;  %v3959_v2 = vld [vmem:[#allocation9 + $0x770] sm:$0xff]  ;;  %v9427_v8 = vcombine.high %v3827_v45, %v3831_v50 }
 0x549   : > { %5875 = vmatpush1.bf16.msra.mxu1 %v9466_v29  ;;  %v9562_v29 = vcombine.low %v3963_v3, %v3967_v58  ;;  %v3819_v37 = vld [vmem:[#allocation9 + $0x310] sm:$0xff] }
 0x54a   : > { %5588 = vmatmul.mubr.bf16.gmra.mxu0 %v12704_v52  ;;  %5876 = vmatprep.subr.bf16.mxu1 %v9459_v0  ;;  %v9555_v0 = vcombine.high %v3955_v25, %v3959_v2  ;;  %v3823_v43 = vld [vmem:[#allocation9 + $0x330] sm:$0xff] }
 0x54b   : > { %5701 = vmatmul.mubr.bf16.gmra.mxu1 %v12706_v54  ;;  %5764 = vmatpush1.bf16.msra.mxu0 %v9330_v1  ;;  %v9426_v1 = vcombine.low %v3827_v45, %v3831_v50  ;;  %v3947_v4 = vld [vmem:[#allocation9 + $0x710] sm:$0xff] }
 0x54c   : > { %5597 = vmatprep.mubr.bf16.mxu0 %v12728_v21  ;;  %5710 = vmatprep.mubr.bf16.mxu1 %v12734_v35  ;;  %v3951_v47 = vld [vmem:[#allocation9 + $0x730] sm:$0xff] }
 0x54d   : > { %5877 = vmatpush1.bf16.msra.mxu1 %v9458_v23  ;;  %5765 = vmatprep.subr.bf16.mxu0 %v9323_v55  ;;  %v9554_v23 = vcombine.low %v3955_v25, %v3959_v2  ;;  %v9419_v55 = vcombine.high %v3819_v37, %v3823_v43  ;;  %v3811_v60 = vld [vmem:[#allocation9 + $0x2d0] sm:$0xff] }
 0x54e   : > { %5878 = vmatprep.subr.bf16.mxu1 %v9451_v7  ;;  %v3815_v46 = vld [vmem:[#allocation9 + $0x2f0] sm:$0xff]  ;;  %v9547_v7 = vcombine.high %v3947_v4, %v3951_v47 }
 0x54f   : > { %5766 = vmatpush1.bf16.msra.mxu0 %v9322_v36  ;;  %v9418_v36 = vcombine.low %v3819_v37, %v3823_v43  ;;  %v3939_v19 = vld [vmem:[#allocation9 + $0x6d0] sm:$0xff] }
 0x550   : > { %5767 = vmatprep.subr.bf16.mxu0 %v9443_v16  ;;  %v3943_v6 = vld [vmem:[#allocation9 + $0x6f0] sm:$0xff]  ;;  %v9411_v16 = vcombine.high %v3811_v60, %v3815_v46 }
 0x551   : > { %5879 = vmatpush1.bf16.msra.mxu1 %v9450_v9  ;;  %v9546_v9 = vcombine.low %v3947_v4, %v3951_v47  ;;  %v3803_v38 = vld [vmem:[#allocation9 + $0x290] sm:$0xff] }
 0x552   : > { %5598 = vmatmul.mubr.bf16.gmra.mxu0 %v12742_v61  ;;  %5880 = vmatprep.subr.bf16.mxu1 %v9571_v57  ;;  %v9539_v57 = vcombine.high %v3939_v19, %v3943_v6  ;;  %v3807_v42 = vld [vmem:[#allocation9 + $0x2b0] sm:$0xff] }
 0x553   : > { %5711 = vmatmul.mubr.bf16.gmra.mxu1 %v12750_v31  ;;  %5768 = vmatpush2.bf16.msra.mxu0 %v9442_v62  ;;  %v9410_v62 = vcombine.low %v3811_v60, %v3815_v46  ;;  %v3931_v3 = vld [vmem:[#allocation9 + $0x690] sm:$0xff]  ;;  %v3780_v60 = vld [vmem:[#allocation9 + $0x1d8] sm:$0xff] }
 0x554   : > { %5607 = vmatprep.mubr.bf16.mxu0 %v12770_v32  ;;  %5720 = vmatprep.mubr.bf16.mxu1 %v12776_v41  ;;  %v3935_v58 = vld [vmem:[#allocation9 + $0x6b0] sm:$0xff]  ;;  %v3784_v46 = vld [vmem:[#allocation9 + $0x1f8] sm:$0xff] }
 0x555   : > { %5881 = vmatpush2.bf16.msra.mxu1 %v9570_v10  ;;  %5769 = vmatprep.subr.bf16.mxu0 %v9435_v18  ;;  %v9538_v10 = vcombine.low %v3939_v19, %v3943_v6  ;;  %v9403_v18 = vcombine.high %v3803_v38, %v3807_v42  ;;  %v3795_v45 = vld [vmem:[#allocation9 + $0x250] sm:$0xff]  ;;  %v3908_v19 = vld [vmem:[#allocation9 + $0x5d8] sm:$0xff] }
 0x556   : > { %5882 = vmatprep.subr.bf16.mxu1 %v9563_v14  ;;  %v3799_v50 = vld [vmem:[#allocation9 + $0x270] sm:$0xff]  ;;  %v9531_v14 = vcombine.high %v3931_v3, %v3935_v58  ;;  %v3912_v6 = vld [vmem:[#allocation9 + $0x5f8] sm:$0xff] }
 0x557   : > { %5770 = vmatpush2.bf16.msra.mxu0 %v9434_v12  ;;  %v9402_v12 = vcombine.low %v3803_v38, %v3807_v42  ;;  %v3923_v25 = vld [vmem:[#allocation9 + $0x650] sm:$0xff]  ;;  %v3776_v38 = vld [vmem:[#allocation9 + $0x1b8] sm:$0xff]  ;;  %v9509_v42 = vcombine.high %v3908_v19, %v3912_v6 }
 0x558   : > { %5771 = vmatprep.subr.bf16.mxu0 %v9427_v8  ;;  %v3927_v2 = vld [vmem:[#allocation9 + $0x670] sm:$0xff]  ;;  %v9395_v8 = vcombine.high %v3795_v45, %v3799_v50 }
 0x559   : > { %5883 = vmatpush2.bf16.msra.mxu1 %v9562_v29  ;;  %v9530_v29 = vcombine.low %v3931_v3, %v3935_v58  ;;  %v3787_v37 = vld [vmem:[#allocation9 + $0x210] sm:$0xff]  ;;  %v3900_v3 = vld [vmem:[#allocation9 + $0x598] sm:$0xff] }
 0x55a   : > { %5608 = vmatmul.mubr.bf16.gmra.mxu0 %v12781_v49  ;;  %5884 = vmatprep.subr.bf16.mxu1 %v9555_v0  ;;  %v9523_v0 = vcombine.high %v3923_v25, %v3927_v2  ;;  %v3791_v43 = vld [vmem:[#allocation9 + $0x230] sm:$0xff]  ;;  %v3904_v58 = vld [vmem:[#allocation9 + $0x5b8] sm:$0xff] }
 0x55b   : > { %5721 = vmatmul.mubr.bf16.gmra.mxu1 %v12787_v15  ;;  %5772 = vmatpush2.bf16.msra.mxu0 %v9426_v1  ;;  %v9394_v1 = vcombine.low %v3795_v45, %v3799_v50  ;;  %v3915_v4 = vld [vmem:[#allocation9 + $0x610] sm:$0xff]  ;;  %v3764_v45 = vld [vmem:[#allocation9 + $0x158] sm:$0xff] }
 0x55c   : > { %5617 = vmatprep.mubr.bf16.mxu0 %v12805_v63  ;;  %5730 = vmatprep.mubr.bf16.mxu1 %v12808_v48  ;;  %v3919_v47 = vld [vmem:[#allocation9 + $0x630] sm:$0xff]  ;;  %v3768_v50 = vld [vmem:[#allocation9 + $0x178] sm:$0xff] }
 0x55d   : > { %5885 = vmatpush2.bf16.msra.mxu1 %v9554_v23  ;;  %5773 = vmatprep.subr.bf16.mxu0 %v9419_v55  ;;  %v9522_v23 = vcombine.low %v3923_v25, %v3927_v2  ;;  %v9387_v55 = vcombine.high %v3787_v37, %v3791_v43  ;;  %v3892_v25 = vld [vmem:[#allocation9 + $0x558] sm:$0xff] }
 0x55e   : > { %5886 = vmatprep.subr.bf16.mxu1 %v9547_v7  ;;  %v9515_v7 = vcombine.high %v3915_v4, %v3919_v47  ;;  %v3896_v2 = vld [vmem:[#allocation9 + $0x578] sm:$0xff] }
 0x55f   : > { %5774 = vmatpush2.bf16.msra.mxu0 %v9418_v36  ;;  %v9386_v36 = vcombine.low %v3787_v37, %v3791_v43  ;;  %v3760_v37 = vld [vmem:[#allocation9 + $0x138] sm:$0xff]  ;;  %v9493_v43 = vcombine.high %v3892_v25, %v3896_v2 }
 0x560   : > { %5775 = vmatprep.subr.bf16.mxu0 %v9411_v16  ;;  %v9381_v16 = vcombine.high %v3780_v60, %v3784_v46 }
 0x561   : > { %5887 = vmatpush2.bf16.msra.mxu1 %v9546_v9  ;;  %v9514_v9 = vcombine.low %v3915_v4, %v3919_v47  ;;  %v3884_v4 = vld [vmem:[#allocation9 + $0x518] sm:$0xff] }
 0x562   : > { %5618 = vmatmul.mubr.bf16.gmra.mxu0 %v12821_v51  ;;  %5888 = vmatprep.subr.bf16.mxu1 %v9539_v57  ;;  %v3772_v57 = vld [vmem:[#allocation9 + $0x198] sm:$0xff] }
 0x563   : > { %5731 = vmatmul.mubr.bf16.gmra.mxu1 %v12823_v53  ;;  %5776 = vmatpush2.bf16.msra.mxu0 %v9410_v62  ;;  %v9380_v62 = vcombine.low %v3780_v60, %v3784_v46  ;;  %v3888_v47 = vld [vmem:[#allocation9 + $0x538] sm:$0xff] }
 0x564   : > { %5627 = vmatprep.mubr.bf16.mxu0 %v12825_v5  ;;  %5740 = vmatprep.mubr.bf16.mxu1 %v12834_v22  ;;  %v3748_v60 = vld [vmem:[#allocation9 + $0xd8] sm:$0xff] }
 0x565   : > { %5889 = vmatpush2.bf16.msra.mxu1 %v9538_v10  ;;  %5777 = vmatprep.subr.bf16.mxu0 %v9403_v18  ;;  %v9373_v10 = vcombine.high %v3772_v57, %v3776_v38  ;;  %v9508_v18 = vcombine.low %v3908_v19, %v3912_v6  ;;  %v3752_v46 = vld [vmem:[#allocation9 + $0xf8] sm:$0xff] }
 0x566   : > { %5890 = vmatprep.subr.bf16.mxu1 %v9531_v14  ;;  %v9501_v14 = vcombine.high %v3900_v3, %v3904_v58  ;;  %v3876_v19 = vld [vmem:[#allocation9 + $0x4d8] sm:$0xff] }
 0x567   : > { %5778 = vmatpush2.bf16.msra.mxu0 %v9402_v12  ;;  %v9372_v12 = vcombine.low %v3772_v57, %v3776_v38  ;;  %v3880_v6 = vld [vmem:[#allocation9 + $0x4f8] sm:$0xff] }
 0x568   : > { %5779 = vmatprep.subr.bf16.mxu0 %v9395_v8  ;;  %v9365_v8 = vcombine.high %v3764_v45, %v3768_v50  ;;  %v3740_v57 = vld [vmem:[#allocation9 + $0x98] sm:$0xff] }
 0x569   : > { %5891 = vmatpush2.bf16.msra.mxu1 %v9530_v29  ;;  %v9500_v29 = vcombine.low %v3900_v3, %v3904_v58  ;;  %v3744_v38 = vld [vmem:[#allocation9 + $0xb8] sm:$0xff] }
 0x56a   : > { %5628 = vmatmul.mubr.bf16.gmra.mxu0 %v12841_v44  ;;  %5892 = vmatprep.subr.bf16.mxu1 %v9523_v0  ;;  %v3756_v0 = vld [vmem:[#allocation9 + $0x118] sm:$0xff] }
 0x56b   : > { %5741 = vmatmul.mubr.bf16.gmra.mxu1 %v12843_v26  ;;  %5780 = vmatpush2.bf16.msra.mxu0 %v9394_v1  ;;  %v9364_v1 = vcombine.low %v3764_v45, %v3768_v50  ;;  %v3868_v3 = vld [vmem:[#allocation9 + $0x498] sm:$0xff] }
 0x56c   : > { %5783 = vmatprep.mubr.bf16.mxu0 %v16043_v28  ;;  %5896 = vmatprep.mubr.bf16.mxu1 %v16044_v30  ;;  %v3872_v58 = vld [vmem:[#allocation9 + $0x4b8] sm:$0xff] }
 0x56d   : > { %5893 = vmatpush2.bf16.msra.mxu1 %v9522_v23  ;;  %5781 = vmatprep.subr.bf16.mxu0 %v9387_v55  ;;  %v9357_v23 = vcombine.high %v3756_v0, %v3760_v37  ;;  %v9492_v55 = vcombine.low %v3892_v25, %v3896_v2  ;;  %v3732_v45 = vld [vmem:[#allocation9 + $0x58] sm:$0xff] }
 0x56e   : > { %5894 = vmatprep.subr.bf16.mxu1 %v9515_v7  ;;  %v9485_v7 = vcombine.high %v3884_v4, %v3888_v47  ;;  %v3736_v50 = vld [vmem:[#allocation9 + $0x78] sm:$0xff] }
 0x56f   : > { %5782 = vmatpush2.bf16.msra.mxu0 %v9386_v36  ;;  %v9356_v36 = vcombine.low %v3756_v0, %v3760_v37  ;;  %v3860_v25 = vld [vmem:[#allocation9 + $0x458] sm:$0xff] }
 0x570   : > { %5977 = vmatprep.subr.bf16.mxu0 %v9381_v16  ;;  %v9349_v16 = vcombine.high %v3748_v60, %v3752_v46  ;;  %v3864_v2 = vld [vmem:[#allocation9 + $0x478] sm:$0xff] }
 0x571   : > { %5895 = vmatpush2.bf16.msra.mxu1 %v9514_v9  ;;  %v9484_v9 = vcombine.low %v3884_v4, %v3888_v47  ;;  %v3724_v0 = vld [vmem:[#allocation9 + $0x18] sm:$0xff] }
 0x572   : > { %5784 = vmatmul.mubr.bf16.vlgmr.msra.gmra.mxu0 %v16045_v34  ;;  %6090 = vmatprep.subr.bf16.mxu1 %v9509_v42  ;;  %v9477_v42 = vcombine.high %v3876_v19, %v3880_v6  ;;  %v3728_v37 = vld [vmem:[#allocation9 + $0x38] sm:$0xff] }
 0x573   : > { %5978 = vmatpush1.bf16.msra.mxu0 %v9380_v62  ;;  %5793 = vmatprep.mubr.bf16.mxu0 %v16047_v33  ;;  %v9348_v62 = vcombine.low %v3748_v60, %v3752_v46  ;;  %v3852_v4 = vld [vmem:[#allocation9 + $0x418] sm:$0xff] }
 0x574   : > { %5897 = vmatmul.mubr.bf16.vlgmr.msra.gmra.mxu1 %v16046_v59  ;;  %5979 = vmatprep.subr.bf16.mxu0 %v9373_v10  ;;  %v9341_v10 = vcombine.high %v3740_v57, %v3744_v38  ;;  %v3856_v47 = vld [vmem:[#allocation9 + $0x438] sm:$0xff] }
 0x575   : > { %5906 = vmatprep.mubr.bf16.mxu1 %v16048_v20  ;;  %6091 = vmatpush1.bf16.msra.mxu1 %v9508_v18  ;;  %v9476_v18 = vcombine.low %v3876_v19, %v3880_v6  ;;  %v3844_v60 = vld [vmem:[#allocation9 + $0x3d8] sm:$0xff] }
 0x576   : > { %6092 = vmatprep.subr.bf16.mxu1 %v9501_v14  ;;  %v9469_v14 = vcombine.high %v3868_v3, %v3872_v58  ;;  %v3848_v46 = vld [vmem:[#allocation9 + $0x3f8] sm:$0xff] }
 0x577   : > { %5980 = vmatpush1.bf16.msra.mxu0 %v9372_v12  ;;  %v9340_v12 = vcombine.low %v3740_v57, %v3744_v38  ;;  %v3972_v19 = vld [vmem:[#allocation9 + $0x7d8] sm:$0xff] }
 0x578   : > { %5981 = vmatprep.subr.bf16.mxu0 %v9365_v8  ;;  %v9333_v8 = vcombine.high %v3732_v45, %v3736_v50  ;;  %v3976_v6 = vld [vmem:[#allocation9 + $0x7f8] sm:$0xff] }
 0x579   : > { %6093 = vmatpush1.bf16.msra.mxu1 %v9500_v29  ;;  %v9468_v29 = vcombine.low %v3868_v3, %v3872_v58  ;;  %v3836_v57 = vld [vmem:[#allocation9 + $0x398] sm:$0xff] }
 0x57a   : > { %5794 = vmatmul.mubr.bf16.gmra.mxu0 %v16049_v17  ;;  %6094 = vmatprep.subr.bf16.mxu1 %v9493_v43  ;;  %v9461_v43 = vcombine.high %v3860_v25, %v3864_v2  ;;  %v3840_v38 = vld [vmem:[#allocation9 + $0x3b8] sm:$0xff] }
 0x57b   : > { %5982 = vmatpush1.bf16.msra.mxu0 %v9364_v1  ;;  %5803 = vmatprep.mubr.bf16.mxu0 %v16051_v13  ;;  %v9332_v1 = vcombine.low %v3732_v45, %v3736_v50  ;;  %v3964_v3 = vld [vmem:[#allocation9 + $0x798] sm:$0xff]  ;;  %v9572_v45 = vcombine.low %v3972_v19, %v3976_v6 }
 0x57c   : > { %5907 = vmatmul.mubr.bf16.gmra.mxu1 %v16050_v56  ;;  %5983 = vmatprep.subr.bf16.mxu0 %v9357_v23  ;;  %v9325_v23 = vcombine.high %v3724_v0, %v3728_v37  ;;  %v3968_v58 = vld [vmem:[#allocation9 + $0x7b8] sm:$0xff] }
 0x57d   : > { %5916 = vmatprep.mubr.bf16.mxu1 %v16052_v40  ;;  %6095 = vmatpush1.bf16.msra.mxu1 %v9492_v55  ;;  %v9460_v55 = vcombine.low %v3860_v25, %v3864_v2  ;;  %v3828_v50 = vld [vmem:[#allocation9 + $0x358] sm:$0xff]  ;;  %v9436_v2 = vcombine.low %v3836_v57, %v3840_v38 }
 0x57e   : > { %6096 = vmatprep.subr.bf16.mxu1 %v9485_v7  ;;  %v9453_v7 = vcombine.high %v3852_v4, %v3856_v47 }
 0x57f   : > { %5984 = vmatpush1.bf16.msra.mxu0 %v9356_v36  ;;  %v9324_v36 = vcombine.low %v3724_v0, %v3728_v37  ;;  %v12902_v37 = vld [vmem:[%s15771_s11] sm:$0xff] }
 0x580   : > { %5985 = vmatprep.subr.bf16.mxu0 %v9349_v16  ;;  %v9445_v16 = vcombine.high %v3844_v60, %v3848_v46  ;;  %v5446_v25 = vpop.f32.mrf.mxu1 }
 0x581   : > { %6097 = vmatpush1.bf16.msra.mxu1 %v9484_v9  ;;  %v9452_v9 = vcombine.low %v3852_v4, %v3856_v47  ;;  %v3820_v4 = vld [vmem:[#allocation9 + $0x318] sm:$0xff] }
 0x582   : > { %5804 = vmatmul.mubr.bf16.gmra.mxu0 %v16053_v27  ;;  %6098 = vmatprep.subr.bf16.mxu1 %v9477_v42  ;;  %v9573_v42 = vcombine.high %v3972_v19, %v3976_v6  ;;  %v3824_v47 = vld [vmem:[#allocation9 + $0x338] sm:$0xff] }
 0x583   : > { %5986 = vmatpush1.bf16.msra.mxu0 %v9348_v62  ;;  %5813 = vmatprep.mubr.bf16.mxu0 %v16055_v24  ;;  %v9444_v62 = vcombine.low %v3844_v60, %v3848_v46  ;;  %v3948_v46 = vld [vmem:[#allocation9 + $0x718] sm:$0xff] }
 0x584   : > { %5917 = vmatmul.mubr.bf16.gmra.mxu1 %v16054_v39  ;;  %5987 = vmatprep.subr.bf16.mxu0 %v9341_v10  ;;  %v5333_v10 = vpop.f32.mrf.mxu0 }
 0x585   : > { %5926 = vmatprep.mubr.bf16.mxu1 %v12693_v11  ;;  %6099 = vmatpush1.bf16.msra.mxu1 %v9476_v18  ;;  %v9437_v18 = vcombine.high %v3836_v57, %v3840_v38  ;;  %v3812_v57 = vld [vmem:[#allocation9 + $0x2d8] sm:$0xff] }
 0x586   : > { %6100 = vmatprep.subr.bf16.mxu1 %v9469_v14  ;;  %v3832_v14 = vld [vmem:[#allocation9 + $0x378] sm:$0xff]  ;;  %v5335_v0 = vpop.f32.mrf.mxu0 }
 0x587   : > { %5988 = vmatpush1.bf16.msra.mxu0 %v9340_v12  ;;  %v9565_v12 = vcombine.high %v3964_v3, %v3968_v58  ;;  %v9428_v60 = vcombine.low %v3828_v50, %v3832_v14  ;;  %v3816_v38 = vld [vmem:[#allocation9 + $0x2f8] sm:$0xff] }
 0x588   : > { %5989 = vmatprep.subr.bf16.mxu0 %v9333_v8  ;;  %v3956_v8 = vld [vmem:[#allocation9 + $0x758] sm:$0xff]  ;;  %v5337_v6 = vpop.f32.mrf.mxu0 }
 0x589   : > { %6101 = vmatpush1.bf16.msra.mxu1 %v9468_v29  ;;  %v3960_v29 = vld [vmem:[#allocation9 + $0x778] sm:$0xff] }
 0x58a   : > { %5814 = vmatmul.mubr.bf16.gmra.mxu0 %v12704_v52  ;;  %6102 = vmatprep.subr.bf16.mxu1 %v9461_v43  ;;  %v9429_v43 = vcombine.high %v3828_v50, %v3832_v14  ;;  %v3944_v50 = vld [vmem:[#allocation9 + $0x6f8] sm:$0xff] }
 0x58b   : > { %5990 = vmatpush1.bf16.msra.mxu0 %v9332_v1  ;;  %5823 = vmatprep.mubr.bf16.mxu0 %v12728_v21  ;;  %v9564_v1 = vcombine.low %v3964_v3, %v3968_v58 }
 0x58c   : > { %5927 = vmatmul.mubr.bf16.gmra.mxu1 %v12706_v54  ;;  %5991 = vmatprep.subr.bf16.mxu0 %v9325_v23  ;;  %v9557_v23 = vcombine.high %v3956_v8, %v3960_v29 }
 0x58d   : > { %5936 = vmatprep.mubr.bf16.mxu1 %v12734_v35  ;;  %6103 = vmatpush1.bf16.msra.mxu1 %v9460_v55  ;;  %v5448_v55 = vpop.f32.mrf.mxu1 }
 0x58e   : > { %6104 = vmatprep.subr.bf16.mxu1 %v9453_v7  ;;  %v3952_v7 = vld [vmem:[#allocation9 + $0x738] sm:$0xff] }
 0x58f   : > { %5992 = vmatpush1.bf16.msra.mxu0 %v9324_v36  ;;  %v16056_v36 = vld [vmem:[#allocation25_spill] sm:$0xff]  ;;  %v9549_v3 = vcombine.high %v3948_v46, %v3952_v7  ;;  %v5450_v58 = vpop.f32.mrf.mxu1 }
 0x590   : > { %5993 = vmatprep.subr.bf16.mxu0 %v9445_v16  ;;  %v12908_v19 = vrot.slane %v12902_v37, %v16056_v36  ;;  %v9421_v16 = vcombine.high %v3820_v4, %v3824_v47 }
 0x591   : > { %6105 = vmatpush1.bf16.msra.mxu1 %v9452_v9  ;;  %v9556_v9 = vcombine.low %v3956_v8, %v3960_v29  ;;  %v9548_v29 = vcombine.low %v3948_v46, %v3952_v7 }
 0x592   : > { %5824 = vmatmul.mubr.bf16.gmra.mxu0 %v12742_v61  ;;  %6106 = vmatprep.subr.bf16.mxu1 %v9573_v42  ;;  %v16057_v42 = vld [vmem:[#allocation24_spill] sm:$0xff]  ;;  %v5334_v14 = vadd.f32 %v5333_v10, %v12908_v19  ;;  %v5338_v8 = vadd.f32 %v5337_v6, %v12908_v19  ;;  %v5452_v10 = vpop.f32.mrf.mxu1 }
 0x593   : > { %5994 = vmatpush2.bf16.msra.mxu0 %v9444_v62  ;;  %5833 = vmatprep.mubr.bf16.mxu0 %v12770_v32  ;;  %v12912_v62 = vrot.slane %v12902_v37, %v16057_v42  ;;  %v3932_v42 = vld [vmem:[#allocation9 + $0x698] sm:$0xff] }
 0x594   : > { %5937 = vmatmul.mubr.bf16.gmra.mxu1 %v12750_v31  ;;  %5995 = vmatprep.subr.bf16.mxu0 %v9437_v18  ;;  %v9420_v18 = vcombine.low %v3820_v4, %v3824_v47  ;;  %v12922_v36 = vadd.f32 %v5446_v25, %v5334_v14 }
 0x595   : > { %5946 = vmatprep.mubr.bf16.mxu1 %v12776_v41  ;;  %6107 = vmatpush2.bf16.msra.mxu1 %v9572_v45  ;;  %v3940_v45 = vld [vmem:[#allocation9 + $0x6d8] sm:$0xff] }
 0x596   : > { %6108 = vmatprep.subr.bf16.mxu1 %v9565_v12  ;;  %v5339_v12 = vpop.f32.mrf.mxu0  ;;  %v9541_v4 = vcombine.high %v3940_v45, %v3944_v50  ;;  %v9540_v7 = vcombine.low %v3940_v45, %v3944_v50 }
 0x597   : > { %5996 = vmatpush2.bf16.msra.mxu0 %v9436_v2  ;;  %v9413_v2 = vcombine.high %v3812_v57, %v3816_v38  ;;  %v5340_v47 = vadd.f32 %v5339_v12, %v12912_v62 }
 0x598   : > { %5997 = vmatprep.subr.bf16.mxu0 %v9429_v43  ;;  %v3804_v43 = vld [vmem:[#allocation9 + $0x298] sm:$0xff] }
 0x599   : > { %6109 = vmatpush2.bf16.msra.mxu1 %v9564_v1  ;;  %v3808_v1 = vld [vmem:[#allocation9 + $0x2b8] sm:$0xff]  ;;  %v12929_v12 = vadd.f32 %v5452_v10, %v5340_v47 }
 0x59a   : > { %5834 = vmatmul.mubr.bf16.gmra.mxu0 %v12781_v49  ;;  %6110 = vmatprep.subr.bf16.mxu1 %v9557_v23  ;;  %v5336_v23 = vadd.f32 %v5335_v0, %v12912_v62  ;;  %v9405_v6 = vcombine.high %v3804_v43, %v3808_v1  ;;  %v5343_v46 = vpop.f32.mrf.mxu0  ;;  %v3800_v0 = vld [vmem:[#allocation9 + $0x278] sm:$0xff]  ;;  %v9404_v45 = vcombine.low %v3804_v43, %v3808_v1 }
 0x59b   : > { %5998 = vmatpush2.bf16.msra.mxu0 %v9428_v60  ;;  %5843 = vmatprep.mubr.bf16.mxu0 %v12805_v63  ;;  %v9412_v60 = vcombine.low %v3812_v57, %v3816_v38  ;;  %v3924_v57 = vld [vmem:[#allocation9 + $0x658] sm:$0xff]  ;;  %v5344_v25 = vadd.f32 %v5343_v46, %v12908_v19 }
 0x59c   : > { %5947 = vmatmul.mubr.bf16.gmra.mxu1 %v12787_v15  ;;  %5999 = vmatprep.subr.bf16.mxu0 %v9421_v16  ;;  %v3936_v16 = vld [vmem:[#allocation9 + $0x6b8] sm:$0xff]  ;;  %v5456_v14 = vpop.f32.mrf.mxu1 }
 0x59d   : > { %5956 = vmatprep.mubr.bf16.mxu1 %v12808_v48  ;;  %6111 = vmatpush2.bf16.msra.mxu1 %v9556_v9  ;;  %v12924_v48 = vadd.f32 %v5450_v58, %v5338_v8  ;;  %v3796_v9 = vld [vmem:[#allocation9 + $0x258] sm:$0xff]  ;;  %v5345_v58 = vpop.f32.mrf.mxu0  ;;  %v12943_v46 = vadd.f32 %v5456_v14, %v5344_v25 }
 0x59e   : > { %6112 = vmatprep.subr.bf16.mxu1 %v9549_v3  ;;  %v12926_v3 = vadd.f32 %v5448_v55, %v5336_v23  ;;  %v3928_v38 = vld [vmem:[#allocation9 + $0x678] sm:$0xff]  ;;  %v6331_v55 = vmul.f32 %v12922_v36, %v12922_v36  ;;  %v9397_v50 = vcombine.high %v3796_v9, %v3800_v0  ;;  %v5458_v8 = vpop.f32.mrf.mxu1  ;;  %v9532_v23 = vcombine.low %v3932_v42, %v3936_v16 }
 0x59f   : > { %6000 = vmatpush2.bf16.msra.mxu0 %v9420_v18  ;;  %v9533_v18 = vcombine.high %v3932_v42, %v3936_v16  ;;  %v3788_v47 = vld [vmem:[#allocation9 + $0x218] sm:$0xff]  ;;  %v9396_v16 = vcombine.low %v3796_v9, %v3800_v0  ;;  %v9524_v14 = vcombine.low %v3924_v57, %v3928_v38  ;;  %v6347_v0 = vmul.f32 %v12943_v46, %v12943_v46 }
 0x5a0   : > { %6001 = vmatprep.subr.bf16.mxu0 %v9413_v2  ;;  %v6339_v2 = vmul.f32 %v12924_v48, %v12924_v48  ;;  %v3792_v10 = vld [vmem:[#allocation9 + $0x238] sm:$0xff]  ;;  %v6332_v43 = vmul.f32 %v12926_v3, %v12926_v3 }
 0x5a1   : > { %6113 = vmatpush2.bf16.msra.mxu1 %v9548_v29  ;;  %v5347_v29 = vpop.f32.mrf.mxu0  ;;  %v3916_v1 = vld [vmem:[#allocation9 + $0x618] sm:$0xff] }
 0x5a2   : > { %5844 = vmatmul.mubr.bf16.gmra.mxu0 %v12821_v51  ;;  %6114 = vmatprep.subr.bf16.mxu1 %v9541_v4  ;;  %v9525_v4 = vcombine.high %v3924_v57, %v3928_v38  ;;  %v6467_v15 = vmul.f32 %v6339_v2, %v12924_v48 }
 0x5a3   : > { %6002 = vmatpush2.bf16.msra.mxu0 %v9412_v60  ;;  %5853 = vmatprep.mubr.bf16.mxu0 %v12825_v5  ;;  %v3920_v60 = vld [vmem:[#allocation9 + $0x638] sm:$0xff]  ;;  %v5349_v42 = vpop.f32.mrf.mxu0  ;;  %v6459_v5 = vmul.f32 %v6331_v55, %v12922_v36 }
 0x5a4   : > { %5957 = vmatmul.mubr.bf16.gmra.mxu1 %v12823_v53  ;;  %6003 = vmatprep.subr.bf16.mxu0 %v9405_v6  ;;  %v6340_v6 = vmul.f32 %v12929_v12, %v12929_v12  ;;  %v5346_v53 = vadd.f32 %v5345_v58, %v12912_v62  ;;  %v5350_v51 = vadd.f32 %v5349_v42, %v12912_v62  ;;  %v6595_v38 = vmul.f32 0.044715, %v6467_v15 }
 0x5a5   : > { %5966 = vmatprep.mubr.bf16.mxu1 %v12834_v22  ;;  %6115 = vmatpush2.bf16.msra.mxu1 %v9540_v7  ;;  %v5348_v22 = vadd.f32 %v5347_v29, %v12908_v19  ;;  %v5460_v7 = vpop.f32.mrf.mxu1  ;;  %v9517_v58 = vcombine.high %v3916_v1, %v3920_v60  ;;  %v6460_v29 = vmul.f32 %v6332_v43, %v12926_v3  ;;  %v6587_v57 = vmul.f32 0.044715, %v6459_v5 }
 0x5a6   : > { %6116 = vmatprep.subr.bf16.mxu1 %v9533_v18  ;;  %v9389_v18 = vcombine.high %v3788_v47, %v3792_v10  ;;  %v6468_v9 = vmul.f32 %v6340_v6, %v12929_v12  ;;  %v6475_v5 = vmul.f32 %v6347_v0, %v12943_v46  ;;  %v10167_v0 = vld [vmem:[#allocation10 + $0x160] ss:$8 sps:$4 sm:$0xff]  }
 0x5a7   : > { %6004 = vmatpush2.bf16.msra.mxu0 %v9404_v45  ;;  %v12950_v63 = vadd.f32 %v5460_v7, %v5348_v22  ;;  %v5462_v25 = vpop.f32.mrf.mxu1  ;;  %v12959_v45 = vadd.f32 %v5458_v8, %v5346_v53  ;;  %v9388_v22 = vcombine.low %v3788_v47, %v3792_v10  ;;  %v6588_v2 = vmul.f32 0.044715, %v6460_v29  ;;  %v10133_v47 = vld [vmem:[#allocation10 + $0x64] ss:$8 sps:$4 sm:$0xff]  }
 0x5a8   : > { %6005 = vmatprep.subr.bf16.mxu0 %v9397_v50  ;;  %v12953_v49 = vadd.f32 %v5462_v25, %v5350_v51  ;;  %v10130_v51 = vld [vmem:[#allocation10 + $0x74] ss:$8 sps:$4 sm:$0xff]   ;;  %v9516_v50 = vcombine.low %v3916_v1, %v3920_v60  ;;  %v6715_v15 = vadd.f32 %v6587_v57, %v12922_v36  ;;  %v10161_v60 = vld [vmem:[#allocation10 + $0x170] ss:$8 sps:$4 sm:$0xff]   ;;  %v6603_v7 = vmul.f32 0.044715, %v6475_v5 }
 0x5a9   : > { %6117 = vmatpush2.bf16.msra.mxu1 %v9532_v23  ;;  %v6355_v55 = vmul.f32 %v12950_v63, %v12950_v63  ;;  %v6348_v8 = vmul.f32 %v12959_v45, %v12959_v45  ;;  %v10163_v23 = vld [vmem:[#allocation10 + $0x174] ss:$8 sps:$4 sm:$0xff]   ;;  %v6716_v43 = vadd.f32 %v6588_v2, %v12926_v3  ;;  %v10131_v25 = vld [vmem:[#allocation10 + $0x60] ss:$8 sps:$4 sm:$0xff]   ;;  %v10139_v2 = vld [vmem:[#allocation10 + $0x44] ss:$8 sps:$4 sm:$0xff]  }
 0x5aa   : > { %5854 = vmatmul.mubr.bf16.gmra.mxu0 %v12841_v44  ;;  %6118 = vmatprep.subr.bf16.mxu1 %v9525_v4  ;;  %v6356_v53 = vmul.f32 %v12953_v49, %v12953_v49  ;;  %v10128_v4 = vld [vmem:[#allocation10 + $0x70] ss:$8 sps:$4 sm:$0xff]   ;;  %v6731_v57 = vadd.f32 %v6603_v7, %v12943_v46 }
 0x5ab   : > { %6006 = vmatpush2.bf16.msra.mxu0 %v9396_v16  ;;  %6009 = vmatprep.mubr.bf16.mxu0 %v16043_v28  ;;  %v6596_v28 = vmul.f32 0.044715, %v6468_v9  ;;  %v6483_v10 = vmul.f32 %v6355_v55, %v12950_v63  ;;  %v6476_v42 = vmul.f32 %v6348_v8, %v12959_v45  ;;  %v10169_v16 = vld [vmem:[#allocation10 + $0x164] ss:$8 sps:$4 sm:$0xff]  }
 0x5ac   : > { %5967 = vmatmul.mubr.bf16.gmra.mxu1 %v12843_v26  ;;  %6007 = vmatprep.subr.bf16.mxu0 %v9389_v18  ;;  %v6484_v1 = vmul.f32 %v6356_v53, %v12953_v49  ;;  %v6843_v18 = vmul.f32 0.7978846, %v6715_v15 }
 0x5ad   : > { %6119 = vmatpush2.bf16.msra.mxu1 %v9524_v14  ;;  %6122 = vmatprep.mubr.bf16.mxu1 %v16044_v30  ;;  %v6723_v30 = vadd.f32 %v6595_v38, %v12924_v48  ;;  %v6724_v6 = vadd.f32 %v6596_v28, %v12929_v12  ;;  %v6611_v29 = vmul.f32 0.044715, %v6483_v10  ;;  %v10137_v10 = vld [vmem:[#allocation10 + $0x40] ss:$8 sps:$4 sm:$0xff]  }
 0x5ae   : > { %6120 = vmatprep.subr.bf16.mxu1 %v9517_v58  ;;  %v10136_v58 = vld [vmem:[#allocation10 + $0x54] ss:$8 sps:$4 sm:$0xff]   ;;  %v6612_v9 = vmul.f32 0.044715, %v6484_v1  ;;  %10576 = vtanh.f32 %v6843_v18 }
 0x5af   : > { %6008 = vmatpush2.bf16.msra.mxu0 %v9388_v22  ;;  %v6851_v14 = vmul.f32 0.7978846, %v6723_v30  ;;  %v6852_v22 = vmul.f32 0.7978846, %v6724_v6 }
 0x5b0   : > { %8199 = vmatprep.subr.bf16.mxu0 %v10130_v51  ;;  %v6604_v51 = vmul.f32 0.044715, %v6476_v42  ;;  %v5353_v38 = vpop.f32.mrf.mxu0  ;;  %v6740_v28 = vadd.f32 %v6612_v9, %v12953_v49  ;;  %v10187_v9 = vld [vmem:[#allocation10 + $0x134] ss:$8 sps:$4 sm:$0xff]  }
 0x5b1   : > { %6121 = vmatpush2.bf16.msra.mxu1 %v9516_v50  ;;  %v5354_v55 = vadd.f32 %v5353_v38, %v12908_v19  ;;  %v5466_v50 = vpop.f32.mrf.mxu1  ;;  %10578 = vtanh.f32 %v6851_v14 }
 0x5b2   : > { %6010 = vmatmul.mubr.bf16.vlgmr.msra.gmra.mxu0 %v16045_v34  ;;  %8312 = vmatprep.subr.bf16.mxu1 %v10163_v23  ;;  %v6844_v34 = vmul.f32 0.7978846, %v6716_v43  ;;  %v5355_v53 = vpop.f32.mrf.mxu0  ;;  %v6859_v23 = vmul.f32 0.7978846, %v6731_v57  ;;  %v6732_v15 = vadd.f32 %v6604_v51, %v12959_v45  ;;  %v6868_v7 = vmul.f32 0.7978846, %v6740_v28 }
 0x5b3   : > { %6019 = vmatprep.mubr.bf16.mxu0 %v16047_v33  ;;  %8200 = vmatpush1.bf16.msra.mxu0 %v10128_v4  ;;  %v10175_v33 = vld [vmem:[#allocation10 + $0x154] ss:$8 sps:$4 sm:$0xff]   ;;  %v12986_v5 = vadd.f32 %v5466_v50, %v5354_v55  ;;  %v5356_v8 = vadd.f32 %v5355_v53, %v12912_v62  ;;  %v5468_v4 = vpop.f32.mrf.mxu1  ;;  %v10143_v51 = vld [vmem:[#allocation10 + $0x20] ss:$8 sps:$4 sm:$0xff]  }
 0x5b4   : > { %6123 = vmatmul.mubr.bf16.vlgmr.msra.gmra.mxu1 %v16046_v59  ;;  %8201 = vmatprep.subr.bf16.mxu0 %v10133_v47  ;;  %v10134_v59 = vld [vmem:[#allocation10 + $0x50] ss:$8 sps:$4 sm:$0xff]   ;;  %10580 = vtanh.f32 %v6844_v34  ;;  %v5357_v30 = vpop.f32.mrf.mxu0  ;;  %v10191_v53 = vld [vmem:[#allocation10 + $0x120] ss:$8 sps:$4 sm:$0xff]  }
 0x5b5   : > { %6132 = vmatprep.mubr.bf16.mxu1 %v16048_v20  ;;  %8313 = vmatpush1.bf16.msra.mxu1 %v10161_v60  ;;  %v6739_v20 = vadd.f32 %v6611_v29, %v12950_v63  ;;  %10582 = vtanh.f32 %v6852_v22  ;;  %v10173_v47 = vld [vmem:[#allocation10 + $0x150] ss:$8 sps:$4 sm:$0xff]   ;;  %v6363_v43 = vmul.f32 %v12986_v5, %v12986_v5  ;;  %v12994_v1 = vadd.f32 %v5468_v4, %v5356_v8  ;;  %v10181_v60 = vld [vmem:[#allocation10 + $0x144] ss:$8 sps:$4 sm:$0xff]  }
 0x5b6   : > { %8314 = vmatprep.subr.bf16.mxu1 %v10169_v16  ;;  %10584 = vtanh.f32 %v6859_v23  ;;  %v6860_v16 = vmul.f32 0.7978846, %v6732_v15  ;;  %v5358_v18 = vadd.f32 %v5357_v30, %v12908_v19  ;;  %v10145_v29 = vld [vmem:[#allocation10 + $0x24] ss:$8 sps:$4 sm:$0xff]   ;;  %v10185_v22 = vld [vmem:[#allocation10 + $0x130] ss:$8 sps:$4 sm:$0xff]  }
 0x5b7   : > { %8202 = vmatpush1.bf16.msra.mxu0 %v10131_v25  ;;  %v6867_v6 = vmul.f32 0.7978846, %v6739_v20  ;;  %v6364_v42 = vmul.f32 %v12994_v1, %v12994_v1  ;;  %v10179_v25 = vld [vmem:[#allocation10 + $0x140] ss:$8 sps:$4 sm:$0xff]   ;;  %v6491_v14 = vmul.f32 %v6363_v43, %v12986_v5  ;;  %v10148_v20 = vld [vmem:[#allocation10 + $0x14] ss:$8 sps:$4 sm:$0xff]  }
 0x5b8   : > { %8203 = vmatprep.subr.bf16.mxu0 %v10136_v58  ;;  %v5470_v58 = vpop.f32.mrf.mxu1  ;;  %v10151_v30 = vld [vmem:[#allocation10 + $0x4] ss:$8 sps:$4 sm:$0xff]  }
 0x5b9   : > { %8315 = vmatpush1.bf16.msra.mxu1 %v10167_v0  ;;  %10586 = vtanh.f32 %v6867_v6  ;;  %v13005_v0 = vadd.f32 %v5470_v58, %v5358_v18  ;;  %v6619_v57 = vmul.f32 0.044715, %v6491_v14  ;;  %v10149_v6 = vld [vmem:[#allocation10] ss:$8 sps:$4 sm:$0xff]   ;;  %v10194_v58 = vld [vmem:[#allocation10 + $0x110] ss:$8 sps:$4 sm:$0xff]  }
 0x5ba   : > { %6020 = vmatmul.mubr.bf16.gmra.mxu0 %v16049_v17  ;;  %8316 = vmatprep.subr.bf16.mxu1 %v10175_v33  ;;  %v10142_v17 = vld [vmem:[#allocation10 + $0x34] ss:$8 sps:$4 sm:$0xff]   ;;  %10588 = vtanh.f32 %v6868_v7  ;;  %v5472_v38 = vpop.f32.mrf.mxu1  ;;  %v10193_v33 = vld [vmem:[#allocation10 + $0x124] ss:$8 sps:$4 sm:$0xff]  }
 0x5bb   : > { %6029 = vmatprep.mubr.bf16.mxu0 %v16051_v13  ;;  %8204 = vmatpush1.bf16.msra.mxu0 %v10134_v59  ;;  %v5359_v13 = vpop.f32.mrf.mxu0  ;;  %10590 = vtanh.f32 %v6860_v16  ;;  %v10577_v59 = vpop.eup %10576  ;;  %v6747_v8 = vadd.f32 %v6619_v57, %v12986_v5  ;;  %v16060_v7 = vld [vmem:[#allocation26_spill] sm:$0xff]  ;;  %v6211_v16 = vmul.f32 0.5, %v12924_v48  ;;  %v6212_v48 = vmul.f32 0.5, %v12929_v12 }
 0x5bc   : > { %6133 = vmatmul.mubr.bf16.gmra.mxu1 %v16050_v56  ;;  %8205 = vmatprep.subr.bf16.mxu0 %v10139_v2  ;;  %v10140_v56 = vld [vmem:[#allocation10 + $0x30] ss:$8 sps:$4 sm:$0xff]   ;;  %v5360_v34 = vadd.f32 %v5359_v13, %v12912_v62  ;;  %v7099_v23 = vadd.f32 1.0, %v10577_v59  ;;  %v10196_v13 = vld [vmem:[#allocation10 + $0x114] ss:$8 sps:$4 sm:$0xff]  }
 0x5bd   : > { %6142 = vmatprep.mubr.bf16.mxu1 %v16052_v40  ;;  %8317 = vmatpush1.bf16.msra.mxu1 %v10173_v47  ;;  %v6492_v40 = vmul.f32 %v6364_v42, %v12994_v1  ;;  %v16058_v47 = vld [vmem:[#allocation23_spill] sm:$0xff]  ;;  %v13027_v42 = vrot.slane %v12902_v37, %v16060_v7 }
 0x5be   : > { %8318 = vmatprep.subr.bf16.mxu1 %v10181_v60  ;;  %v13009_v50 = vadd.f32 %v5472_v38, %v5360_v34  ;;  %v6203_v60 = vmul.f32 0.5, %v12922_v36  ;;  %v10199_v34 = vld [vmem:[#allocation10 + $0x104] ss:$8 sps:$4 sm:$0xff]  }
 0x5bf   : > { %8206 = vmatpush1.bf16.msra.mxu0 %v10137_v10  ;;  %v6620_v55 = vmul.f32 0.044715, %v6492_v40  ;;  %v16059_v10 = vsub.s32 3, %v16058_v47  ;;  %v6219_v40 = vmul.f32 0.5, %v12943_v46 }
 0x5c0   : > { %8207 = vmatprep.subr.bf16.mxu0 %v10142_v17  ;;  %v6204_v17 = vmul.f32 0.5, %v12926_v3  ;;  %v6875_v3 = vmul.f32 0.7978846, %v6747_v8 }
 0x5c1   : > { %8319 = vmatpush1.bf16.msra.mxu1 %v10179_v25  ;;  %v6748_v4 = vadd.f32 %v6620_v55, %v12994_v1  ;;  %v13021_v43 = vrot.slane %v12902_v37, %v16059_v10  ;;  %v13050_v55 = vmul.f32 0.5, %v12959_v45 }
 0x5c2   : > { %6030 = vmatmul.mubr.bf16.gmra.mxu0 %v16053_v27  ;;  %v10579_v27 = vpop.eup %10578  ;;  %8320 = vmatprep.subr.bf16.mxu1 %v10187_v9  ;;  %v13036_v9 = vmul.f32 %v7099_v23, %v6203_v60  ;;  %10592 = vtanh.f32 %v6875_v3  ;;  %v10152_v23 = vld [vmem:[#allocation10 + $0xf0] ss:$8 sps:$4 sm:$0xff]  }
 0x5c3   : > { %6039 = vmatprep.mubr.bf16.mxu0 %v16055_v24  ;;  %8208 = vmatpush1.bf16.msra.mxu0 %v10140_v56  ;;  %v10581_v2 = vpop.eup %10580  ;;  %v6371_v24 = vmul.f32 %v13005_v0, %v13005_v0  ;;  %v7107_v15 = vadd.f32 1.0, %v10579_v27 }
 0x5c4   : > { %6143 = vmatmul.mubr.bf16.gmra.mxu1 %v16054_v39  ;;  %8209 = vmatprep.subr.bf16.mxu0 %v10145_v29  ;;  %v10583_v28 = vpop.eup %10582  ;;  %v10146_v39 = vld [vmem:[#allocation10 + $0x10] ss:$8 sps:$4 sm:$0xff]   ;;  %v7100_v14 = vadd.f32 1.0, %v10581_v2 }
 0x5c5   : > { %6152 = vmatprep.mubr.bf16.mxu1 %v12693_v11  ;;  %8321 = vmatpush1.bf16.msra.mxu1 %v10185_v22  ;;  %v6372_v11 = vmul.f32 %v13009_v50, %v13009_v50  ;;  %v6499_v18 = vmul.f32 %v6371_v24, %v13005_v0  ;;  %v5363_v25 = vpop.f32.mrf.mxu0  ;;  %v7108_v56 = vadd.f32 1.0, %v10583_v28  ;;  %v10585_v36 = vpop.eup %10584  ;;  %v6876_v22 = vmul.f32 0.7978846, %v6748_v4 }
 0x5c6   : > { %8322 = vmatprep.subr.bf16.mxu1 %v10193_v33  ;;  %v5364_v29 = vadd.f32 %v5363_v25, %v12908_v19  ;;  %v5476_v37 = vpop.f32.mrf.mxu1  ;;  %v10587_v38 = vpop.eup %10586  ;;  %v13043_v33 = vmul.f32 0.5, %v12950_v63  ;;  %v13052_v2 = vmul.f32 %v7100_v14, %v6204_v17  ;;  %v10197_v63 = vld [vmem:[#allocation10 + $0x100] ss:$8 sps:$4 sm:$0xff]  }
 0x5c7   : > { %8210 = vmatpush1.bf16.msra.mxu0 %v10143_v51  ;;  %v6500_v57 = vmul.f32 %v6372_v11, %v13009_v50  ;;  %v5365_v46 = vpop.f32.mrf.mxu0  ;;  %v10154_v51 = vld [vmem:[#allocation10 + $0xf4] ss:$8 sps:$4 sm:$0xff]   ;;  %v13054_v24 = vmul.f32 %v7108_v56, %v6212_v48  ;;  %10594 = vtanh.f32 %v6876_v22  ;;  %v7123_v10 = vadd.f32 1.0, %v10587_v38  ;;  %v10205_v22 = vld [vmem:[#allocation10 + $0x1e4] ss:$8 sps:$4 sm:$0xff]  }
 0x5c8   : > { %8211 = vmatprep.subr.bf16.mxu0 %v10148_v20  ;;  %v5366_v12 = vadd.f32 %v5365_v46, %v12912_v62  ;;  %v5478_v59 = vpop.f32.mrf.mxu1  ;;  %v10589_v20 = vpop.eup %10588 }
 0x5c9   : > { %8323 = vmatpush1.bf16.msra.mxu1 %v10191_v53  ;;  %v5367_v27 = vpop.f32.mrf.mxu0  ;;  %v7115_v53 = vadd.f32 1.0, %v10585_v36  ;;  %v10591_v28 = vpop.eup %10590  ;;  %v6628_v4 = vmul.f32 0.044715, %v6500_v57  ;;  %v10200_v36 = vld [vmem:[#allocation10 + $0x1f0] ss:$8 sps:$4 sm:$0xff]   ;;  %v13081_v57 = vmul.f32 0.5, %v12986_v5  ;;  %v13093_v5 = vmul.f32 %v7123_v10, %v13043_v33 }
 0x5ca   : > { %6040 = vmatmul.mubr.bf16.gmra.mxu0 %v12704_v52  ;;  %v13038_v52 = vmul.f32 %v7107_v15, %v6211_v16  ;;  %8324 = vmatprep.subr.bf16.mxu1 %v10196_v13  ;;  %v13058_v8 = vadd.f32 %v5478_v59, %v5366_v12  ;;  %v5368_v45 = vadd.f32 %v5367_v27, %v12908_v19  ;;  %v10202_v16 = vld [vmem:[#allocation10 + $0x1f4] ss:$8 sps:$4 sm:$0xff]   ;;  %v7116_v56 = vadd.f32 1.0, %v10591_v28  ;;  %v10166_v10 = vld [vmem:[#allocation10 + $0xc4] ss:$8 sps:$4 sm:$0xff]  }
 0x5cb   : > { %6049 = vmatprep.mubr.bf16.mxu0 %v12728_v21  ;;  %8212 = vmatpush1.bf16.msra.mxu0 %v10146_v39  ;;  %v13045_v21 = vadd.f32 %v5476_v37, %v5364_v29  ;;  %v5480_v39 = vpop.f32.mrf.mxu1  ;;  %v5369_v11 = vpop.f32.mrf.mxu0  ;;  %v10160_v12 = vld [vmem:[#allocation10 + $0xd4] ss:$8 sps:$4 sm:$0xff]  }
 0x5cc   : > { %6153 = vmatmul.mubr.bf16.gmra.mxu1 %v12706_v54  ;;  %8213 = vmatprep.subr.bf16.mxu0 %v10151_v30  ;;  %v6627_v54 = vmul.f32 0.044715, %v6499_v18  ;;  %v10157_v30 = vld [vmem:[#allocation10 + $0xe4] ss:$8 sps:$4 sm:$0xff]   ;;  %v6380_v60 = vmul.f32 %v13058_v8, %v13058_v8  ;;  %v13065_v17 = vadd.f32 %v5480_v39, %v5368_v45  ;;  %v5370_v7 = vadd.f32 %v5369_v11, %v12912_v62  ;;  %v10158_v39 = vld [vmem:[#allocation10 + $0xd0] ss:$8 sps:$4 sm:$0xff]  }
 0x5cd   : > { %6162 = vmatprep.mubr.bf16.mxu1 %v12734_v35  ;;  %8325 = vmatpush1.bf16.msra.mxu1 %v10194_v58  ;;  %v6379_v35 = vmul.f32 %v13045_v21, %v13045_v21  ;;  %v5482_v13 = vpop.f32.mrf.mxu1  ;;  %v5373_v25 = vpop.f32.mrf.mxu0  ;;  %v13072_v58 = vmul.f32 %v7115_v53, %v6219_v40  ;;  %v6756_v40 = vadd.f32 %v6628_v4, %v13009_v50  ;;  %v10203_v53 = vld [vmem:[#allocation10 + $0x1e0] ss:$8 sps:$4 sm:$0xff]  }
 0x5ce   : > { %8326 = vmatprep.subr.bf16.mxu1 %v10199_v34  ;;  %v6755_v3 = vadd.f32 %v6627_v54, %v13005_v0  ;;  %v6508_v29 = vmul.f32 %v6380_v60, %v13058_v8  ;;  %v6387_v37 = vmul.f32 %v13065_v17, %v13065_v17  ;;  %v6228_v34 = vmul.f32 0.5, %v12953_v49 }
 0x5cf   : > { %8214 = vmatpush1.bf16.msra.mxu0 %v10149_v6  ;;  %v7124_v6 = vadd.f32 1.0, %v10589_v20  ;;  %v6507_v18 = vmul.f32 %v6379_v35, %v13045_v21  ;;  %v13084_v46 = vadd.f32 %v5482_v13, %v5370_v7  ;;  %v5375_v38 = vpop.f32.mrf.mxu0  ;;  %v13096_v20 = vmul.f32 0.5, %v12994_v1 }
 0x5d0   : > { %8215 = vmatprep.subr.bf16.mxu0 %v10154_v51  ;;  %v5374_v51 = vadd.f32 %v5373_v25, %v12908_v19  ;;  %v6883_v28 = vmul.f32 0.7978846, %v6755_v3  ;;  %v6636_v35 = vmul.f32 0.044715, %v6508_v29  ;;  %v6515_v33 = vmul.f32 %v6387_v37, %v13065_v17  ;;  %v16061_v3 = vld [vmem:[#allocation58_spill] sm:$0xff] }
 0x5d1   : > { %8327 = vmatpush1.bf16.msra.mxu1 %v10197_v63  ;;  %v5486_v48 = vpop.f32.mrf.mxu1  ;;  %v13090_v59 = vmul.f32 %v7124_v6, %v6228_v34  ;;  %v6635_v54 = vmul.f32 0.044715, %v6507_v18  ;;  %v5377_v63 = vpop.f32.mrf.mxu0  ;;  %v6884_v4 = vmul.f32 0.7978846, %v6756_v40  ;;  %v13127_v29 = vmul.f32 0.5, %v13009_v50  ;;  %v16062_v40 = vld [vmem:[#allocation40_spill] sm:$0xff] }
 0x5d2   : > { %6050 = vmatmul.mubr.bf16.gmra.mxu0 %v12742_v61  ;;  %v10155_v61 = vld [vmem:[#allocation10 + $0xe0] ss:$8 sps:$4 sm:$0xff]   ;;  %8328 = vmatprep.subr.bf16.mxu1 %v10202_v16  ;;  %v13100_v27 = vadd.f32 %v5486_v48, %v5374_v51  ;;  %v5378_v11 = vadd.f32 %v5377_v63, %v12908_v19  ;;  %v10208_v16 = vld [vmem:[#allocation10 + $0x1d4] ss:$8 sps:$4 sm:$0xff]   ;;  %v10206_v37 = vld [vmem:[#allocation10 + $0x1d0] ss:$8 sps:$4 sm:$0xff]   ;;  %10596 = vtanh.f32 %v6883_v28  ;;  %v6764_v48 = vadd.f32 %v6636_v35, %v13058_v8 }
 0x5d3   : > { %6059 = vmatprep.mubr.bf16.mxu0 %v12770_v32  ;;  %8216 = vmatpush2.bf16.msra.mxu0 %v10152_v23  ;;  %v5376_v32 = vadd.f32 %v5375_v38, %v12912_v62  ;;  %v5488_v49 = vpop.f32.mrf.mxu1  ;;  %v13109_v23 = vmul.f32 0.5, %v13005_v0  ;;  %v6763_v18 = vadd.f32 %v6635_v54, %v13045_v21  ;;  %v10164_v51 = vld [vmem:[#allocation10 + $0xc0] ss:$8 sps:$4 sm:$0xff]   ;;  %v10211_v38 = vld [vmem:[#allocation10 + $0x1c4] ss:$8 sps:$4 sm:$0xff]   ;;  %10598 = vtanh.f32 %v6884_v4 }
 0x5d4   : > { %6163 = vmatmul.mubr.bf16.gmra.mxu1 %v12750_v31  ;;  %8217 = vmatprep.subr.bf16.mxu0 %v10157_v30  ;;  %v6388_v31 = vmul.f32 %v13084_v46, %v13084_v46  ;;  %v5379_v30 = vpop.f32.mrf.mxu0  ;;  %v16063_v54 = vld [vmem:[#allocation63_spill] sm:$0xff]  ;;  %v10172_v63 = vld [vmem:[#allocation10 + $0xb4] ss:$8 sps:$4 sm:$0xff]  }
 0x5d5   : > { %6172 = vmatprep.mubr.bf16.mxu1 %v12776_v41  ;;  %v13103_v41 = vmul.f32 %v7116_v56, %v13050_v55  ;;  %8329 = vmatpush2.bf16.msra.mxu1 %v10200_v36  ;;  %v13106_v45 = vadd.f32 %v5488_v49, %v5376_v32  ;;  %v5490_v1 = vpop.f32.mrf.mxu1  ;;  %v6395_v55 = vmul.f32 %v13100_v27, %v13100_v27  ;;  %v13133_v32 = vmul.f32 0.5, %v13045_v21  ;;  %v16064_v21 = vld [vmem:[#allocation60_spill] sm:$0xff] }
 0x5d6   : > { %8330 = vmatprep.subr.bf16.mxu1 %v10205_v22  ;;  %v6516_v60 = vmul.f32 %v6388_v31, %v13084_v46  ;;  %v13122_v25 = vadd.f32 %v5490_v1, %v5378_v11  ;;  %v5380_v56 = vadd.f32 %v5379_v30, %v12912_v62  ;;  %v5383_v36 = vpop.f32.mrf.mxu0  ;;  %v6891_v4 = vmul.f32 0.7978846, %v6763_v18 }
 0x5d7   : > { %8218 = vmatpush2.bf16.msra.mxu0 %v10155_v61  ;;  %v6396_v7 = vmul.f32 %v13106_v45, %v13106_v45  ;;  %v5492_v13 = vpop.f32.mrf.mxu1  ;;  %v6643_v61 = vmul.f32 0.044715, %v6515_v33  ;;  %v5384_v34 = vadd.f32 %v5383_v36, %v12908_v19  ;;  %v6523_v50 = vmul.f32 %v6395_v55, %v13100_v27 }
 0x5d8   : > { %8219 = vmatprep.subr.bf16.mxu0 %v10160_v12  ;;  %v10593_v12 = vpop.eup %10592  ;;  %v6403_v49 = vmul.f32 %v13122_v25, %v13122_v25  ;;  %v5385_v31 = vpop.f32.mrf.mxu0  ;;  %v6644_v28 = vmul.f32 0.044715, %v6516_v60  ;;  %v13140_v33 = vadd.f32 %v5492_v13, %v5380_v56  ;;  %v13146_v55 = vmul.f32 0.5, %v13065_v17  ;;  %v10209_v60 = vld [vmem:[#allocation10 + $0x1c0] ss:$8 sps:$4 sm:$0xff]  }
 0x5d9   : > { %8331 = vmatpush2.bf16.msra.mxu1 %v10203_v53  ;;  %v5496_v22 = vpop.f32.mrf.mxu1  ;;  %v10595_v53 = vpop.eup %10594  ;;  %v6524_v35 = vmul.f32 %v6396_v7, %v13106_v45  ;;  %v5386_v11 = vadd.f32 %v5385_v31, %v12912_v62  ;;  %v6892_v7 = vmul.f32 0.7978846, %v6764_v48  ;;  %v6771_v13 = vadd.f32 %v6643_v61, %v13065_v17 }
 0x5da   : > { %6060 = vmatmul.mubr.bf16.gmra.mxu0 %v16061_v3  ;;  %v13142_v1 = vadd.f32 %v5496_v22, %v5384_v34  ;;  %8332 = vmatprep.subr.bf16.mxu1 %v10208_v16  ;;  %v5387_v30 = vpop.f32.mrf.mxu0  ;;  %v6404_v56 = vmul.f32 %v13140_v33, %v13140_v33  ;;  %v10170_v16 = vld [vmem:[#allocation10 + $0xb0] ss:$8 sps:$4 sm:$0xff]   ;;  %v7131_v18 = vadd.f32 1.0, %v10593_v12  ;;  %v6651_v3 = vmul.f32 0.044715, %v6523_v50 }
 0x5db   : > { %6069 = vmatprep.mubr.bf16.mxu0 %v16062_v40  ;;  %8220 = vmatpush2.bf16.msra.mxu0 %v10158_v39  ;;  %v5498_v39 = vpop.f32.mrf.mxu1  ;;  %v6531_v34 = vmul.f32 %v6403_v49, %v13122_v25  ;;  %v13158_v40 = vadd.f32 1.0, %v10595_v53  ;;  %v6772_v17 = vadd.f32 %v6644_v28, %v13084_v46  ;;  %v6652_v48 = vmul.f32 0.044715, %v6524_v35  ;;  %v10212_v53 = vld [vmem:[#allocation10 + $0x1b0] ss:$8 sps:$4 sm:$0xff]  }
 0x5dc   : > { %6173 = vmatmul.mubr.bf16.gmra.mxu1 %v16063_v54  ;;  %8221 = vmatprep.subr.bf16.mxu0 %v10166_v10  ;;  %v13150_v10 = vmul.f32 0.5, %v13058_v8  ;;  %v13156_v22 = vadd.f32 %v5498_v39, %v5386_v11  ;;  %v5389_v8 = vpop.f32.mrf.mxu0  ;;  %v6411_v61 = vmul.f32 %v13142_v1, %v13142_v1  ;;  %10600 = vtanh.f32 %v6891_v4  ;;  %v16066_v39 = vld [vmem:[#allocation41_spill] sm:$0xff]  ;;  %v10176_v4 = vld [vmem:[#allocation10 + $0xa0] ss:$8 sps:$4 sm:$0xff]  }
 0x5dd   : > { %6182 = vmatprep.mubr.bf16.mxu1 %v16064_v21  ;;  %8333 = vmatpush2.bf16.msra.mxu1 %v10206_v37  ;;  %v5500_v36 = vpop.f32.mrf.mxu1  ;;  %v10178_v37 = vld [vmem:[#allocation10 + $0xa4] ss:$8 sps:$4 sm:$0xff]   ;;  %v6532_v50 = vmul.f32 %v6404_v56, %v13140_v33  ;;  %v5390_v54 = vadd.f32 %v5389_v8, %v12912_v62  ;;  %10602 = vtanh.f32 %v6892_v7  ;;  %v6899_v28 = vmul.f32 0.7978846, %v6771_v13 }
 0x5de   : > { %8334 = vmatprep.subr.bf16.mxu1 %v10211_v38  ;;  %v10214_v38 = vld [vmem:[#allocation10 + $0x1b4] ss:$8 sps:$4 sm:$0xff]   ;;  %v6412_v49 = vmul.f32 %v13156_v22, %v13156_v22  ;;  %v13173_v11 = vmul.f32 %v7131_v18, %v13081_v57  ;;  %v6779_v56 = vadd.f32 %v6651_v3, %v13100_v27  ;;  %v6659_v8 = vmul.f32 0.044715, %v6531_v34  ;;  %v16067_v7 = vld [vmem:[#allocation46_spill] sm:$0xff] }
 0x5df   : > { %8222 = vmatpush2.bf16.msra.mxu0 %v10164_v51  ;;  %v5388_v51 = vadd.f32 %v5387_v30, %v12908_v19  ;;  %v5502_v12 = vpop.f32.mrf.mxu1  ;;  %v10217_v30 = vld [vmem:[#allocation10 + $0x1a4] ss:$8 sps:$4 sm:$0xff]   ;;  %v16068_v18 = vld [vmem:[#allocation48_spill] sm:$0xff]  ;;  %v6660_v34 = vmul.f32 0.044715, %v6532_v50  ;;  %10604 = vtanh.f32 %v6899_v28 }
 0x5e0   : > { %8223 = vmatprep.subr.bf16.mxu0 %v10172_v63  ;;  %v16065_v63 = vld [vmem:[#allocation65_spill] sm:$0xff]  ;;  %v13176_v0 = vadd.f32 %v5502_v12, %v5390_v54  ;;  %v6540_v12 = vmul.f32 %v6412_v49, %v13156_v22  ;;  %v13195_v49 = vpop.eup %10596 }
 0x5e1   : > { %8335 = vmatpush2.bf16.msra.mxu1 %v10209_v60  ;;  %v13169_v35 = vadd.f32 %v5500_v36, %v5388_v51  ;;  %v10184_v36 = vld [vmem:[#allocation10 + $0x94] ss:$8 sps:$4 sm:$0xff]   ;;  %v6900_v51 = vmul.f32 0.7978846, %v6772_v17  ;;  %v10182_v50 = vld [vmem:[#allocation10 + $0x90] ss:$8 sps:$4 sm:$0xff]  }
 0x5e2   : > { %v5393_v31 = vpop.f32.mrf.mxu0  ;;  %6070 = vmatmul.mubr.bf16.gmra.mxu0 %v16065_v63  ;;  %v6539_v63 = vmul.f32 %v6411_v61, %v13142_v1  ;;  %8336 = vmatprep.subr.bf16.mxu1 %v10214_v38  ;;  %v6420_v54 = vmul.f32 %v13176_v0, %v13176_v0  ;;  %v13191_v61 = vmul.f32 0.5, %v13100_v27 }
 0x5e3   : > { %v5506_v21 = vpop.f32.mrf.mxu1  ;;  %6079 = vmatprep.mubr.bf16.mxu0 %v16066_v39  ;;  %8224 = vmatpush2.bf16.msra.mxu0 %v10170_v16  ;;  %v5394_v60 = vadd.f32 %v5393_v31, %v12908_v19  ;;  %v6780_v16 = vadd.f32 %v6652_v48, %v13106_v45  ;;  %v6419_v57 = vmul.f32 %v13169_v35, %v13169_v35  ;;  %v10215_v48 = vld [vmem:[#allocation10 + $0x1a0] ss:$8 sps:$4 sm:$0xff]   ;;  %10606 = vtanh.f32 %v6900_v51 }
 0x5e4   : > { %6183 = vmatmul.mubr.bf16.gmra.mxu1 %v16067_v7  ;;  %v5395_v13 = vpop.f32.mrf.mxu0  ;;  %8225 = vmatprep.subr.bf16.mxu0 %v10178_v37  ;;  %v6907_v7 = vmul.f32 0.7978846, %v6779_v56  ;;  %v10220_v56 = vld [vmem:[#allocation10 + $0x194] ss:$8 sps:$4 sm:$0xff]  }
 0x5e5   : > { %6192 = vmatprep.mubr.bf16.mxu1 %v16068_v18  ;;  %v5508_v3 = vpop.f32.mrf.mxu1  ;;  %v13188_v37 = vadd.f32 %v5506_v21, %v5394_v60  ;;  %8337 = vmatpush2.bf16.msra.mxu1 %v10212_v53  ;;  %v6547_v31 = vmul.f32 %v6419_v57, %v13169_v35  ;;  %v5396_v39 = vadd.f32 %v5395_v13, %v12912_v62  ;;  %v13201_v60 = vpop.eup %10598  ;;  %v6667_v13 = vmul.f32 0.044715, %v6539_v63  ;;  %v10190_v18 = vld [vmem:[#allocation10 + $0x84] ss:$8 sps:$4 sm:$0xff]  }
 0x5e6   : > { %v5397_v17 = vpop.f32.mrf.mxu0  ;;  %8338 = vmatprep.subr.bf16.mxu1 %v10217_v30  ;;  %v6787_v21 = vadd.f32 %v6659_v8, %v13122_v25  ;;  %v6548_v53 = vmul.f32 %v6420_v54, %v13176_v0  ;;  %v6908_v6 = vmul.f32 0.7978846, %v6780_v16  ;;  %v6788_v8 = vadd.f32 %v6660_v34, %v13140_v33  ;;  %v10188_v16 = vld [vmem:[#allocation10 + $0x80] ss:$8 sps:$4 sm:$0xff]   ;;  %v10223_v34 = vld [vmem:[#allocation10 + $0x184] ss:$8 sps:$4 sm:$0xff]  }
 0x5e7   : > { %v5510_v38 = vpop.f32.mrf.mxu1  ;;  %8226 = vmatpush2.bf16.msra.mxu0 %v10176_v4  ;;  %v6427_v28 = vmul.f32 %v13188_v37, %v13188_v37  ;;  %v13203_v57 = vadd.f32 %v5508_v3, %v5396_v39  ;;  %v5398_v4 = vadd.f32 %v5397_v17, %v12908_v19  ;;  %v6668_v54 = vmul.f32 0.044715, %v6540_v12 }
 0x5e8   : > { %v5399_v27 = vpop.f32.mrf.mxu0  ;;  %8227 = vmatprep.subr.bf16.mxu0 %v10184_v36  ;;  %v10218_v36 = vld [vmem:[#allocation10 + $0x190] ss:$8 sps:$4 sm:$0xff]   ;;  %v6675_v51 = vmul.f32 0.044715, %v6547_v31  ;;  %10608 = vtanh.f32 %v6907_v7  ;;  %v6915_v12 = vmul.f32 0.7978846, %v6787_v21 }
 0x5e9   : > { %16069 = vst [vmem:[#allocation55_spill] sm:$0xff] %v13203_v57  ;;  %v5512_v30 = vpop.f32.mrf.mxu1  ;;  %v6555_v15 = vmul.f32 %v6427_v28, %v13188_v37  ;;  %8339 = vmatpush2.bf16.msra.mxu1 %v10215_v48  ;;  %v6428_v63 = vmul.f32 %v13203_v57, %v13203_v57  ;;  %v13211_v3 = vadd.f32 %v5510_v38, %v5398_v4  ;;  %v6676_v28 = vmul.f32 0.044715, %v6548_v53  ;;  %v10226_v31 = vld [vmem:[#allocation10 + $0x274] ss:$8 sps:$4 sm:$0xff]  }
 0x5ea   : > { %v5403_v14 = vpop.f32.mrf.mxu0  ;;  %6080 = vmatmul.mubr.bf16.gmra.mxu0 %v12841_v44  ;;  %v5400_v17 = vadd.f32 %v5399_v27, %v12912_v62  ;;  %v16070_v44 = vpack.c.bf16 %v13054_v24, %v13052_v2  ;;  %v6795_v38 = vadd.f32 %v6667_v13, %v13142_v1  ;;  %8340 = vmatprep.subr.bf16.mxu1 %v10220_v56  ;;  %10610 = vtanh.f32 %v6908_v6  ;;  %v10221_v53 = vld [vmem:[#allocation10 + $0x180] ss:$8 sps:$4 sm:$0xff]   ;;  %v13228_v13 = vpop.eup %10600  ;;  %v10224_v6 = vld [vmem:[#allocation10 + $0x270] ss:$8 sps:$4 sm:$0xff]  }
 0x5eb   : > { %v5516_v39 = vpop.f32.mrf.mxu1  ;;  %8228 = vmatpush2.bf16.msra.mxu0 %v10182_v50  ;;  %v5404_v47 = vadd.f32 %v5403_v14, %v12908_v19  ;;  %v6683_v27 = vmul.f32 0.044715, %v6555_v15  ;;  %v6556_v50 = vmul.f32 %v6428_v63, %v13203_v57  ;;  %v6435_v7 = vmul.f32 %v13211_v3, %v13211_v3 }
 0x5ec   : > { %6193 = vmatmul.mubr.bf16.gmra.mxu1 %v12843_v26  ;;  %8231 = vmatprep.mubr.bf16.mxu0 %v16070_v44  ;;  %v5405_v48 = vpop.f32.mrf.mxu0  ;;  %v6796_v26 = vadd.f32 %v6668_v54, %v13156_v22  ;;  %v13224_v14 = vadd.f32 %v5512_v30, %v5400_v17  ;;  %v6916_v15 = vmul.f32 0.7978846, %v6788_v8  ;;  %v6803_v4 = vadd.f32 %v6675_v51, %v13169_v35  ;;  %v13233_v30 = vpop.eup %10602  ;;  %v10229_v51 = vld [vmem:[#allocation10 + $0x264] ss:$8 sps:$4 sm:$0xff]  }
 0x5ed   : > { %v5518_v21 = vpop.f32.mrf.mxu1  ;;  %8229 = vmatprep.subr.bf16.mxu0 %v10190_v18  ;;  %v13226_v2 = vadd.f32 %v5516_v39, %v5404_v47  ;;  %8341 = vmatpush2.bf16.msra.mxu1 %v10218_v36  ;;  %v6563_v63 = vmul.f32 %v6435_v7, %v13211_v3  ;;  %v5406_v18 = vadd.f32 %v5405_v48, %v12912_v62  ;;  %10612 = vtanh.f32 %v6915_v12 }
 0x5ee   : > { %16071 = vst [vmem:[#allocation62_spill] sm:$0xff] %v13224_v14  ;;  %v5407_v24 = vpop.f32.mrf.mxu0  ;;  %8342 = vmatprep.subr.bf16.mxu1 %v10223_v34  ;;  %v6804_v47 = vadd.f32 %v6676_v28, %v13176_v0  ;;  %v6684_v54 = vmul.f32 0.044715, %v6556_v50  ;;  %v6436_v36 = vmul.f32 %v13224_v14, %v13224_v14  ;;  %v6923_v17 = vmul.f32 0.7978846, %v6795_v38 }
 0x5ef   : > { %v5520_v56 = vpop.f32.mrf.mxu1  ;;  %8230 = vmatpush2.bf16.msra.mxu0 %v10188_v16  ;;  %v6811_v39 = vadd.f32 %v6683_v27, %v13188_v37  ;;  %v6443_v16 = vmul.f32 %v13226_v2, %v13226_v2  ;;  %v13241_v34 = vadd.f32 %v5518_v21, %v5406_v18  ;;  %v6924_v48 = vmul.f32 0.7978846, %v6796_v26 }
 0x5f0   : > { %v5409_v8 = vpop.f32.mrf.mxu0  ;;  %8425 = vmatprep.subr.bf16.mxu0 %v10226_v31  ;;  %v6564_v12 = vmul.f32 %v6436_v36, %v13224_v14  ;;  %v5408_v28 = vadd.f32 %v5407_v24, %v12908_v19  ;;  %v16073_v31 = vpack.c.bf16 %v13038_v52, %v13036_v9  ;;  %10614 = vtanh.f32 %v6916_v15  ;;  %v10227_v19 = vld [vmem:[#allocation10 + $0x260] ss:$8 sps:$4 sm:$0xff]   ;;  %v13253_v24 = vpop.eup %10604  ;;  %v10232_v15 = vld [vmem:[#allocation10 + $0x254] ss:$8 sps:$4 sm:$0xff]  }
 0x5f1   : > { %16072 = vst [vmem:[#allocation56_spill] sm:$0xff] %v13241_v34  ;;  %v5522_v44 = vpop.f32.mrf.mxu1  ;;  %v5410_v50 = vadd.f32 %v5409_v8, %v12912_v62  ;;  %8343 = vmatpush2.bf16.msra.mxu1 %v10221_v53  ;;  %v6931_v38 = vmul.f32 0.7978846, %v6803_v4  ;;  %v6691_v27 = vmul.f32 0.044715, %v6563_v63  ;;  %v6571_v21 = vmul.f32 %v6443_v16, %v13226_v2 }
 0x5f2   : > { %v5559_v7 = vpop.f32.mrf.mxu0  ;;  %8232 = vmatmul.mubr.bf16.vlgmr.msra.gmra.mxu0 %v16073_v31  ;;  %v16074_v26 = vpack.c.bf16 %v13090_v59, %v13103_v41  ;;  %v6932_v62 = vmul.f32 0.7978846, %v6804_v47  ;;  %v6812_v36 = vadd.f32 %v6684_v54, %v13203_v57  ;;  %v13256_v9 = vadd.f32 %v5520_v56, %v5408_v28  ;;  %v10230_v16 = vld [vmem:[#allocation10 + $0x250] ss:$8 sps:$4 sm:$0xff]  }
 0x5f3   : > { %v5672_v18 = vpop.f32.mrf.mxu1  ;;  %8426 = vmatpush1.bf16.msra.mxu0 %v10224_v6  ;;  %v5560_v52 = vadd.f32 %v5559_v7, %v13027_v42  ;;  %v13260_v4 = vmul.f32 0.5, %v13122_v25  ;;  %10616 = vtanh.f32 %v6923_v17  ;;  %v6939_v59 = vmul.f32 0.7978846, %v6811_v39  ;;  %v13262_v6 = vpop.eup %10606 }
 0x5f4   : > { %8241 = vmatprep.mubr.bf16.mxu0 %v16074_v26  ;;  %v5561_v53 = vpop.f32.mrf.mxu0  ;;  %8427 = vmatprep.subr.bf16.mxu0 %v10229_v51  ;;  %v6692_v41 = vmul.f32 0.044715, %v6564_v12  ;;  %10618 = vtanh.f32 %v6924_v48  ;;  %v6699_v47 = vmul.f32 0.044715, %v6571_v21  ;;  %v6444_v56 = vmul.f32 %v13241_v34, %v13241_v34 }
 0x5f5   : > { %v5674_v63 = vpop.f32.mrf.mxu1  ;;  %v13266_v54 = vadd.f32 %v5522_v44, %v5410_v50  ;;  %10620 = vtanh.f32 %v6931_v38  ;;  %v6819_v51 = vadd.f32 %v6691_v27, %v13211_v3  ;;  %v6451_v25 = vmul.f32 %v13256_v9, %v13256_v9  ;;  %v10235_v50 = vld [vmem:[#allocation10 + $0x244] ss:$8 sps:$4 sm:$0xff]   ;;  %v13277_v7 = vpop.eup %10608 }
 0x5f6   : > { %v5563_v8 = vpop.f32.mrf.mxu0  ;;  %v13271_v17 = vadd.f32 %v5672_v18, %v5560_v52  ;;  %v13274_v48 = vmul.f32 0.5, %v13142_v1  ;;  %10622 = vtanh.f32 %v6932_v62  ;;  %v6940_v12 = vmul.f32 0.7978846, %v6812_v36 }
 0x5f7   : > { %16075 = vst [vmem:[#allocation64_spill] sm:$0xff] %v13266_v54  ;;  %v5676_v39 = vpop.f32.mrf.mxu1  ;;  %8428 = vmatpush1.bf16.msra.mxu0 %v10227_v19  ;;  %v5562_v44 = vadd.f32 %v5561_v53, %v13021_v43  ;;  %v13280_v31 = vmul.f32 0.5, %v13169_v35  ;;  %10624 = vtanh.f32 %v6939_v59  ;;  %v6820_v38 = vadd.f32 %v6692_v41, %v13224_v14  ;;  %v13294_v36 = vpop.eup %10610 }
 0x5f8   : > { %16076 = vst [vmem:[#allocation53_spill] sm:$0xff] %v13274_v48  ;;  %v5565_v28 = vpop.f32.mrf.mxu0  ;;  %8429 = vmatprep.subr.bf16.mxu0 %v10232_v15  ;;  %v6333_v27 = vmul.f32 %v13271_v17, %v13271_v17  ;;  %v6827_v21 = vadd.f32 %v6699_v47, %v13226_v2  ;;  %v6572_v18 = vmul.f32 %v6444_v56, %v13241_v34  ;;  %v6947_v52 = vmul.f32 0.7978846, %v6819_v51  ;;  %v10233_v47 = vld [vmem:[#allocation10 + $0x240] ss:$8 sps:$4 sm:$0xff]  }
 0x5f9   : > { %16077 = vst [vmem:[#allocation59_spill] sm:$0xff] %v13280_v31  ;;  %v5678_v1 = vpop.f32.mrf.mxu1  ;;  %v6452_v26 = vmul.f32 %v13266_v54, %v13266_v54  ;;  %v13289_v19 = vadd.f32 %v5674_v63, %v5562_v44  ;;  %v16079_v35 = vpack.c.bf16 %v13093_v5, %v13072_v58  ;;  %v6579_v53 = vmul.f32 %v6451_v25, %v13256_v9  ;;  %v10238_v51 = vld [vmem:[#allocation10 + $0x234] ss:$8 sps:$4 sm:$0xff]  }
 0x5fa   : > { %v5569_v62 = vpop.f32.mrf.mxu0  ;;  %v6461_v15 = vmul.f32 %v6333_v27, %v13271_v17  ;;  %v5564_v59 = vadd.f32 %v5563_v8, %v13027_v42  ;;  %v13300_v63 = vmul.f32 0.5, %v13188_v37  ;;  %10626 = vtanh.f32 %v6940_v12  ;;  %v13305_v25 = vpop.eup %10612 }
 0x5fb   : > { %16078 = vst [vmem:[#allocation54_spill] sm:$0xff] %v13289_v19  ;;  %8242 = vmatmul.mubr.bf16.gmra.mxu0 %v16079_v35  ;;  %v5682_v41 = vpop.f32.mrf.mxu1  ;;  %v6334_v58 = vmul.f32 %v13289_v19, %v13289_v19  ;;  %v5566_v5 = vadd.f32 %v5565_v28, %v13021_v43  ;;  %v6948_v44 = vmul.f32 0.7978846, %v6820_v38  ;;  %v6955_v37 = vmul.f32 0.7978846, %v6827_v21 }
 0x5fc   : > { %8430 = vmatpush1.bf16.msra.mxu0 %v10230_v16  ;;  %16080 = vst [vmem:[#allocation61_spill] sm:$0xff] %v13300_v63  ;;  %v5571_v56 = vpop.f32.mrf.mxu0  ;;  %v6589_v27 = vmul.f32 0.044715, %v6461_v15  ;;  %v13307_v8 = vadd.f32 %v5676_v39, %v5564_v59  ;;  %v5570_v16 = vadd.f32 %v5569_v62, %v13027_v42  ;;  %v6700_v63 = vmul.f32 0.044715, %v6572_v18 }
 0x5fd   : > { %8431 = vmatprep.subr.bf16.mxu0 %v10235_v50  ;;  %v5684_v35 = vpop.f32.mrf.mxu1  ;;  %v6580_v12 = vmul.f32 %v6452_v26, %v13266_v54  ;;  %v13311_v14 = vadd.f32 %v5678_v1, %v5566_v5  ;;  %10628 = vtanh.f32 %v6947_v52  ;;  %v6707_v28 = vmul.f32 0.044715, %v6579_v53  ;;  %v10236_v39 = vld [vmem:[#allocation10 + $0x230] ss:$8 sps:$4 sm:$0xff]   ;;  %v13317_v15 = vpop.eup %10614  ;;  %v10241_v52 = vld [vmem:[#allocation10 + $0x224] ss:$8 sps:$4 sm:$0xff]  }
 0x5fe   : > { %v5573_v57 = vpop.f32.mrf.mxu0  ;;  %v6341_v50 = vmul.f32 %v13307_v8, %v13307_v8  ;;  %v13315_v31 = vadd.f32 %v5682_v41, %v5570_v16  ;;  %v6717_v21 = vadd.f32 %v6589_v27, %v13271_v17  ;;  %v6462_v18 = vmul.f32 %v6334_v58, %v13289_v19 }
 0x5ff   : > { %v5686_v38 = vpop.f32.mrf.mxu1  ;;  %v6342_v1 = vmul.f32 %v13311_v14, %v13311_v14  ;;  %v7140_v26 = vadd.f32 1.0, %v13201_v60  ;;  %v13325_v53 = vmul.f32 0.5, %v13211_v3  ;;  %10630 = vtanh.f32 %v6948_v44 }
 0x600   : > { %8432 = vmatpush1.bf16.msra.mxu0 %v10233_v47  ;;  %v5575_v62 = vpop.f32.mrf.mxu0  ;;  %v13328_v59 = vmul.f32 0.5, %v13226_v2  ;;  %v6469_v41 = vmul.f32 %v6341_v50, %v13307_v8  ;;  %v13331_v5 = vpop.eup %10616  ;;  %10632 = vtanh.f32 %v6955_v37  ;;  %v6828_v58 = vadd.f32 %v6700_v63, %v13241_v34  ;;  %v10239_v37 = vld [vmem:[#allocation10 + $0x220] ss:$8 sps:$4 sm:$0xff]  }
 0x601   : > { %8433 = vmatprep.subr.bf16.mxu0 %v10238_v51  ;;  %16081 = vst [vmem:[#allocation69_spill] sm:$0xff] %v13325_v53  ;;  %v5688_v47 = vpop.f32.mrf.mxu1  ;;  %16083 = vst [vmem:[#allocation66_spill] sm:$0xff] %v13331_v5  ;;  %v6708_v27 = vmul.f32 0.044715, %v6580_v12  ;;  %v6349_v60 = vmul.f32 %v13315_v31, %v13315_v31  ;;  %v13336_v16 = vpop.eup %10618  ;;  %v6835_v3 = vadd.f32 %v6707_v28, %v13256_v9  ;;  %v6845_v12 = vmul.f32 0.7978846, %v6717_v21 }
 0x602   : > { %16082 = vst [vmem:[#allocation70_spill] sm:$0xff] %v13328_v59  ;;  %v5579_v51 = vpop.f32.mrf.mxu0  ;;  %v7260_v2 = vmul.f32 %v13158_v40, %v13096_v20  ;;  %v7268_v44 = vmul.f32 %v7140_v26, %v13127_v29  ;;  %v5572_v50 = vadd.f32 %v5571_v56, %v13021_v43  ;;  %v13343_v63 = vpop.eup %10620  ;;  %v6590_v34 = vmul.f32 0.044715, %v6462_v18  ;;  %v10244_v28 = vld [vmem:[#allocation10 + $0x214] ss:$8 sps:$4 sm:$0xff]  }
 0x603   : > { %v5692_v59 = vpop.f32.mrf.mxu1  ;;  %16084 = vst [vmem:[#allocation71_spill] sm:$0xff] %v13343_v63  ;;  %v6470_v53 = vmul.f32 %v6342_v1, %v13311_v14  ;;  %v5574_v48 = vadd.f32 %v5573_v57, %v13027_v42  ;;  %v13349_v20 = vpop.eup %10622  ;;  %v6597_v29 = vmul.f32 0.044715, %v6469_v41  ;;  %v6956_v18 = vmul.f32 0.7978846, %v6828_v58 }
 0x604   : > { %8434 = vmatpush1.bf16.msra.mxu0 %v10236_v39  ;;  %v13347_v5 = vpop.f32.mrf.mxu0  ;;  %16085 = vst [vmem:[#allocation72_spill] sm:$0xff] %v13349_v20  ;;  %v7372_v40 = vpack.c.bf16 %v7268_v44, %v7260_v2  ;;  %v13351_v56 = vadd.f32 %v5684_v35, %v5572_v50  ;;  %v5576_v39 = vadd.f32 %v5575_v62, %v13021_v43  ;;  %v13356_v21 = vpop.eup %10624  ;;  %v6963_v20 = vmul.f32 0.7978846, %v6835_v3  ;;  %v10242_v58 = vld [vmem:[#allocation10 + $0x210] ss:$8 sps:$4 sm:$0xff]  }
 0x605   : > { %8435 = vmatprep.subr.bf16.mxu0 %v10241_v52  ;;  %v13354_v26 = vpop.f32.mrf.mxu1  ;;  %16086 = vst [vmem:[#allocation67_spill] sm:$0xff] %v13356_v21  ;;  %v6836_v1 = vadd.f32 %v6708_v27, %v13266_v54  ;;  %v6477_v57 = vmul.f32 %v6349_v60, %v13315_v31  ;;  %v13360_v63 = vadd.f32 %v5686_v38, %v5574_v48  ;;  %10634 = vtanh.f32 %v6845_v12  ;;  %v10247_v3 = vld [vmem:[#allocation10 + $0x204] ss:$8 sps:$4 sm:$0xff]  }
 0x606   : > { %v13362_v52 = vpop.f32.mrf.mxu0  ;;  %8251 = vmatprep.mubr.bf16.mxu0 %v7372_v40  ;;  %v6350_v35 = vmul.f32 %v13351_v56, %v13351_v56  ;;  %v13366_v41 = vadd.f32 %v5688_v47, %v5576_v39  ;;  %v5580_v62 = vadd.f32 %v5579_v51, %v13027_v42  ;;  %v6718_v27 = vadd.f32 %v6590_v34, %v13289_v19 }
 0x607   : > { %v13369_v2 = vpop.f32.mrf.mxu1  ;;  %v6598_v48 = vmul.f32 0.044715, %v6470_v53  ;;  %v6357_v38 = vmul.f32 %v13360_v63, %v13360_v63  ;;  %v13376_v44 = vpop.eup %10626  ;;  %v6725_v47 = vadd.f32 %v6597_v29, %v13307_v8  ;;  %10636 = vtanh.f32 %v6956_v18  ;;  %v10245_v29 = vld [vmem:[#allocation10 + $0x200] ss:$8 sps:$4 sm:$0xff]  }
 0x608   : > { %16087 = vst [vmem:[#allocation30_spill] sm:$0xff] %v13366_v41  ;;  %8436 = vmatpush1.bf16.msra.mxu0 %v10239_v37  ;;  %v13374_v60 = vpop.f32.mrf.mxu0  ;;  %v6478_v51 = vmul.f32 %v6350_v35, %v13351_v56  ;;  %v6358_v50 = vmul.f32 %v13366_v41, %v13366_v41  ;;  %v13382_v37 = vadd.f32 %v5692_v59, %v5580_v62  ;;  %v13387_v53 = vmul.f32 0.5, %v13256_v9 }
 0x609   : > { %8437 = vmatprep.subr.bf16.mxu0 %v10244_v28  ;;  %v13384_v34 = vpop.f32.mrf.mxu1  ;;  %v13390_v12 = vmul.f32 0.5, %v13271_v17  ;;  %v7139_v28 = vadd.f32 1.0, %v13195_v49  ;;  %v6964_v39 = vmul.f32 0.7978846, %v6836_v1  ;;  %v6605_v35 = vmul.f32 0.044715, %v6477_v57 }
 0x60a   : > { %16088 = vst [vmem:[#allocation57_spill] sm:$0xff] %v13387_v53  ;;  %v13393_v40 = vpop.f32.mrf.mxu0  ;;  %v6606_v54 = vmul.f32 0.044715, %v6478_v51  ;;  %v6365_v59 = vmul.f32 %v13382_v37, %v13382_v37  ;;  %v13399_v18 = vpop.eup %10628  ;;  %10638 = vtanh.f32 %v6963_v20  ;;  %v6846_v9 = vmul.f32 0.7978846, %v6718_v27 }
 0x60b   : > { %v13397_v62 = vpop.f32.mrf.mxu1  ;;  %16089 = vst [vmem:[#allocation52_spill] sm:$0xff] %v13399_v18  ;;  %v6485_v17 = vmul.f32 %v6357_v38, %v13360_v63  ;;  %v7267_v49 = vmul.f32 %v7139_v28, %v13109_v23  ;;  %v10250_v1 = vld [vmem:[#allocation10 + $0x2f4] ss:$8 sps:$4 sm:$0xff]   ;;  %v6853_v57 = vmul.f32 0.7978846, %v6725_v47  ;;  %v6726_v51 = vadd.f32 %v6598_v48, %v13311_v14 }
 0x60c   : > { %8438 = vmatpush1.bf16.msra.mxu0 %v10242_v58  ;;  %v13403_v53 = vpop.f32.mrf.mxu0  ;;  %v6486_v21 = vmul.f32 %v6358_v50, %v13366_v41  ;;  %v7148_v19 = vadd.f32 1.0, %v13233_v30  ;;  %v13410_v18 = vpop.eup %10630  ;;  %v6260_v27 = vmul.f32 0.5, %v13084_v46  ;;  %v7156_v23 = vadd.f32 1.0, %v13262_v6  ;;  %v10248_v46 = vld [vmem:[#allocation10 + $0x2f0] ss:$8 sps:$4 sm:$0xff]  }
 0x60d   : > { %8439 = vmatprep.subr.bf16.mxu0 %v10247_v3  ;;  %v13408_v58 = vpop.f32.mrf.mxu1  ;;  %v7371_v20 = vpack.c.bf16 %v7267_v49, %v13173_v11  ;;  %v5582_v38 = vadd.f32 %v13347_v5, %v13021_v43  ;;  %v13419_v48 = vpop.eup %10632  ;;  %v6733_v47 = vadd.f32 %v6605_v35, %v13315_v31  ;;  %v6734_v30 = vadd.f32 %v6606_v54, %v13351_v56  ;;  %v10253_v54 = vld [vmem:[#allocation10 + $0x2e4] ss:$8 sps:$4 sm:$0xff]  }
 0x60e   : > { %v13417_v3 = vpop.f32.mrf.mxu0  ;;  %16090 = vst [vmem:[#allocation77_spill] sm:$0xff] %v13419_v48  ;;  %v6493_v50 = vmul.f32 %v6365_v59, %v13382_v37  ;;  %v7276_v28 = vmul.f32 %v7148_v19, %v13150_v10  ;;  %v6613_v6 = vmul.f32 0.044715, %v6485_v17  ;;  %v7284_v49 = vmul.f32 %v7156_v23, %v6260_v27 }
 0x60f   : > { %v13425_v11 = vpop.f32.mrf.mxu1  ;;  %8252 = vmatmul.mubr.bf16.gmra.mxu0 %v7371_v20  ;;  %v13428_v5 = vadd.f32 %v13354_v26, %v5582_v38  ;;  %v5584_v48 = vadd.f32 %v13362_v52, %v13027_v42  ;;  %10640 = vtanh.f32 %v6964_v39  ;;  %v13435_v10 = vmul.f32 0.5, %v13307_v8 }
 0x610   : > { %8440 = vmatpush1.bf16.msra.mxu0 %v10245_v29  ;;  %v13432_v35 = vpop.f32.mrf.mxu0  ;;  %v6854_v19 = vmul.f32 0.7978846, %v6726_v51  ;;  %v6614_v29 = vmul.f32 0.044715, %v6486_v21  ;;  %10642 = vtanh.f32 %v6853_v57  ;;  %v7380_v17 = vpack.c.bf16 %v7284_v49, %v7276_v28  ;;  %v10251_v57 = vld [vmem:[#allocation10 + $0x2e0] ss:$8 sps:$4 sm:$0xff]  }
 0x611   : > { %16091 = vst [vmem:[#allocation29_spill] sm:$0xff] %v13428_v5  ;;  %8441 = vmatprep.subr.bf16.mxu0 %v10250_v1  ;;  %v13437_v59 = vpop.f32.mrf.mxu1  ;;  %v6366_v26 = vmul.f32 %v13428_v5, %v13428_v5  ;;  %v13442_v20 = vadd.f32 %v13369_v2, %v5584_v48  ;;  %10644 = vtanh.f32 %v6846_v9  ;;  %v13447_v39 = vmul.f32 0.5, %v13315_v31  ;;  %v10256_v31 = vld [vmem:[#allocation10 + $0x2d4] ss:$8 sps:$4 sm:$0xff]  }
 0x612   : > { %v13444_v52 = vpop.f32.mrf.mxu0  ;;  %v6861_v8 = vmul.f32 0.7978846, %v6733_v47  ;;  %v5586_v21 = vadd.f32 %v13374_v60, %v13021_v43  ;;  %v6862_v51 = vmul.f32 0.7978846, %v6734_v30  ;;  %v6741_v27 = vadd.f32 %v6613_v6, %v13360_v63  ;;  %8261 = vmatprep.mubr.bf16.mxu0 %v7380_v17  ;;  %v10635_v38 = vpop.eup %10634 }
 0x613   : > { %16092 = vst [vmem:[#allocation78_spill] sm:$0xff] %v13447_v39  ;;  %v13451_v1 = vpop.f32.mrf.mxu1  ;;  %v6621_v23 = vmul.f32 0.044715, %v6493_v50  ;;  %v5590_v2 = vadd.f32 %v13393_v40, %v13027_v42  ;;  %v6742_v48 = vadd.f32 %v6614_v29, %v13366_v41  ;;  %v7147_v47 = vadd.f32 1.0, %v13228_v13 }
 0x614   : > { %8442 = vmatpush2.bf16.msra.mxu0 %v10248_v46  ;;  %v13456_v9 = vpop.f32.mrf.mxu0  ;;  %v13460_v60 = vadd.f32 %v13384_v34, %v5586_v21  ;;  %v7155_v30 = vadd.f32 1.0, %v13253_v24  ;;  %10646 = vtanh.f32 %v6854_v19  ;;  %v13467_v50 = vmul.f32 0.5, %v13360_v63  ;;  %v13474_v49 = vpop.eup %10636 }
 0x615   : > { %8443 = vmatprep.subr.bf16.mxu0 %v10253_v54  ;;  %v13464_v28 = vpop.f32.mrf.mxu1  ;;  %v6494_v40 = vmul.f32 %v6366_v26, %v13428_v5  ;;  %v6373_v46 = vmul.f32 %v13442_v20, %v13442_v20  ;;  %10648 = vtanh.f32 %v6861_v8  ;;  %v13477_v13 = vadd.f32 %v13397_v62, %v5590_v2  ;;  %v10254_v8 = vld [vmem:[#allocation10 + $0x2d0] ss:$8 sps:$4 sm:$0xff]  }
 0x616   : > { %16093 = vst [vmem:[#allocation79_spill] sm:$0xff] %v13460_v60  ;;  %16094 = vst [vmem:[#allocation42_spill] sm:$0xff] %v13467_v50  ;;  %v13472_v6 = vpop.f32.mrf.mxu0  ;;  %v7275_v24 = vmul.f32 %v7147_v47, %v13133_v32  ;;  %v7283_v34 = vmul.f32 %v7155_v30, %v13146_v55  ;;  %v7101_v63 = vadd.f32 1.0, %v10635_v38  ;;  %v6869_v19 = vmul.f32 0.7978846, %v6741_v27 }
 0x617   : > { %v13481_v54 = vpop.f32.mrf.mxu1  ;;  %v6749_v29 = vadd.f32 %v6621_v23, %v13382_v37  ;;  %v6374_v17 = vmul.f32 %v13460_v60, %v13460_v60  ;;  %v13488_v62 = vpop.eup %10638  ;;  %10650 = vtanh.f32 %v6862_v51  ;;  %v6870_v32 = vmul.f32 0.7978846, %v6742_v48  ;;  %v10259_v27 = vld [vmem:[#allocation10 + $0x2c4] ss:$8 sps:$4 sm:$0xff]  }
 0x618   : > { %8444 = vmatpush2.bf16.msra.mxu0 %v10251_v57  ;;  %v13486_v26 = vpop.f32.mrf.mxu0  ;;  %16095 = vst [vmem:[#allocation33_spill] sm:$0xff] %v13488_v62  ;;  %v13491_v55 = vmul.f32 0.5, %v13382_v37  ;;  %v7379_v21 = vpack.c.bf16 %v7283_v34, %v7275_v24  ;;  %v6622_v2 = vmul.f32 0.044715, %v6494_v40  ;;  %v6501_v23 = vmul.f32 %v6373_v46, %v13442_v20  ;;  %v10257_v34 = vld [vmem:[#allocation10 + $0x2c0] ss:$8 sps:$4 sm:$0xff]  }
 0x619   : > { %8445 = vmatprep.subr.bf16.mxu0 %v10256_v31  ;;  %v13493_v57 = vpop.f32.mrf.mxu1  ;;  %v6268_v38 = vmul.f32 0.5, %v13106_v45  ;;  %v7164_v47 = vadd.f32 1.0, %v13294_v36  ;;  %v6381_v51 = vmul.f32 %v13477_v13, %v13477_v13  ;;  %v6276_v37 = vmul.f32 0.5, %v13140_v33 }
 0x61a   : > { %16096 = vst [vmem:[#allocation50_spill] sm:$0xff] %v13491_v55  ;;  %v13498_v30 = vpop.f32.mrf.mxu0  ;;  %8262 = vmatmul.mubr.bf16.gmra.mxu0 %v7379_v21  ;;  %v7172_v31 = vadd.f32 1.0, %v13317_v15  ;;  %v5592_v48 = vadd.f32 %v13403_v53, %v13021_v43  ;;  %v13509_v46 = vmul.f32 %v7101_v63, %v13390_v12  ;;  %10652 = vtanh.f32 %v6869_v19  ;;  %v10262_v12 = vld [vmem:[#allocation10 + $0x2b4] ss:$8 sps:$4 sm:$0xff]  }
 0x61b   : > { %v13506_v40 = vpop.f32.mrf.mxu1  ;;  %v6877_v45 = vmul.f32 0.7978846, %v6749_v29  ;;  %v6502_v36 = vmul.f32 %v6374_v17, %v13460_v60  ;;  %v7292_v21 = vmul.f32 %v7164_v47, %v6268_v38  ;;  %v5594_v53 = vadd.f32 %v13417_v3, %v13027_v42 }
 0x61c   : > { %v13512_v24 = vpop.f32.mrf.mxu0  ;;  %8446 = vmatpush2.bf16.msra.mxu0 %v10254_v8  ;;  %v7300_v33 = vmul.f32 %v7172_v31, %v6276_v37  ;;  %v13515_v15 = vadd.f32 %v13408_v58, %v5592_v48  ;;  %v13521_v63 = vpop.eup %10640  ;;  %v6750_v19 = vadd.f32 %v6622_v2, %v13428_v5  ;;  %v6629_v29 = vmul.f32 0.044715, %v6501_v23 }
 0x61d   : > { %v13519_v55 = vpop.f32.mrf.mxu1  ;;  %8447 = vmatprep.subr.bf16.mxu0 %v10259_v27  ;;  %v5596_v17 = vadd.f32 %v13432_v35, %v13021_v43  ;;  %v5600_v8 = vadd.f32 %v13444_v52, %v13027_v42  ;;  %v10643_v38 = vpop.eup %10642  ;;  %v6509_v3 = vmul.f32 %v6381_v51, %v13477_v13  ;;  %v13534_v37 = vadd.f32 %v13425_v11, %v5594_v53 }
 0x61e   : > { %v13528_v58 = vpop.f32.mrf.mxu0  ;;  %v7388_v47 = vpack.c.bf16 %v7300_v33, %v7292_v21  ;;  %v6382_v27 = vmul.f32 %v13515_v15, %v13515_v15  ;;  %v13538_v23 = vpop.eup %10644  ;;  %v6630_v35 = vmul.f32 0.044715, %v6502_v36  ;;  %v7163_v51 = vadd.f32 1.0, %v13277_v7  ;;  %v10260_v21 = vld [vmem:[#allocation10 + $0x2b0] ss:$8 sps:$4 sm:$0xff]  }
 0x61f   : > { %v13536_v2 = vpop.f32.mrf.mxu1  ;;  %v13541_v31 = vadd.f32 %v13437_v59, %v5596_v17  ;;  %v13544_v52 = vadd.f32 %v13451_v1, %v5600_v8  ;;  %10654 = vtanh.f32 %v6870_v32  ;;  %v13550_v11 = vmul.f32 0.5, %v13442_v20  ;;  %v10265_v1 = vld [vmem:[#allocation10 + $0x2a4] ss:$8 sps:$4 sm:$0xff]   ;;  %v13563_v17 = vld [vmem:[#allocation10 + $0x374] ss:$8 sps:$4 sm:$0xff]  }
 0x620   : > { %v13547_v48 = vpop.f32.mrf.mxu0  ;;  %8448 = vmatpush2.bf16.msra.mxu0 %v10257_v34  ;;  %8271 = vmatprep.mubr.bf16.mxu0 %v7388_v47  ;;  %v6510_v33 = vmul.f32 %v6382_v27, %v13515_v15  ;;  %v6389_v59 = vmul.f32 %v13534_v37, %v13534_v37  ;;  %v7109_v53 = vadd.f32 1.0, %v10643_v38  ;;  %10656 = vtanh.f32 %v6877_v45 }
 0x621   : > { %16097 = vst [vmem:[#allocation43_spill] sm:$0xff] %v13541_v31  ;;  %16098 = vst [vmem:[#allocation44_spill] sm:$0xff] %v13550_v11  ;;  %v13555_v36 = vpop.f32.mrf.mxu1  ;;  %8449 = vmatprep.subr.bf16.mxu0 %v10262_v12  ;;  %v6390_v7 = vmul.f32 %v13541_v31, %v13541_v31  ;;  %v6397_v32 = vmul.f32 %v13544_v52, %v13544_v52  ;;  %v13565_v8 = vpop.eup %10646  ;;  %v6878_v47 = vmul.f32 0.7978846, %v6750_v19  ;;  %v6637_v11 = vmul.f32 0.044715, %v6509_v3 }
 0x622   : > { %v13561_v34 = vpop.f32.mrf.mxu0  ;;  %v6757_v27 = vadd.f32 %v6629_v29, %v13442_v20  ;;  %v7171_v12 = vadd.f32 1.0, %v13305_v25  ;;  %v13571_v45 = vpop.eup %10648  ;;  %v6758_v5 = vadd.f32 %v6630_v35, %v13460_v60  ;;  %v6638_v62 = vmul.f32 0.044715, %v6510_v33  ;;  %v10263_v19 = vld [vmem:[#allocation10 + $0x2a0] ss:$8 sps:$4 sm:$0xff]   ;;  %9745 = vmatprep.subr.bf16.mxu1 %v13563_v17 }
 0x623   : > { %v13569_v38 = vpop.f32.mrf.mxu1  ;;  %16099 = vst [vmem:[#allocation32_spill] sm:$0xff] %v13571_v45  ;;  %v6517_v50 = vmul.f32 %v6389_v59, %v13534_v37  ;;  %v7291_v39 = vmul.f32 %v7163_v51, %v13191_v61  ;;  %v6518_v20 = vmul.f32 %v6390_v7, %v13541_v31  ;;  %v6525_v25 = vmul.f32 %v6397_v32, %v13544_v52  ;;  %v10268_v33 = vld [vmem:[#allocation10 + $0x294] ss:$8 sps:$4 sm:$0xff]  }
 0x624   : > { %v13576_v41 = vpop.f32.mrf.mxu0  ;;  %8450 = vmatpush2.bf16.msra.mxu0 %v10260_v21  ;;  %v7299_v29 = vmul.f32 %v7171_v12, %v13260_v4  ;;  %v7180_v3 = vadd.f32 1.0, %v13336_v16  ;;  %v13585_v59 = vpop.eup %10650  ;;  %v6284_v61 = vmul.f32 0.5, %v13156_v22  ;;  %v6292_v51 = vmul.f32 0.5, %v13176_v0  ;;  %v16102_v21 = vld [vmem:[#allocation72_spill] sm:$0xff] }
 0x625   : > { %16100 = vst [vmem:[#allocation35_spill] sm:$0xff] %v13576_v41  ;;  %v13583_v35 = vpop.f32.mrf.mxu1  ;;  %8451 = vmatprep.subr.bf16.mxu0 %v10265_v1  ;;  %v7188_v60 = vadd.f32 1.0, %v16102_v21  ;;  %v5602_v7 = vadd.f32 %v13456_v9, %v13021_v43  ;;  %v13595_v4 = vmul.f32 %v7109_v53, %v13435_v10  ;;  %v6885_v16 = vmul.f32 0.7978846, %v6757_v27  ;;  %v10266_v9 = vld [vmem:[#allocation10 + $0x290] ss:$8 sps:$4 sm:$0xff]  }
 0x626   : > { %16101 = vst [vmem:[#allocation39_spill] sm:$0xff] %v13583_v35  ;;  %v13592_v32 = vpop.f32.mrf.mxu0  ;;  %v6765_v1 = vadd.f32 %v6637_v11, %v13477_v13  ;;  %v7387_v12 = vpack.c.bf16 %v7299_v29, %v7291_v39  ;;  %v6645_v35 = vmul.f32 0.044715, %v6517_v50  ;;  %v7308_v22 = vmul.f32 %v7180_v3, %v6284_v61 }
 0x627   : > { %16103 = vst [vmem:[#allocation37_spill] sm:$0xff] %v13592_v32  ;;  %v13598_v45 = vpop.f32.mrf.mxu1  ;;  %v7316_v41 = vmul.f32 %v7188_v60, %v6292_v51  ;;  %v13601_v0 = vadd.f32 %v13464_v28, %v5602_v7  ;;  %v13605_v32 = vpop.eup %10652  ;;  %v6766_v10 = vadd.f32 %v6638_v62, %v13515_v15  ;;  %v6646_v53 = vmul.f32 0.044715, %v6518_v20  ;;  %v10271_v28 = vld [vmem:[#allocation10 + $0x284] ss:$8 sps:$4 sm:$0xff]  }
 0x628   : > { %v13603_v21 = vpop.f32.mrf.mxu0  ;;  %8452 = vmatpush2.bf16.msra.mxu0 %v10263_v19  ;;  %v5604_v39 = vadd.f32 %v13472_v6, %v13027_v42  ;;  %v5606_v50 = vadd.f32 %v13486_v26, %v13021_v43  ;;  %10658 = vtanh.f32 %v6878_v47  ;;  %v6886_v11 = vmul.f32 0.7978846, %v6758_v5 }
 0x629   : > { %16104 = vst [vmem:[#allocation73_spill] sm:$0xff] %v13601_v0  ;;  %8272 = vmatmul.mubr.bf16.gmra.mxu0 %v7387_v12  ;;  %v13612_v60 = vpop.f32.mrf.mxu1  ;;  %8453 = vmatprep.subr.bf16.mxu0 %v10268_v33  ;;  %v6653_v27 = vmul.f32 0.044715, %v6525_v25  ;;  %v7396_v19 = vpack.c.bf16 %v7316_v41, %v7308_v22  ;;  %v6893_v3 = vmul.f32 0.7978846, %v6765_v1  ;;  %v6398_v62 = vmul.f32 %v13601_v0, %v13601_v0  ;;  %v16106_v41 = vld [vmem:[#allocation66_spill] sm:$0xff] }
 0x62a   : > { %v13614_v29 = vpop.f32.mrf.mxu0  ;;  %v13619_v20 = vadd.f32 %v13481_v54, %v5604_v39  ;;  %v5610_v6 = vadd.f32 %v13498_v30, %v13027_v42  ;;  %v6773_v33 = vadd.f32 %v6645_v35, %v13534_v37  ;;  %v13627_v5 = vadd.f32 %v13493_v57, %v5606_v50  ;;  %v16107_v25 = vld [vmem:[#allocation71_spill] sm:$0xff]  ;;  %v16109_v39 = vld [vmem:[#allocation53_spill] sm:$0xff] }
 0x62b   : > { %v13623_v26 = vpop.f32.mrf.mxu1  ;;  %8281 = vmatprep.mubr.bf16.mxu0 %v7396_v19  ;;  %v7179_v47 = vadd.f32 1.0, %v16106_v41  ;;  %v7187_v61 = vadd.f32 1.0, %v16107_v25  ;;  %v10269_v54 = vld [vmem:[#allocation10 + $0x280] ss:$8 sps:$4 sm:$0xff]   ;;  %10660 = vtanh.f32 %v6885_v16  ;;  %v13634_v7 = vmul.f32 0.5, %v13477_v13 }
 0x62c   : > { %16105 = vst [vmem:[#allocation75_spill] sm:$0xff] %v13627_v5  ;;  %v13631_v51 = vpop.f32.mrf.mxu0  ;;  %8454 = vmatpush2.bf16.msra.mxu0 %v10266_v9  ;;  %v6894_v30 = vmul.f32 0.7978846, %v6766_v10  ;;  %v6774_v1 = vadd.f32 %v6646_v53, %v13541_v31  ;;  %v13639_v57 = vpop.eup %10654  ;;  %v6781_v12 = vadd.f32 %v6653_v27, %v13544_v52  ;;  %v6405_v22 = vmul.f32 %v13619_v20, %v13619_v20  ;;  %v16110_v50 = vld [vmem:[#allocation59_spill] sm:$0xff]  ;;  %v16112_v10 = vld [vmem:[#allocation62_spill] sm:$0xff] }
 0x62d   : > { %16108 = vst [vmem:[#allocation74_spill] sm:$0xff] %v13634_v7  ;;  %v13637_v35 = vpop.f32.mrf.mxu1  ;;  %8455 = vmatprep.subr.bf16.mxu0 %v10271_v28  ;;  %v7307_v9 = vmul.f32 %v7179_v47, %v16109_v39  ;;  %v7315_v16 = vmul.f32 %v7187_v61, %v16110_v50  ;;  %v13648_v13 = vpop.eup %10656  ;;  %10662 = vtanh.f32 %v6886_v11  ;;  %v6526_v53 = vmul.f32 %v6398_v62, %v13601_v0  ;;  %v16111_v39 = vld [vmem:[#allocation55_spill] sm:$0xff]  ;;  %v16113_v7 = vld [vmem:[#allocation54_spill] sm:$0xff] }
 0x62e   : > { %v13646_v19 = vpop.f32.mrf.mxu0  ;;  %v13654_v28 = vadd.f32 %v13506_v40, %v5610_v6  ;;  %10664 = vtanh.f32 %v6893_v3  ;;  %v6901_v41 = vmul.f32 0.7978846, %v6773_v33  ;;  %v6406_v47 = vmul.f32 %v13627_v5, %v13627_v5 }
 0x62f   : > { %v13656_v27 = vpop.f32.mrf.mxu1  ;;  %v7395_v25 = vpack.c.bf16 %v7315_v16, %v7307_v9  ;;  %v6300_v50 = vmul.f32 0.5, %v16111_v39  ;;  %v6308_v11 = vmul.f32 0.5, %v16112_v10  ;;  %v7196_v62 = vadd.f32 1.0, %v13376_v44 }
 0x630   : > { %v13660_v61 = vpop.f32.mrf.mxu0  ;;  %8456 = vmatpush2.bf16.msra.mxu0 %v10269_v54  ;;  %v7204_v40 = vadd.f32 1.0, %v13410_v18  ;;  %10666 = vtanh.f32 %v6894_v30  ;;  %v6902_v3 = vmul.f32 0.7978846, %v6774_v1  ;;  %v6909_v33 = vmul.f32 0.7978846, %v6781_v12 }
 0x631   : > { %v13666_v6 = vpop.f32.mrf.mxu1  ;;  %8538 = vmatprep.subr.bf16.mxu0 %v13563_v17  ;;  %v6533_v9 = vmul.f32 %v6405_v22, %v13619_v20  ;;  %8282 = vmatmul.mubr.bf16.gmra.mxu0 %v7395_v25  ;;  %v6654_v54 = vmul.f32 0.044715, %v6526_v53  ;;  %v6413_v10 = vmul.f32 %v13654_v28, %v13654_v28  ;;  %v7324_v39 = vmul.f32 %v7196_v62, %v6300_v50 }
 0x632   : > { %v13670_v16 = vpop.f32.mrf.mxu0  ;;  %v7332_v44 = vmul.f32 %v7204_v40, %v6308_v11  ;;  %v6206_v18 = vmul.f32 0.5, %v16113_v7  ;;  %v6214_v31 = vmul.f32 0.5, %v13311_v14  ;;  %v7102_v17 = vadd.f32 1.0, %v13538_v23 }
 0x633   : > { %v7110_v30 = vadd.f32 1.0, %v13565_v8  ;;  %10668 = vtanh.f32 %v6901_v41  ;;  %v6534_v22 = vmul.f32 %v6406_v47, %v13627_v5  ;;  %v5612_v25 = vadd.f32 %v13512_v24, %v13021_v43 }
 0x634   : > { %v13678_v1 = vpop.f32.mrf.mxu1  ;;  %v13680_v12 = vpop.f32.mrf.mxu0  ;;  %v7404_v53 = vpack.c.bf16 %v7332_v44, %v7324_v39  ;;  %v6661_v50 = vmul.f32 0.044715, %v6533_v9  ;;  %v7230_v11 = vmul.f32 %v7102_v17, %v6206_v18  ;;  %v5614_v14 = vadd.f32 %v13528_v58, %v13027_v42  ;;  %v16116_v17 = vld [vmem:[#allocation52_spill] sm:$0xff] }
 0x635   : > { %v7238_v7 = vmul.f32 %v7110_v30, %v6214_v31  ;;  %v13691_v62 = vpop.eup %10658  ;;  %v6541_v41 = vmul.f32 %v6413_v10, %v13654_v28  ;;  %v13695_v47 = vadd.f32 %v13519_v55, %v5612_v25  ;;  %v5616_v24 = vadd.f32 %v13547_v48, %v13021_v43 }
 0x636   : > { %v13687_v23 = vpop.f32.mrf.mxu1  ;;  %v13689_v8 = vpop.f32.mrf.mxu0  ;;  %8291 = vmatprep.mubr.bf16.mxu0 %v7404_v53  ;;  %v5620_v31 = vadd.f32 %v13561_v34, %v13027_v42  ;;  %10670 = vtanh.f32 %v6902_v3  ;;  %v6782_v58 = vadd.f32 %v6654_v54, %v13601_v0  ;;  %v13703_v9 = vadd.f32 %v13536_v2, %v5614_v14  ;;  %v16114_v34 = vld [vmem:[#allocation67_spill] sm:$0xff] }
 0x637   : > { %v7358_v40 = vpack.c.bf16 %v7238_v7, %v7230_v11  ;;  %v6414_v55 = vmul.f32 %v13695_v47, %v13695_v47  ;;  %v13712_v44 = vadd.f32 %v13555_v36, %v5616_v24  ;;  %v7195_v3 = vadd.f32 1.0, %v16114_v34 }
 0x638   : > { %v13705_v39 = vpop.f32.mrf.mxu1  ;;  %v13707_v10 = vpop.f32.mrf.mxu0  ;;  %v13715_v48 = vadd.f32 %v13569_v38, %v5620_v31  ;;  %v13721_v2 = vmul.f32 0.5, %v13534_v37  ;;  %v13724_v18 = vmul.f32 0.5, %v13544_v52  ;;  %10672 = vtanh.f32 %v6909_v33  ;;  %v10272_v38 = vld [vmem:[#allocation10 + $0x370] ss:$8 sps:$4 sm:$0xff]   ;;  %v10277_v33 = vld [vmem:[#allocation10 + $0x364] ss:$8 sps:$4 sm:$0xff]  }
 0x639   : > { %v13718_v54 = vpop.eup %10660  ;;  %8344 = vmatprep.mubr.bf16.mxu1 %v7358_v40  ;;  %v7203_v30 = vadd.f32 1.0, %v16116_v17  ;;  %v6789_v25 = vadd.f32 %v6661_v50, %v13619_v20  ;;  %v6662_v11 = vmul.f32 0.044715, %v6534_v22  ;;  %v6669_v7 = vmul.f32 0.044715, %v6541_v41  ;;  %v16119_v40 = vld [vmem:[#allocation61_spill] sm:$0xff] }
 0x63a   : > { %16115 = vst [vmem:[#allocation76_spill] sm:$0xff] %v13724_v18  ;;  %v13727_v53 = vpop.f32.mrf.mxu1  ;;  %v13729_v36 = vpop.f32.mrf.mxu0  ;;  %v16118_v37 = vpack.c.bf16 %v13595_v4, %v13509_v46  ;;  %v6421_v52 = vmul.f32 %v13703_v9, %v13703_v9  ;;  %v6910_v24 = vmul.f32 0.7978846, %v6782_v58  ;;  %v6542_v31 = vmul.f32 %v6414_v55, %v13695_v47  ;;  %v16120_v17 = vld [vmem:[#allocation69_spill] sm:$0xff]  ;;  %v16124_v55 = vld [vmem:[#allocation56_spill] sm:$0xff] }
 0x63b   : > { %16117 = vst [vmem:[#allocation47_spill] sm:$0xff] %v13727_v53  ;;  %v13737_v14 = vpop.eup %10662  ;;  %v7323_v34 = vmul.f32 %v7195_v3, %v16119_v40  ;;  %v7331_v18 = vmul.f32 %v7203_v30, %v16120_v17  ;;  %v13749_v4 = vmul.f32 0.5, %v13619_v20  ;;  %v6422_v41 = vmul.f32 %v13712_v44, %v13712_v44 }
 0x63c   : > { %8345 = vmatmul.mubr.bf16.vlgmr.msra.gmra.mxu1 %v16118_v37  ;;  %v13742_v50 = vpop.f32.mrf.mxu1  ;;  %v13744_v22 = vpop.f32.mrf.mxu0  ;;  %v6429_v58 = vmul.f32 %v13715_v48, %v13715_v48  ;;  %v6316_v3 = vmul.f32 0.5, %v16124_v55  ;;  %v16125_v37 = vld [vmem:[#allocation64_spill] sm:$0xff]  ;;  %v7212_v17 = vadd.f32 1.0, %v13474_v49  ;;  %v6790_v53 = vadd.f32 %v6662_v11, %v13627_v5 }
 0x63d   : > { %16121 = vst [vmem:[#allocation34_spill] sm:$0xff] %v13742_v50  ;;  %16122 = vst [vmem:[#allocation38_spill] sm:$0xff] %v13744_v22  ;;  %9761 = vmatpush1.bf16.msra.mxu1 %v10272_v38  ;;  %v13746_v46 = vpop.eup %10664  ;;  %v7403_v30 = vpack.c.bf16 %v7331_v18, %v7323_v34  ;;  %v6324_v40 = vmul.f32 0.5, %v16125_v37  ;;  %v7220_v38 = vadd.f32 1.0, %v13521_v63  ;;  %v6917_v50 = vmul.f32 0.7978846, %v6789_v25 }
 0x63e   : > { %16123 = vst [vmem:[#allocation31_spill] sm:$0xff] %v13749_v4  ;;  %9746 = vmatprep.subr.bf16.mxu1 %v10277_v33  ;;  %v13759_v22 = vpop.f32.mrf.mxu1  ;;  %v13761_v20 = vpop.f32.mrf.mxu0  ;;  %v10275_v4 = vld [vmem:[#allocation10 + $0x360] ss:$8 sps:$4 sm:$0xff]   ;;  %v6797_v55 = vadd.f32 %v6669_v7, %v13654_v28  ;;  %v6549_v18 = vmul.f32 %v6421_v52, %v13703_v9  ;;  %v10280_v33 = vld [vmem:[#allocation10 + $0x354] ss:$8 sps:$4 sm:$0xff]   ;;  %10674 = vtanh.f32 %v6910_v24  ;;  %v7340_v49 = vmul.f32 %v7212_v17, %v6316_v3 }
 0x63f   : > { %16126 = vst [vmem:[#allocation36_spill] sm:$0xff] %v13759_v22  ;;  %16127 = vst [vmem:[#allocation49_spill] sm:$0xff] %v13761_v20  ;;  %v13763_v0 = vpop.eup %10666  ;;  %v6670_v34 = vmul.f32 0.044715, %v6542_v31  ;;  %8292 = vmatmul.mubr.bf16.gmra.mxu0 %v7403_v30  ;;  %v7348_v63 = vmul.f32 %v7220_v38, %v6324_v40  ;;  %v6550_v20 = vmul.f32 %v6422_v41, %v13712_v44  ;;  %v6222_v11 = vmul.f32 0.5, %v13351_v56  ;;  %v16130_v31 = vld [vmem:[#allocation30_spill] sm:$0xff] }
 0x640   : > { %v13768_v37 = vpop.f32.mrf.mxu1  ;;  %v13770_v22 = vpop.f32.mrf.mxu0  ;;  %v6557_v25 = vmul.f32 %v6429_v58, %v13715_v48  ;;  %v7118_v7 = vadd.f32 1.0, %v13585_v59  ;;  %v6230_v3 = vmul.f32 0.5, %v16130_v31  ;;  %v7126_v30 = vadd.f32 1.0, %v13639_v57  ;;  %v16131_v40 = vld [vmem:[#allocation35_spill] sm:$0xff]  ;;  %v10278_v58 = vld [vmem:[#allocation10 + $0x350] ss:$8 sps:$4 sm:$0xff]  }
 0x641   : > { %16128 = vst [vmem:[#allocation68_spill] sm:$0xff] %v13768_v37  ;;  %16129 = vst [vmem:[#allocation45_spill] sm:$0xff] %v13770_v22  ;;  %9762 = vmatpush1.bf16.msra.mxu1 %v10275_v4  ;;  %v13776_v52 = vpop.eup %10668  ;;  %v7412_v24 = vpack.c.bf16 %v7348_v63, %v7340_v49  ;;  %v5622_v17 = vadd.f32 %v16131_v40, %v13021_v43  ;;  %v10283_v38 = vld [vmem:[#allocation10 + $0x344] ss:$8 sps:$4 sm:$0xff]   ;;  %10676 = vtanh.f32 %v6917_v50  ;;  %v6918_v56 = vmul.f32 0.7978846, %v6790_v53 }
 0x642   : > { %9747 = vmatprep.subr.bf16.mxu1 %v10280_v33  ;;  %v13782_v4 = vpop.f32.mrf.mxu1  ;;  %v13784_v41 = vpop.f32.mrf.mxu0  ;;  %v6925_v59 = vmul.f32 0.7978846, %v6797_v55  ;;  %v6677_v33 = vmul.f32 0.044715, %v6549_v18  ;;  %v7246_v37 = vmul.f32 %v7118_v7, %v6222_v11  ;;  %v7254_v49 = vmul.f32 %v7126_v30, %v6230_v3  ;;  %v16133_v63 = vld [vmem:[#allocation39_spill] sm:$0xff]  ;;  %v16134_v57 = vld [vmem:[#allocation32_spill] sm:$0xff] }
 0x643   : > { %16132 = vst [vmem:[#allocation51_spill] sm:$0xff] %v13782_v4  ;;  %8301 = vmatprep.mubr.bf16.mxu0 %v7412_v24  ;;  %v13787_v31 = vadd.f32 %v16133_v63, %v5622_v17  ;;  %v7117_v22 = vadd.f32 1.0, %v16134_v57  ;;  %v13794_v4 = vpop.eup %10670  ;;  %v6798_v50 = vadd.f32 %v6670_v34, %v13695_v47  ;;  %v7125_v53 = vadd.f32 1.0, %v13605_v32  ;;  %v16136_v55 = vld [vmem:[#allocation37_spill] sm:$0xff]  ;;  %v16137_v30 = vld [vmem:[#allocation78_spill] sm:$0xff] }
 0x644   : > { %v13790_v5 = vpop.f32.mrf.mxu1  ;;  %v13792_v40 = vpop.f32.mrf.mxu0  ;;  %v5624_v18 = vadd.f32 %v16136_v55, %v13027_v42  ;;  %v5626_v11 = vadd.f32 %v13603_v21, %v13021_v43  ;;  %v6678_v7 = vmul.f32 0.044715, %v6550_v20  ;;  %v6685_v24 = vmul.f32 0.044715, %v6557_v25  ;;  %v10281_v57 = vld [vmem:[#allocation10 + $0x340] ss:$8 sps:$4 sm:$0xff]  }
 0x645   : > { %16135 = vst [vmem:[#allocation26_spill] sm:$0xff] %v13792_v40  ;;  %9763 = vmatpush1.bf16.msra.mxu1 %v10278_v58  ;;  %v7366_v3 = vpack.c.bf16 %v7254_v49, %v7246_v37  ;;  %v7245_v17 = vmul.f32 %v7117_v22, %v16137_v30  ;;  %v13807_v34 = vpop.eup %10672  ;;  %v16139_v32 = vld [vmem:[#allocation42_spill] sm:$0xff]  ;;  %v5630_v20 = vadd.f32 %v13614_v29, %v13027_v42  ;;  %v10286_v37 = vld [vmem:[#allocation10 + $0x334] ss:$8 sps:$4 sm:$0xff]   ;;  %10678 = vtanh.f32 %v6918_v56  ;;  %v10284_v56 = vld [vmem:[#allocation10 + $0x330] ss:$8 sps:$4 sm:$0xff]  }
 0x646   : > { %9748 = vmatprep.subr.bf16.mxu1 %v10283_v38  ;;  %v13803_v63 = vpop.f32.mrf.mxu1  ;;  %v13805_v58 = vpop.f32.mrf.mxu0  ;;  %v7253_v40 = vmul.f32 %v7125_v53, %v16139_v32  ;;  %v13811_v55 = vadd.f32 %v13598_v45, %v5624_v18  ;;  %v13814_v21 = vadd.f32 %v13612_v60, %v5626_v11  ;;  %v6805_v22 = vadd.f32 %v6677_v33, %v13703_v9  ;;  %v16140_v38 = vld [vmem:[#allocation77_spill] sm:$0xff] }
 0x647   : > { %16138 = vst [vmem:[#allocation58_spill] sm:$0xff] %v13805_v58  ;;  %8354 = vmatprep.mubr.bf16.mxu1 %v7366_v3  ;;  %v6430_v25 = vmul.f32 %v13787_v31, %v13787_v31  ;;  %v7211_v49 = vadd.f32 1.0, %v16140_v38  ;;  %v16141_v30 = vld [vmem:[#allocation33_spill] sm:$0xff]  ;;  %v6926_v60 = vmul.f32 0.7978846, %v6798_v50  ;;  %v13832_v11 = vadd.f32 %v13623_v26, %v5630_v20  ;;  %v16143_v3 = vld [vmem:[#allocation70_spill] sm:$0xff] }
 0x648   : > { %v7219_v53 = vadd.f32 1.0, %v16141_v30  ;;  %v13823_v32 = vpop.f32.mrf.mxu1  ;;  %v13825_v45 = vpop.f32.mrf.mxu0  ;;  %v7365_v18 = vpack.c.bf16 %v7253_v40, %v7245_v17  ;;  %v6437_v29 = vmul.f32 %v13811_v55, %v13811_v55  ;;  %v6438_v33 = vmul.f32 %v13814_v21, %v13814_v21  ;;  %v16144_v30 = vld [vmem:[#allocation57_spill] sm:$0xff] }
 0x649   : > { %16142 = vst [vmem:[#allocation40_spill] sm:$0xff] %v13823_v32  ;;  %9764 = vmatpush1.bf16.msra.mxu1 %v10281_v57  ;;  %v7339_v38 = vmul.f32 %v7211_v49, %v16143_v3  ;;  %10680 = vtanh.f32 %v6925_v59  ;;  %v6806_v40 = vadd.f32 %v6678_v7, %v13712_v44  ;;  %v6813_v50 = vadd.f32 %v6685_v24, %v13715_v48  ;;  %v16148_v24 = vld [vmem:[#allocation29_spill] sm:$0xff] }
 0x64a   : > { %9749 = vmatprep.subr.bf16.mxu1 %v10286_v37  ;;  %v7347_v32 = vmul.f32 %v7219_v53, %v16144_v30  ;;  %v13836_v58 = vpop.f32.mrf.mxu1  ;;  %v13838_v57 = vpop.f32.mrf.mxu0  ;;  %8355 = vmatmul.mubr.bf16.gmra.mxu1 %v7365_v18  ;;  %v7134_v17 = vadd.f32 1.0, %v13691_v62  ;;  %v10289_v37 = vld [vmem:[#allocation10 + $0x324] ss:$8 sps:$4 sm:$0xff]   ;;  %v6933_v26 = vmul.f32 0.7978846, %v6805_v22  ;;  %v6558_v20 = vmul.f32 %v6430_v25, %v13787_v31 }
 0x64b   : > { %16145 = vst [vmem:[#allocation63_spill] sm:$0xff] %v13836_v58  ;;  %v6445_v49 = vmul.f32 %v13832_v11, %v13832_v11  ;;  %v13850_v59 = vpop.eup %10674  ;;  %v6565_v7 = vmul.f32 %v6437_v29, %v13811_v55  ;;  %v6238_v18 = vmul.f32 0.5, %v16148_v24  ;;  %v16149_v62 = vld [vmem:[#allocation79_spill] sm:$0xff]  ;;  %v7142_v22 = vadd.f32 1.0, %v13737_v14 }
 0x64c   : > { %v7411_v53 = vpack.c.bf16 %v7347_v32, %v7339_v38  ;;  %v13846_v3 = vpop.f32.mrf.mxu1  ;;  %v13848_v30 = vpop.f32.mrf.mxu0  ;;  %v6246_v58 = vmul.f32 0.5, %v16149_v62  ;;  %10682 = vtanh.f32 %v6926_v60  ;;  %v6566_v25 = vmul.f32 %v6438_v33, %v13814_v21  ;;  %v10287_v29 = vld [vmem:[#allocation10 + $0x320] ss:$8 sps:$4 sm:$0xff]  }
 0x64d   : > { %16146 = vst [vmem:[#allocation60_spill] sm:$0xff] %v13846_v3  ;;  %16147 = vst [vmem:[#allocation65_spill] sm:$0xff] %v13848_v30  ;;  %9765 = vmatpush1.bf16.msra.mxu1 %v10284_v56  ;;  %v5632_v32 = vadd.f32 %v13631_v51, %v13021_v43  ;;  %v7133_v38 = vadd.f32 1.0, %v13648_v13  ;;  %v6934_v24 = vmul.f32 0.7978846, %v6806_v40  ;;  %v7262_v3 = vmul.f32 %v7134_v17, %v6238_v18  ;;  %v16152_v17 = vld [vmem:[#allocation50_spill] sm:$0xff] }
 0x64e   : > { %9750 = vmatprep.subr.bf16.mxu1 %v10289_v37  ;;  %8302 = vmatmul.mubr.bf16.gmra.mxu0 %v7411_v53  ;;  %v13860_v56 = vpop.f32.mrf.mxu1  ;;  %v13862_v30 = vpop.f32.mrf.mxu0  ;;  %v7270_v62 = vmul.f32 %v7142_v22, %v6246_v58  ;;  %v7141_v14 = vadd.f32 1.0, %v13718_v54  ;;  %v6941_v60 = vmul.f32 0.7978846, %v6813_v50  ;;  %v6686_v33 = vmul.f32 0.044715, %v6558_v20  ;;  %v16153_v18 = vld [vmem:[#allocation44_spill] sm:$0xff] }
 0x64f   : > { %16150 = vst [vmem:[#allocation41_spill] sm:$0xff] %v13860_v56  ;;  %16151 = vst [vmem:[#allocation46_spill] sm:$0xff] %v13862_v30  ;;  %v13865_v37 = vpop.eup %10676  ;;  %v6573_v53 = vmul.f32 %v6445_v49, %v13832_v11  ;;  %v13869_v51 = vadd.f32 %v13637_v35, %v5632_v32  ;;  %v6693_v30 = vmul.f32 0.044715, %v6565_v7  ;;  %v7261_v58 = vmul.f32 %v7133_v38, %v16152_v17  ;;  %v10292_v7 = vld [vmem:[#allocation10 + $0x314] ss:$8 sps:$4 sm:$0xff]  }
 0x650   : > { %v13871_v13 = vpop.f32.mrf.mxu1  ;;  %v13873_v56 = vpop.f32.mrf.mxu0  ;;  %v7374_v40 = vpack.c.bf16 %v7270_v62, %v7262_v3  ;;  %v7269_v54 = vmul.f32 %v7141_v14, %v16153_v18  ;;  %v6694_v22 = vmul.f32 0.044715, %v6566_v25  ;;  %v5634_v20 = vadd.f32 %v13646_v19, %v13027_v42  ;;  %v16154_v38 = vld [vmem:[#allocation23_spill] sm:$0xff]  ;;  %v10290_v14 = vld [vmem:[#allocation10 + $0x310] ss:$8 sps:$4 sm:$0xff]  }
 0x651   : > { %9766 = vmatpush1.bf16.msra.mxu1 %v10287_v29  ;;  %v6446_v50 = vmul.f32 %v13869_v51, %v13869_v51  ;;  %v5636_v35 = vadd.f32 %v13660_v61, %v13021_v43  ;;  %v13888_v3 = vmul.f32 0.5, %v13654_v28  ;;  %10684 = vtanh.f32 %v6933_v26  ;;  %v10896_v26 = vld [vmem:[%s15771_s11] sm:$0xff] }
 0x652   : > { %v13883_v49 = vpop.f32.mrf.mxu1  ;;  %v13885_v32 = vpop.f32.mrf.mxu0  ;;  %8364 = vmatprep.mubr.bf16.mxu1 %v7374_v40  ;;  %v7373_v25 = vpack.c.bf16 %v7269_v54, %v7261_v58  ;;  %v3997_v29 = vsub.s32 4, %v16154_v38  ;;  %10686 = vtanh.f32 %v6934_v24  ;;  %v6701_v62 = vmul.f32 0.044715, %v6573_v53  ;;  %9751 = vmatprep.subr.bf16.mxu1 %v10292_v7  ;;  %v10295_v54 = vld [vmem:[#allocation10 + $0x304] ss:$8 sps:$4 sm:$0xff]  }
 0x653   : > { %v6574_v42 = vmul.f32 %v6446_v50, %v13869_v51  ;;  %v13893_v19 = vadd.f32 %v13656_v27, %v5634_v20  ;;  %10688 = vtanh.f32 %v6941_v60  ;;  %v6814_v28 = vadd.f32 %v6686_v33, %v13787_v31  ;;  %v13906_v27 = vpop.eup %10678 }
 0x654   : > { %v13895_v43 = vpop.f32.mrf.mxu1  ;;  %v13897_v61 = vpop.f32.mrf.mxu0  ;;  %8365 = vmatmul.mubr.bf16.gmra.mxu1 %v7373_v25  ;;  %v13903_v24 = vrot.slane %v10896_v26, %v3997_v29  ;;  %v7150_v53 = vadd.f32 1.0, %v13763_v0  ;;  %v6821_v40 = vadd.f32 %v6693_v30, %v13811_v55  ;;  %v6822_v17 = vadd.f32 %v6694_v22, %v13814_v21  ;;  %v16158_v30 = vld [vmem:[#allocation43_spill] sm:$0xff] }
 0x655   : > { %16155 = vst [vmem:[#allocation48_spill] sm:$0xff] %v13897_v61  ;;  %v13911_v58 = vadd.f32 %v13666_v6, %v5636_v35  ;;  %v6254_v60 = vmul.f32 0.5, %v13515_v15  ;;  %9767 = vmatpush1.bf16.msra.mxu1 %v10290_v14  ;;  %v6453_v0 = vmul.f32 %v13893_v19, %v13893_v19  ;;  %v6262_v20 = vmul.f32 0.5, %v16158_v30 }
 0x656   : > { %v13914_v33 = vpop.f32.mrf.mxu1  ;;  %v13916_v18 = vpop.f32.mrf.mxu0  ;;  %v5786_v50 = vadd.f32 %v13670_v16, %v13903_v24  ;;  %v7158_v22 = vadd.f32 1.0, %v13794_v4  ;;  %v6829_v15 = vadd.f32 %v6701_v62, %v13832_v11  ;;  %v6702_v35 = vmul.f32 0.044715, %v6574_v42  ;;  %9752 = vmatprep.subr.bf16.mxu1 %v10295_v54 }
 0x657   : > { %16156 = vst [vmem:[#allocation72_spill] sm:$0xff] %v13914_v33  ;;  %16157 = vst [vmem:[#allocation66_spill] sm:$0xff] %v13916_v18  ;;  %v13924_v6 = vpop.eup %10680  ;;  %v4001_v7 = vsub.s32 5, %v16154_v38  ;;  %v7149_v25 = vadd.f32 1.0, %v13746_v46  ;;  %v10293_v18 = vld [vmem:[#allocation10 + $0x300] ss:$8 sps:$4 sm:$0xff]   ;;  %v7278_v30 = vmul.f32 %v7150_v53, %v6254_v60  ;;  %v6454_v42 = vmul.f32 %v13911_v58, %v13911_v58 }
 0x658   : > { %v13929_v29 = vpop.f32.mrf.mxu1  ;;  %v13931_v14 = vpop.f32.mrf.mxu0  ;;  %v13934_v16 = vadd.f32 %v13678_v1, %v5786_v50  ;;  %v7286_v4 = vmul.f32 %v7158_v22, %v6262_v20  ;;  %v7157_v33 = vadd.f32 1.0, %v13776_v52  ;;  %v6942_v61 = vmul.f32 0.7978846, %v6814_v28 }
 0x659   : > { %16159 = vst [vmem:[#allocation71_spill] sm:$0xff] %v13929_v29  ;;  %v6949_v62 = vmul.f32 0.7978846, %v6821_v40  ;;  %v13939_v38 = vrot.slane %v10896_v26, %v4001_v7  ;;  %9768 = vmatpush1.bf16.msra.mxu1 %v10293_v18  ;;  %v13945_v54 = vpop.eup %10682  ;;  %v6950_v1 = vmul.f32 0.7978846, %v6822_v17  ;;  %v6581_v53 = vmul.f32 %v6453_v0, %v13893_v19  ;;  %v16161_v26 = vld [vmem:[#allocation74_spill] sm:$0xff] }
 0x65a   : > { %v13941_v46 = vpop.f32.mrf.mxu1  ;;  %v13943_v29 = vpop.f32.mrf.mxu0  ;;  %v6335_v52 = vmul.f32 %v13934_v16, %v13934_v16  ;;  %v7382_v28 = vpack.c.bf16 %v7286_v4, %v7278_v30  ;;  %v6957_v40 = vmul.f32 0.7978846, %v6829_v15  ;;  %v7277_v50 = vmul.f32 %v7149_v25, %v16161_v26  ;;  %v10298_v7 = vld [vmem:[#allocation10 + $0x3f4] ss:$8 sps:$4 sm:$0xff]   ;;  %v10296_v30 = vld [vmem:[#allocation10 + $0x3f0] ss:$8 sps:$4 sm:$0xff]  }
 0x65b   : > { %16160 = vst [vmem:[#allocation53_spill] sm:$0xff] %v13941_v46  ;;  %v5788_v60 = vadd.f32 %v13680_v12, %v13939_v38  ;;  %v7285_v20 = vmul.f32 %v7157_v33, %v13721_v2  ;;  %v6830_v17 = vadd.f32 %v6702_v35, %v13869_v51  ;;  %v5790_v15 = vadd.f32 %v13689_v8, %v13903_v24  ;;  %v14041_v46 = vld [vmem:[#allocation10 + $0x3d4] ss:$8 sps:$4 sm:$0xff]  }
 0x65c   : > { %v13954_v22 = vpop.f32.mrf.mxu1  ;;  %v13956_v18 = vpop.f32.mrf.mxu0  ;;  %v6463_v0 = vmul.f32 %v6335_v52, %v13934_v16  ;;  %8374 = vmatprep.mubr.bf16.mxu1 %v7382_v28  ;;  %v5792_v12 = vadd.f32 %v13707_v10, %v13939_v38  ;;  %v6582_v25 = vmul.f32 %v6454_v42, %v13911_v58  ;;  %v5796_v4 = vadd.f32 %v13729_v36, %v13903_v24 }
 0x65d   : > { %16162 = vst [vmem:[#allocation59_spill] sm:$0xff] %v13954_v22  ;;  %16163 = vst [vmem:[#allocation55_spill] sm:$0xff] %v13956_v18  ;;  %v13966_v2 = vadd.f32 %v13687_v23, %v5788_v60  ;;  %v7381_v33 = vpack.c.bf16 %v7285_v20, %v7277_v50  ;;  %9753 = vmatprep.subr.bf16.mxu1 %v10298_v7  ;;  %10690 = vtanh.f32 %v6942_v61  ;;  %v6709_v8 = vmul.f32 0.044715, %v6581_v53  ;;  %v16166_v60 = vld [vmem:[#allocation47_spill] sm:$0xff]  ;;  %v16169_v20 = vld [vmem:[#allocation34_spill] sm:$0xff] }
 0x65e   : > { %v13970_v35 = vpop.f32.mrf.mxu1  ;;  %v13972_v52 = vpop.f32.mrf.mxu0  ;;  %v6591_v28 = vmul.f32 0.044715, %v6463_v0  ;;  %v13975_v10 = vadd.f32 %v13705_v39, %v5790_v15  ;;  %9769 = vmatpush2.bf16.msra.mxu1 %v10296_v30  ;;  %v13980_v23 = vmul.f32 0.5, %v13703_v9  ;;  %10692 = vtanh.f32 %v6949_v62  ;;  %16181 = vst [vmem:[#allocation32_spill] sm:$0xff] %v14041_v46 }
 0x65f   : > { %16164 = vst [vmem:[#allocation62_spill] sm:$0xff] %v13970_v35  ;;  %16165 = vst [vmem:[#allocation54_spill] sm:$0xff] %v13972_v52  ;;  %v13977_v42 = vpop.eup %10684  ;;  %v6336_v36 = vmul.f32 %v13966_v2, %v13966_v2  ;;  %8375 = vmatmul.mubr.bf16.gmra.mxu1 %v7381_v33  ;;  %v13985_v26 = vadd.f32 %v16166_v60, %v5792_v12  ;;  %10694 = vtanh.f32 %v6950_v1  ;;  %v6958_v50 = vmul.f32 0.7978846, %v6830_v17  ;;  %v16172_v60 = vld [vmem:[#allocation73_spill] sm:$0xff] }
 0x660   : > { %v13987_v61 = vpop.f32.mrf.mxu1  ;;  %v13989_v53 = vpop.f32.mrf.mxu0  ;;  %v6343_v9 = vmul.f32 %v13975_v10, %v13975_v10  ;;  %v13996_v62 = vadd.f32 %v16169_v20, %v5796_v4  ;;  %v14001_v0 = vmul.f32 0.5, %v13715_v48  ;;  %10696 = vtanh.f32 %v6957_v40 }
 0x661   : > { %16167 = vst [vmem:[#allocation67_spill] sm:$0xff] %v13987_v61  ;;  %16168 = vst [vmem:[#allocation52_spill] sm:$0xff] %v13989_v53  ;;  %v13991_v39 = vpop.eup %10686  ;;  %v6710_v15 = vmul.f32 0.044715, %v6582_v25  ;;  %v6719_v12 = vadd.f32 %v6591_v28, %v13934_v16  ;;  %v6837_v1 = vadd.f32 %v6709_v8, %v13893_v19  ;;  %v6464_v17 = vmul.f32 %v6336_v36, %v13966_v2  ;;  %v14012_v61 = vld [vmem:[#allocation10 + $0x3e4] ss:$8 sps:$4 sm:$0xff]  }
 0x662   : > { %v13998_v7 = vpop.eup %10688  ;;  %v14004_v30 = vpop.f32.mrf.mxu1  ;;  %v6270_v4 = vmul.f32 0.5, %v16172_v60  ;;  %v7166_v20 = vadd.f32 1.0, %v13850_v59  ;;  %16173 = vst [vmem:[#allocation56_spill] sm:$0xff] %v14012_v61  ;;  %v6471_v48 = vmul.f32 %v6343_v9, %v13975_v10  ;;  %v6344_v40 = vmul.f32 %v13985_v26, %v13985_v26  ;;  %v16174_v25 = vld [vmem:[#allocation75_spill] sm:$0xff]  ;;  %v16177_v9 = vld [vmem:[#allocation38_spill] sm:$0xff]  ;;  %9754 = vmatprep.subr.bf16.mxu1 %v14012_v61 }
 0x663   : > { %16170 = vst [vmem:[#allocation61_spill] sm:$0xff] %v14004_v30  ;;  %v14006_v33 = vpop.f32.mrf.mxu0  ;;  %v6278_v28 = vmul.f32 0.5, %v16174_v25  ;;  %v7174_v30 = vadd.f32 1.0, %v13906_v27  ;;  %v10299_v36 = vld [vmem:[#allocation10 + $0x3e0] ss:$8 sps:$4 sm:$0xff]   ;;  %v14024_v60 = vmul.f32 0.5, %v13811_v55  ;;  %10698 = vtanh.f32 %v6958_v50 }
 0x664   : > { %16171 = vst [vmem:[#allocation69_spill] sm:$0xff] %v14006_v33  ;;  %v14019_v33 = vpop.f32.mrf.mxu1  ;;  %v6351_v59 = vmul.f32 %v13996_v62, %v13996_v62  ;;  %v5798_v53 = vadd.f32 %v16177_v9, %v13939_v38  ;;  %v6838_v25 = vadd.f32 %v6710_v15, %v13911_v58  ;;  %v6847_v27 = vmul.f32 0.7978846, %v6719_v12  ;;  %9770 = vmatpush2.bf16.msra.mxu1 %v10299_v36  ;;  %v16180_v50 = vld [vmem:[#allocation36_spill] sm:$0xff]  ;;  %v16186_v36 = vld [vmem:[#allocation31_spill] sm:$0xff] }
 0x665   : > { %16175 = vst [vmem:[#allocation64_spill] sm:$0xff] %v14019_v33  ;;  %v14021_v8 = vpop.f32.mrf.mxu0  ;;  %v7294_v35 = vmul.f32 %v7166_v20, %v6270_v4  ;;  %v7302_v33 = vmul.f32 %v7174_v30, %v6278_v28  ;;  %v6592_v55 = vmul.f32 0.044715, %v6464_v17  ;;  %v7165_v22 = vadd.f32 1.0, %v13807_v34  ;;  %v14048_v28 = vld [vmem:[#allocation10 + $0x3d0] ss:$8 sps:$4 sm:$0xff]   ;;  %9755 = vmatprep.subr.bf16.mxu1 %v14041_v46 }
 0x666   : > { %16176 = vst [vmem:[#allocation30_spill] sm:$0xff] %v14021_v8  ;;  %v14032_v52 = vpop.f32.mrf.mxu1  ;;  %v14037_v18 = vadd.f32 %v16180_v50, %v5798_v53  ;;  %v7173_v9 = vadd.f32 1.0, %v13865_v37  ;;  %v6965_v61 = vmul.f32 0.7978846, %v6837_v1  ;;  %v6599_v15 = vmul.f32 0.044715, %v6471_v48 }
 0x667   : > { %16178 = vst [vmem:[#allocation35_spill] sm:$0xff] %v14032_v52  ;;  %v14034_v8 = vpop.f32.mrf.mxu0  ;;  %v6472_v12 = vmul.f32 %v6344_v40, %v13985_v26  ;;  %v7390_v30 = vpack.c.bf16 %v7302_v33, %v7294_v35  ;;  %16184 = vst [vmem:[#allocation42_spill] sm:$0xff] %v14048_v28  ;;  %v6479_v53 = vmul.f32 %v6351_v59, %v13996_v62  ;;  %v16185_v17 = vld [vmem:[#allocation76_spill] sm:$0xff]  ;;  %v14055_v1 = vld [vmem:[#allocation10 + $0x3c4] ss:$8 sps:$4 sm:$0xff]   ;;  %v14059_v35 = vmul.f32 0.5, %v13832_v11 }
 0x668   : > { %16179 = vst [vmem:[#allocation39_spill] sm:$0xff] %v14034_v8  ;;  %v14044_v4 = vpop.f32.mrf.mxu1  ;;  %v6352_v34 = vmul.f32 %v14037_v18, %v14037_v18  ;;  %v7293_v37 = vmul.f32 %v7165_v22, %v16185_v17  ;;  %v7301_v50 = vmul.f32 %v7173_v9, %v16186_v36  ;;  %16187 = vst [vmem:[#allocation77_spill] sm:$0xff] %v14055_v1  ;;  %v6966_v33 = vmul.f32 0.7978846, %v6838_v25  ;;  %v16188_v48 = vld [vmem:[#allocation49_spill] sm:$0xff] }
 0x669   : > { %16182 = vst [vmem:[#allocation37_spill] sm:$0xff] %v14044_v4  ;;  %v14046_v20 = vpop.f32.mrf.mxu0  ;;  %10700 = vtanh.f32 %v6847_v27  ;;  %8384 = vmatprep.mubr.bf16.mxu1 %v7390_v30  ;;  %v5800_v40 = vadd.f32 %v16188_v48, %v13903_v24  ;;  %9771 = vmatpush2.bf16.msra.mxu1 %v14048_v28  ;;  %v6720_v22 = vadd.f32 %v6592_v55, %v13966_v2  ;;  %v16191_v11 = vld [vmem:[#allocation45_spill] sm:$0xff]  ;;  %v6600_v30 = vmul.f32 0.044715, %v6472_v12  ;;  %v16192_v48 = vld [vmem:[#allocation68_spill] sm:$0xff] }
 0x66a   : > { %16183 = vst [vmem:[#allocation78_spill] sm:$0xff] %v14046_v20  ;;  %v14063_v59 = vpop.f32.mrf.mxu1  ;;  %v6480_v9 = vmul.f32 %v6352_v34, %v14037_v18  ;;  %v7389_v17 = vpack.c.bf16 %v7301_v50, %v7293_v37  ;;  %v5802_v36 = vadd.f32 %v16191_v11, %v13939_v38  ;;  %9756 = vmatprep.subr.bf16.mxu1 %v14055_v1  ;;  %v14073_v25 = vpop.eup %10690  ;;  %v14083_v34 = vld [vmem:[#allocation10 + $0x3c0] ss:$8 sps:$4 sm:$0xff]   ;;  %10702 = vtanh.f32 %v6965_v61 }
 0x66b   : > { %16189 = vst [vmem:[#allocation33_spill] sm:$0xff] %v14063_v59  ;;  %v14065_v4 = vpop.f32.mrf.mxu0  ;;  %v6727_v27 = vadd.f32 %v6599_v15, %v13975_v10  ;;  %v14077_v46 = vadd.f32 %v16192_v48, %v5800_v40  ;;  %v5806_v28 = vadd.f32 %v13784_v41, %v13903_v24  ;;  %16194 = vst [vmem:[#allocation29_spill] sm:$0xff] %v14083_v34  ;;  %v14085_v37 = vpop.eup %10692  ;;  %v6607_v50 = vmul.f32 0.044715, %v6479_v53  ;;  %v16195_v11 = vld [vmem:[#allocation51_spill] sm:$0xff] }
 0x66c   : > { %16190 = vst [vmem:[#allocation70_spill] sm:$0xff] %v14065_v4  ;;  %8385 = vmatmul.mubr.bf16.gmra.mxu1 %v7389_v17  ;;  %v14088_v1 = vadd.f32 %v16195_v11, %v5802_v36  ;;  %v6286_v15 = vmul.f32 0.5, %v13695_v47  ;;  %v14091_v12 = vpop.f32.mrf.mxu1  ;;  %v14093_v40 = vld [vmem:[#allocation10 + $0x3b4] ss:$8 sps:$4 sm:$0xff]   ;;  %v14095_v48 = vpop.eup %10694  ;;  %v6608_v41 = vmul.f32 0.044715, %v6480_v9  ;;  %10704 = vtanh.f32 %v6966_v33 }
 0x66d   : > { %v14081_v55 = vpop.f32.mrf.mxu0  ;;  %16196 = vst [vmem:[#allocation79_spill] sm:$0xff] %v14091_v12  ;;  %16197 = vst [vmem:[#allocation50_spill] sm:$0xff] %v14093_v40  ;;  %v14100_v59 = vadd.f32 %v13790_v5, %v5806_v28  ;;  %v7182_v61 = vadd.f32 1.0, %v13945_v54  ;;  %9772 = vmatpush2.bf16.msra.mxu1 %v14083_v34  ;;  %v14106_v47 = vpop.eup %10696  ;;  %v6294_v36 = vmul.f32 0.5, %v13712_v44  ;;  %v7190_v9 = vadd.f32 1.0, %v13991_v39  ;;  %v16199_v11 = vld [vmem:[#allocation26_spill] sm:$0xff] }
 0x66e   : > { %16193 = vst [vmem:[#allocation57_spill] sm:$0xff] %v14081_v55  ;;  %v6359_v55 = vmul.f32 %v14077_v46, %v14077_v46  ;;  %v6360_v17 = vmul.f32 %v14088_v1, %v14088_v1  ;;  %v5808_v12 = vadd.f32 %v16199_v11, %v13939_v38  ;;  %9757 = vmatprep.subr.bf16.mxu1 %v14093_v40  ;;  %v6848_v5 = vmul.f32 0.7978846, %v6720_v22  ;;  %v14120_v4 = vld [vmem:[#allocation10 + $0x3b0] ss:$8 sps:$4 sm:$0xff]   ;;  %v14126_v11 = vpop.f32.mrf.mxu1 }
 0x66f   : > { %v14103_v53 = vpop.f32.mrf.mxu0  ;;  %v6855_v54 = vmul.f32 0.7978846, %v6727_v27  ;;  %v6367_v34 = vmul.f32 %v14100_v59, %v14100_v59  ;;  %16201 = vst [vmem:[#allocation74_spill] sm:$0xff] %v14120_v4  ;;  %v6728_v44 = vadd.f32 %v6600_v30, %v13985_v26  ;;  %v7310_v20 = vmul.f32 %v7182_v61, %v6286_v15  ;;  %v14128_v22 = vld [vmem:[#allocation10 + $0x3a4] ss:$8 sps:$4 sm:$0xff]  }
 0x670   : > { %16198 = vst [vmem:[#allocation44_spill] sm:$0xff] %v14103_v53  ;;  %v6487_v28 = vmul.f32 %v6359_v55, %v14077_v46  ;;  %v7318_v39 = vmul.f32 %v7190_v9, %v6294_v36  ;;  %v14124_v8 = vadd.f32 %v13803_v63, %v5808_v12  ;;  %16202 = vst [vmem:[#allocation47_spill] sm:$0xff] %v14128_v22  ;;  %v14130_v27 = vpop.eup %10698  ;;  %v7189_v52 = vadd.f32 1.0, %v13977_v42  ;;  %v14149_v61 = vld [vmem:[#allocation10 + $0x3a0] ss:$8 sps:$4 sm:$0xff]   ;;  %v14155_v9 = vpop.f32.mrf.mxu1 }
 0x671   : > { %v14118_v53 = vpop.f32.mrf.mxu0  ;;  %v6735_v55 = vadd.f32 %v6607_v50, %v13996_v62  ;;  %v6736_v40 = vadd.f32 %v6608_v41, %v14037_v18  ;;  %9773 = vmatpush2.bf16.msra.mxu1 %v14120_v4  ;;  %v14140_v63 = vmul.f32 0.5, %v13893_v19  ;;  %v6488_v15 = vmul.f32 %v6360_v17, %v14088_v1  ;;  %16203 = vst [vmem:[#allocation34_spill] sm:$0xff] %v14149_v61 }
 0x672   : > { %16200 = vst [vmem:[#allocation43_spill] sm:$0xff] %v14118_v53  ;;  %v7181_v53 = vadd.f32 1.0, %v13924_v6  ;;  %v7398_v12 = vpack.c.bf16 %v7318_v39, %v7310_v20  ;;  %9758 = vmatprep.subr.bf16.mxu1 %v14128_v22  ;;  %10706 = vtanh.f32 %v6855_v54  ;;  %v6615_v50 = vmul.f32 0.044715, %v6487_v28  ;;  %v16204_v20 = vld [vmem:[#allocation58_spill] sm:$0xff] }
 0x673   : > { %v14136_v30 = vpop.f32.mrf.mxu0  ;;  %v6495_v41 = vmul.f32 %v6367_v34, %v14100_v59  ;;  %v6368_v6 = vmul.f32 %v14124_v8, %v14124_v8  ;;  %v6856_v36 = vmul.f32 0.7978846, %v6728_v44  ;;  %v7317_v33 = vmul.f32 %v7189_v52, %v13980_v23  ;;  %v14157_v54 = vld [vmem:[#allocation10 + $0x394] ss:$8 sps:$4 sm:$0xff]  }
 0x674   : > { %8394 = vmatprep.mubr.bf16.mxu1 %v7398_v12  ;;  %v7309_v19 = vmul.f32 %v7181_v53, %v13888_v3  ;;  %v5810_v17 = vadd.f32 %v16204_v20, %v13903_v24  ;;  %16205 = vst [vmem:[#allocation73_spill] sm:$0xff] %v14157_v54  ;;  %10708 = vtanh.f32 %v6848_v5  ;;  %v6863_v34 = vmul.f32 0.7978846, %v6735_v55  ;;  %v16207_v23 = vld [vmem:[#allocation40_spill] sm:$0xff]  ;;  %v16208_v55 = vld [vmem:[#allocation63_spill] sm:$0xff] }
 0x675   : > { %v14147_v42 = vpop.f32.mrf.mxu0  ;;  %v6864_v28 = vmul.f32 0.7978846, %v6736_v40  ;;  %v5812_v39 = vadd.f32 %v13825_v45, %v13939_v38  ;;  %9774 = vmatpush2.bf16.msra.mxu1 %v14149_v61  ;;  %v6616_v53 = vmul.f32 0.044715, %v6488_v15  ;;  %v5816_v12 = vadd.f32 %v13838_v57, %v13903_v24  ;;  %v14177_v15 = vld [vmem:[#allocation10 + $0x390] ss:$8 sps:$4 sm:$0xff]  }
 0x676   : > { %v10701_v3 = vpop.eup %10700  ;;  %v7397_v52 = vpack.c.bf16 %v7317_v33, %v7309_v19  ;;  %v14165_v44 = vadd.f32 %v16207_v23, %v5810_v17  ;;  %9759 = vmatprep.subr.bf16.mxu1 %v14157_v54  ;;  %v6743_v40 = vadd.f32 %v6615_v50, %v14077_v46  ;;  %v6623_v5 = vmul.f32 0.044715, %v6495_v41  ;;  %16210 = vst [vmem:[#allocation36_spill] sm:$0xff] %v14177_v15  ;;  %v14186_v50 = vpop.f32.mrf.mxu1 }
 0x677   : > { %v14161_v22 = vpop.f32.mrf.mxu0  ;;  %v6496_v45 = vmul.f32 %v6368_v6, %v14124_v8  ;;  %v14173_v20 = vadd.f32 %v16208_v55, %v5812_v39  ;;  %v6207_v19 = vmul.f32 0.5, %v13934_v16  ;;  %v14181_v33 = vmul.f32 0.5, %v13975_v10  ;;  %v14188_v41 = vpop.eup %10702 }
 0x678   : > { %16206 = vst [vmem:[#allocation75_spill] sm:$0xff] %v14161_v22  ;;  %10710 = vtanh.f32 %v6856_v36  ;;  %v14184_v57 = vmul.f32 0.5, %v13996_v62  ;;  %8395 = vmatmul.mubr.bf16.gmra.mxu1 %v7397_v52  ;;  %v7103_v6 = vadd.f32 1.0, %v10701_v3  ;;  %v6375_v17 = vmul.f32 %v14165_v44, %v14165_v44  ;;  %v16212_v36 = vld [vmem:[#allocation60_spill] sm:$0xff] }
 0x679   : > { %v14175_v61 = vpop.f32.mrf.mxu0  ;;  %10712 = vtanh.f32 %v6863_v34  ;;  %v6376_v16 = vmul.f32 %v14173_v20, %v14173_v20  ;;  %9775 = vmatpush2.bf16.msra.mxu1 %v14177_v15  ;;  %v14198_v10 = vmul.f32 0.5, %v14077_v46  ;;  %v14201_v62 = vmul.f32 0.5, %v14100_v59  ;;  %v14206_v34 = vld [vmem:[#allocation10 + $0x384] ss:$8 sps:$4 sm:$0xff]  }
 0x67a   : > { %16209 = vst [vmem:[#allocation38_spill] sm:$0xff] %v14175_v61  ;;  %10714 = vtanh.f32 %v6864_v28  ;;  %v14204_v3 = vadd.f32 %v16212_v36, %v5816_v12  ;;  %16213 = vst [vmem:[#allocation31_spill] sm:$0xff] %v14206_v34  ;;  %v6871_v52 = vmul.f32 0.7978846, %v6743_v40  ;;  %v6744_v23 = vadd.f32 %v6616_v53, %v14088_v1  ;;  %v14212_v28 = vld [vmem:[#allocation10 + $0x380] ss:$8 sps:$4 sm:$0xff]   ;;  %v14218_v36 = vpop.f32.mrf.mxu1  ;;  %9760 = vmatprep.subr.bf16.mxu1 %v14206_v34 }
 0x67b   : > { %v14194_v39 = vpop.f32.mrf.mxu0  ;;  %v6751_v55 = vadd.f32 %v6623_v5, %v14100_v59  ;;  %v6624_v54 = vmul.f32 0.044715, %v6496_v45  ;;  %16215 = vst [vmem:[#allocation45_spill] sm:$0xff] %v14212_v28  ;;  %v6302_v46 = vmul.f32 0.5, %v13787_v31  ;;  %v6310_v15 = vmul.f32 0.5, %v13814_v21  ;;  %v16216_v5 = vld [vmem:[#allocation65_spill] sm:$0xff] }
 0x67c   : > { %16211 = vst [vmem:[#allocation76_spill] sm:$0xff] %v14194_v39  ;;  %v7198_v39 = vadd.f32 1.0, %v14073_v25  ;;  %v7206_v12 = vadd.f32 1.0, %v14095_v48  ;;  %v14221_v53 = vmul.f32 %v7103_v6, %v6207_v19  ;;  %v6503_v59 = vmul.f32 %v6375_v17, %v14165_v44  ;;  %v10705_v19 = vpop.eup %10704 }
 0x67d   : > { %v14210_v4 = vpop.f32.mrf.mxu0  ;;  %v6504_v40 = vmul.f32 %v6376_v16, %v14173_v20  ;;  %v5818_v45 = vadd.f32 %v16216_v5, %v13939_v38  ;;  %9776 = vmatpush2.bf16.msra.mxu1 %v14212_v28  ;;  %v6383_v21 = vmul.f32 %v14204_v3, %v14204_v3  ;;  %v7197_v34 = vadd.f32 1.0, %v13998_v7  ;;  %v16219_v28 = vld [vmem:[#allocation41_spill] sm:$0xff] }
 0x67e   : > { %16214 = vst [vmem:[#allocation49_spill] sm:$0xff] %v14210_v4  ;;  %v7326_v25 = vmul.f32 %v7198_v39, %v6302_v46  ;;  %v7334_v48 = vmul.f32 %v7206_v12, %v6310_v15  ;;  %10716 = vtanh.f32 %v6871_v52  ;;  %v6872_v6 = vmul.f32 0.7978846, %v6744_v23  ;;  %v16220_v39 = vld [vmem:[#allocation46_spill] sm:$0xff]  ;;  %v14242_v46 = vpop.f32.mrf.mxu1 }
 0x67f   : > { %v14227_v31 = vpop.f32.mrf.mxu0  ;;  %v6879_v17 = vmul.f32 0.7978846, %v6751_v55  ;;  %v7205_v16 = vadd.f32 1.0, %v14085_v37  ;;  %v10707_v5 = vpop.eup %10706  ;;  %v14238_v22 = vadd.f32 %v16219_v28, %v5818_v45  ;;  %v5820_v15 = vadd.f32 %v16220_v39, %v13903_v24 }
 0x680   : > { %16217 = vst [vmem:[#allocation68_spill] sm:$0xff] %v14227_v31  ;;  %v6752_v31 = vadd.f32 %v6624_v54, %v14124_v8  ;;  %v7406_v61 = vpack.c.bf16 %v7334_v48, %v7326_v25  ;;  %v6631_v7 = vmul.f32 0.044715, %v6503_v59  ;;  %v6632_v52 = vmul.f32 0.044715, %v6504_v40 }
 0x681   : > { %v14234_v4 = vpop.f32.mrf.mxu0  ;;  %v7325_v23 = vmul.f32 %v7197_v34, %v14001_v0  ;;  %v7333_v37 = vmul.f32 %v7205_v16, %v14024_v60  ;;  %v14248_v12 = vpop.eup %10708  ;;  %v6511_v54 = vmul.f32 %v6383_v21, %v14204_v3  ;;  %v14252_v28 = vadd.f32 %v13871_v13, %v5820_v15 }
 0x682   : > { %16218 = vst [vmem:[#allocation51_spill] sm:$0xff] %v14234_v4  ;;  %8404 = vmatprep.mubr.bf16.mxu1 %v7406_v61  ;;  %v5822_v45 = vadd.f32 %v13873_v56, %v13939_v38  ;;  %v5826_v59 = vadd.f32 %v13885_v32, %v13903_v24  ;;  %v7111_v40 = vadd.f32 1.0, %v10707_v5  ;;  %10718 = vtanh.f32 %v6872_v6  ;;  %v14273_v32 = vpop.f32.mrf.mxu1 }
 0x683   : > { %v14246_v55 = vpop.f32.mrf.mxu0  ;;  %v14259_v0 = vmul.f32 0.5, %v14165_v44  ;;  %v7405_v60 = vpack.c.bf16 %v7333_v37, %v7325_v23  ;;  %v6384_v61 = vmul.f32 %v14238_v22, %v14238_v22  ;;  %v6391_v13 = vmul.f32 %v14252_v28, %v14252_v28 }
 0x684   : > { %16221 = vst [vmem:[#allocation26_spill] sm:$0xff] %v14246_v55  ;;  %v14268_v21 = vadd.f32 %v13883_v49, %v5822_v45  ;;  %v14271_v56 = vadd.f32 %v13895_v43, %v5826_v59  ;;  %10720 = vtanh.f32 %v6879_v17  ;;  %v6880_v48 = vmul.f32 0.7978846, %v6752_v31 }
 0x685   : > { %v14261_v34 = vpop.f32.mrf.mxu0  ;;  %v14275_v25 = vpop.eup %10710  ;;  %v6759_v6 = vadd.f32 %v6631_v7, %v14165_v44  ;;  %v6760_v16 = vadd.f32 %v6632_v52, %v14173_v20  ;;  %8405 = vmatmul.mubr.bf16.gmra.mxu1 %v7405_v60  ;;  %v6639_v49 = vmul.f32 0.044715, %v6511_v54  ;;  %v6318_v23 = vmul.f32 0.5, %v13869_v51  ;;  %v16224_v52 = vld [vmem:[#allocation48_spill] sm:$0xff] }
 0x686   : > { %16222 = vst [vmem:[#allocation58_spill] sm:$0xff] %v14261_v34  ;;  %v14281_v39 = vpop.eup %10712  ;;  %v6392_v43 = vmul.f32 %v14268_v21, %v14268_v21  ;;  %v6399_v15 = vmul.f32 %v14271_v56, %v14271_v56  ;;  %v6326_v44 = vmul.f32 0.5, %v13911_v58  ;;  %v7214_v31 = vadd.f32 1.0, %v14130_v27  ;;  %v16226_v34 = vld [vmem:[#allocation72_spill] sm:$0xff] }
 0x687   : > { %v14279_v5 = vpop.f32.mrf.mxu0  ;;  %v14288_v17 = vpop.eup %10714  ;;  %v7222_v7 = vadd.f32 1.0, %v10705_v19  ;;  %v5828_v37 = vadd.f32 %v16224_v52, %v13939_v38  ;;  %v14297_v54 = vmul.f32 %v7111_v40, %v14181_v33  ;;  %v6512_v59 = vmul.f32 %v6384_v61, %v14238_v22 }
 0x688   : > { %16223 = vst [vmem:[#allocation40_spill] sm:$0xff] %v14279_v5  ;;  %v6519_v60 = vmul.f32 %v6391_v13, %v14252_v28  ;;  %v7213_v51 = vadd.f32 1.0, %v14106_v47  ;;  %v14302_v5 = vpop.f32.mrf.mxu1  ;;  %v6520_v58 = vmul.f32 %v6392_v43, %v14268_v21  ;;  %v7342_v27 = vmul.f32 %v7214_v31, %v6318_v23 }
 0x689   : > { %v14294_v45 = vpop.f32.mrf.mxu0  ;;  %v7350_v19 = vmul.f32 %v7222_v7, %v6326_v44  ;;  %v14306_v55 = vadd.f32 %v16226_v34, %v5828_v37  ;;  %10722 = vtanh.f32 %v6880_v48  ;;  %v6887_v52 = vmul.f32 0.7978846, %v6759_v6 }
 0x68a   : > { %16225 = vst [vmem:[#allocation63_spill] sm:$0xff] %v14294_v45  ;;  %v6527_v33 = vmul.f32 %v6399_v15, %v14271_v56  ;;  %v7221_v40 = vadd.f32 1.0, %v14188_v41  ;;  %v6888_v61 = vmul.f32 0.7978846, %v6760_v16  ;;  %v6767_v13 = vadd.f32 %v6639_v49, %v14204_v3  ;;  %v14319_v15 = vpop.f32.mrf.mxu1  ;;  %v16228_v16 = vld [vmem:[#allocation66_spill] sm:$0xff] }
 0x68b   : > { %v7414_v45 = vpack.c.bf16 %v7350_v19, %v7342_v27  ;;  %v6400_v47 = vmul.f32 %v14306_v55, %v14306_v55  ;;  %v14313_v4 = vpop.f32.mrf.mxu0  ;;  %v14315_v43 = vpop.eup %10716  ;;  %v6640_v23 = vmul.f32 0.044715, %v6512_v59  ;;  %v6647_v34 = vmul.f32 0.044715, %v6519_v60  ;;  %v16229_v59 = vld [vmem:[#allocation71_spill] sm:$0xff] }
 0x68c   : > { %16227 = vst [vmem:[#allocation60_spill] sm:$0xff] %v14313_v4  ;;  %v7341_v48 = vmul.f32 %v7213_v51, %v14059_v35  ;;  %v7349_v6 = vmul.f32 %v7221_v40, %v14140_v63  ;;  %v6648_v41 = vmul.f32 0.044715, %v6520_v58  ;;  %v5830_v49 = vadd.f32 %v16228_v16, %v13903_v24  ;;  %v16231_v58 = vld [vmem:[#allocation59_spill] sm:$0xff] }
 0x68d   : > { %8414 = vmatprep.mubr.bf16.mxu1 %v7414_v45  ;;  %v5832_v44 = vadd.f32 %v13931_v14, %v13939_v38  ;;  %v5836_v31 = vadd.f32 %v13943_v29, %v13903_v24  ;;  %v7359_v7 = vpack.c.bf16 %v14297_v54, %v14221_v53  ;;  %10724 = vtanh.f32 %v6887_v52  ;;  %v16230_v45 = vld [vmem:[#allocation53_spill] sm:$0xff]  ;;  %v14339_v14 = vpop.f32.mrf.mxu0  ;;  %v14345_v52 = vpop.f32.mrf.mxu1 }
 0x68e   : > { %v6655_v35 = vmul.f32 0.044715, %v6527_v33  ;;  %v7413_v37 = vpack.c.bf16 %v7349_v6, %v7341_v48  ;;  %v6528_v63 = vmul.f32 %v6400_v47, %v14306_v55  ;;  %v14331_v60 = vadd.f32 %v16229_v59, %v5830_v49  ;;  %16232 = vst [vmem:[#allocation65_spill] sm:$0xff] %v14339_v14  ;;  %16233 = vst [vmem:[#allocation41_spill] sm:$0xff] %v14345_v52  ;;  %v16234_v49 = vld [vmem:[#allocation55_spill] sm:$0xff] }
 0x68f   : > { %v14334_v51 = vadd.f32 %v16230_v45, %v5832_v44  ;;  %v14337_v27 = vadd.f32 %v16231_v58, %v5836_v31  ;;  %v14341_v29 = vpop.eup %10718  ;;  %10726 = vtanh.f32 %v6888_v61  ;;  %v6895_v53 = vmul.f32 0.7978846, %v6767_v13  ;;  %v14364_v44 = vpop.f32.mrf.mxu0  ;;  %v16236_v45 = vld [vmem:[#allocation54_spill] sm:$0xff] }
 0x690   : > { %v6768_v54 = vadd.f32 %v6640_v23, %v14238_v22  ;;  %8415 = vmatmul.mubr.bf16.gmra.mxu1 %v7413_v37  ;;  %v7104_v19 = vadd.f32 1.0, %v14248_v12  ;;  %v6775_v33 = vadd.f32 %v6647_v34, %v14252_v28  ;;  %v6776_v40 = vadd.f32 %v6648_v41, %v14268_v21  ;;  %16235 = vst [vmem:[#allocation46_spill] sm:$0xff] %v14364_v44 }
 0x691   : > { %v6407_v47 = vmul.f32 %v14331_v60, %v14331_v60  ;;  %v6208_v48 = vmul.f32 0.5, %v13966_v2  ;;  %v14352_v6 = vpop.eup %10720  ;;  %v6408_v61 = vmul.f32 %v14334_v51, %v14334_v51  ;;  %v6415_v13 = vmul.f32 %v14337_v27, %v14337_v27 }
 0x692   : > { %v6216_v12 = vmul.f32 0.5, %v13985_v26  ;;  %v7112_v23 = vadd.f32 1.0, %v14275_v25  ;;  %v6783_v34 = vadd.f32 %v6655_v35, %v14271_v56  ;;  %v6656_v41 = vmul.f32 0.044715, %v6528_v63  ;;  %v14369_v26 = vpop.f32.mrf.mxu1  ;;  %v16237_v63 = vld [vmem:[#allocation62_spill] sm:$0xff] }
 0x693   : > { %v6535_v16 = vmul.f32 %v6407_v47, %v14331_v60  ;;  %v5838_v2 = vadd.f32 %v16234_v49, %v13939_v38  ;;  %v6536_v31 = vmul.f32 %v6408_v61, %v14334_v51  ;;  %v7232_v37 = vmul.f32 %v7104_v19, %v6208_v48  ;;  %v16238_v47 = vld [vmem:[#allocation52_spill] sm:$0xff]  ;;  %v16239_v61 = vld [vmem:[#allocation67_spill] sm:$0xff] }
 0x694   : > { %v7240_v59 = vmul.f32 %v7112_v23, %v6216_v12  ;;  %v5840_v58 = vadd.f32 %v16236_v45, %v13903_v24  ;;  %v6896_v25 = vmul.f32 0.7978846, %v6768_v54  ;;  %v6543_v35 = vmul.f32 %v6415_v13, %v14337_v27  ;;  %v16240_v23 = vld [vmem:[#allocation61_spill] sm:$0xff] }
 0x695   : > { %v14373_v14 = vadd.f32 %v16237_v63, %v5838_v2  ;;  %v5842_v49 = vadd.f32 %v16238_v47, %v13939_v38  ;;  %v6903_v4 = vmul.f32 0.7978846, %v6775_v33  ;;  %v6904_v44 = vmul.f32 0.7978846, %v6776_v40  ;;  %v16242_v2 = vld [vmem:[#allocation69_spill] sm:$0xff]  ;;  %v14389_v63 = vpop.f32.mrf.mxu0  ;;  %v16245_v47 = vld [vmem:[#allocation64_spill] sm:$0xff] }
 0x696   : > { %v7360_v52 = vpack.c.bf16 %v7240_v59, %v7232_v37  ;;  %v14378_v19 = vadd.f32 %v16239_v61, %v5840_v58  ;;  %v14380_v48 = vpop.eup %10722  ;;  %v6663_v12 = vmul.f32 0.044715, %v6535_v16  ;;  %v5846_v45 = vadd.f32 %v16242_v2, %v13903_v24  ;;  %16243 = vst [vmem:[#allocation72_spill] sm:$0xff] %v14389_v63  ;;  %v14392_v59 = vpop.f32.mrf.mxu1  ;;  %v10900_v63 = vld [vmem:[#allocation10 + $0x354] ss:$8 sps:$4 sm:$0xff]  }
 0x697   : > { %v6416_v54 = vmul.f32 %v14373_v14, %v14373_v14  ;;  %v14385_v13 = vadd.f32 %v16240_v23, %v5842_v49  ;;  %10728 = vtanh.f32 %v6895_v53  ;;  %v6911_v33 = vmul.f32 0.7978846, %v6783_v34  ;;  %16244 = vst [vmem:[#allocation66_spill] sm:$0xff] %v14392_v59  ;;  %v10897_v34 = vld [vmem:[#allocation10 + $0x370] ss:$8 sps:$4 sm:$0xff]  }
 0x698   : > { %v6784_v40 = vadd.f32 %v6656_v41, %v14306_v55  ;;  %v6664_v37 = vmul.f32 0.044715, %v6536_v31  ;;  %8457 = vmatprep.mubr.bf16.mxu0 %v7360_v52  ;;  %10730 = vtanh.f32 %v6896_v25  ;;  %v6671_v16 = vmul.f32 0.044715, %v6543_v35  ;;  %v10898_v25 = vld [vmem:[#allocation10 + $0x364] ss:$8 sps:$4 sm:$0xff]  }
 0x699   : > { %16241 = vst [vmem:[#allocation48_spill] sm:$0xff] %v14385_v13  ;;  %8458 = vmatmul.mubr.bf16.vlgmr.msra.gmra.mxu0 %v7359_v7  ;;  %v6423_v58 = vmul.f32 %v14378_v19, %v14378_v19  ;;  %v14397_v49 = vadd.f32 %v16245_v47, %v5846_v45  ;;  %v14400_v61 = vmul.f32 0.5, %v14204_v3  ;;  %v14403_v53 = vmul.f32 0.5, %v14252_v28  ;;  %v14414_v28 = vpop.f32.mrf.mxu0 }
 0x69a   : > { %10732 = vtanh.f32 %v6903_v4  ;;  %v6544_v52 = vmul.f32 %v6416_v54, %v14373_v14  ;;  %8539 = vmatpush1.bf16.msra.mxu0 %v10897_v34  ;;  %v14406_v41 = vpop.eup %10724  ;;  %v14409_v7 = vmul.f32 0.5, %v14271_v56  ;;  %v6791_v31 = vadd.f32 %v6663_v12, %v14331_v60  ;;  %16246 = vst [vmem:[#allocation71_spill] sm:$0xff] %v14414_v28  ;;  %v10899_v34 = vld [vmem:[#allocation10 + $0x360] ss:$8 sps:$4 sm:$0xff]  }
 0x69b   : > { %10734 = vtanh.f32 %v6904_v44  ;;  %v6424_v3 = vmul.f32 %v14385_v13, %v14385_v13  ;;  %8540 = vmatprep.subr.bf16.mxu0 %v10898_v25  ;;  %v6912_v4 = vmul.f32 0.7978846, %v6784_v40  ;;  %v6792_v35 = vadd.f32 %v6664_v37, %v14334_v51  ;;  %v14419_v44 = vpop.f32.mrf.mxu1  ;;  %v16248_v37 = vld [vmem:[#allocation30_spill] sm:$0xff] }
 0x69c   : > { %10736 = vtanh.f32 %v6911_v33  ;;  %v6431_v54 = vmul.f32 %v14397_v49, %v14397_v49  ;;  %16247 = vst [vmem:[#allocation53_spill] sm:$0xff] %v14419_v44  ;;  %v10727_v56 = vpop.eup %10726  ;;  %v6799_v23 = vadd.f32 %v6671_v16, %v14337_v27  ;;  %v6551_v12 = vmul.f32 %v6423_v58, %v14378_v19 }
 0x69d   : > { %v6224_v2 = vmul.f32 0.5, %v14037_v18  ;;  %v7120_v45 = vadd.f32 1.0, %v14288_v17  ;;  %v6672_v47 = vmul.f32 0.044715, %v6544_v52  ;;  %v6232_v33 = vmul.f32 0.5, %v14088_v1  ;;  %v14434_v17 = vpop.f32.mrf.mxu0 }
 0x69e   : > { %8541 = vmatpush1.bf16.msra.mxu0 %v10899_v34  ;;  %v7128_v40 = vadd.f32 1.0, %v14341_v29  ;;  %v5848_v25 = vadd.f32 %v16248_v37, %v13939_v38  ;;  %v14430_v28 = vmul.f32 0.5, %v14331_v60  ;;  %v6919_v16 = vmul.f32 0.7978846, %v6791_v31  ;;  %16249 = vst [vmem:[#allocation59_spill] sm:$0xff] %v14434_v17  ;;  %v16250_v29 = vld [vmem:[#allocation35_spill] sm:$0xff]  ;;  %v14440_v37 = vpop.f32.mrf.mxu1 }
 0x69f   : > { %v6552_v58 = vmul.f32 %v6424_v3, %v14385_v13  ;;  %v7119_v18 = vadd.f32 1.0, %v14281_v39  ;;  %8542 = vmatprep.subr.bf16.mxu0 %v10900_v63  ;;  %v6559_v52 = vmul.f32 %v6431_v54, %v14397_v49  ;;  %v7248_v1 = vmul.f32 %v7120_v45, %v6224_v2  ;;  %16251 = vst [vmem:[#allocation55_spill] sm:$0xff] %v14440_v37  ;;  %v10901_v2 = vld [vmem:[#allocation10 + $0x350] ss:$8 sps:$4 sm:$0xff]  }
 0x6a0   : > { %v7256_v34 = vmul.f32 %v7128_v40, %v6232_v33  ;;  %v14438_v44 = vadd.f32 %v16250_v29, %v5848_v25  ;;  %10738 = vtanh.f32 %v6912_v4  ;;  %v6920_v60 = vmul.f32 0.7978846, %v6792_v35  ;;  %v16252_v4 = vld [vmem:[#allocation39_spill] sm:$0xff] }
 0x6a1   : > { %v14442_v31 = vmul.f32 0.7978846, %v6799_v23  ;;  %v7127_v3 = vadd.f32 1.0, %v14315_v43  ;;  %v6800_v39 = vadd.f32 %v6672_v47, %v14373_v14  ;;  %v6679_v63 = vmul.f32 0.044715, %v6551_v12  ;;  %v16253_v23 = vld [vmem:[#allocation78_spill] sm:$0xff]  ;;  %v14454_v47 = vpop.f32.mrf.mxu0 }
 0x6a2   : > { %v7368_v59 = vpack.c.bf16 %v7256_v34, %v7248_v1  ;;  %v6432_v54 = vmul.f32 %v14438_v44, %v14438_v44  ;;  %8543 = vmatpush1.bf16.msra.mxu0 %v10901_v2  ;;  %v7247_v45 = vmul.f32 %v7119_v18, %v14184_v57  ;;  %v5850_v35 = vadd.f32 %v16252_v4, %v13903_v24  ;;  %v10902_v43 = vld [vmem:[#allocation10 + $0x344] ss:$8 sps:$4 sm:$0xff]   ;;  %v14459_v18 = vpop.f32.mrf.mxu1  ;;  %v16258_v4 = vld [vmem:[#allocation33_spill] sm:$0xff] }
 0x6a3   : > { %v7255_v33 = vmul.f32 %v7127_v3, %v14198_v10  ;;  %v5852_v40 = vadd.f32 %v16253_v23, %v13939_v38  ;;  %8544 = vmatprep.subr.bf16.mxu0 %v10902_v43  ;;  %16254 = vst [vmem:[#allocation54_spill] sm:$0xff] %v14454_v47  ;;  %v6680_v12 = vmul.f32 0.044715, %v6552_v58  ;;  %v6687_v25 = vmul.f32 0.044715, %v6559_v52  ;;  %v16255_v34 = vld [vmem:[#allocation70_spill] sm:$0xff] }
 0x6a4   : > { %8467 = vmatprep.mubr.bf16.mxu0 %v7368_v59  ;;  %v6560_v1 = vmul.f32 %v6432_v54, %v14438_v44  ;;  %v5856_v57 = vadd.f32 %v16255_v34, %v13903_v24  ;;  %16256 = vst [vmem:[#allocation62_spill] sm:$0xff] %v14459_v18  ;;  %v14461_v10 = vpop.eup %10728  ;;  %10740 = vtanh.f32 %v6919_v16  ;;  %v16257_v3 = vld [vmem:[#allocation37_spill] sm:$0xff]  ;;  %v6807_v59 = vadd.f32 %v6679_v63, %v14378_v19  ;;  %v10903_v52 = vld [vmem:[#allocation10 + $0x340] ss:$8 sps:$4 sm:$0xff]  }
 0x6a5   : > { %v7367_v29 = vpack.c.bf16 %v7255_v33, %v7247_v45  ;;  %v14464_v2 = vadd.f32 %v16257_v3, %v5850_v35  ;;  %v14467_v23 = vadd.f32 %v16258_v4, %v5852_v40  ;;  %v14469_v58 = vpop.eup %10730  ;;  %v16259_v54 = vld [vmem:[#allocation79_spill] sm:$0xff]  ;;  %v6240_v34 = vmul.f32 0.5, %v14124_v8  ;;  %v10904_v3 = vld [vmem:[#allocation10 + $0x334] ss:$8 sps:$4 sm:$0xff]  }
 0x6a6   : > { %8545 = vmatpush1.bf16.msra.mxu0 %v10903_v52  ;;  %v14473_v43 = vadd.f32 %v16259_v54, %v5856_v57  ;;  %v7136_v16 = vadd.f32 1.0, %v14380_v48  ;;  %v6248_v63 = vmul.f32 0.5, %v14173_v20  ;;  %v7144_v40 = vadd.f32 1.0, %v10727_v56  ;;  %v14484_v57 = vpop.f32.mrf.mxu0  ;;  %v14490_v54 = vpop.f32.mrf.mxu1 }
 0x6a7   : > { %v14477_v45 = vpop.eup %10732  ;;  %8468 = vmatmul.mubr.bf16.gmra.mxu0 %v7367_v29  ;;  %v6439_v33 = vmul.f32 %v14464_v2, %v14464_v2  ;;  %v6440_v35 = vmul.f32 %v14467_v23, %v14467_v23  ;;  %8546 = vmatprep.subr.bf16.mxu0 %v10904_v3  ;;  %16260 = vst [vmem:[#allocation52_spill] sm:$0xff] %v14484_v57  ;;  %v6928_v8 = vmul.f32 0.7978846, %v6800_v39  ;;  %v6688_v52 = vmul.f32 0.044715, %v6560_v1  ;;  %v16262_v3 = vld [vmem:[#allocation57_spill] sm:$0xff] }
 0x6a8   : > { %v14486_v4 = vpop.eup %10734  ;;  %v6808_v48 = vadd.f32 %v6680_v12, %v14385_v13  ;;  %v6815_v29 = vadd.f32 %v6687_v25, %v14397_v49  ;;  %16261 = vst [vmem:[#allocation67_spill] sm:$0xff] %v14490_v54  ;;  %v6447_v20 = vmul.f32 %v14473_v43, %v14473_v43  ;;  %v7264_v56 = vmul.f32 %v7136_v16, %v6240_v34  ;;  %v10905_v1 = vld [vmem:[#allocation10 + $0x330] ss:$8 sps:$4 sm:$0xff]   ;;  %v10906_v34 = vld [vmem:[#allocation10 + $0x324] ss:$8 sps:$4 sm:$0xff]   ;;  %v14505_v16 = vpop.f32.mrf.mxu0 }
 0x6a9   : > { %v14492_v47 = vpop.eup %10736  ;;  %v7272_v17 = vmul.f32 %v7144_v40, %v6248_v63  ;;  %v5858_v57 = vadd.f32 %v16262_v3, %v13939_v38  ;;  %v6567_v18 = vmul.f32 %v6439_v33, %v14464_v2  ;;  %v6568_v39 = vmul.f32 %v6440_v35, %v14467_v23 }
 0x6aa   : > { %v7135_v12 = vadd.f32 1.0, %v14352_v6  ;;  %v7143_v25 = vadd.f32 1.0, %v14406_v41  ;;  %8547 = vmatpush1.bf16.msra.mxu0 %v10905_v1  ;;  %10742 = vtanh.f32 %v6920_v60  ;;  %v6935_v54 = vmul.f32 0.7978846, %v6807_v59  ;;  %v14510_v41 = vpop.f32.mrf.mxu1  ;;  %v16266_v1 = vld [vmem:[#allocation43_spill] sm:$0xff] }
 0x6ab   : > { %v7376_v37 = vpack.c.bf16 %v7272_v17, %v7264_v56  ;;  %v14503_v13 = vadd.f32 %v14126_v11, %v5858_v57  ;;  %8548 = vmatprep.subr.bf16.mxu0 %v10906_v34  ;;  %10744 = vtanh.f32 %v14442_v31  ;;  %v6936_v33 = vmul.f32 0.7978846, %v6808_v48  ;;  %v10907_v31 = vld [vmem:[#allocation10 + $0x320] ss:$8 sps:$4 sm:$0xff]  }
 0x6ac   : > { %v7263_v35 = vmul.f32 %v7135_v12, %v14201_v62  ;;  %v7271_v6 = vmul.f32 %v7143_v25, %v14259_v0  ;;  %10746 = vtanh.f32 %v6928_v8  ;;  %v6943_v60 = vmul.f32 0.7978846, %v6815_v29  ;;  %v16263_v48 = vld [vmem:[#allocation23_spill] sm:$0xff]  ;;  %v16264_v29 = vld [vmem:[#allocation44_spill] sm:$0xff]  ;;  %v14537_v3 = vpop.f32.mrf.mxu1 }
 0x6ad   : > { %v6816_v17 = vadd.f32 %v6688_v52, %v14438_v44  ;;  %v6575_v11 = vmul.f32 %v6447_v20, %v14473_v43  ;;  %8477 = vmatprep.mubr.bf16.mxu0 %v7376_v37  ;;  %v14514_v59 = vpop.eup %10738  ;;  %v6695_v63 = vmul.f32 0.044715, %v6567_v18  ;;  %v6696_v40 = vmul.f32 0.044715, %v6568_v39  ;;  %v10908_v37 = vld [vmem:[#allocation10 + $0x314] ss:$8 sps:$4 sm:$0xff]   ;;  %v14524_v20 = vpop.f32.mrf.mxu0 }
 0x6ae   : > { %v7375_v57 = vpack.c.bf16 %v7271_v6, %v7263_v35  ;;  %8549 = vmatpush1.bf16.msra.mxu0 %v10907_v31  ;;  %v4005_v62 = vsub.s32 6, %v16263_v48  ;;  %v14518_v0 = vmul.f32 0.5, %v14337_v27  ;;  %10748 = vtanh.f32 %v6935_v54  ;;  %16265 = vst [vmem:[#allocation61_spill] sm:$0xff] %v14524_v20  ;;  %v10909_v27 = vld [vmem:[%s15771_s11] sm:$0xff]  ;;  %v10910_v35 = vld [vmem:[#allocation10 + $0x310] ss:$8 sps:$4 sm:$0xff]   ;;  %v14564_v31 = vpop.f32.mrf.mxu1 }
 0x6af   : > { %v6448_v8 = vmul.f32 %v14503_v13, %v14503_v13  ;;  %v5860_v52 = vadd.f32 %v16264_v29, %v13903_v24  ;;  %8550 = vmatprep.subr.bf16.mxu0 %v10908_v37  ;;  %v14527_v18 = vmul.f32 0.5, %v14378_v19  ;;  %10750 = vtanh.f32 %v6936_v33  ;;  %v16296_v20 = vld [vmem:[#allocation55_spill] sm:$0xff] }
 0x6b0   : > { %v14530_v56 = vmul.f32 0.5, %v14397_v49  ;;  %8478 = vmatmul.mubr.bf16.gmra.mxu0 %v7375_v57  ;;  %v14535_v54 = vrot.slane %v10909_v27, %v4005_v62  ;;  %10752 = vtanh.f32 %v6943_v60  ;;  %v6944_v24 = vmul.f32 0.7978846, %v6816_v17 }
 0x6b1   : > { %v14540_v39 = vmul.f32 0.5, %v14464_v2  ;;  %v6703_v19 = vmul.f32 0.044715, %v6575_v11  ;;  %v14542_v12 = vpop.eup %10740  ;;  %v6823_v49 = vadd.f32 %v6695_v63, %v14464_v2  ;;  %v6824_v25 = vadd.f32 %v6696_v40, %v14467_v23  ;;  %v10911_v2 = vld [vmem:[#allocation10 + $0x304] ss:$8 sps:$4 sm:$0xff]   ;;  %v14556_v63 = vpop.f32.mrf.mxu0 }
 0x6b2   : > { %v5862_v34 = vadd.f32 %v16266_v1, %v13939_v38  ;;  %v6012_v33 = vadd.f32 %v14136_v30, %v14535_v54  ;;  %8551 = vmatpush1.bf16.msra.mxu0 %v10910_v35  ;;  %v6576_v6 = vmul.f32 %v6448_v8, %v14503_v13  ;;  %v14552_v60 = vadd.f32 %v14155_v9, %v5860_v52  ;;  %v10912_v8 = vld [vmem:[#allocation10 + $0x300] ss:$8 sps:$4 sm:$0xff]   ;;  %v14584_v35 = vpop.f32.mrf.mxu1 }
 0x6b3   : > { %v6256_v17 = vmul.f32 0.5, %v14238_v22  ;;  %v7152_v11 = vadd.f32 1.0, %v14469_v58  ;;  %8552 = vmatprep.subr.bf16.mxu0 %v10911_v2  ;;  %16267 = vst [vmem:[#allocation69_spill] sm:$0xff] %v14556_v63  ;;  %v6264_v30 = vmul.f32 0.5, %v14268_v21  ;;  %v7160_v40 = vadd.f32 1.0, %v14486_v4 }
 0x6b4   : > { %v14559_v38 = vadd.f32 %v14218_v36, %v6012_v33  ;;  %v4009_v57 = vsub.s32 7, %v16263_v48  ;;  %10754 = vtanh.f32 %v6944_v24  ;;  %v14567_v22 = vmul.f32 0.5, %v14473_v43  ;;  %v10913_v24 = vld [vmem:[#allocation10 + $0x3f4] ss:$8 sps:$4 sm:$0xff]  }
 0x6b5   : > { %v6831_v9 = vadd.f32 %v6703_v19, %v14473_v43  ;;  %v7151_v58 = vadd.f32 1.0, %v14461_v10  ;;  %v14572_v62 = vadd.f32 %v14186_v50, %v5862_v34  ;;  %v7280_v21 = vmul.f32 %v7152_v11, %v6256_v17  ;;  %v14581_v10 = vpop.f32.mrf.mxu0  ;;  %v16269_v11 = vld [vmem:[#allocation75_spill] sm:$0xff] }
 0x6b6   : > { %v6337_v36 = vmul.f32 %v14559_v38, %v14559_v38  ;;  %v7288_v4 = vmul.f32 %v7160_v40, %v6264_v30  ;;  %8553 = vmatpush1.bf16.msra.mxu0 %v10912_v8  ;;  %v6951_v29 = vmul.f32 0.7978846, %v6823_v49  ;;  %v6455_v52 = vmul.f32 %v14552_v60, %v14552_v60  ;;  %16268 = vst [vmem:[#allocation64_spill] sm:$0xff] %v14581_v10  ;;  %v16270_v40 = vld [vmem:[#allocation38_spill] sm:$0xff]  ;;  %v16273_v8 = vld [vmem:[#allocation56_spill] sm:$0xff]  ;;  %v16280_v10 = vld [vmem:[#allocation77_spill] sm:$0xff] }
 0x6b7   : > { %v14578_v37 = vrot.slane %v10909_v27, %v4009_v57  ;;  %v7159_v43 = vadd.f32 1.0, %v14477_v45  ;;  %8554 = vmatprep.subr.bf16.mxu0 %v10913_v24  ;;  %v10743_v50 = vpop.eup %10742  ;;  %v6952_v19 = vmul.f32 0.7978846, %v6824_v25  ;;  %v6704_v1 = vmul.f32 0.044715, %v6576_v6 }
 0x6b8   : > { %v6465_v34 = vmul.f32 %v6337_v36, %v14559_v38  ;;  %v7384_v33 = vpack.c.bf16 %v7288_v4, %v7280_v21  ;;  %v14586_v49 = vpop.eup %10744  ;;  %v7279_v17 = vmul.f32 %v7151_v58, %v14400_v61  ;;  %v6016_v2 = vadd.f32 %v16269_v11, %v14535_v54  ;;  %v16271_v36 = vld [vmem:[#allocation76_spill] sm:$0xff] }
 0x6b9   : > { %v6014_v27 = vadd.f32 %v14147_v42, %v14578_v37  ;;  %v7287_v45 = vmul.f32 %v7159_v43, %v14403_v53  ;;  %v14594_v30 = vpop.eup %10746  ;;  %v6456_v25 = vmul.f32 %v14572_v62, %v14572_v62  ;;  %v6018_v57 = vadd.f32 %v16270_v40, %v14578_v37  ;;  %v10914_v21 = vld [vmem:[#allocation10 + $0x3f0] ss:$8 sps:$4 sm:$0xff]   ;;  %v14610_v43 = vpop.f32.mrf.mxu0 }
 0x6ba   : > { %v6593_v6 = vmul.f32 0.044715, %v6465_v34  ;;  %8487 = vmatprep.mubr.bf16.mxu0 %v7384_v33  ;;  %v6022_v42 = vadd.f32 %v16271_v36, %v14535_v54  ;;  %8555 = vmatpush2.bf16.msra.mxu0 %v10914_v21  ;;  %v6583_v61 = vmul.f32 %v6455_v52, %v14552_v60  ;;  %v14607_v4 = vadd.f32 %v14273_v32, %v6016_v2  ;;  %v14618_v52 = vpop.f32.mrf.mxu1  ;;  %v10915_v2 = vld [vmem:[#allocation10 + $0x3e0] ss:$8 sps:$4 sm:$0xff]   ;;  %v16275_v36 = vld [vmem:[#allocation32_spill] sm:$0xff] }
 0x6bb   : > { %v14604_v53 = vadd.f32 %v14242_v46, %v6014_v27  ;;  %v7383_v58 = vpack.c.bf16 %v7287_v45, %v7279_v17  ;;  %8556 = vmatprep.subr.bf16.mxu0 %v16273_v8  ;;  %16274 = vst [vmem:[#allocation35_spill] sm:$0xff] %v14610_v43  ;;  %v14612_v24 = vpop.eup %10748  ;;  %10756 = vtanh.f32 %v6951_v29  ;;  %v6959_v34 = vmul.f32 0.7978846, %v6831_v9 }
 0x6bc   : > { %v6721_v33 = vadd.f32 %v6593_v6, %v14559_v38  ;;  %v14616_v11 = vadd.f32 %v14319_v15, %v6022_v42  ;;  %v14620_v46 = vpop.eup %10750  ;;  %10758 = vtanh.f32 %v6952_v19  ;;  %v14623_v32 = vmul.f32 0.5, %v14552_v60  ;;  %v14646_v8 = vpop.f32.mrf.mxu1 }
 0x6bd   : > { %16272 = vst [vmem:[#allocation30_spill] sm:$0xff] %v14604_v53  ;;  %8488 = vmatmul.mubr.bf16.gmra.mxu0 %v7383_v58  ;;  %v6345_v27 = vmul.f32 %v14607_v4, %v14607_v4  ;;  %v14628_v29 = vadd.f32 %v14302_v5, %v6018_v57  ;;  %v14630_v9 = vpop.eup %10752  ;;  %v6832_v15 = vadd.f32 %v6704_v1, %v14503_v13  ;;  %v6711_v6 = vmul.f32 0.044715, %v6583_v61  ;;  %v14642_v1 = vpop.f32.mrf.mxu0 }
 0x6be   : > { %v6584_v17 = vmul.f32 %v6456_v25, %v14572_v62  ;;  %v6338_v45 = vmul.f32 %v14604_v53, %v14604_v53  ;;  %v6353_v19 = vmul.f32 %v14616_v11, %v14616_v11  ;;  %8557 = vmatpush2.bf16.msra.mxu0 %v10915_v2  ;;  %v6272_v5 = vmul.f32 0.5, %v14306_v55  ;;  %16276 = vst [vmem:[#allocation39_spill] sm:$0xff] %v14642_v1  ;;  %v16277_v55 = vld [vmem:[#allocation49_spill] sm:$0xff] }
 0x6bf   : > { %v6473_v40 = vmul.f32 %v6345_v27, %v14607_v4  ;;  %v7168_v57 = vadd.f32 1.0, %v14514_v59  ;;  %8558 = vmatprep.subr.bf16.mxu0 %v16275_v36  ;;  %v6849_v25 = vmul.f32 0.7978846, %v6721_v33  ;;  %v6280_v21 = vmul.f32 0.5, %v14334_v51  ;;  %v16278_v51 = vld [vmem:[#allocation42_spill] sm:$0xff] }
 0x6c0   : > { %v6481_v42 = vmul.f32 %v6353_v19, %v14616_v11  ;;  %v7176_v58 = vadd.f32 1.0, %v10743_v50  ;;  %10760 = vtanh.f32 %v6959_v34  ;;  %v6346_v27 = vmul.f32 %v14628_v29, %v14628_v29  ;;  %v16279_v34 = vld [vmem:[#allocation41_spill] sm:$0xff] }
 0x6c1   : > { %v6601_v61 = vmul.f32 0.044715, %v6473_v40  ;;  %v6024_v59 = vadd.f32 %v16277_v55, %v14578_v37  ;;  %v14652_v2 = vpop.eup %10754  ;;  %v6466_v36 = vmul.f32 %v6338_v45, %v14604_v53  ;;  %v7296_v33 = vmul.f32 %v7168_v57, %v6272_v5  ;;  %v14662_v55 = vpop.f32.mrf.mxu0 }
 0x6c2   : > { %v7304_v48 = vmul.f32 %v7176_v58, %v6280_v21  ;;  %v7167_v19 = vadd.f32 1.0, %v14492_v47  ;;  %8559 = vmatpush2.bf16.msra.mxu0 %v16278_v51  ;;  %v6960_v50 = vmul.f32 0.7978846, %v6832_v15  ;;  %v6712_v1 = vmul.f32 0.044715, %v6584_v17  ;;  %16281 = vst [vmem:[#allocation78_spill] sm:$0xff] %v14662_v55  ;;  %v14665_v57 = vpop.f32.mrf.mxu1 }
 0x6c3   : > { %v14658_v40 = vadd.f32 %v16279_v34, %v6024_v59  ;;  %v7175_v43 = vadd.f32 1.0, %v14542_v12  ;;  %8560 = vmatprep.subr.bf16.mxu0 %v16280_v10  ;;  %v6839_v63 = vadd.f32 %v6711_v6, %v14552_v60  ;;  %10762 = vtanh.f32 %v6849_v25  ;;  %v16282_v60 = vld [vmem:[#allocation68_spill] sm:$0xff]  ;;  %v16286_v59 = vld [vmem:[#allocation50_spill] sm:$0xff] }
 0x6c4   : > { %v6609_v45 = vmul.f32 0.044715, %v6481_v42  ;;  %v7392_v5 = vpack.c.bf16 %v7304_v48, %v7296_v33  ;;  %v6729_v47 = vadd.f32 %v6601_v61, %v14607_v4  ;;  %v7295_v17 = vmul.f32 %v7167_v19, %v14409_v7  ;;  %v16283_v48 = vld [vmem:[#allocation51_spill] sm:$0xff]  ;;  %v16284_v42 = vld [vmem:[#allocation29_spill] sm:$0xff]  ;;  %v16288_v19 = vld [vmem:[#allocation66_spill] sm:$0xff] }
 0x6c5   : > { %v6354_v15 = vmul.f32 %v14658_v40, %v14658_v40  ;;  %v7303_v12 = vmul.f32 %v7175_v43, %v14430_v28  ;;  %v6594_v21 = vmul.f32 0.044715, %v6466_v36  ;;  %v6474_v10 = vmul.f32 %v6346_v27, %v14628_v29  ;;  %v16285_v28 = vld [vmem:[#allocation26_spill] sm:$0xff]  ;;  %v14685_v27 = vpop.f32.mrf.mxu0 }
 0x6c6   : > { %8497 = vmatprep.mubr.bf16.mxu0 %v7392_v5  ;;  %v6026_v6 = vadd.f32 %v16282_v60, %v14535_v54  ;;  %v6028_v25 = vadd.f32 %v16283_v48, %v14578_v37  ;;  %8561 = vmatpush2.bf16.msra.mxu0 %v16284_v42  ;;  %v14679_v58 = vmul.f32 0.5, %v14559_v38  ;;  %v6032_v43 = vadd.f32 %v16285_v28, %v14535_v54  ;;  %v14694_v38 = vpop.f32.mrf.mxu1  ;;  %v16293_v28 = vld [vmem:[#allocation48_spill] sm:$0xff]  ;;  %v16295_v55 = vld [vmem:[#allocation34_spill] sm:$0xff] }
 0x6c7   : > { %v6482_v61 = vmul.f32 %v6354_v15, %v14658_v40  ;;  %v7391_v7 = vpack.c.bf16 %v7303_v12, %v7295_v17  ;;  %8562 = vmatprep.subr.bf16.mxu0 %v16286_v59  ;;  %16287 = vst [vmem:[#allocation70_spill] sm:$0xff] %v14685_v27  ;;  %10764 = vtanh.f32 %v6960_v50  ;;  %v6840_v36 = vadd.f32 %v6712_v1, %v14572_v62  ;;  %v16289_v12 = vld [vmem:[#allocation53_spill] sm:$0xff] }
 0x6c8   : > { %v14689_v33 = vadd.f32 %v14369_v26, %v6026_v6  ;;  %v14692_v51 = vadd.f32 %v16288_v19, %v6028_v25  ;;  %v14696_v34 = vpop.eup %10756  ;;  %v6967_v5 = vmul.f32 0.7978846, %v6839_v63  ;;  %v6857_v15 = vmul.f32 0.7978846, %v6729_v47  ;;  %v16290_v25 = vld [vmem:[#allocation74_spill] sm:$0xff] }
 0x6c9   : > { %v6737_v17 = vadd.f32 %v6609_v45, %v14616_v11  ;;  %8498 = vmatmul.mubr.bf16.gmra.mxu0 %v7391_v7  ;;  %v14700_v60 = vadd.f32 %v16289_v12, %v6032_v43  ;;  %v14702_v50 = vpop.eup %10758  ;;  %v6722_v26 = vadd.f32 %v6594_v21, %v14604_v53  ;;  %v6602_v1 = vmul.f32 0.044715, %v6474_v10  ;;  %v16291_v7 = vld [vmem:[#allocation47_spill] sm:$0xff]  ;;  %v14715_v21 = vpop.f32.mrf.mxu0  ;;  %v16294_v19 = vld [vmem:[#allocation58_spill] sm:$0xff] }
 0x6ca   : > { %v6361_v6 = vmul.f32 %v14689_v33, %v14689_v33  ;;  %v6362_v48 = vmul.f32 %v14692_v51, %v14692_v51  ;;  %8563 = vmatpush2.bf16.msra.mxu0 %v16290_v25  ;;  %v6610_v63 = vmul.f32 0.044715, %v6482_v61  ;;  %v6288_v47 = vmul.f32 0.5, %v14373_v14  ;;  %16292 = vst [vmem:[#allocation37_spill] sm:$0xff] %v14715_v21  ;;  %v14722_v12 = vpop.f32.mrf.mxu1 }
 0x6cb   : > { %v6369_v45 = vmul.f32 %v14700_v60, %v14700_v60  ;;  %v7184_v42 = vadd.f32 1.0, %v14594_v30  ;;  %8564 = vmatprep.subr.bf16.mxu0 %v16291_v7  ;;  %v6296_v43 = vmul.f32 0.5, %v16293_v28  ;;  %v7192_v59 = vadd.f32 1.0, %v14620_v46 }
 0x6cc   : > { %v6489_v10 = vmul.f32 %v6361_v6, %v14689_v33  ;;  %v6034_v61 = vadd.f32 %v16294_v19, %v14578_v37  ;;  %10766 = vtanh.f32 %v6857_v15  ;;  %v6865_v25 = vmul.f32 0.7978846, %v6737_v17  ;;  %v16297_v17 = vld [vmem:[#allocation73_spill] sm:$0xff] }
 0x6cd   : > { %v6490_v14 = vmul.f32 %v6362_v48, %v14692_v51  ;;  %v7183_v30 = vadd.f32 1.0, %v14586_v49  ;;  %v14726_v7 = vpop.eup %10760  ;;  %v6497_v6 = vmul.f32 %v6369_v45, %v14700_v60  ;;  %v7312_v27 = vmul.f32 %v7184_v42, %v6288_v47  ;;  %v14736_v49 = vpop.f32.mrf.mxu0 }
 0x6ce   : > { %v6617_v21 = vmul.f32 0.044715, %v6489_v10  ;;  %v7320_v28 = vmul.f32 %v7192_v59, %v6296_v43  ;;  %8565 = vmatpush2.bf16.msra.mxu0 %v16295_v55  ;;  %v6968_v46 = vmul.f32 0.7978846, %v6840_v36  ;;  %v6730_v19 = vadd.f32 %v6602_v1, %v14628_v29  ;;  %v14739_v42 = vpop.f32.mrf.mxu1  ;;  %v16298_v43 = vld [vmem:[#allocation40_spill] sm:$0xff] }
 0x6cf   : > { %v14732_v53 = vadd.f32 %v16296_v20, %v6034_v61  ;;  %v7191_v15 = vadd.f32 1.0, %v14612_v24  ;;  %8566 = vmatprep.subr.bf16.mxu0 %v16297_v17  ;;  %10768 = vtanh.f32 %v6967_v5  ;;  %v6850_v48 = vmul.f32 0.7978846, %v6722_v26  ;;  %v16299_v26 = vld [vmem:[#allocation63_spill] sm:$0xff] }
 0x6d0   : > { %v6738_v45 = vadd.f32 %v6610_v63, %v14658_v40  ;;  %v7400_v47 = vpack.c.bf16 %v7320_v28, %v7312_v27  ;;  %v10763_v55 = vpop.eup %10762  ;;  %10770 = vtanh.f32 %v6865_v25  ;;  %v6618_v36 = vmul.f32 0.044715, %v6490_v14  ;;  %v16300_v27 = vld [vmem:[#allocation36_spill] sm:$0xff]  ;;  %v16302_v14 = vld [vmem:[#allocation31_spill] sm:$0xff] }
 0x6d1   : > { %v7311_v1 = vmul.f32 %v7183_v30, %v14518_v0  ;;  %v7319_v20 = vmul.f32 %v7191_v15, %v14527_v18  ;;  %v6745_v24 = vadd.f32 %v6617_v21, %v14689_v33  ;;  %v6625_v10 = vmul.f32 0.044715, %v6497_v6  ;;  %v16301_v0 = vld [vmem:[#allocation60_spill] sm:$0xff]  ;;  %v14754_v21 = vpop.f32.mrf.mxu0  ;;  %v16303_v6 = vld [vmem:[#allocation62_spill] sm:$0xff]  ;;  %v16304_v15 = vld [vmem:[#allocation67_spill] sm:$0xff] }
 0x6d2   : > { %8507 = vmatprep.mubr.bf16.mxu0 %v7400_v47  ;;  %v6036_v5 = vadd.f32 %v16298_v43, %v14535_v54  ;;  %v6038_v63 = vadd.f32 %v16299_v26, %v14578_v37  ;;  %8567 = vmatpush2.bf16.msra.mxu0 %v16300_v27  ;;  %v6858_v59 = vmul.f32 0.7978846, %v6730_v19  ;;  %v6370_v61 = vmul.f32 %v14732_v53, %v14732_v53  ;;  %v14762_v19 = vpop.f32.mrf.mxu1 }
 0x6d3   : > { %v7399_v25 = vpack.c.bf16 %v7319_v20, %v7311_v1  ;;  %v6042_v18 = vadd.f32 %v16301_v0, %v14535_v54  ;;  %8568 = vmatprep.subr.bf16.mxu0 %v16302_v14  ;;  %10772 = vtanh.f32 %v6968_v46  ;;  %v6866_v30 = vmul.f32 0.7978846, %v6738_v45 }
 0x6d4   : > { %v14757_v28 = vadd.f32 %v16303_v6, %v6036_v5  ;;  %v14760_v17 = vadd.f32 %v16304_v15, %v6038_v63  ;;  %v14764_v47 = vpop.eup %10764  ;;  %10774 = vtanh.f32 %v6850_v48  ;;  %v6217_v1 = vmul.f32 0.5, %v14607_v4  ;;  %v16306_v63 = vld [vmem:[#allocation45_spill] sm:$0xff]  ;;  %v14789_v27 = vpop.f32.mrf.mxu1 }
 0x6d5   : > { %v6746_v20 = vadd.f32 %v6618_v36, %v14692_v51  ;;  %8508 = vmatmul.mubr.bf16.gmra.mxu0 %v7399_v25  ;;  %v14769_v43 = vadd.f32 %v14510_v41, %v6042_v18  ;;  %v7105_v46 = vadd.f32 1.0, %v10763_v55  ;;  %v6873_v45 = vmul.f32 0.7978846, %v6745_v24  ;;  %v14781_v41 = vpop.f32.mrf.mxu0 }
 0x6d6   : > { %v6753_v5 = vadd.f32 %v6625_v10, %v14700_v60  ;;  %v6377_v26 = vmul.f32 %v14757_v28, %v14757_v28  ;;  %8569 = vmatpush2.bf16.msra.mxu0 %v16306_v63  ;;  %10776 = vtanh.f32 %v6858_v59  ;;  %v14776_v48 = vmul.f32 0.5, %v14616_v11 }
 0x6d7   : > { %16305 = vst [vmem:[#allocation33_spill] sm:$0xff] %v14769_v43  ;;  %v6498_v4 = vmul.f32 %v6370_v61, %v14732_v53  ;;  %v6378_v36 = vmul.f32 %v14760_v17, %v14760_v17  ;;  %10778 = vtanh.f32 %v6866_v30  ;;  %v14784_v55 = vmul.f32 0.5, %v14689_v33 }
 0x6d8   : > { %v6385_v24 = vmul.f32 %v14769_v43, %v14769_v43  ;;  %v7200_v10 = vadd.f32 1.0, %v14652_v2  ;;  %v6874_v11 = vmul.f32 0.7978846, %v6746_v20  ;;  %v6304_v59 = vmul.f32 0.5, %v14438_v44  ;;  %v14799_v20 = vpop.f32.mrf.mxu0 }
 0x6d9   : > { %v6312_v61 = vmul.f32 0.5, %v14467_v23  ;;  %v7208_v25 = vadd.f32 1.0, %v14702_v50  ;;  %v10767_v0 = vpop.eup %10766  ;;  %v14795_v18 = vmul.f32 %v7105_v46, %v14679_v58  ;;  %10780 = vtanh.f32 %v6873_v45  ;;  %16307 = vst [vmem:[#allocation79_spill] sm:$0xff] %v14799_v20  ;;  %v16308_v23 = vld [vmem:[#allocation65_spill] sm:$0xff]  ;;  %v14806_v46 = vpop.f32.mrf.mxu1 }
 0x6da   : > { %v6881_v33 = vmul.f32 0.7978846, %v6753_v5  ;;  %v6505_v14 = vmul.f32 %v6377_v26, %v14757_v28  ;;  %v6626_v30 = vmul.f32 0.044715, %v6498_v4  ;;  %v6506_v2 = vmul.f32 %v6378_v36, %v14760_v17  ;;  %v16309_v4 = vld [vmem:[#allocation46_spill] sm:$0xff] }
 0x6db   : > { %v7328_v6 = vmul.f32 %v7200_v10, %v6304_v59  ;;  %v7336_v15 = vmul.f32 %v7208_v25, %v6312_v61  ;;  %v6513_v44 = vmul.f32 %v6385_v24, %v14769_v43  ;;  %v6044_v50 = vadd.f32 %v16308_v23, %v14578_v37 }
 0x6dc   : > { %v7199_v63 = vadd.f32 1.0, %v14630_v9  ;;  %v7207_v58 = vadd.f32 1.0, %v14696_v34  ;;  %v14808_v45 = vpop.eup %10768  ;;  %v7113_v5 = vadd.f32 1.0, %v10767_v0  ;;  %10782 = vtanh.f32 %v6874_v11  ;;  %v16311_v11 = vld [vmem:[#allocation72_spill] sm:$0xff] }
 0x6dd   : > { %v7408_v26 = vpack.c.bf16 %v7336_v15, %v7328_v6  ;;  %v6046_v36 = vadd.f32 %v16309_v4, %v14535_v54  ;;  %v10771_v10 = vpop.eup %10770  ;;  %v6633_v59 = vmul.f32 0.044715, %v6505_v14  ;;  %v14813_v24 = vadd.f32 %v14537_v3, %v6044_v50  ;;  %v14823_v15 = vpop.f32.mrf.mxu0 }
 0x6de   : > { %v7327_v61 = vmul.f32 %v7199_v63, %v14530_v56  ;;  %v7335_v9 = vmul.f32 %v7207_v58, %v14540_v39  ;;  %v6754_v34 = vadd.f32 %v6626_v30, %v14732_v53  ;;  %v6634_v25 = vmul.f32 0.044715, %v6506_v2  ;;  %16312 = vst [vmem:[#allocation44_spill] sm:$0xff] %v14823_v15  ;;  %v16313_v56 = vld [vmem:[#allocation71_spill] sm:$0xff]  ;;  %v14829_v50 = vpop.f32.mrf.mxu1 }
 0x6df   : > { %16310 = vst [vmem:[#allocation57_spill] sm:$0xff] %v14813_v24  ;;  %8517 = vmatprep.mubr.bf16.mxu0 %v7408_v26  ;;  %v14819_v0 = vadd.f32 %v14564_v31, %v6046_v36  ;;  %v6048_v6 = vadd.f32 %v16311_v11, %v14578_v37  ;;  %v6641_v14 = vmul.f32 0.044715, %v6513_v44  ;;  %v6386_v3 = vmul.f32 %v14813_v24, %v14813_v24 }
 0x6e0   : > { %v7407_v23 = vpack.c.bf16 %v7335_v9, %v7327_v61  ;;  %v6052_v39 = vadd.f32 %v16313_v56, %v14535_v54  ;;  %v10773_v30 = vpop.eup %10772  ;;  %v14831_v2 = vmul.f32 %v7113_v5, %v6217_v1  ;;  %10784 = vtanh.f32 %v6881_v33  ;;  %v14851_v61 = vpop.f32.mrf.mxu0 }
 0x6e1   : > { %v6393_v31 = vmul.f32 %v14819_v0, %v14819_v0  ;;  %v14836_v63 = vadd.f32 %v14584_v35, %v6048_v6  ;;  %v14838_v44 = vpop.eup %10774  ;;  %v14840_v58 = vadd.f32 1.0, %v10771_v10  ;;  %v6761_v26 = vadd.f32 %v6633_v59, %v14757_v28  ;;  %16314 = vst [vmem:[#allocation43_spill] sm:$0xff] %v14851_v61 }
 0x6e2   : > { %v6514_v4 = vmul.f32 %v6386_v3, %v14813_v24  ;;  %8518 = vmatmul.mubr.bf16.gmra.mxu0 %v7407_v23  ;;  %v14845_v36 = vadd.f32 %v14618_v52, %v6052_v39  ;;  %v6882_v1 = vmul.f32 0.7978846, %v6754_v34  ;;  %v6762_v33 = vadd.f32 %v6634_v25, %v14760_v17  ;;  %v14859_v34 = vpop.f32.mrf.mxu1 }
 0x6e3   : > { %v6521_v5 = vmul.f32 %v6393_v31, %v14819_v0  ;;  %v6394_v35 = vmul.f32 %v14836_v63, %v14836_v63  ;;  %v14853_v10 = vpop.eup %10776  ;;  %v6769_v59 = vadd.f32 %v6641_v14, %v14769_v43  ;;  %v6320_v52 = vmul.f32 0.5, %v14503_v13  ;;  %v14874_v43 = vpop.f32.mrf.mxu0 }
 0x6e4   : > { %v6642_v9 = vmul.f32 0.044715, %v6514_v4  ;;  %v6401_v11 = vmul.f32 %v14845_v36, %v14845_v36  ;;  %v14861_v25 = vpop.eup %10778  ;;  %v6328_v3 = vmul.f32 0.5, %v14572_v62  ;;  %v7216_v23 = vadd.f32 1.0, %v14764_v47  ;;  %v16315_v4 = vld [vmem:[#allocation59_spill] sm:$0xff] }
 0x6e5   : > { %v6649_v6 = vmul.f32 0.044715, %v6521_v5  ;;  %v7224_v56 = vadd.f32 1.0, %v10773_v30  ;;  %v6889_v39 = vmul.f32 0.7978846, %v6761_v26  ;;  %v6522_v14 = vmul.f32 %v6394_v35, %v14836_v63  ;;  %v14880_v35 = vpop.f32.mrf.mxu1 }
 0x6e6   : > { %v6770_v31 = vadd.f32 %v6642_v9, %v14813_v24  ;;  %v6054_v61 = vadd.f32 %v16315_v4, %v14578_v37  ;;  %v14869_v15 = vpop.eup %10780  ;;  %v6529_v5 = vmul.f32 %v6401_v11, %v14845_v36  ;;  %v7344_v20 = vmul.f32 %v7216_v23, %v6320_v52 }
 0x6e7   : > { %v7352_v62 = vmul.f32 %v7224_v56, %v6328_v3  ;;  %10786 = vtanh.f32 %v6882_v1  ;;  %v6890_v47 = vmul.f32 0.7978846, %v6762_v33  ;;  %v7215_v26 = vadd.f32 1.0, %v14726_v7 }
 0x6e8   : > { %v14877_v30 = vadd.f32 %v14646_v8, %v6054_v61  ;;  %v6897_v9 = vmul.f32 0.7978846, %v6769_v59  ;;  %v6777_v4 = vadd.f32 %v6649_v6, %v14819_v0  ;;  %v7223_v13 = vadd.f32 1.0, %v14808_v45  ;;  %v16316_v61 = vld [vmem:[#allocation54_spill] sm:$0xff]  ;;  %v16317_v6 = vld [vmem:[#allocation52_spill] sm:$0xff] }
 0x6e9   : > { %v7416_v24 = vpack.c.bf16 %v7352_v62, %v7344_v20  ;;  %v14884_v11 = vpop.eup %10782  ;;  %10788 = vtanh.f32 %v6889_v39  ;;  %v6898_v52 = vmul.f32 0.7978846, %v6770_v31  ;;  %v6650_v3 = vmul.f32 0.044715, %v6522_v14  ;;  %v14892_v20 = vpop.f32.mrf.mxu0 }
 0x6ea   : > { %v6402_v1 = vmul.f32 %v14877_v30, %v14877_v30  ;;  %v6657_v8 = vmul.f32 0.044715, %v6529_v5  ;;  %v7343_v7 = vmul.f32 %v7215_v26, %v14567_v22  ;;  %v7351_v33 = vmul.f32 %v7223_v13, %v14623_v32  ;;  %v14899_v39 = vpop.f32.mrf.mxu1 }
 0x6eb   : > { %8527 = vmatprep.mubr.bf16.mxu0 %v7416_v24  ;;  %v6056_v59 = vadd.f32 %v16316_v61, %v14535_v54  ;;  %10790 = vtanh.f32 %v6890_v47  ;;  %v6058_v23 = vadd.f32 %v16317_v6, %v14578_v37  ;;  %v6062_v56 = vadd.f32 %v14505_v16, %v14535_v54  ;;  %v14917_v26 = vpop.f32.mrf.mxu0  ;;  %v16320_v6 = vld [vmem:[#allocation69_spill] sm:$0xff] }
 0x6ec   : > { %v6530_v45 = vmul.f32 %v6402_v1, %v14877_v30  ;;  %10792 = vtanh.f32 %v6897_v9  ;;  %v6905_v22 = vmul.f32 0.7978846, %v6777_v4  ;;  %v7415_v24 = vpack.c.bf16 %v7351_v33, %v7343_v7  ;;  %v16318_v4 = vld [vmem:[#allocation30_spill] sm:$0xff]  ;;  %v16319_v7 = vld [vmem:[#allocation61_spill] sm:$0xff] }
 0x6ed   : > { %v14902_v32 = vadd.f32 %v14665_v57, %v6056_v59  ;;  %v14904_v31 = vpop.eup %10784  ;;  %v6778_v14 = vadd.f32 %v6650_v3, %v14836_v63  ;;  %v14908_v5 = vadd.f32 %v14694_v38, %v6058_v23  ;;  %v14911_v62 = vadd.f32 %v14722_v12, %v6062_v56  ;;  %v14925_v3 = vpop.f32.mrf.mxu1 }
 0x6ee   : > { %v6658_v13 = vmul.f32 0.044715, %v6530_v45  ;;  %10794 = vtanh.f32 %v6898_v52  ;;  %v6785_v16 = vadd.f32 %v6657_v8, %v14845_v36  ;;  %8528 = vmatmul.mubr.bf16.gmra.mxu0 %v7415_v24  ;;  %v7106_v57 = vadd.f32 1.0, %v14838_v44 }
 0x6ef   : > { %v6409_v47 = vmul.f32 %v14902_v32, %v14902_v32  ;;  %v6410_v9 = vmul.f32 %v14908_v5, %v14908_v5  ;;  %v6417_v38 = vmul.f32 %v14911_v62, %v14911_v62  ;;  %v6210_v12 = vmul.f32 0.5, %v16318_v4 }
 0x6f0   : > { %v6218_v52 = vmul.f32 0.5, %v14628_v29  ;;  %v6786_v1 = vadd.f32 %v6658_v13, %v14877_v30  ;;  %v7114_v44 = vadd.f32 1.0, %v14853_v10  ;;  %v6064_v33 = vadd.f32 %v16319_v7, %v14578_v37  ;;  %v16321_v13 = vld [vmem:[#allocation64_spill] sm:$0xff]  ;;  %v14941_v10 = vpop.f32.mrf.mxu0 }
 0x6f1   : > { %v6537_v8 = vmul.f32 %v6409_v47, %v14902_v32  ;;  %v6538_v61 = vmul.f32 %v6410_v9, %v14908_v5  ;;  %v6545_v59 = vmul.f32 %v6417_v38, %v14911_v62  ;;  %v7234_v45 = vmul.f32 %v7106_v57, %v6210_v12  ;;  %16322 = vst [vmem:[#allocation75_spill] sm:$0xff] %v14941_v10  ;;  %v14947_v57 = vpop.f32.mrf.mxu1 }
 0x6f2   : > { %v6066_v23 = vadd.f32 %v16320_v6, %v14535_v54  ;;  %v7242_v56 = vmul.f32 %v7114_v44, %v6218_v52  ;;  %v14937_v24 = vadd.f32 %v14739_v42, %v6064_v33  ;;  %v6068_v47 = vadd.f32 %v16321_v13, %v14578_v37  ;;  %v16323_v6 = vld [vmem:[#allocation35_spill] sm:$0xff] }
 0x6f3   : > { %v6665_v29 = vmul.f32 0.044715, %v6537_v8  ;;  %v7129_v4 = vadd.f32 1.0, %v14869_v15  ;;  %10796 = vtanh.f32 %v6905_v22  ;;  %v6906_v9 = vmul.f32 0.7978846, %v6778_v14 }
 0x6f4   : > { %v14945_v38 = vadd.f32 %v14762_v19, %v6066_v23  ;;  %v14949_v12 = vpop.eup %10786  ;;  %v6666_v52 = vmul.f32 0.044715, %v6538_v61  ;;  %v7362_v8 = vpack.c.bf16 %v7242_v56, %v7234_v45  ;;  %v6418_v42 = vmul.f32 %v14937_v24, %v14937_v24  ;;  %v14966_v23 = vpop.f32.mrf.mxu0 }
 0x6f5   : > { %v14954_v44 = vadd.f32 %v14789_v27, %v6068_v47  ;;  %v6913_v7 = vmul.f32 0.7978846, %v6785_v16  ;;  %v6914_v33 = vmul.f32 0.7978846, %v6786_v1  ;;  %v6673_v15 = vmul.f32 0.044715, %v6545_v59  ;;  %v14979_v56 = vpop.f32.mrf.mxu1 }
 0x6f6   : > { %v6425_v22 = vmul.f32 %v14945_v38, %v14945_v38  ;;  %v14958_v19 = vpop.eup %10788  ;;  %v6793_v14 = vadd.f32 %v6665_v29, %v14902_v32  ;;  %8570 = vmatprep.mubr.bf16.mxu0 %v7362_v8  ;;  %v6546_v61 = vmul.f32 %v6418_v42, %v14937_v24  ;;  %v6072_v27 = vadd.f32 %v16323_v6, %v14535_v54  ;;  %v14994_v6 = vpop.f32.mrf.mxu0 }
 0x6f7   : > { %v6426_v45 = vmul.f32 %v14954_v44, %v14954_v44  ;;  %16324 = vst [vmem:[#allocation38_spill] sm:$0xff] %v14966_v23  ;;  %v7249_v16 = vmul.f32 %v14840_v58, %v14776_v48  ;;  %v14971_v1 = vmul.f32 0.5, %v14700_v60  ;;  %v14974_v59 = vmul.f32 0.5, %v14757_v28  ;;  %16326 = vst [vmem:[#allocation76_spill] sm:$0xff] %v14994_v6  ;;  %v16329_v23 = vld [vmem:[#allocation70_spill] sm:$0xff] }
 0x6f8   : > { %10798 = vtanh.f32 %v6906_v9  ;;  %v16325_v29 = vpack.c.bf16 %v14831_v2, %v14795_v18  ;;  %v10791_v13 = vpop.eup %10790  ;;  %v6794_v47 = vadd.f32 %v6666_v52, %v14908_v5  ;;  %v6553_v8 = vmul.f32 %v6425_v22, %v14945_v38 }
 0x6f9   : > { %v6554_v48 = vmul.f32 %v6426_v45, %v14954_v44  ;;  %v14985_v60 = vadd.f32 %v14806_v46, %v6072_v27  ;;  %v14987_v58 = vpop.eup %10792  ;;  %v7257_v28 = vmul.f32 %v7129_v4, %v14784_v55  ;;  %10800 = vtanh.f32 %v6913_v7 }
 0x6fa   : > { %8571 = vmatmul.mubr.bf16.vlgmr.msra.gmra.mxu0 %v16325_v29  ;;  %v6674_v9 = vmul.f32 0.044715, %v6546_v61  ;;  %v7122_v18 = vadd.f32 1.0, %v14861_v25  ;;  %10802 = vtanh.f32 %v6914_v33  ;;  %v6921_v42 = vmul.f32 0.7978846, %v6793_v14  ;;  %v16327_v33 = vld [vmem:[#allocation39_spill] sm:$0xff] }
 0x6fb   : > { %v6801_v52 = vadd.f32 %v6673_v15, %v14911_v62  ;;  %v6682_v22 = vmul.f32 0.044715, %v6554_v48  ;;  %v14996_v45 = vpop.eup %10794  ;;  %v6433_v46 = vmul.f32 %v14985_v60, %v14985_v60  ;;  %v6226_v55 = vmul.f32 0.5, %v14658_v40  ;;  %v16328_v15 = vld [vmem:[#allocation78_spill] sm:$0xff] }
 0x6fc   : > { %v14991_v2 = vpop.f32.mrf.mxu1  ;;  %v6234_v4 = vmul.f32 0.5, %v14692_v51  ;;  %v7130_v25 = vadd.f32 1.0, %v14884_v11  ;;  %v6922_v7 = vmul.f32 0.7978846, %v6794_v47  ;;  %v6681_v61 = vmul.f32 0.044715, %v6553_v8 }
 0x6fd   : > { %v6074_v14 = vadd.f32 %v16327_v33, %v14578_v37  ;;  %v6076_v27 = vadd.f32 %v16328_v15, %v14535_v54  ;;  %v6802_v29 = vadd.f32 %v6674_v9, %v14937_v24  ;;  %v7250_v48 = vmul.f32 %v7122_v18, %v6226_v55  ;;  %v15019_v33 = vpop.f32.mrf.mxu0 }
 0x6fe   : > { %v7258_v6 = vmul.f32 %v7130_v25, %v6234_v4  ;;  %v6078_v10 = vadd.f32 %v16329_v23, %v14578_v37  ;;  %v15010_v40 = vpop.f32.mrf.mxu1  ;;  %v6929_v51 = vmul.f32 0.7978846, %v6801_v52  ;;  %v6810_v11 = vadd.f32 %v6682_v22, %v14954_v44 }
 0x6ff   : > { %v15014_v47 = vadd.f32 %v14829_v50, %v6074_v14  ;;  %v15017_v8 = vadd.f32 %v14859_v34, %v6076_v27  ;;  %10804 = vtanh.f32 %v6921_v42  ;;  %v6561_v9 = vmul.f32 %v6433_v46, %v14985_v60  ;;  %v15040_v25 = vpop.f32.mrf.mxu0 }
 0x700   : > { %v7370_v18 = vpack.c.bf16 %v7258_v6, %v7250_v48  ;;  %v15023_v55 = vadd.f32 %v14880_v35, %v6078_v10  ;;  %v15025_v23 = vpop.eup %10796  ;;  %v7369_v52 = vpack.c.bf16 %v7257_v28, %v7249_v16  ;;  %10806 = vtanh.f32 %v6922_v7  ;;  %v16330_v35 = vld [vmem:[#allocation37_spill] sm:$0xff]  ;;  %v15036_v6 = vpop.f32.mrf.mxu1 }
 0x701   : > { %v6434_v50 = vmul.f32 %v15014_v47, %v15014_v47  ;;  %v6441_v34 = vmul.f32 %v15017_v8, %v15017_v8  ;;  %v6930_v22 = vmul.f32 0.7978846, %v6802_v29  ;;  %v6809_v4 = vadd.f32 %v6681_v61, %v14945_v38 }
 0x702   : > { %8580 = vmatprep.mubr.bf16.mxu1 %v7370_v18  ;;  %v6442_v42 = vmul.f32 %v15023_v55, %v15023_v55  ;;  %v6082_v10 = vadd.f32 %v16330_v35, %v14535_v54  ;;  %10808 = vtanh.f32 %v6929_v51  ;;  %v6938_v16 = vmul.f32 0.7978846, %v6810_v11 }
 0x703   : > { %v6562_v28 = vmul.f32 %v6434_v50, %v15014_v47  ;;  %8581 = vmatmul.mubr.bf16.vlgmr.msra.gmra.mxu1 %v7369_v52  ;;  %v7138_v46 = vadd.f32 1.0, %v14949_v12  ;;  %v6689_v7 = vmul.f32 0.044715, %v6561_v9  ;;  %v6242_v14 = vmul.f32 0.5, %v14732_v53  ;;  %v15051_v9 = vpop.f32.mrf.mxu1 }
 0x704   : > { %v6570_v61 = vmul.f32 %v6442_v42, %v15023_v55  ;;  %v7146_v15 = vadd.f32 1.0, %v10791_v13  ;;  %v6569_v48 = vmul.f32 %v6441_v34, %v15017_v8  ;;  %v6250_v51 = vmul.f32 0.5, %v14760_v17  ;;  %v15059_v17 = vpop.f32.mrf.mxu0 }
 0x705   : > { %v10799_v27 = vpop.eup %10798  ;;  %v6690_v29 = vmul.f32 0.044715, %v6562_v28  ;;  %v6084_v11 = vadd.f32 %v14736_v49, %v14578_v37  ;;  %10810 = vtanh.f32 %v6930_v22  ;;  %v6937_v18 = vmul.f32 0.7978846, %v6809_v4 }
 0x706   : > { %v6698_v12 = vmul.f32 0.044715, %v6570_v61  ;;  %v15049_v52 = vadd.f32 %v14899_v39, %v6082_v10  ;;  %v15053_v50 = vpop.eup %10800  ;;  %v7266_v13 = vmul.f32 %v7138_v46, %v6242_v14  ;;  %v7274_v42 = vmul.f32 %v7146_v15, %v6250_v51  ;;  %v16331_v51 = vld [vmem:[#allocation33_spill] sm:$0xff] }
 0x707   : > { %v6818_v53 = vadd.f32 %v6690_v29, %v15014_v47  ;;  %v15057_v34 = vadd.f32 %v14925_v3, %v6084_v11  ;;  %v15061_v49 = vpop.eup %10802  ;;  %10812 = vtanh.f32 %v6938_v16  ;;  %v7137_v39 = vadd.f32 1.0, %v14904_v31 }
 0x708   : > { %v6826_v22 = vadd.f32 %v6698_v12, %v15023_v55  ;;  %v7145_v4 = vadd.f32 1.0, %v14958_v19  ;;  %v6817_v35 = vadd.f32 %v6689_v7, %v14985_v60  ;;  %v6697_v10 = vmul.f32 0.044715, %v6569_v48  ;;  %v15080_v48 = vpop.f32.mrf.mxu0 }
 0x709   : > { %v7378_v28 = vpack.c.bf16 %v7274_v42, %v7266_v13  ;;  %v6450_v46 = vmul.f32 %v15057_v34, %v15057_v34  ;;  %v6946_v3 = vmul.f32 0.7978846, %v6818_v53  ;;  %v6449_v61 = vmul.f32 %v15049_v52, %v15049_v52 }
 0x70a   : > { %v7265_v14 = vmul.f32 %v7137_v39, %v14971_v1  ;;  %v7273_v16 = vmul.f32 %v7145_v4, %v14974_v59  ;;  %v15073_v15 = vpop.f32.mrf.mxu1  ;;  %v6954_v31 = vmul.f32 0.7978846, %v6826_v22  ;;  %v6086_v7 = vadd.f32 %v14754_v21, %v14535_v54  ;;  %v15101_v4 = vpop.f32.mrf.mxu0 }
 0x70b   : > { %8590 = vmatprep.mubr.bf16.mxu1 %v7378_v28  ;;  %v6578_v19 = vmul.f32 %v6450_v46, %v15057_v34  ;;  %v6088_v29 = vadd.f32 %v14781_v41, %v14578_v37  ;;  %v6257_v11 = vmul.f32 0.5, %v16331_v51  ;;  %10814 = vtanh.f32 %v6937_v18 }
 0x70c   : > { %v7377_v1 = vpack.c.bf16 %v7273_v16, %v7265_v14  ;;  %v15083_v12 = vpop.f32.mrf.mxu1  ;;  %v10805_v59 = vpop.eup %10804  ;;  %v6825_v53 = vadd.f32 %v6697_v10, %v15017_v8  ;;  %v15087_v42 = vadd.f32 %v14947_v57, %v6086_v7  ;;  %v6265_v37 = vmul.f32 0.5, %v14819_v0  ;;  %v16333_v0 = vld [vmem:[#allocation57_spill] sm:$0xff] }
 0x70d   : > { %v6706_v13 = vmul.f32 0.044715, %v6578_v19  ;;  %v15090_v54 = vadd.f32 %v14979_v56, %v6088_v29  ;;  %v10807_v21 = vpop.eup %10806  ;;  %v6945_v41 = vmul.f32 0.7978846, %v6817_v35  ;;  %10816 = vtanh.f32 %v6946_v3 }
 0x70e   : > { %v6577_v18 = vmul.f32 %v6449_v61, %v15049_v52  ;;  %8591 = vmatmul.mubr.bf16.gmra.mxu1 %v7377_v1  ;;  %v15094_v22 = vpop.f32.mrf.mxu1  ;;  %10818 = vtanh.f32 %v6954_v31  ;;  %v6457_v57 = vmul.f32 %v15087_v42, %v15087_v42  ;;  %v6258_v35 = vmul.f32 0.5, %v16333_v0 }
 0x70f   : > { %16332 = vst [vmem:[#allocation56_spill] sm:$0xff] %v15094_v22  ;;  %v6834_v39 = vadd.f32 %v6706_v13, %v15057_v34  ;;  %v6458_v56 = vmul.f32 %v15090_v54, %v15090_v54  ;;  %v15103_v10 = vpop.eup %10808  ;;  %v6266_v28 = vmul.f32 0.5, %v14836_v63  ;;  %v7154_v46 = vadd.f32 1.0, %v14996_v45  ;;  %v15114_v45 = vpop.f32.mrf.mxu0 }
 0x710   : > { %v7162_v3 = vadd.f32 1.0, %v10799_v27  ;;  %v15108_v61 = vpop.f32.mrf.mxu1  ;;  %v6953_v14 = vmul.f32 0.7978846, %v6825_v53  ;;  %v6585_v16 = vmul.f32 %v6457_v57, %v15087_v42  ;;  %v7153_v19 = vadd.f32 1.0, %v14987_v58 }
 0x711   : > { %16334 = vst [vmem:[#allocation32_spill] sm:$0xff] %v15108_v61  ;;  %v6586_v31 = vmul.f32 %v6458_v56, %v15090_v54  ;;  %v6705_v7 = vmul.f32 0.044715, %v6577_v18  ;;  %v7282_v29 = vmul.f32 %v7154_v46, %v6258_v35  ;;  %v7161_v1 = vadd.f32 1.0, %v15025_v23 }
 0x712   : > { %v7290_v51 = vmul.f32 %v7162_v3, %v6266_v28  ;;  %v10811_v13 = vpop.eup %10810  ;;  %v6962_v0 = vmul.f32 0.7978846, %v6834_v39  ;;  %v6713_v63 = vmul.f32 0.044715, %v6585_v16  ;;  %10820 = vtanh.f32 %v6945_v41 }
 0x713   : > { %v6714_v22 = vmul.f32 0.044715, %v6586_v31  ;;  %v7281_v53 = vmul.f32 %v7153_v19, %v6257_v11  ;;  %v7289_v61 = vmul.f32 %v7161_v1, %v6265_v37  ;;  %10822 = vtanh.f32 %v6953_v14  ;;  %v15127_v14 = vpop.f32.mrf.mxu0 }
 0x714   : > { %v7386_v27 = vpack.c.bf16 %v7290_v51, %v7282_v29  ;;  %v15116_v57 = vpop.f32.mrf.mxu1  ;;  %v10813_v56 = vpop.eup %10812  ;;  %v6841_v58 = vadd.f32 %v6713_v63, %v15087_v42  ;;  %v6274_v23 = vmul.f32 0.5, %v14877_v30  ;;  %v6282_v35 = vmul.f32 0.5, %v14908_v5 }
 0x715   : > { %v6842_v18 = vadd.f32 %v6714_v22, %v15090_v54  ;;  %v7385_v39 = vpack.c.bf16 %v7289_v61, %v7281_v53  ;;  %v7170_v28 = vadd.f32 1.0, %v15061_v49  ;;  %v7178_v41 = vadd.f32 1.0, %v10807_v21  ;;  %v8273_v63 = vpop.f32.mrf.mxu0 }
 0x716   : > { %8600 = vmatprep.mubr.bf16.mxu1 %v7386_v27  ;;  %v15123_v46 = vpop.f32.mrf.mxu1  ;;  %v6281_v11 = vmul.f32 0.5, %v14902_v32  ;;  %v6833_v37 = vadd.f32 %v6705_v7, %v15049_v52  ;;  %10824 = vtanh.f32 %v6962_v0  ;;  %v7169_v61 = vadd.f32 1.0, %v15053_v50 }
 0x717   : > { %v6970_v3 = vmul.f32 0.7978846, %v6842_v18  ;;  %8601 = vmatmul.mubr.bf16.gmra.mxu1 %v7385_v39  ;;  %v7298_v22 = vmul.f32 %v7170_v28, %v6274_v23  ;;  %v7306_v30 = vmul.f32 %v7178_v41, %v6282_v35  ;;  %v7177_v16 = vadd.f32 1.0, %v10805_v59 }
 0x718   : > { %v15130_v5 = vpop.f32.mrf.mxu1  ;;  %v10815_v49 = vpop.eup %10814  ;;  %v6273_v21 = vmul.f32 0.5, %v14845_v36  ;;  %v6969_v31 = vmul.f32 0.7978846, %v6841_v58  ;;  %v6290_v29 = vmul.f32 0.5, %v14937_v24  ;;  %v6298_v51 = vmul.f32 0.5, %v14954_v44 }
 0x719   : > { %10826 = vtanh.f32 %v6970_v3  ;;  %v7394_v32 = vpack.c.bf16 %v7306_v30, %v7298_v22  ;;  %v7305_v19 = vmul.f32 %v7177_v16, %v6281_v11  ;;  %v7186_v1 = vadd.f32 1.0, %v10811_v13  ;;  %v8275_v44 = vpop.f32.mrf.mxu0 }
 0x71a   : > { %v10817_v7 = vpop.eup %10816  ;;  %v7194_v0 = vadd.f32 1.0, %v10813_v56  ;;  %v15135_v27 = vpop.f32.mrf.mxu1  ;;  %v6961_v59 = vmul.f32 0.7978846, %v6833_v37  ;;  %v7297_v53 = vmul.f32 %v7169_v61, %v6273_v21  ;;  %10828 = vtanh.f32 %v6969_v31 }
 0x71b   : > { %v10819_v50 = vpop.eup %10818  ;;  %8610 = vmatprep.mubr.bf16.mxu1 %v7394_v32  ;;  %v7314_v18 = vmul.f32 %v7186_v1, %v6290_v29  ;;  %v7193_v23 = vadd.f32 1.0, %v10815_v49  ;;  %v6314_v35 = vmul.f32 0.5, %v15023_v55  ;;  %v7202_v24 = vadd.f32 1.0, %v10817_v7  ;;  %v8277_v49 = vpop.f32.mrf.mxu0 }
 0x71c   : > { %v7322_v36 = vmul.f32 %v7194_v0, %v6298_v51  ;;  %v7393_v58 = vpack.c.bf16 %v7305_v19, %v7297_v53  ;;  %v7210_v28 = vadd.f32 1.0, %v10819_v50  ;;  %v6297_v56 = vmul.f32 0.5, %v14945_v38  ;;  %v16335_v53 = vld [vmem:[#allocation25_spill] sm:$0xff] }
 0x71d   : > { %10830 = vtanh.f32 %v6961_v59  ;;  %v7185_v41 = vadd.f32 1.0, %v15103_v10  ;;  %v6306_v37 = vmul.f32 0.5, %v15014_v47  ;;  %v6289_v55 = vmul.f32 0.5, %v14911_v62  ;;  %v7547_v10 = vld [vmem:[%s15773_s13] sm:$0x3]  ;;  %v8279_v51 = vpop.f32.mrf.mxu0 }
 0x71e   : > { %v7402_v39 = vpack.c.bf16 %v7322_v36, %v7314_v18  ;;  %v7338_v3 = vmul.f32 %v7210_v28, %v6314_v35  ;;  %v7321_v61 = vmul.f32 %v7193_v23, %v6297_v56  ;;  %v6313_v1 = vmul.f32 0.5, %v15017_v8  ;;  %v16336_v36 = vld [vmem:[#allocation24_spill] sm:$0xff] }
 0x71f   : > { %v15138_v13 = vpop.f32.mrf.mxu1  ;;  %8611 = vmatmul.mubr.bf16.gmra.mxu1 %v7393_v58  ;;  %v10821_v11 = vpop.eup %10820  ;;  %v7330_v16 = vmul.f32 %v7202_v24, %v6306_v37  ;;  %v7313_v31 = vmul.f32 %v7185_v41, %v6289_v55  ;;  %v6330_v0 = vmul.f32 0.5, %v15090_v54  ;;  %v15152_v18 = vrot.slane %v7547_v10, %v16335_v53 }
 0x720   : > { %8620 = vmatprep.mubr.bf16.mxu1 %v7402_v39  ;;  %v10823_v30 = vpop.eup %10822  ;;  %v7201_v62 = vadd.f32 1.0, %v10821_v11  ;;  %v15155_v58 = vrot.slane %v7547_v10, %v16336_v36  ;;  %v6322_v23 = vmul.f32 0.5, %v15057_v34  ;;  %v6305_v39 = vmul.f32 0.5, %v14985_v60  ;;  %v8283_v11 = vpop.f32.mrf.mxu0 }
 0x721   : > { %v15143_v22 = vpop.f32.mrf.mxu1  ;;  %v7410_v32 = vpack.c.bf16 %v7338_v3, %v7330_v16  ;;  %v7401_v19 = vpack.c.bf16 %v7321_v61, %v7313_v31  ;;  %v7209_v7 = vadd.f32 1.0, %v10823_v30  ;;  %v8268_v28 = vadd.f32 %v15114_v45, %v15152_v18 }
 0x722   : > { %v8270_v54 = vadd.f32 %v15127_v14, %v15155_v58  ;;  %v8274_v56 = vadd.f32 %v8273_v63, %v15152_v18  ;;  %v7329_v37 = vmul.f32 %v7201_v62, %v6305_v39  ;;  %v8276_v3 = vadd.f32 %v8275_v44, %v15155_v58  ;;  %v8285_v63 = vpop.f32.mrf.mxu0 }
 0x723   : > { %v10825_v21 = vpop.eup %10824  ;;  %v8380_v38 = vpop.f32.mrf.mxu1  ;;  %v7337_v35 = vmul.f32 %v7209_v7, %v6313_v1  ;;  %v8278_v14 = vadd.f32 %v8277_v49, %v15152_v18  ;;  %v6329_v10 = vmul.f32 0.5, %v15087_v42  ;;  %v8286_v36 = vadd.f32 %v8285_v63, %v15155_v58 }
 0x724   : > { %v7218_v29 = vadd.f32 1.0, %v10825_v21  ;;  %v15165_v60 = vadd.f32 %v8380_v38, %v8268_v28  ;;  %v8280_v38 = vadd.f32 %v8279_v51, %v15155_v58  ;;  %v8287_v62 = vpop.f32.mrf.mxu0 }
 0x725   : > { %v8382_v59 = vpop.f32.mrf.mxu1  ;;  %v7409_v45 = vpack.c.bf16 %v7337_v35, %v7329_v37  ;;  %v8288_v39 = vadd.f32 %v8287_v62, %v15152_v18 }
 0x726   : > { %v10827_v47 = vpop.eup %10826  ;;  %v7346_v41 = vmul.f32 %v7218_v29, %v6322_v23  ;;  %v15167_v61 = vadd.f32 %v8382_v59, %v8270_v54  ;;  %v8284_v59 = vadd.f32 %v8283_v11, %v15152_v18  ;;  %v8289_v42 = vpop.f32.mrf.mxu0 }
 0x727   : > { %8621 = vmatmul.mubr.bf16.gmra.mxu1 %v7401_v19  ;;  %v7226_v50 = vadd.f32 1.0, %v10827_v47  ;;  %v10829_v8 = vpop.eup %10828  ;;  %v6321_v47 = vmul.f32 0.5, %v15049_v52 }
 0x728   : > { %8630 = vmatprep.mubr.bf16.mxu1 %v7410_v32  ;;  %v7225_v21 = vadd.f32 1.0, %v10829_v8  ;;  %v8293_v52 = vpop.f32.mrf.mxu0  ;;  %v8290_v8 = vadd.f32 %v8289_v42, %v15155_v58 }
 0x729   : > { %v7354_v24 = vmul.f32 %v7226_v50, %v6330_v0  ;;  %v8294_v37 = vadd.f32 %v8293_v52, %v15152_v18 }
 0x72a   : > { %v10831_v34 = vpop.eup %10830  ;;  %v7353_v29 = vmul.f32 %v7225_v21, %v6329_v10  ;;  %v16346_v10 = vld [vmem:[#allocation44_spill] sm:$0xff] }
 0x72b   : > { %v7418_v55 = vpack.c.bf16 %v7354_v24, %v7346_v41  ;;  %v7217_v44 = vadd.f32 1.0, %v10831_v34 }
 0x72c   : > { %v8386_v30 = vpop.f32.mrf.mxu1 }
 0x72d   : > { %v15169_v16 = vadd.f32 %v8386_v30, %v8274_v56  ;;  %v7345_v49 = vmul.f32 %v7217_v44, %v6321_v47  ;;  %v15191_v56 = vpop.f32.mrf.mxu0  ;;  %v8236_v44 = vadd.f32 %v16346_v10, %v15155_v58  ;;  %v16347_v47 = vld [vmem:[#allocation43_spill] sm:$0xff] }
 0x72e   : > { %v8388_v31 = vpop.f32.mrf.mxu1 }
 0x72f   : > { %v15172_v32 = vadd.f32 %v8388_v31, %v8276_v3  ;;  %8631 = vmatmul.mubr.bf16.gmra.mxu1 %v7409_v45  ;;  %v7417_v50 = vpack.c.bf16 %v7353_v29, %v7345_v49  ;;  %v15195_v11 = vpop.f32.mrf.mxu0  ;;  %v16345_v31 = vld [vmem:[#allocation79_spill] sm:$0xff]  ;;  %v8238_v29 = vadd.f32 %v16347_v47, %v15152_v18 }
 0x730   : > { %v8390_v19 = vpop.f32.mrf.mxu1  ;;  %8640 = vmatprep.mubr.bf16.mxu1 %v7418_v55 }
 0x731   : > { %16337 = vst [vmem:[#allocation49_spill] sm:$0xff] %v15172_v32  ;;  %v15176_v7 = vadd.f32 %v8390_v19, %v8278_v14  ;;  %v15200_v34 = vpop.f32.mrf.mxu0  ;;  %v8234_v14 = vadd.f32 %v16345_v31, %v15152_v18  ;;  %v16367_v32 = vld [vmem:[#allocation56_spill] sm:$0xff] }
 0x732   : > { %v8392_v1 = vpop.f32.mrf.mxu1 }
 0x733   : > { %16338 = vst [vmem:[#allocation42_spill] sm:$0xff] %v15176_v7  ;;  %v15179_v0 = vadd.f32 %v8392_v1, %v8280_v38  ;;  %v15202_v55 = vpop.f32.mrf.mxu0  ;;  %v8347_v19 = vadd.f32 %v14991_v2, %v8234_v14  ;;  %v8349_v1 = vadd.f32 %v15010_v40, %v8236_v44 }
 0x735   : > { %16339 = vst [vmem:[#allocation41_spill] sm:$0xff] %v15179_v0  ;;  %v15204_v45 = vpop.f32.mrf.mxu0  ;;  %v16366_v0 = vld [vmem:[#allocation76_spill] sm:$0xff] }
 0x737   : > { %8641 = vmatmul.mubr.bf16.gmra.mxu1 %v7417_v50  ;;  %v15206_v21 = vpop.f32.mrf.mxu0  ;;  %v8351_v50 = vadd.f32 %v15036_v6, %v8238_v29 }
 0x738   : > { %v8396_v53 = vpop.f32.mrf.mxu1 }
 0x739   : > { %v15183_v23 = vadd.f32 %v8396_v53, %v8284_v59  ;;  %v15210_v63 = vpop.f32.mrf.mxu0 }
 0x73a   : > { %v8398_v51 = vpop.f32.mrf.mxu1 }
 0x73b   : > { %16340 = vst [vmem:[#allocation77_spill] sm:$0xff] %v15183_v23  ;;  %v15186_v35 = vadd.f32 %v8398_v51, %v8286_v36 }
 0x73c   : > { %v8400_v24 = vpop.f32.mrf.mxu1 }
 0x73d   : > { %16341 = vst [vmem:[#allocation68_spill] sm:$0xff] %v15186_v35  ;;  %v15189_v28 = vadd.f32 %v8400_v24, %v8288_v39 }
 0x73e   : > { %v8402_v54 = vpop.f32.mrf.mxu1 }
 0x73f   : > { %16342 = vst [vmem:[#allocation51_spill] sm:$0xff] %v15189_v28  ;;  %v15193_v41 = vadd.f32 %v8402_v54, %v8290_v8 }
 0x741   : > { %16343 = vst [vmem:[#allocation29_spill] sm:$0xff] %v15193_v41 }
 0x745   : > { %v8406_v3 = vpop.f32.mrf.mxu1 }
 0x746   : > { %v15198_v30 = vadd.f32 %v8406_v3, %v8294_v37 }
 0x748   : > { %16344 = vst [vmem:[#allocation26_spill] sm:$0xff] %v15198_v30 }
 0x759   : > { %v8459_v38 = vpop.f32.mrf.mxu0 }
 0x75a   : > { %v8460_v62 = vadd.f32 %v8459_v38, %v8347_v19 }
 0x75b   : > { %v8461_v49 = vpop.f32.mrf.mxu0 }
 0x75c   : > { %v15219_v59 = vadd.f32 %v8461_v49, %v8349_v1 }
 0x75d   : > { %v8463_v42 = vpop.f32.mrf.mxu0 }
 0x75e   : > { %v15221_v53 = vadd.f32 %v8463_v42, %v8351_v50  ;;  %v8408_v42 = vpop.f32.mrf.mxu1 }
 0x75f   : > { %v15223_v36 = vpop.f32.mrf.mxu0 }
 0x760   : > { %v8410_v41 = vpop.f32.mrf.mxu1 }
 0x762   : > { %v8412_v35 = vpop.f32.mrf.mxu1 }
 0x767   : > { %v15225_v51 = vpop.f32.mrf.mxu0 }
 0x769   : > { %v15227_v2 = vpop.f32.mrf.mxu0 }
 0x76b   : > { %v15229_v39 = vpop.f32.mrf.mxu0 }
 0x76d   : > { %v15231_v52 = vpop.f32.mrf.mxu0 }
 0x770   : > { %v15233_v40 = vpop.f32.mrf.mxu0 }
 0x772   : > { %v15235_v24 = vpop.f32.mrf.mxu0 }
 0x774   : > { %v15237_v6 = vpop.f32.mrf.mxu0 }
 0x776   : > { %v15239_v8 = vpop.f32.mrf.mxu0 }
 0x77d   : > { %v15241_v54 = vpop.f32.mrf.mxu0 }
 0x77f   : > { %v15243_v37 = vpop.f32.mrf.mxu0 }
 0x781   : > { %v15245_v3 = vpop.f32.mrf.mxu0 }
 0x783   : > { %v15247_v31 = vpop.f32.mrf.mxu0 }
 0x789   : > { %v15249_v14 = vpop.f32.mrf.mxu0 }
 0x78a   : > { %16348 = vst [vmem:[#allocation50_spill] sm:$0xff] %v15249_v14 }
 0x78b   : > { %v15251_v10 = vpop.f32.mrf.mxu0 }
 0x78c   : > { %16349 = vst [vmem:[#allocation66_spill] sm:$0xff] %v15251_v10 }
 0x78d   : > { %v15253_v44 = vpop.f32.mrf.mxu0 }
 0x78e   : > { %16350 = vst [vmem:[#allocation53_spill] sm:$0xff] %v15253_v44 }
 0x78f   : > { %v15255_v19 = vpop.f32.mrf.mxu0 }
 0x790   : > { %16351 = vst [vmem:[#allocation74_spill] sm:$0xff] %v15255_v19 }
 0x795   : > { %v15257_v38 = vpop.f32.mrf.mxu0 }
 0x796   : > { %16352 = vst [vmem:[#allocation47_spill] sm:$0xff] %v15257_v38 }
 0x797   : > { %v15259_v47 = vpop.f32.mrf.mxu0 }
 0x798   : > { %16353 = vst [vmem:[#allocation48_spill] sm:$0xff] %v15259_v47  ;;  %v8416_v47 = vpop.f32.mrf.mxu1 }
 0x799   : > { %v15261_v29 = vpop.f32.mrf.mxu0 }
 0x79a   : > { %16354 = vst [vmem:[#allocation58_spill] sm:$0xff] %v15261_v29  ;;  %v8418_v44 = vpop.f32.mrf.mxu1 }
 0x79b   : > { %v15263_v1 = vpop.f32.mrf.mxu0 }
 0x79c   : > { %16355 = vst [vmem:[#allocation34_spill] sm:$0xff] %v15263_v1  ;;  %v8240_v1 = vadd.f32 %v14874_v43, %v15155_v58  ;;  %v8256_v43 = vadd.f32 %v15019_v33, %v15155_v58 }
 0x7a2   : > { %v15265_v49 = vpop.f32.mrf.mxu0 }
 0x7a3   : > { %16356 = vst [vmem:[#allocation55_spill] sm:$0xff] %v15265_v49 }
 0x7a4   : > { %v15267_v50 = vpop.f32.mrf.mxu0 }
 0x7a5   : > { %16357 = vst [vmem:[#allocation73_spill] sm:$0xff] %v15267_v50  ;;  %v8244_v50 = vadd.f32 %v14892_v20, %v15152_v18  ;;  %v8260_v20 = vadd.f32 %v15059_v17, %v15155_v58 }
 0x7a6   : > { %v15269_v30 = vpop.f32.mrf.mxu0 }
 0x7a7   : > { %16358 = vst [vmem:[#allocation40_spill] sm:$0xff] %v15269_v30  ;;  %v8246_v30 = vadd.f32 %v14917_v26, %v15155_v58  ;;  %v8264_v26 = vadd.f32 %v15080_v48, %v15152_v18  ;;  %v8357_v33 = vadd.f32 %v15073_v15, %v8244_v50  ;;  %v8300_v48 = vadd.f32 %v15200_v34, %v15155_v58  ;;  %v8420_v50 = vpop.f32.mrf.mxu1 }
 0x7a8   : > { %v15271_v28 = vpop.f32.mrf.mxu0  ;;  %v8306_v15 = vadd.f32 %v15204_v45, %v15155_v58  ;;  %v8310_v34 = vadd.f32 %v15210_v63, %v15155_v58 }
 0x7a9   : > { %16359 = vst [vmem:[#allocation63_spill] sm:$0xff] %v15271_v28  ;;  %v16364_v28 = vld [vmem:[#allocation75_spill] sm:$0xff]  ;;  %v8359_v17 = vadd.f32 %v15083_v12, %v8246_v30  ;;  %v8369_v30 = vadd.f32 %v15123_v46, %v8256_v43 }
 0x7aa   : > { %v8248_v29 = vadd.f32 %v16364_v28, %v15152_v18  ;;  %v8266_v28 = vadd.f32 %v15101_v4, %v15155_v58 }
 0x7ac   : > { %v8361_v4 = vadd.f32 %v16367_v32, %v8248_v29  ;;  %v8308_v32 = vadd.f32 %v15206_v21, %v15152_v18  ;;  %v8379_v46 = vadd.f32 %v15143_v22, %v8266_v28 }
 0x7ae   : > { %v15273_v23 = vpop.f32.mrf.mxu0 }
 0x7af   : > { %16360 = vst [vmem:[#allocation36_spill] sm:$0xff] %v15273_v23  ;;  %v16365_v23 = vld [vmem:[#allocation38_spill] sm:$0xff] }
 0x7b0   : > { %v15275_v38 = vpop.f32.mrf.mxu0 }
 0x7b1   : > { %16361 = vst [vmem:[#allocation60_spill] sm:$0xff] %v15275_v38  ;;  %v8250_v38 = vadd.f32 %v16365_v23, %v15155_v58  ;;  %v8353_v23 = vadd.f32 %v15051_v9, %v8240_v1  ;;  %v8304_v9 = vadd.f32 %v15202_v55, %v15152_v18  ;;  %v16368_v1 = vld [vmem:[#allocation32_spill] sm:$0xff] }
 0x7b2   : > { %v15277_v19 = vpop.f32.mrf.mxu0 }
 0x7b3   : > { %16362 = vst [vmem:[#allocation31_spill] sm:$0xff] %v15277_v19  ;;  %v8254_v19 = vadd.f32 %v16366_v0, %v15152_v18  ;;  %v8296_v0 = vadd.f32 %v15191_v56, %v15155_v58  ;;  %v8363_v56 = vadd.f32 %v16368_v1, %v8250_v38  ;;  %v8466_v58 = vadd.f32 %v15223_v36, %v8353_v23 }
 0x7b4   : > { %v15281_v49 = vpop.f32.mrf.mxu0 }
 0x7b5   : > { %16363 = vst [vmem:[#allocation62_spill] sm:$0xff] %v15281_v49  ;;  %v8258_v49 = vadd.f32 %v15040_v25, %v15152_v18  ;;  %v8298_v25 = vadd.f32 %v15195_v11, %v15152_v18  ;;  %v8367_v11 = vadd.f32 %v15116_v57, %v8254_v19  ;;  %v8373_v57 = vadd.f32 %v15135_v27, %v8260_v20  ;;  %v8422_v27 = vpop.f32.mrf.mxu1 }
 0x7b6   : > { %v8377_v18 = vadd.f32 %v15138_v13, %v8264_v26  ;;  %v15341_v21 = vadd.f32 %v8408_v42, %v8296_v0  ;;  %v15353_v13 = vadd.f32 %v8418_v44, %v8306_v15  ;;  %v15357_v42 = vadd.f32 %v8420_v50, %v8308_v32 }
 0x7b7   : > { %v8371_v55 = vadd.f32 %v15130_v5, %v8258_v49  ;;  %v15344_v63 = vadd.f32 %v8410_v41, %v8298_v25  ;;  %v15351_v49 = vadd.f32 %v8416_v47, %v8304_v9  ;;  %v15361_v20 = vadd.f32 %v8422_v27, %v8310_v34  ;;  %v16376_v27 = vld [vmem:[#allocation77_spill] sm:$0xff] }
 0x7b8   : > { %v8470_v26 = vadd.f32 %v15225_v51, %v8357_v33  ;;  %v8474_v44 = vadd.f32 %v15229_v39, %v8361_v4  ;;  %v8480_v9 = vadd.f32 %v15233_v40, %v8367_v11  ;;  %v8482_v51 = vadd.f32 %v15235_v24, %v8369_v30  ;;  %v16369_v30 = vld [vmem:[#allocation50_spill] sm:$0xff] }
 0x7b9   : > { %v15380_v4 = vadd.f32 %v15239_v8, %v8373_v57  ;;  %v15390_v24 = vadd.f32 %v15243_v37, %v8379_v46  ;;  %v15398_v8 = vadd.f32 %v15247_v31, %v15167_v61  ;;  %v15405_v37 = vadd.f32 %v16369_v30, %v15169_v16  ;;  %v16375_v16 = vld [vmem:[#allocation74_spill] sm:$0xff] }
 0x7ba   : > { %v8572_v7 = vpop.f32.mrf.mxu0 }
 0x7bb   : > { %v15310_v10 = vadd.f32 %v8572_v7, %v8460_v62 }
 0x7bc   : > { %v8574_v14 = vpop.f32.mrf.mxu0 }
 0x7bd   : > { %v8683_v12 = vmul.f32 %v15310_v10, %v15310_v10  ;;  %v15324_v7 = vadd.f32 %v8574_v14, %v15219_v59 }
 0x7be   : > { %v8576_v45 = vpop.f32.mrf.mxu0 }
 0x7bf   : > { %v8715_v62 = vmul.f32 %v8683_v12, %v15310_v10  ;;  %v8684_v19 = vmul.f32 %v15324_v7, %v15324_v7  ;;  %v15337_v59 = vadd.f32 %v8576_v45, %v15221_v53  ;;  %v15349_v53 = vadd.f32 %v8412_v35, %v8300_v48  ;;  %v16371_v45 = vld [vmem:[#allocation66_spill] sm:$0xff] }
 0x7c0   : > { %v8578_v5 = vpop.f32.mrf.mxu0  ;;  %v8472_v35 = vadd.f32 %v15227_v2, %v8359_v17  ;;  %v8476_v48 = vadd.f32 %v15231_v52, %v8363_v56  ;;  %v15376_v2 = vadd.f32 %v15237_v6, %v8371_v55  ;;  %v15387_v56 = vadd.f32 %v15241_v54, %v8377_v18  ;;  %v16370_v55 = vld [vmem:[#allocation49_spill] sm:$0xff] }
 0x7c1   : > { %v8747_v14 = vmul.f32 0.044715, %v8715_v62  ;;  %v8716_v38 = vmul.f32 %v8684_v19, %v15324_v7  ;;  %v8685_v29 = vmul.f32 %v15337_v59, %v15337_v59  ;;  %v15355_v22 = vadd.f32 %v8578_v5, %v8466_v58  ;;  %v16372_v19 = vld [vmem:[#allocation42_spill] sm:$0xff]  ;;  %v16373_v18 = vld [vmem:[#allocation53_spill] sm:$0xff] }
 0x7c2   : > { %v15394_v6 = vadd.f32 %v15245_v3, %v15165_v60  ;;  %v15410_v57 = vadd.f32 %v16371_v45, %v16370_v55  ;;  %v15415_v46 = vadd.f32 %v16373_v18, %v16372_v19  ;;  %v16374_v58 = vld [vmem:[#allocation41_spill] sm:$0xff]  ;;  %v16387_v55 = vld [vmem:[#allocation40_spill] sm:$0xff] }
 0x7c3   : > { %v8779_v41 = vadd.f32 %v8747_v14, %v15310_v10  ;;  %v8748_v36 = vmul.f32 0.044715, %v8716_v38  ;;  %v8717_v43 = vmul.f32 %v8685_v29, %v15337_v59  ;;  %v8686_v47 = vmul.f32 %v15355_v22, %v15355_v22  ;;  %v8582_v25 = vpop.f32.mrf.mxu1  ;;  %v16377_v14 = vld [vmem:[#allocation47_spill] sm:$0xff] }
 0x7c4   : > { %v15372_v15 = vadd.f32 %v8582_v25, %v8470_v26  ;;  %v15419_v5 = vadd.f32 %v16375_v16, %v16374_v58  ;;  %v15423_v38 = vadd.f32 %v16377_v14, %v16376_v27  ;;  %v15449_v45 = vadd.f32 %v16387_v55, %v15344_v63 }
 0x7c5   : > { %v8811_v28 = vmul.f32 0.7978846, %v8779_v41  ;;  %v8780_v23 = vadd.f32 %v8748_v36, %v15324_v7  ;;  %v8749_v0 = vmul.f32 0.044715, %v8717_v43  ;;  %v8718_v1 = vmul.f32 %v8686_v47, %v15355_v22  ;;  %v8584_v17 = vpop.f32.mrf.mxu1  ;;  %v16378_v41 = vld [vmem:[#allocation68_spill] sm:$0xff]  ;;  %v16380_v47 = vld [vmem:[#allocation51_spill] sm:$0xff] }
 0x7c6   : > { %v8687_v52 = vmul.f32 %v15372_v15, %v15372_v15  ;;  %v15384_v40 = vadd.f32 %v8584_v17, %v8472_v35  ;;  %v16379_v36 = vld [vmem:[#allocation48_spill] sm:$0xff]  ;;  %v16385_v17 = vld [vmem:[#allocation55_spill] sm:$0xff] }
 0x7c7   : > { %v8812_v33 = vmul.f32 0.7978846, %v8780_v23  ;;  %v8781_v39 = vadd.f32 %v8749_v0, %v15337_v59  ;;  %v8750_v50 = vmul.f32 0.044715, %v8718_v1  ;;  %10832 = vtanh.f32 %v8811_v28  ;;  %v8586_v11 = vpop.f32.mrf.mxu1  ;;  %v16383_v1 = vld [vmem:[#allocation34_spill] sm:$0xff] }
 0x7c8   : > { %v8719_v32 = vmul.f32 %v8687_v52, %v15372_v15  ;;  %v8688_v54 = vmul.f32 %v15384_v40, %v15384_v40  ;;  %v8587_v3 = vadd.f32 %v8586_v11, %v8474_v44  ;;  %v15427_v43 = vadd.f32 %v16379_v36, %v16378_v41  ;;  %v16381_v44 = vld [vmem:[#allocation58_spill] sm:$0xff] }
 0x7c9   : > { %v8813_v12 = vmul.f32 0.7978846, %v8781_v39  ;;  %10834 = vtanh.f32 %v8812_v33  ;;  %v8782_v60 = vadd.f32 %v8750_v50, %v15355_v22  ;;  %v8588_v34 = vpop.f32.mrf.mxu1  ;;  %v15432_v28 = vadd.f32 %v16381_v44, %v16380_v47  ;;  %v16384_v39 = vld [vmem:[#allocation26_spill] sm:$0xff] }
 0x7ca   : > { %v8751_v61 = vmul.f32 0.044715, %v8719_v32  ;;  %v8720_v31 = vmul.f32 %v8688_v54, %v15384_v40  ;;  %v8589_v62 = vadd.f32 %v8588_v34, %v8476_v48  ;;  %v8689_v29 = vmul.f32 %v8587_v3, %v8587_v3  ;;  %v16382_v48 = vld [vmem:[#allocation29_spill] sm:$0xff] }
 0x7cb   : > { %10836 = vtanh.f32 %v8813_v12  ;;  %v8814_v23 = vmul.f32 0.7978846, %v8782_v60  ;;  %v15436_v33 = vadd.f32 %v16383_v1, %v16382_v48  ;;  %v15440_v50 = vadd.f32 %v16385_v17, %v16384_v39  ;;  %v16386_v32 = vld [vmem:[#allocation73_spill] sm:$0xff] }
 0x7cc   : > { %v8783_v26 = vadd.f32 %v8751_v61, %v15372_v15  ;;  %v8752_v35 = vmul.f32 0.044715, %v8720_v31  ;;  %v8721_v0 = vmul.f32 %v8689_v29, %v8587_v3  ;;  %v8690_v25 = vmul.f32 %v8589_v62, %v8589_v62  ;;  %v16388_v61 = vld [vmem:[#allocation63_spill] sm:$0xff] }
 0x7cd   : > { %v15445_v54 = vadd.f32 %v16386_v32, %v15341_v21  ;;  %v15453_v31 = vadd.f32 %v16388_v61, %v15349_v53  ;;  %v16389_v21 = vld [vmem:[#allocation36_spill] sm:$0xff]  ;;  %v8651_v53 = vmul.f32 0.5, %v15310_v10  ;;  %v8652_v44 = vmul.f32 0.5, %v15324_v7 }
 0x7ce   : > { %v8815_v52 = vmul.f32 0.7978846, %v8783_v26  ;;  %v8784_v11 = vadd.f32 %v8752_v35, %v15384_v40  ;;  %v8592_v12 = vpop.f32.mrf.mxu1  ;;  %v8753_v30 = vmul.f32 0.044715, %v8721_v0  ;;  %v8722_v60 = vmul.f32 %v8690_v25, %v8589_v62 }
 0x7cf   : > { %v8593_v34 = vadd.f32 %v8592_v12, %v8480_v9  ;;  %v15457_v14 = vadd.f32 %v16389_v21, %v15351_v49  ;;  %v16390_v9 = vld [vmem:[#allocation60_spill] sm:$0xff]  ;;  %v8656_v1 = vmul.f32 0.5, %v15384_v40 }
 0x7d0   : > { %10838 = vtanh.f32 %v8815_v52  ;;  %v8816_v19 = vmul.f32 0.7978846, %v8784_v11  ;;  %v8594_v18 = vpop.f32.mrf.mxu1  ;;  %v8785_v58 = vadd.f32 %v8753_v30, %v8587_v3  ;;  %v8754_v16 = vmul.f32 0.044715, %v8722_v60 }
 0x7d1   : > { %10840 = vtanh.f32 %v8814_v23  ;;  %v8691_v27 = vmul.f32 %v8593_v34, %v8593_v34  ;;  %v15461_v29 = vadd.f32 %v16390_v9, %v15353_v13  ;;  %v8595_v63 = vadd.f32 %v8594_v18, %v8482_v51 }
 0x7d2   : > { %10842 = vtanh.f32 %v8816_v19  ;;  %v8596_v41 = vpop.f32.mrf.mxu1  ;;  %v8817_v36 = vmul.f32 0.7978846, %v8785_v58  ;;  %v8786_v26 = vadd.f32 %v8754_v16, %v8589_v62  ;;  %v8653_v23 = vmul.f32 0.5, %v15337_v59 }
 0x7d3   : > { %v8723_v35 = vmul.f32 %v8691_v27, %v8593_v34  ;;  %v8692_v0 = vmul.f32 %v8595_v63, %v8595_v63  ;;  %v15467_v49 = vadd.f32 %v8596_v41, %v15376_v2  ;;  %v15470_v13 = vmul.f32 0.5, %v15355_v22 }
 0x7d4   : > { %v10833_v47 = vpop.eup %10832  ;;  %v8598_v25 = vpop.f32.mrf.mxu1  ;;  %v8655_v51 = vmul.f32 0.5, %v15372_v15  ;;  %10844 = vtanh.f32 %v8817_v36  ;;  %v8818_v10 = vmul.f32 0.7978846, %v8786_v26  ;;  %v15476_v52 = vmul.f32 0.5, %v8587_v3 }
 0x7d5   : > { %v8755_v39 = vmul.f32 0.044715, %v8723_v35  ;;  %v8724_v17 = vmul.f32 %v8692_v0, %v8595_v63  ;;  %v8693_v7 = vmul.f32 %v15467_v49, %v15467_v49  ;;  %v8875_v59 = vadd.f32 1.0, %v10833_v47 }
 0x7d6   : > { %v10835_v48 = vpop.eup %10834  ;;  %10846 = vtanh.f32 %v8818_v10  ;;  %v15479_v2 = vadd.f32 %v8598_v25, %v15380_v4  ;;  %v15481_v22 = vmul.f32 0.5, %v8589_v62  ;;  %v15484_v60 = vmul.f32 0.5, %v8593_v34 }
 0x7d7   : > { %v8787_v15 = vadd.f32 %v8755_v39, %v8593_v34  ;;  %v8756_v11 = vmul.f32 0.044715, %v8724_v17  ;;  %v8725_v12 = vmul.f32 %v8693_v7, %v15467_v49  ;;  %v8602_v32 = vpop.f32.mrf.mxu1  ;;  %v8876_v30 = vadd.f32 1.0, %v10835_v48 }
 0x7d8   : > { %v10837_v40 = vpop.eup %10836  ;;  %v8694_v55 = vmul.f32 %v15479_v2, %v15479_v2  ;;  %v15489_v3 = vadd.f32 %v8602_v32, %v15387_v56  ;;  %v15491_v4 = vmul.f32 0.5, %v8595_v63  ;;  %v15493_v58 = vmul.f32 %v8875_v59, %v8651_v53 }
 0x7d9   : > { %v8819_v61 = vmul.f32 0.7978846, %v8787_v15  ;;  %v8788_v62 = vadd.f32 %v8756_v11, %v8595_v63  ;;  %v8757_v19 = vmul.f32 0.044715, %v8725_v12  ;;  %v8604_v18 = vpop.f32.mrf.mxu1  ;;  %v8877_v21 = vadd.f32 1.0, %v10837_v40 }
 0x7da   : > { %v8726_v16 = vmul.f32 %v8694_v55, %v15479_v2  ;;  %v8695_v34 = vmul.f32 %v15489_v3, %v15489_v3  ;;  %v15499_v27 = vadd.f32 %v8604_v18, %v15390_v24  ;;  %v15502_v63 = vmul.f32 %v8876_v30, %v8652_v44 }
 0x7db   : > { %10848 = vtanh.f32 %v8819_v61  ;;  %v8820_v56 = vmul.f32 0.7978846, %v8788_v62  ;;  %v8789_v9 = vadd.f32 %v8757_v19, %v15467_v49  ;;  %v8606_v41 = vpop.f32.mrf.mxu1  ;;  %v15515_v59 = vmul.f32 %v8877_v21, %v8653_v23 }
 0x7dc   : > { %v8758_v26 = vmul.f32 0.044715, %v8726_v16  ;;  %v8727_v53 = vmul.f32 %v8695_v34, %v15489_v3  ;;  %v8696_v35 = vmul.f32 %v15499_v27, %v15499_v27  ;;  %v15508_v25 = vadd.f32 %v8606_v41, %v15394_v6 }
 0x7dd   : > { %v10839_v36 = vpop.eup %10838  ;;  %10850 = vtanh.f32 %v8820_v56  ;;  %v8821_v24 = vmul.f32 0.7978846, %v8789_v9  ;;  %v8608_v10 = vpop.f32.mrf.mxu1 }
 0x7de   : > { %v10841_v47 = vpop.eup %10840  ;;  %v8879_v0 = vadd.f32 1.0, %v10839_v36  ;;  %v8790_v39 = vadd.f32 %v8758_v26, %v15479_v2  ;;  %v8759_v17 = vmul.f32 0.044715, %v8727_v53  ;;  %v8728_v44 = vmul.f32 %v8696_v35, %v15499_v27 }
 0x7df   : > { %v10843_v48 = vpop.eup %10842  ;;  %v15513_v7 = vadd.f32 %v8608_v10, %v15398_v8  ;;  %10852 = vtanh.f32 %v8821_v24  ;;  %v8612_v12 = vpop.f32.mrf.mxu1  ;;  %v8697_v30 = vmul.f32 %v15508_v25, %v15508_v25  ;;  %v8878_v61 = vadd.f32 1.0, %v10841_v47 }
 0x7e0   : > { %v15517_v15 = vmul.f32 %v8879_v0, %v8655_v51  ;;  %v8880_v11 = vadd.f32 1.0, %v10843_v48  ;;  %v8822_v32 = vmul.f32 0.7978846, %v8790_v39  ;;  %v8791_v6 = vadd.f32 %v8759_v17, %v15489_v3 }
 0x7e1   : > { %v8760_v40 = vmul.f32 0.044715, %v8728_v44  ;;  %v10845_v55 = vpop.eup %10844  ;;  %v8698_v23 = vmul.f32 %v15513_v7, %v15513_v7  ;;  %v8614_v51 = vpop.f32.mrf.mxu1  ;;  %v8729_v56 = vmul.f32 %v8697_v30, %v15508_v25  ;;  %v15540_v53 = vmul.f32 %v8878_v61, %v15470_v13 }
 0x7e2   : > { %v8939_v8 = vmax.f32 %v15493_v58, %v15517_v15  ;;  %v15524_v62 = vmul.f32 %v8880_v11, %v8656_v1  ;;  %v8881_v19 = vadd.f32 1.0, %v10845_v55  ;;  %10854 = vtanh.f32 %v8822_v32 }
 0x7e3   : > { %v8823_v18 = vmul.f32 0.7978846, %v8791_v6  ;;  %v8792_v16 = vadd.f32 %v8760_v40, %v15499_v27  ;;  %v10847_v34 = vpop.eup %10846  ;;  %v8730_v9 = vmul.f32 %v8698_v23, %v15513_v7  ;;  %v15534_v1 = vadd.f32 %v8612_v12, %v15405_v37  ;;  %v8616_v58 = vpop.f32.mrf.mxu1 }
 0x7e4   : > { %v8960_v21 = vmax.f32 %v15502_v63, %v15524_v62  ;;  %v15537_v41 = vmul.f32 %v8881_v19, %v15476_v52  ;;  %v8882_v36 = vadd.f32 1.0, %v10847_v34  ;;  %v8761_v35 = vmul.f32 0.044715, %v8729_v56 }
 0x7e5   : > { %10856 = vtanh.f32 %v8823_v18  ;;  %v8824_v26 = vmul.f32 0.7978846, %v8792_v16  ;;  %v8762_v47 = vmul.f32 0.044715, %v8730_v9  ;;  %v8699_v63 = vmul.f32 %v15534_v1, %v15534_v1  ;;  %v8618_v0 = vpop.f32.mrf.mxu1 }
 0x7e6   : > { %v8940_v37 = vmax.f32 %v15515_v59, %v15537_v41  ;;  %v15547_v24 = vmul.f32 %v8882_v36, %v15481_v22  ;;  %v15550_v52 = vadd.f32 %v8614_v51, %v15410_v57  ;;  %v8793_v10 = vadd.f32 %v8761_v35, %v15508_v25 }
 0x7e7   : > { %10858 = vtanh.f32 %v8824_v26  ;;  %v8794_v13 = vadd.f32 %v8762_v47, %v15513_v7  ;;  %v8731_v48 = vmul.f32 %v8699_v63, %v15534_v1  ;;  %v15556_v39 = vadd.f32 %v8616_v58, %v15415_v46  ;;  %v8622_v17 = vpop.f32.mrf.mxu1 }
 0x7e8   : > { %v10849_v44 = vpop.eup %10848  ;;  %v8961_v59 = vmax.f32 %v15540_v53, %v15547_v24  ;;  %v8661_v22 = vmul.f32 0.5, %v15467_v49  ;;  %v8700_v57 = vmul.f32 %v15550_v52, %v15550_v52  ;;  %v15564_v15 = vadd.f32 %v8618_v0, %v15419_v5 }
 0x7e9   : > { %v8883_v11 = vadd.f32 1.0, %v10849_v44  ;;  %v8662_v12 = vmul.f32 0.5, %v15479_v2  ;;  %v8825_v32 = vmul.f32 0.7978846, %v8793_v10  ;;  %v8826_v6 = vmul.f32 0.7978846, %v8794_v13  ;;  %v8624_v46 = vpop.f32.mrf.mxu1 }
 0x7ea   : > { %v10851_v40 = vpop.eup %10850  ;;  %v8663_v30 = vmul.f32 0.5, %v15489_v3  ;;  %v8763_v55 = vmul.f32 0.044715, %v8731_v48  ;;  %v8732_v61 = vmul.f32 %v8700_v57, %v15550_v52  ;;  %v8701_v49 = vmul.f32 %v15556_v39, %v15556_v39 }
 0x7eb   : > { %v8915_v62 = vmul.f32 %v8883_v11, %v15484_v60  ;;  %v8884_v23 = vadd.f32 1.0, %v10851_v40  ;;  %10860 = vtanh.f32 %v8825_v32  ;;  %v8702_v5 = vmul.f32 %v15564_v15, %v15564_v15  ;;  %v8626_v2 = vpop.f32.mrf.mxu1 }
 0x7ec   : > { %v10853_v51 = vpop.eup %10852  ;;  %10862 = vtanh.f32 %v8826_v6  ;;  %v8795_v19 = vadd.f32 %v8763_v55, %v15534_v1  ;;  %v8764_v18 = vmul.f32 0.044715, %v8732_v61  ;;  %v8733_v3 = vmul.f32 %v8701_v49, %v15556_v39 }
 0x7ed   : > { %v15576_v16 = vmax.f32 %v8939_v8, %v8915_v62  ;;  %v8916_v34 = vmul.f32 %v8884_v23, %v15491_v4  ;;  %v8885_v56 = vadd.f32 1.0, %v10853_v51  ;;  %v8734_v60 = vmul.f32 %v8702_v5, %v15564_v15  ;;  %v8628_v9 = vpop.f32.mrf.mxu1 }
 0x7ee   : > { %v8827_v58 = vmul.f32 0.7978846, %v8795_v19  ;;  %v8796_v41 = vadd.f32 %v8764_v18, %v15550_v52  ;;  %v8765_v36 = vmul.f32 0.044715, %v8733_v3  ;;  %v15582_v26 = vadd.f32 %v8622_v17, %v15423_v38 }
 0x7ef   : > { %v10855_v53 = vpop.eup %10854  ;;  %v15584_v35 = vmax.f32 %v8960_v21, %v8916_v34  ;;  %v8917_v47 = vmul.f32 %v8885_v56, %v8661_v22  ;;  %v8766_v63 = vmul.f32 0.044715, %v8734_v60  ;;  %v15587_v8 = vadd.f32 %v8624_v46, %v15427_v43  ;;  %v8632_v4 = vpop.f32.mrf.mxu1 }
 0x7f0   : > { %v8886_v0 = vadd.f32 1.0, %v10855_v53  ;;  %10864 = vtanh.f32 %v8827_v58  ;;  %v8828_v24 = vmul.f32 0.7978846, %v8796_v41  ;;  %v8797_v10 = vadd.f32 %v8765_v36, %v15556_v39 }
 0x7f1   : > { %v15590_v48 = vmax.f32 %v8940_v37, %v8917_v47  ;;  %v8664_v38 = vmul.f32 0.5, %v15499_v27  ;;  %v8798_v17 = vadd.f32 %v8766_v63, %v15564_v15  ;;  %v8703_v21 = vmul.f32 %v15582_v26, %v15582_v26  ;;  %v8634_v44 = vpop.f32.mrf.mxu1 }
 0x7f2   : > { %v10857_v13 = vpop.eup %10856  ;;  %v8918_v22 = vmul.f32 %v8886_v0, %v8662_v12  ;;  %10866 = vtanh.f32 %v8828_v24  ;;  %v8829_v57 = vmul.f32 0.7978846, %v8797_v10  ;;  %v8665_v32 = vmul.f32 0.5, %v15508_v25 }
 0x7f3   : > { %v8887_v43 = vadd.f32 1.0, %v10857_v13  ;;  %v8830_v6 = vmul.f32 0.7978846, %v8798_v17  ;;  %v8735_v46 = vmul.f32 %v8703_v21, %v15582_v26  ;;  %v8704_v37 = vmul.f32 %v15587_v8, %v15587_v8  ;;  %v8636_v27 = vpop.f32.mrf.mxu1 }
 0x7f4   : > { %v10859_v11 = vpop.eup %10858  ;;  %v15600_v40 = vmax.f32 %v8961_v59, %v8918_v22  ;;  %10868 = vtanh.f32 %v8829_v57  ;;  %v15606_v62 = vadd.f32 %v8626_v2, %v15432_v28  ;;  %v15613_v5 = vadd.f32 %v8628_v9, %v15436_v33 }
 0x7f5   : > { %v15602_v55 = vmul.f32 %v8887_v43, %v8663_v30  ;;  %v8888_v61 = vadd.f32 1.0, %v10859_v11  ;;  %10870 = vtanh.f32 %v8830_v6  ;;  %v8767_v12 = vmul.f32 0.044715, %v8735_v46  ;;  %v8638_v2 = vpop.f32.mrf.mxu1 }
 0x7f6   : > { %v8736_v49 = vmul.f32 %v8704_v37, %v15587_v8  ;;  %v15616_v59 = vadd.f32 %v8632_v4, %v15440_v50  ;;  %v8666_v30 = vmul.f32 0.5, %v15513_v7  ;;  %v8705_v28 = vmul.f32 %v15606_v62, %v15606_v62 }
 0x7f7   : > { %v8943_v25 = vmax.f32 %v15576_v16, %v15602_v55  ;;  %v15610_v23 = vmul.f32 %v8888_v61, %v8664_v38  ;;  %v8799_v51 = vadd.f32 %v8767_v12, %v15582_v26  ;;  %v8667_v16 = vmul.f32 0.5, %v15534_v1  ;;  %v8642_v47 = vpop.f32.mrf.mxu1 }
 0x7f8   : > { %v8768_v19 = vmul.f32 0.044715, %v8736_v49  ;;  %v10861_v18 = vpop.eup %10860  ;;  %v8668_v33 = vmul.f32 0.5, %v15550_v52  ;;  %v8706_v50 = vmul.f32 %v15613_v5, %v15613_v5  ;;  %v8737_v9 = vmul.f32 %v8705_v28, %v15606_v62 }
 0x7f9   : > { %v8964_v3 = vmax.f32 %v15584_v35, %v15610_v23  ;;  %v10863_v34 = vpop.eup %10862  ;;  %v8889_v7 = vadd.f32 1.0, %v10861_v18  ;;  %v8831_v56 = vmul.f32 0.7978846, %v8799_v51  ;;  %v8707_v36 = vmul.f32 %v15616_v59, %v15616_v59 }
 0x7fa   : > { %v8800_v60 = vadd.f32 %v8768_v19, %v15587_v8  ;;  %v8890_v58 = vadd.f32 1.0, %v10863_v34  ;;  %v8738_v41 = vmul.f32 %v8706_v50, %v15613_v5  ;;  %v15634_v1 = vadd.f32 %v8634_v44, %v15445_v54 }
 0x7fb   : > { %v8921_v52 = vmul.f32 %v8889_v7, %v8665_v32  ;;  %10872 = vtanh.f32 %v8831_v56  ;;  %v8769_v35 = vmul.f32 0.044715, %v8737_v9  ;;  %v8669_v4 = vmul.f32 0.5, %v15556_v39  ;;  %v8644_v32 = vpop.f32.mrf.mxu1 }
 0x7fc   : > { %v8832_v53 = vmul.f32 0.7978846, %v8800_v60  ;;  %v8922_v63 = vmul.f32 %v8890_v58, %v8666_v30  ;;  %v8770_v0 = vmul.f32 0.044715, %v8738_v41  ;;  %v8739_v24 = vmul.f32 %v8707_v36, %v15616_v59 }
 0x7fd   : > { %v10865_v10 = vpop.eup %10864  ;;  %v8944_v13 = vmax.f32 %v15590_v48, %v8921_v52  ;;  %v8801_v38 = vadd.f32 %v8769_v35, %v15606_v62  ;;  %v8708_v54 = vmul.f32 %v15634_v1, %v15634_v1  ;;  %v15646_v11 = vadd.f32 %v8636_v27, %v15449_v45 }
 0x7fe   : > { %10874 = vtanh.f32 %v8832_v53  ;;  %v8965_v17 = vmax.f32 %v15600_v40, %v8922_v63  ;;  %v8891_v21 = vadd.f32 1.0, %v10865_v10  ;;  %v8802_v44 = vadd.f32 %v8770_v0, %v15613_v5  ;;  %v16392_v53 = vld [vmem:[#allocation62_spill] sm:$0xff] }
 0x7ff   : > { %v8771_v22 = vmul.f32 0.044715, %v8739_v24  ;;  %v10867_v43 = vpop.eup %10866  ;;  %v8833_v39 = vmul.f32 0.7978846, %v8801_v38  ;;  %v8740_v57 = vmul.f32 %v8708_v54, %v15634_v1  ;;  %v15649_v48 = vadd.f32 %v8638_v2, %v15453_v31  ;;  %v8646_v2 = vpop.f32.mrf.mxu1 }
 0x800   : > { %v8923_v6 = vmul.f32 %v8891_v21, %v8667_v16  ;;  %v8892_v46 = vadd.f32 1.0, %v10867_v43  ;;  %v8834_v37 = vmul.f32 0.7978846, %v8802_v44  ;;  %v8670_v61 = vmul.f32 0.5, %v15564_v15  ;;  %v16391_v15 = vld [vmem:[#allocation31_spill] sm:$0xff] }
 0x801   : > { %v8803_v40 = vadd.f32 %v8771_v22, %v15616_v59  ;;  %v10869_v55 = vpop.eup %10868  ;;  %10876 = vtanh.f32 %v8833_v39  ;;  %v8772_v12 = vmul.f32 0.044715, %v8740_v57  ;;  %v8709_v49 = vmul.f32 %v15646_v11, %v15646_v11  ;;  %v8648_v36 = vpop.f32.mrf.mxu1 }
 0x802   : > { %v10871_v23 = vpop.eup %10870  ;;  %v15655_v45 = vmax.f32 %v8943_v25, %v8923_v6  ;;  %v8924_v27 = vmul.f32 %v8892_v46, %v8668_v33  ;;  %v8893_v31 = vadd.f32 1.0, %v10869_v55  ;;  %10878 = vtanh.f32 %v8834_v37 }
 0x803   : > { %v8894_v30 = vadd.f32 1.0, %v10871_v23  ;;  %v8835_v51 = vmul.f32 0.7978846, %v8803_v40  ;;  %v8804_v19 = vadd.f32 %v8772_v12, %v15634_v1  ;;  %v8741_v28 = vmul.f32 %v8709_v49, %v15646_v11 }
 0x804   : > { %v8534_v18 = vadd.f32 %v16391_v15, %v15357_v42  ;;  %v15661_v16 = vmax.f32 %v8964_v3, %v8924_v27  ;;  %v8925_v50 = vmul.f32 %v8893_v31, %v8669_v4  ;;  %v8710_v25 = vmul.f32 %v15649_v48, %v15649_v48 }
 0x805   : > { %v8926_v34 = vmul.f32 %v8894_v30, %v8670_v61  ;;  %10880 = vtanh.f32 %v8835_v51  ;;  %v8836_v33 = vmul.f32 0.7978846, %v8804_v19  ;;  %v8773_v7 = vmul.f32 0.044715, %v8741_v28 }
 0x806   : > { %v15665_v56 = vmax.f32 %v8944_v13, %v8925_v50  ;;  %v8742_v60 = vmul.f32 %v8710_v25, %v15649_v48  ;;  %v15669_v9 = vadd.f32 %v8642_v47, %v15457_v14  ;;  %v15672_v58 = vadd.f32 %v8644_v32, %v15461_v29 }
 0x807   : > { %v15674_v42 = vmax.f32 %v8965_v17, %v8926_v34  ;;  %10882 = vtanh.f32 %v8836_v33  ;;  %v8805_v3 = vadd.f32 %v8773_v7, %v15646_v11  ;;  %v15677_v41 = vadd.f32 %v8646_v2, %v8534_v18 }
 0x808   : > { %v10873_v52 = vpop.eup %10872  ;;  %v8536_v35 = vadd.f32 %v16392_v53, %v15361_v20  ;;  %v8671_v63 = vmul.f32 0.5, %v15582_v26  ;;  %v8774_v4 = vmul.f32 0.044715, %v8742_v60  ;;  %v8711_v14 = vmul.f32 %v15669_v9, %v15669_v9 }
 0x809   : > { %v8895_v29 = vadd.f32 1.0, %v10873_v52  ;;  %v8672_v47 = vmul.f32 0.5, %v15587_v8  ;;  %v8837_v0 = vmul.f32 0.7978846, %v8805_v3  ;;  %v8712_v24 = vmul.f32 %v15672_v58, %v15672_v58 }
 0x80a   : > { %v8806_v13 = vadd.f32 %v8774_v4, %v15649_v48  ;;  %v8743_v38 = vmul.f32 %v8711_v14, %v15669_v9  ;;  %v8713_v20 = vmul.f32 %v15677_v41, %v15677_v41  ;;  %v15691_v26 = vadd.f32 %v8648_v36, %v8536_v35 }
 0x80b   : > { %v10875_v10 = vpop.eup %10874  ;;  %v8927_v54 = vmul.f32 %v8895_v29, %v8671_v63  ;;  %10884 = vtanh.f32 %v8837_v0  ;;  %v8744_v21 = vmul.f32 %v8712_v24, %v15672_v58  ;;  %v8673_v46 = vmul.f32 0.5, %v15606_v62 }
 0x80c   : > { %v8896_v17 = vadd.f32 1.0, %v10875_v10  ;;  %v8838_v8 = vmul.f32 0.7978846, %v8806_v13  ;;  %v8775_v44 = vmul.f32 0.044715, %v8743_v38  ;;  %v8745_v22 = vmul.f32 %v8713_v20, %v15677_v41 }
 0x80d   : > { %v8947_v43 = vmax.f32 %v15655_v45, %v8927_v54  ;;  %v8776_v57 = vmul.f32 0.044715, %v8744_v21  ;;  %v8714_v32 = vmul.f32 %v15691_v26, %v15691_v26  ;;  %v8674_v45 = vmul.f32 0.5, %v15613_v5 }
 0x80e   : > { %v8928_v39 = vmul.f32 %v8896_v17, %v8672_v47  ;;  %v10877_v6 = vpop.eup %10876  ;;  %10886 = vtanh.f32 %v8838_v8  ;;  %v8807_v37 = vadd.f32 %v8775_v44, %v15669_v9  ;;  %v8777_v40 = vmul.f32 0.044715, %v8745_v22 }
 0x80f   : > { %v10879_v55 = vpop.eup %10878  ;;  %v8897_v12 = vadd.f32 1.0, %v10877_v6  ;;  %v8808_v49 = vadd.f32 %v8776_v57, %v15672_v58  ;;  %v8746_v23 = vmul.f32 %v8714_v32, %v15691_v26  ;;  %v8675_v15 = vmul.f32 0.5, %v15616_v59 }
 0x810   : > { %v8968_v61 = vmax.f32 %v15661_v16, %v8928_v39  ;;  %v8898_v27 = vadd.f32 1.0, %v10879_v55  ;;  %v8839_v31 = vmul.f32 0.7978846, %v8807_v37  ;;  %v8809_v30 = vadd.f32 %v8777_v40, %v15677_v41 }
 0x811   : > { %v8929_v51 = vmul.f32 %v8897_v12, %v8673_v46  ;;  %v8840_v62 = vmul.f32 0.7978846, %v8808_v49  ;;  %v8778_v19 = vmul.f32 0.044715, %v8746_v23  ;;  %v8676_v7 = vmul.f32 0.5, %v15634_v1 }
 0x812   : > { %v10881_v28 = vpop.eup %10880  ;;  %v8930_v2 = vmul.f32 %v8898_v27, %v8674_v45  ;;  %10888 = vtanh.f32 %v8839_v31  ;;  %v8841_v18 = vmul.f32 0.7978846, %v8809_v30  ;;  %v8678_v14 = vmul.f32 0.5, %v15649_v48 }
 0x813   : > { %v8948_v16 = vmax.f32 %v15665_v56, %v8929_v51  ;;  %v8899_v50 = vadd.f32 1.0, %v10881_v28  ;;  %10890 = vtanh.f32 %v8840_v62  ;;  %v8810_v25 = vadd.f32 %v8778_v19, %v15691_v26  ;;  %v16393_v51 = vld [vmem:[#allocation23_spill] sm:$0xff] }
 0x814   : > { %v10883_v5 = vpop.eup %10882  ;;  %v8969_v34 = vmax.f32 %v15674_v42, %v8930_v2  ;;  %10892 = vtanh.f32 %v8841_v18  ;;  %v8677_v56 = vmul.f32 0.5, %v15646_v11  ;;  %v8679_v10 = vmul.f32 0.5, %v15669_v9  ;;  %v16395_v18 = vld [vmem:[#allocation28_spill] sm:$0xff] }
 0x815   : > { %v8931_v33 = vmul.f32 %v8899_v50, %v8675_v15  ;;  %v8900_v60 = vadd.f32 1.0, %v10883_v5  ;;  %v8842_v3 = vmul.f32 0.7978846, %v8810_v25  ;;  %v8680_v20 = vmul.f32 0.5, %v15672_v58  ;;  %v16394_v15 = vld [vmem:[#allocation27_spill] sm:$0xff] }
 0x816   : > { %v8681_v11 = vmul.f32 0.5, %v15677_v41  ;;  %v8682_v39 = vmul.f32 0.5, %v15691_v26  ;;  %v11123_v41 = vmov 1966171168  }
 0x817   : > { %v8949_v36 = vmax.f32 %v8947_v43, %v8931_v33  ;;  %v8932_v52 = vmul.f32 %v8900_v60, %v8676_v7  ;;  %10894 = vtanh.f32 %v8842_v3  ;;  %v8988_v12 = vunpack.c.l.s4 %v11123_v41 }
 0x818   : > { %v10885_v59 = vpop.eup %10884 }
 0x819   : > { %v8970_v53 = vmax.f32 %v8968_v61, %v8932_v52  ;;  %v8901_v35 = vadd.f32 1.0, %v10885_v59  ;;  %v8989_v27 = vunpack.c.0.s8 %v8988_v12 }
 0x81b   : > { %v10887_v63 = vpop.eup %10886  ;;  %v8933_v4 = vmul.f32 %v8901_v35, %v8677_v56  ;;  %v8992_v62 = vsub.s32 %v8989_v27, %v16393_v51 }
 0x81c   : > { %v8902_v29 = vadd.f32 1.0, %v10887_v63 }
 0x81d   : > { %v8950_v42 = vmax.f32 %v8948_v16, %v8933_v4  ;;  %v16396_v16 = vcombine.low %v16394_v15, %v16395_v18 }
 0x81e   : > { %v8934_v47 = vmul.f32 %v8902_v29, %v8678_v14 }
 0x81f   : > { %v10889_v0 = vpop.eup %10888  ;;  %v8993_v50 = vrot.slane %v16396_v16, %v8992_v62 }
 0x820   : > { %v10891_v24 = vpop.eup %10890  ;;  %v8971_v1 = vmax.f32 %v8969_v34, %v8934_v47  ;;  %v8903_v13 = vadd.f32 1.0, %v10889_v0  ;;  %v16397_v34 = vlaneseq }
 0x821   : > { %v10893_v38 = vpop.eup %10892  ;;  %v8904_v54 = vadd.f32 1.0, %v10891_v24 }
 0x822   : > { %v8935_v17 = vmul.f32 %v8903_v13, %v8679_v10  ;;  %v8905_v21 = vadd.f32 1.0, %v10893_v38  ;;  %vm9012_vm1 = vcmp.lt.s32.totalorder %v16397_v34, 512 }
 0x823   : > { %v8936_v8 = vmul.f32 %v8904_v54, %v8680_v20 }
 0x824   : > { %v10895_v44 = vpop.eup %10894  ;;  %v8951_v48 = vmax.f32 %v8949_v36, %v8935_v17  ;;  %v8937_v22 = vmul.f32 %v8905_v21, %v8681_v11 }
 0x825   : > { %v8972_v43 = vmax.f32 %v8970_v53, %v8936_v8  ;;  %v8906_v57 = vadd.f32 1.0, %v10895_v44 }
 0x826   : > { %v8952_v32 = vmax.f32 %v8950_v42, %v8937_v22 }
 0x827   : > { %v8938_v6 = vmul.f32 %v8906_v57, %v8682_v39 }
 0x828   : > { %v8953_v9 = vmax.f32 %v8951_v48, %v8952_v32 }
 0x829   : > { %v8973_v46 = vmax.f32 %v8971_v1, %v8938_v6 }
 0x82a   : > { %v8954_v37 = vrot.slane %v8953_v9, 4 }
 0x82b   : > { %v8974_v58 = vmax.f32 %v8972_v43, %v8973_v46 }
 0x82c   : > { %v8955_v40 = vmax.f32 %v8953_v9, %v8954_v37 }
 0x82d   : > { %v8975_v55 = vrot.slane %v8974_v58, 4 }
 0x82e   : > { %v8956_v61 = vrot.slane %v8955_v40, 2 }
 0x82f   : > { %v8976_v49 = vmax.f32 %v8974_v58, %v8975_v55 }
 0x830   : > { %v8957_v23 = vmax.f32 %v8955_v40, %v8956_v61 }
 0x831   : > { %v8977_v45 = vrot.slane %v8976_v49, 2 }
 0x832   : > { %v8958_v31 = vrot.slane %v8957_v23, 1 }
 0x833   : > { %v8978_v26 = vmax.f32 %v8976_v49, %v8977_v45 }
 0x834   : > { %v8959_v19 = vmax.f32 %v8957_v23, %v8958_v31 }
 0x835   : > { %v8979_v30 = vrot.slane %v8978_v26, 1 }
 0x837   : > { %v8980_v28 = vmax.f32 %v8978_v26, %v8979_v30 }
 0x839   : > { %v8986_v2 = vcombine.low %v8959_v19, %v8980_v28 }
 0x83b   : > { %v9000_v25 = vrot.slane %v8986_v2, %v8992_v62 }
 0x83d   : > { %v9001_v5 = vcombine.low %v8993_v50, %v9000_v25 }
 0x83f   : > { %v9008_v33 = vrot.slane %v9001_v5, %v8992_v62 }
 0x841   : > { %9014 = vst.msk [vmem:[%s549_s21] sm:$0xf] %vm9012_vm1, %v9008_v33 }
 0x842   : > { %11033 = shalt.err (!%p11030_p6)
}
 0x843   : > { %s11034_s22 = scalar_lea.hbm %s9028_s28, 64  ;;  %s11038_s7 = scalar_lea.hbm %s15774_s14, 128 }
 0x844   : > { %p11035_p7 = scmp.ne.s32.totalorder %s9028_s28, %s11034_s22  ;;  %p11039_p1 = scmp.lt.s32.totalorder %s9028_s28, %s15774_s14 }
 0x845   : > { %p11040_p8 = scmp.lt.s32.totalorder %s11038_s7, %s11034_s22 }
 0x846   : > { %p11036_p9 = pnand %p11035_p7, %p11240_p4 }
 0x847   : > { %p11041_p10 = por %p11040_p8, %p11039_p1 }
 0x848   : > { %p11037_p12 = pneg %p11036_p9 }
 0x84a   : > { %p11042_p11 = pnand %p11041_p10, %p11037_p12 }
 0x84c   : > { %11045 = shalt.err (!%p11042_p11)
}
 0x84d   : > { %9793 = dma.vmem_to_hbm [thread:$0]  (%p11240_p4), %s9031_s27, 64, %s9028_s28, %s9016_s26  }
 0x84e PF: > { %s16398_s29 = sld [smem:[#allocation17_spill]]  ;;  %p9820_p13 = scmp.ge.s32.totalorder %s11108_s18, 2 }
 0x84f   : > { %s16399_s20 = sld [smem:[#allocation21_spill]] }
 0x854   : > { %s9042_s19 = sand.u32 1, %s16398_s29  }
 0x855   : > { %p16400_p0 = scmp.ne.s32.totalorder %s16399_s20, 0  ;;  %s9043_s16 = scalar_lea.sflag [#allocation6], %s9042_s19 }
 0x857   : > { %p9809_p2 = pnand %p9820_p13, %p16400_p0 }
 0x859   : > { %p9810_p5 = pneg %p9809_p2 }
 0x85b   : > { %11083 = dma.done.wait (%p9810_p5), %s9043_s16, 64  }
 0x85c   : > { %11085 = vsyncadd (%p9810_p5), %s9043_s16, 4294967232  ;;  %s30_s18 = sadd.s32 1, %s11108_s18   ;;  %s16401_s15 = sld [smem:[#allocation18_spill]] }
 0x85d   : > { %p27_p3 = scmp.ge.s32.totalorder %s30_s18, 4   ;;  %s16402_s22 = sld [smem:[#allocation22_spill]] }
 0x85e   : > { %s16403_s16 = sld [smem:[#allocation19_spill]]  ;;  %s16405_s29 = smov %s11092_s30 }
 0x85f   : > { %s16404_s17 = sld [smem:[#allocation20_spill]]  ;;  %29 = sbr.rel (!%p27_p3) target bundleno = 9 (0x9), region = 128 }
 0x862   : > { %s16406_s30 = smov %s16401_s15 }
 0x863   : > { %s16407_s15 = smov %s16402_s22 }
 0x864   :  { %9048 = vsyncpa [#allocation5], 1 }
 0x865   :  { %9050 = vsyncpa [#allocation5 + $0x1], 1 }
 0x866   :  { %9051 = vsyncpa [#allocation8], 1 }
 0x867   :  { %9052 = vsyncpa [#allocation11], 1 }
 0x868   :  { %9053 = vsyncpa [#allocation6], 1 }
 0x869   :  { %9055 = vsyncpa [#allocation6 + $0x1], 1 }

</bundles_post_ra>
